<compile_context>
chip_gen: v5e
topology: v5e:2x2
jax: 0.10.0
libtpu: 0.0.40
codegen_flags: <defaults>
</compile_context>

<pallas_src>
import jax
import jax.numpy as jnp
from jax.experimental import pallas as pl
from jax.experimental.pallas import tpu as pltpu


NC_PAD = 128     # lane-dense padded class dimension
POOL_PAD = 128   # lane-dense padded image-pool dimension (3 -> 128)


def _round_up(x, m):
    return (x + m - 1) // m * m


def _pick_tm(batch):
    """Batch tile size: MXU-friendly and chip-aware."""
    kind = jax.devices()[0].device_kind.lower()
    # v5e MXU is 4x128^2 -> TM=128 already saturates it; scoped VMEM is tighter.
    cap = 128 if ("v5 lite" in kind or "v5e" in kind) else 256
    if batch <= 16:
        return 16
    if batch <= 2 * cap:
        # >=2 grid steps so both TensorCores get work on v7x ("parallel" axis).
        return min(cap, _round_up(pl.cdiv(batch, 2), 16))
    return cap


# ----------------------------------------------------------------------------
# Pallas kernel: image-projection tail + projection heads + fusion MLP
# ----------------------------------------------------------------------------
def fusion_kernel(txt_ref, imgp_ref,
                  proj_ref,                  # (128, 2048) bf16, zero-padded rows
                  wtp_ref, btp_ref,          # text_projection: 768 -> 512
                  wfc_ref, bfc_ref,          # resnet.fc:       2048 -> 512
                  w1a_ref, w1b_ref, b1_ref,  # fusion Linear(1024, 512), split
                  w2_ref, b2_ref,            # fusion Linear(512, NC_PAD), padded
                  out_ref):
    # text_features = text_projection(bert_pooled)
    t = jnp.dot(txt_ref[...], wtp_ref[...],
                preferred_element_type=jnp.float32) + btp_ref[...]
    t = t.astype(jnp.bfloat16)               # early cast -> short f32 live range

    # image stub tail fused in: relu(pooled @ proj), then resnet.fc
    i_full = jnp.maximum(
        jnp.dot(imgp_ref[...], proj_ref[...],
                preferred_element_type=jnp.float32), 0.0).astype(jnp.bfloat16)
    i = jnp.dot(i_full, wfc_ref[...],
                preferred_element_type=jnp.float32) + bfc_ref[...]
    i = i.astype(jnp.bfloat16)

    # combined = cat([t, i], dim=1); Linear(1024,512) == t @ W1a + i @ W1b + b1
    h = (jnp.dot(t, w1a_ref[...], preferred_element_type=jnp.float32)
         + jnp.dot(i, w1b_ref[...], preferred_element_type=jnp.float32)
         + b1_ref[...])
    h = jnp.maximum(h, 0.0).astype(jnp.bfloat16)   # ReLU
    # Dropout(0.5) in eval mode is identity.
    # TODO(synk): training-mode dropout (stochastic masking) not implemented.

    # Final Linear(512, num_classes), lane-dense padded (TM, 128) output.
    out_ref[...] = jnp.dot(h, w2_ref[...],
                           preferred_element_type=jnp.float32) + b2_ref[...]


def multimodal_head(text_feat, img_pooled, params):
    """text_feat: (B, 768) f32 pooled text; img_pooled: (B, 3) f32 GAP image."""
    B = text_feat.shape[0]
    num_classes = params["b2"].shape[-1]

    TM = _pick_tm(B)
    B_pad = _round_up(B, TM)
    grid = (B_pad // TM,)

    # bf16 activations (halves HBM->VMEM traffic); pad batch only if ragged.
    txt = text_feat.astype(jnp.bfloat16)
    imgp = jnp.pad(img_pooled, ((0, 0), (0, POOL_PAD - img_pooled.shape[1])))
    imgp = imgp.astype(jnp.bfloat16)
    if B_pad != B:
        txt = jnp.pad(txt, ((0, B_pad - B), (0, 0)))
        imgp = jnp.pad(imgp, ((0, B_pad - B), (0, 0)))

    # bf16 weights (f32 accumulation in-kernel); zero-padded lane-dense last layer.
    proj_p = jnp.pad(params["img_proj"],
                     ((0, POOL_PAD - params["img_proj"].shape[0]), (0, 0))
                     ).astype(jnp.bfloat16)
    wtp = params["W_tp"].astype(jnp.bfloat16)
    wfc = params["W_fc"].astype(jnp.bfloat16)
    w1a = params["W1a"].astype(jnp.bfloat16)
    w1b = params["W1b"].astype(jnp.bfloat16)
    w2p = (jnp.zeros((512, NC_PAD), jnp.float32)
           .at[:, :num_classes].set(params["W2"])).astype(jnp.bfloat16)
    b2p = jnp.zeros((1, NC_PAD), jnp.float32).at[:, :num_classes].set(params["b2"])

    # Activations/output tiled over batch (default double-buffering); weights
    # resident with a constant index_map and single-buffered (never re-fetched).
    batch_spec = lambda cols: pl.BlockSpec((TM, cols), lambda i: (i, 0))
    const_spec = lambda shape: pl.BlockSpec(shape, lambda i: (0, 0),
                                            pipeline_mode=pl.Buffered(1))

    in_specs = [
        batch_spec(768),                 # txt
        batch_spec(POOL_PAD),            # img pooled (lane-padded)
        const_spec((POOL_PAD, 2048)),    # img_proj (row-padded)
        const_spec((768, 512)),          # W_tp
        const_spec((1, 512)),            # b_tp
        const_spec((2048, 512)),         # W_fc
        const_spec((1, 512)),            # b_fc
        const_spec((512, 512)),          # W1a
        const_spec((512, 512)),          # W1b
        const_spec((1, 512)),            # b1
        const_spec((512, NC_PAD)),       # W2 (padded)
        const_spec((1, NC_PAD)),         # b2 (padded)
    ]
    out_spec = pl.BlockSpec((TM, NC_PAD), lambda i: (i, 0))

    flops = 2 * B_pad * (POOL_PAD * 2048 + 2048 * 512 + 768 * 512
                         + 2 * 512 * 512 + 512 * NC_PAD)
    weight_bytes = 2 * (POOL_PAD * 2048 + 768 * 512 + 2048 * 512
                        + 2 * 512 * 512 + 512 * NC_PAD)
    bias_bytes = 4 * (3 * 512 + NC_PAD)
    act_bytes = 2 * B_pad * (768 + POOL_PAD) + 4 * B_pad * NC_PAD
    cost = pl.CostEstimate(flops=flops, transcendentals=0,
                           bytes_accessed=weight_bytes + bias_bytes + act_bytes)

    out_padded = pl.pallas_call(
        fusion_kernel,
        out_shape=jax.ShapeDtypeStruct((B_pad, NC_PAD), jnp.float32),
        grid=grid,
        in_specs=in_specs,
        out_specs=out_spec,
        compiler_params=pltpu.CompilerParams(
            dimension_semantics=("parallel",),
            vmem_limit_bytes=32 * 1024 * 1024),
        cost_estimate=cost,
    )(txt, imgp, proj_p,
      wtp, params["b_tp"], wfc, params["b_fc"],
      w1a, w1b, params["b1"], w2p, b2p)

    return out_padded[:B, :num_classes]


# ----------------------------------------------------------------------------
# Deterministic synthetic backbones (plain-JAX glue)
# ----------------------------------------------------------------------------
# TODO(synk): BertModel('bert-base-chinese') encoder has no Pallas equivalent
#             here; stand-in = masked mean-pool of a deterministic embedding
#             table + tanh (pooler-like), producing the (B, 768) pooled feature.
def text_backbone_stub(input_ids, attention_mask, embed_table):
    emb = embed_table[input_ids]                              # (B, S, 768)
    mask = attention_mask[..., None].astype(jnp.float32)      # (B, S, 1)
    pooled = (emb * mask).sum(axis=1) / jnp.maximum(mask.sum(axis=1), 1.0)
    return jnp.tanh(pooled)                                   # (B, 768)


# TODO(synk): ResNet50 conv trunk has no Pallas equivalent here; stand-in =
#             global average pool over H,W giving (B, 3); the 3->2048
#             projection + ReLU of the stub is fused into the Pallas kernel.
def image_pool_stub(images_nchw):
    return images_nchw.mean(axis=(2, 3))                      # (B, 3)


# ----------------------------------------------------------------------------
# Parameter initialization (deterministic)
# ----------------------------------------------------------------------------
def init_params(key, num_classes=3, vocab=1000):
    ks = jax.random.split(key, 10)
    scale = lambda fan_in: 1.0 / jnp.sqrt(jnp.float32(fan_in))
    p = {
        # nn.Linear stores weight as (out, in); we keep (in, out) for x @ W.
        "W_tp": jax.random.normal(ks[0], (768, 512), jnp.float32) * scale(768),
        "b_tp": jnp.zeros((1, 512), jnp.float32),
        "W_fc": jax.random.normal(ks[1], (2048, 512), jnp.float32) * scale(2048),
        "b_fc": jnp.zeros((1, 512), jnp.float32),
        "W1a": jax.random.normal(ks[2], (512, 512), jnp.float32) * scale(1024),
        "W1b": jax.random.normal(ks[3], (512, 512), jnp.float32) * scale(1024),
        "b1": jnp.zeros((1, 512), jnp.float32),
        "W2": jax.random.normal(ks[4], (512, num_classes), jnp.float32) * scale(512),
        "b2": jnp.zeros((1, num_classes), jnp.float32),
        # stand-in backbone params
        "embed_table": jax.random.normal(ks[5], (vocab, 768), jnp.float32) * 0.02,
        "img_proj": jax.random.normal(ks[6], (3, 2048), jnp.float32) * scale(3),
    }
    return p


@jax.jit
def multimodal_forward(input_ids, attention_mask, images, params):
    text_feat = text_backbone_stub(input_ids, attention_mask,
                                   params["embed_table"])     # (B, 768)
    img_pooled = image_pool_stub(images)                      # (B, 3)
    return multimodal_head(text_feat, img_pooled, params)     # (B, num_classes)


# ----------------------------------------------------------------------------
if __name__ == "__main__":
    key = jax.random.PRNGKey(0)
    k_ids, k_img, k_param = jax.random.split(key, 3)

    B, S, H, W = 2, 8, 16, 16
    num_classes = 3

    input_ids = jax.random.randint(k_ids, (B, S), 0, 1000, dtype=jnp.int32)
    attention_mask = jnp.ones((B, S), dtype=jnp.int32)
    images = jax.random.normal(k_img, (B, 3, H, W), jnp.float32)  # NCHW

    params = init_params(k_param, num_classes=num_classes)

    out = multimodal_forward(input_ids, attention_mask, images, params)
    out = jax.block_until_ready(out)
    assert out.shape == (B, num_classes), out.shape

    # Reference check of the Pallas head against plain jnp with the same
    # bf16 weight/activation casts and f32 accumulation.  (bf16 weights add
    # up to ~1e-2 relative error vs. the original f32 PyTorch math; acceptable
    # for inference.)
    bf16, f32 = jnp.bfloat16, jnp.float32
    tfeat = text_backbone_stub(input_ids, attention_mask, params["embed_table"])
    pooled = image_pool_stub(images)
    t = jnp.dot(tfeat.astype(bf16), params["W_tp"].astype(bf16),
                preferred_element_type=f32) + params["b_tp"]
    t = t.astype(bf16)
    i_full = jnp.maximum(
        jnp.dot(pooled.astype(bf16), params["img_proj"].astype(bf16),
                preferred_element_type=f32), 0.0).astype(bf16)
    i = jnp.dot(i_full, params["W_fc"].astype(bf16),
                preferred_element_type=f32) + params["b_fc"]
    i = i.astype(bf16)
    h = jnp.maximum(
        jnp.dot(t, params["W1a"].astype(bf16), preferred_element_type=f32)
        + jnp.dot(i, params["W1b"].astype(bf16), preferred_element_type=f32)
        + params["b1"], 0.0).astype(bf16)
    ref = jnp.dot(h, params["W2"].astype(bf16),
                  preferred_element_type=f32) + params["b2"]
    assert jnp.allclose(out, ref, atol=2e-2, rtol=2e-2), (out, ref)

    print("KERNEL_OK")
</pallas_src>

<mosaic_0001>
module attributes {stable_mosaic.version = 11 : i64} {
  func.func @fusion_kernel(%arg0: i32, %arg1: memref<16x768xbf16, #tpu.memory_space<vmem>>, %arg2: memref<16x128xbf16, #tpu.memory_space<vmem>>, %arg3: memref<128x2048xbf16, #tpu.memory_space<vmem>>, %arg4: memref<768x512xbf16, #tpu.memory_space<vmem>>, %arg5: memref<1x512xf32, #tpu.memory_space<vmem>>, %arg6: memref<2048x512xbf16, #tpu.memory_space<vmem>>, %arg7: memref<1x512xf32, #tpu.memory_space<vmem>>, %arg8: memref<512x512xbf16, #tpu.memory_space<vmem>>, %arg9: memref<512x512xbf16, #tpu.memory_space<vmem>>, %arg10: memref<1x512xf32, #tpu.memory_space<vmem>>, %arg11: memref<512x128xbf16, #tpu.memory_space<vmem>>, %arg12: memref<1x128xf32, #tpu.memory_space<vmem>>, %arg13: memref<16x128xf32, #tpu.memory_space<vmem>>) attributes {dimension_semantics = [#tpu.dimension_semantics<parallel>], iteration_bounds = array<i64: 1>, scalar_prefetch = 0 : i64, scratch_operands = 0 : i64, tpu.core_type = #tpu.core_type<tc>, window_params = [{transform_indices = @transform_0, window_bounds = array<i64: 16, 768>}, {transform_indices = @transform_1, window_bounds = array<i64: 16, 128>}, {pipeline_mode = #tpu.pipeline_mode<synchronous>, transform_indices = @transform_2, window_bounds = array<i64: 128, 2048>}, {pipeline_mode = #tpu.pipeline_mode<synchronous>, transform_indices = @transform_3, window_bounds = array<i64: 768, 512>}, {pipeline_mode = #tpu.pipeline_mode<synchronous>, transform_indices = @transform_4, window_bounds = array<i64: 1, 512>}, {pipeline_mode = #tpu.pipeline_mode<synchronous>, transform_indices = @transform_5, window_bounds = array<i64: 2048, 512>}, {pipeline_mode = #tpu.pipeline_mode<synchronous>, transform_indices = @transform_6, window_bounds = array<i64: 1, 512>}, {pipeline_mode = #tpu.pipeline_mode<synchronous>, transform_indices = @transform_7, window_bounds = array<i64: 512, 512>}, {pipeline_mode = #tpu.pipeline_mode<synchronous>, transform_indices = @transform_8, window_bounds = array<i64: 512, 512>}, {pipeline_mode = #tpu.pipeline_mode<synchronous>, transform_indices = @transform_9, window_bounds = array<i64: 1, 512>}, {pipeline_mode = #tpu.pipeline_mode<synchronous>, transform_indices = @transform_10, window_bounds = array<i64: 512, 128>}, {pipeline_mode = #tpu.pipeline_mode<synchronous>, transform_indices = @transform_11, window_bounds = array<i64: 1, 128>}, {transform_indices = @transform_12, window_bounds = array<i64: 16, 128>}]} {
    %c0 = arith.constant 0 : index
    %c0_0 = arith.constant 0 : index
    %0 = vector.load %arg1[%c0, %c0_0] : memref<16x768xbf16, #tpu.memory_space<vmem>>, vector<16x768xbf16>
    %c0_1 = arith.constant 0 : index
    %c0_2 = arith.constant 0 : index
    %1 = vector.load %arg4[%c0_1, %c0_2] : memref<768x512xbf16, #tpu.memory_space<vmem>>, vector<768x512xbf16>
    %cst = arith.constant dense<0.000000e+00> : vector<16x512xf32>
    %2 = tpu.matmul %0, %1, %cst {dimension_numbers = #tpu.dot_dimension_numbers<[1], [0], [0], [1], [0, 0, 1, 1], [], []>} : vector<16x768xbf16>, vector<768x512xbf16>, vector<16x512xf32> -> vector<16x512xf32>
    %c0_3 = arith.constant 0 : index
    %c0_4 = arith.constant 0 : index
    %3 = vector.load %arg5[%c0_3, %c0_4] : memref<1x512xf32, #tpu.memory_space<vmem>>, vector<1x512xf32>
    %4 = vector.broadcast %3 : vector<1x512xf32> to vector<16x512xf32>
    %5 = arith.addf %2, %4 : vector<16x512xf32>
    %6 = arith.truncf %5 : vector<16x512xf32> to vector<16x512xbf16>
    %c0_5 = arith.constant 0 : index
    %c0_6 = arith.constant 0 : index
    %7 = vector.load %arg2[%c0_5, %c0_6] : memref<16x128xbf16, #tpu.memory_space<vmem>>, vector<16x128xbf16>
    %c0_7 = arith.constant 0 : index
    %c0_8 = arith.constant 0 : index
    %8 = vector.load %arg3[%c0_7, %c0_8] : memref<128x2048xbf16, #tpu.memory_space<vmem>>, vector<128x2048xbf16>
    %cst_9 = arith.constant dense<0.000000e+00> : vector<16x2048xf32>
    %9 = tpu.matmul %7, %8, %cst_9 {dimension_numbers = #tpu.dot_dimension_numbers<[1], [0], [0], [1], [0, 0, 1, 1], [], []>} : vector<16x128xbf16>, vector<128x2048xbf16>, vector<16x2048xf32> -> vector<16x2048xf32>
    %cst_10 = arith.constant 0.000000e+00 : f32
    %10 = vector.broadcast %cst_10 : f32 to vector<16x2048xf32>
    %11 = arith.maximumf %9, %10 : vector<16x2048xf32>
    %12 = arith.truncf %11 : vector<16x2048xf32> to vector<16x2048xbf16>
    %c0_11 = arith.constant 0 : index
    %c0_12 = arith.constant 0 : index
    %13 = vector.load %arg6[%c0_11, %c0_12] : memref<2048x512xbf16, #tpu.memory_space<vmem>>, vector<2048x512xbf16>
    %cst_13 = arith.constant dense<0.000000e+00> : vector<16x512xf32>
    %14 = tpu.matmul %12, %13, %cst_13 {dimension_numbers = #tpu.dot_dimension_numbers<[1], [0], [0], [1], [0, 0, 1, 1], [], []>} : vector<16x2048xbf16>, vector<2048x512xbf16>, vector<16x512xf32> -> vector<16x512xf32>
    %c0_14 = arith.constant 0 : index
    %c0_15 = arith.constant 0 : index
    %15 = vector.load %arg7[%c0_14, %c0_15] : memref<1x512xf32, #tpu.memory_space<vmem>>, vector<1x512xf32>
    %16 = vector.broadcast %15 : vector<1x512xf32> to vector<16x512xf32>
    %17 = arith.addf %14, %16 : vector<16x512xf32>
    %18 = arith.truncf %17 : vector<16x512xf32> to vector<16x512xbf16>
    %c0_16 = arith.constant 0 : index
    %c0_17 = arith.constant 0 : index
    %19 = vector.load %arg8[%c0_16, %c0_17] : memref<512x512xbf16, #tpu.memory_space<vmem>>, vector<512x512xbf16>
    %cst_18 = arith.constant dense<0.000000e+00> : vector<16x512xf32>
    %20 = tpu.matmul %6, %19, %cst_18 {dimension_numbers = #tpu.dot_dimension_numbers<[1], [0], [0], [1], [0, 0, 1, 1], [], []>} : vector<16x512xbf16>, vector<512x512xbf16>, vector<16x512xf32> -> vector<16x512xf32>
    %c0_19 = arith.constant 0 : index
    %c0_20 = arith.constant 0 : index
    %21 = vector.load %arg9[%c0_19, %c0_20] : memref<512x512xbf16, #tpu.memory_space<vmem>>, vector<512x512xbf16>
    %cst_21 = arith.constant dense<0.000000e+00> : vector<16x512xf32>
    %22 = tpu.matmul %18, %21, %cst_21 {dimension_numbers = #tpu.dot_dimension_numbers<[1], [0], [0], [1], [0, 0, 1, 1], [], []>} : vector<16x512xbf16>, vector<512x512xbf16>, vector<16x512xf32> -> vector<16x512xf32>
    %23 = arith.addf %20, %22 : vector<16x512xf32>
    %c0_22 = arith.constant 0 : index
    %c0_23 = arith.constant 0 : index
    %24 = vector.load %arg10[%c0_22, %c0_23] : memref<1x512xf32, #tpu.memory_space<vmem>>, vector<1x512xf32>
    %25 = vector.broadcast %24 : vector<1x512xf32> to vector<16x512xf32>
    %26 = arith.addf %23, %25 : vector<16x512xf32>
    %cst_24 = arith.constant 0.000000e+00 : f32
    %27 = vector.broadcast %cst_24 : f32 to vector<16x512xf32>
    %28 = arith.maximumf %26, %27 : vector<16x512xf32>
    %29 = arith.truncf %28 : vector<16x512xf32> to vector<16x512xbf16>
    %c0_25 = arith.constant 0 : index
    %c0_26 = arith.constant 0 : index
    %30 = vector.load %arg11[%c0_25, %c0_26] : memref<512x128xbf16, #tpu.memory_space<vmem>>, vector<512x128xbf16>
    %cst_27 = arith.constant dense<0.000000e+00> : vector<16x128xf32>
    %31 = tpu.matmul %29, %30, %cst_27 {dimension_numbers = #tpu.dot_dimension_numbers<[1], [0], [0], [1], [0, 0, 1, 1], [], []>} : vector<16x512xbf16>, vector<512x128xbf16>, vector<16x128xf32> -> vector<16x128xf32>
    %c0_28 = arith.constant 0 : index
    %c0_29 = arith.constant 0 : index
    %32 = vector.load %arg12[%c0_28, %c0_29] : memref<1x128xf32, #tpu.memory_space<vmem>>, vector<1x128xf32>
    %33 = vector.broadcast %32 : vector<1x128xf32> to vector<16x128xf32>
    %34 = arith.addf %31, %33 : vector<16x128xf32>
    %c0_30 = arith.constant 0 : index
    %c0_31 = arith.constant 0 : index
    %35 = vector.load %arg13[%c0_30, %c0_31] : memref<16x128xf32, #tpu.memory_space<vmem>>, vector<16x128xf32>
    tpu.vector_store %arg13[%c0_30, %c0_31], %34 {strides = array<i32>} : memref<16x128xf32, #tpu.memory_space<vmem>>, vector<16x128xf32>,
    return
  }
  func.func @transform_0(%arg0: i32) -> (i32, i32) {
    %c0_i32 = arith.constant 0 : i32
    %c0_i32_0 = arith.constant 0 : i32
    return %arg0, %c0_i32 : i32, i32
  }
  func.func @transform_1(%arg0: i32) -> (i32, i32) {
    %c0_i32 = arith.constant 0 : i32
    %c0_i32_0 = arith.constant 0 : i32
    return %arg0, %c0_i32 : i32, i32
  }
  func.func @transform_2(%arg0: i32) -> (i32, i32) {
    %c0_i32 = arith.constant 0 : i32
    %c0_i32_0 = arith.constant 0 : i32
    %c0_i32_1 = arith.constant 0 : i32
    return %c0_i32, %c0_i32_0 : i32, i32
  }
  func.func @transform_3(%arg0: i32) -> (i32, i32) {
    %c0_i32 = arith.constant 0 : i32
    %c0_i32_0 = arith.constant 0 : i32
    %c0_i32_1 = arith.constant 0 : i32
    return %c0_i32, %c0_i32_0 : i32, i32
  }
  func.func @transform_4(%arg0: i32) -> (i32, i32) {
    %c0_i32 = arith.constant 0 : i32
    %c0_i32_0 = arith.constant 0 : i32
    %c0_i32_1 = arith.constant 0 : i32
    return %c0_i32, %c0_i32_0 : i32, i32
  }
  func.func @transform_5(%arg0: i32) -> (i32, i32) {
    %c0_i32 = arith.constant 0 : i32
    %c0_i32_0 = arith.constant 0 : i32
    %c0_i32_1 = arith.constant 0 : i32
    return %c0_i32, %c0_i32_0 : i32, i32
  }
  func.func @transform_6(%arg0: i32) -> (i32, i32) {
    %c0_i32 = arith.constant 0 : i32
    %c0_i32_0 = arith.constant 0 : i32
    %c0_i32_1 = arith.constant 0 : i32
    return %c0_i32, %c0_i32_0 : i32, i32
  }
  func.func @transform_7(%arg0: i32) -> (i32, i32) {
    %c0_i32 = arith.constant 0 : i32
    %c0_i32_0 = arith.constant 0 : i32
    %c0_i32_1 = arith.constant 0 : i32
    return %c0_i32, %c0_i32_0 : i32, i32
  }
  func.func @transform_8(%arg0: i32) -> (i32, i32) {
    %c0_i32 = arith.constant 0 : i32
    %c0_i32_0 = arith.constant 0 : i32
    %c0_i32_1 = arith.constant 0 : i32
    return %c0_i32, %c0_i32_0 : i32, i32
  }
  func.func @transform_9(%arg0: i32) -> (i32, i32) {
    %c0_i32 = arith.constant 0 : i32
    %c0_i32_0 = arith.constant 0 : i32
    %c0_i32_1 = arith.constant 0 : i32
    return %c0_i32, %c0_i32_0 : i32, i32
  }
  func.func @transform_10(%arg0: i32) -> (i32, i32) {
    %c0_i32 = arith.constant 0 : i32
    %c0_i32_0 = arith.constant 0 : i32
    %c0_i32_1 = arith.constant 0 : i32
    return %c0_i32, %c0_i32_0 : i32, i32
  }
  func.func @transform_11(%arg0: i32) -> (i32, i32) {
    %c0_i32 = arith.constant 0 : i32
    %c0_i32_0 = arith.constant 0 : i32
    %c0_i32_1 = arith.constant 0 : i32
    return %c0_i32, %c0_i32_0 : i32, i32
  }
  func.func @transform_12(%arg0: i32) -> (i32, i32) {
    %c0_i32 = arith.constant 0 : i32
    %c0_i32_0 = arith.constant 0 : i32
    return %arg0, %c0_i32 : i32, i32
  }
}

</mosaic_0001>

<bundles_post_ra>
// kernel: multimodal_forward.1
= control target key start
LH: loop header
LB: loop body
LE: loop exit
PB: predicated region body
PF: predicated region fallthrough
CT: control target
= control target key end

     0   :  { %s21990_s3 = inlined_call_operand.vmem [shape: bf16[768,512], index: 3, kind: input, shape index: {}]   ;;  %s21991_s0 = inlined_call_operand.vmem [shape: bf16[16,768], index: 0, kind: input, shape index: {}]   ;;  %s21992_s4 = inlined_call_operand.vmem [shape: f32[1,512], index: 4, kind: input, shape index: {}]   ;;  %s21993_s2 = inlined_call_operand.vmem [shape: bf16[128,2048], index: 2, kind: input, shape index: {}]   ;;  %s21994_s1 = inlined_call_operand.vmem [shape: bf16[16,128], index: 1, kind: input, shape index: {}]   ;;  %s21995_s5 = inlined_call_operand.vmem [shape: bf16[2048,512], index: 5, kind: input, shape index: {}]   ;;  %s21996_s6 = inlined_call_operand.vmem [shape: f32[1,512], index: 6, kind: input, shape index: {}]   ;;  %s21997_s8 = inlined_call_operand.vmem [shape: bf16[512,512], index: 8, kind: input, shape index: {}]   ;;  %s21998_s7 = inlined_call_operand.vmem [shape: bf16[512,512], index: 7, kind: input, shape index: {}]   ;;  %s21999_s10 = inlined_call_operand.vmem [shape: bf16[512,128], index: 10, kind: input, shape index: {}]   ;;  %s22000_s11 = inlined_call_operand.vmem [shape: f32[1,128], index: 11, kind: input, shape index: {}]   ;;  %s22001_s9 = inlined_call_operand.vmem [shape: f32[1,512], index: 9, kind: input, shape index: {}]   ;;  %s22002_s12 = inlined_call_operand.vmem [shape: f32[16,128], index: 12, kind: output, shape index: {}]  }
   0x1   :  { %v9083_v0 = vld [vmem:[%s21990_s3 + $0xe0] sm:$0xf]  ;;  %v13489_v1 = vld [vmem:[%s21990_s3 + $0xec] sm:$0xf0] }
   0x2   :  { %v9211_v2 = vld [vmem:[%s21990_s3 + $0x1e0] sm:$0xf]  ;;  %v9084_v3 = vor.u32 %v13489_v1, %v9083_v0  ;;  %v13521_v4 = vld [vmem:[%s21990_s3 + $0x1ec] sm:$0xf0] }
   0x3   :  { %v9339_v5 = vld [vmem:[%s21990_s3 + $0x2e0] sm:$0xf]  ;;  %v13553_v6 = vld [vmem:[%s21990_s3 + $0x2ec] sm:$0xf0]  ;;  %v9212_v7 = vor.u32 %v13521_v4, %v9211_v2 }
   0x4   :  { %v9340_v8 = vor.u32 %v13553_v6, %v9339_v5  ;;  %v9467_v9 = vld [vmem:[%s21990_s3 + $0x3e0] sm:$0xf]  ;;  %v13585_v10 = vld [vmem:[%s21990_s3 + $0x3ec] sm:$0xf0]  ;;  %1239 = vmatpush.bf16.msra.mxu0 %v9084_v3 }
   0x5   :  { %v9067_v11 = vld [vmem:[%s21990_s3 + $0xc0] sm:$0xf]  ;;  %v9468_v12 = vor.u32 %v13585_v10, %v9467_v9  ;;  %v13485_v13 = vld [vmem:[%s21990_s3 + $0xcc] sm:$0xf0]  ;;  %1253 = vmatpush.bf16.msra.mxu1 %v9212_v7 }
   0x6   :  { %v9195_v14 = vld [vmem:[%s21990_s3 + $0x1c0] sm:$0xf]  ;;  %v13517_v15 = vld [vmem:[%s21990_s3 + $0x1cc] sm:$0xf0]  ;;  %1267 = vmatpush.bf16.msra.mxu2 %v9340_v8  ;;  %v9068_v16 = vor.u32 %v13485_v13, %v9067_v11 }
   0x7   :  { %v9196_v17 = vor.u32 %v13517_v15, %v9195_v14  ;;  %v9323_v18 = vld [vmem:[%s21990_s3 + $0x2c0] sm:$0xf]  ;;  %v13549_v19 = vld [vmem:[%s21990_s3 + $0x2cc] sm:$0xf0]  ;;  %1281 = vmatpush.bf16.msra.mxu3 %v9468_v12 }
   0x8   :  { %v9451_v20 = vld [vmem:[%s21990_s3 + $0x3c0] sm:$0xf]  ;;  %v9324_v21 = vor.u32 %v13549_v19, %v9323_v18  ;;  %v13581_v22 = vld [vmem:[%s21990_s3 + $0x3cc] sm:$0xf0]  ;;  %1240 = vmatpush.bf16.msra.mxu0 %v9068_v16 }
   0x9   :  { %v9051_v23 = vld [vmem:[%s21990_s3 + $0xa0] sm:$0xf]  ;;  %v13481_v24 = vld [vmem:[%s21990_s3 + $0xac] sm:$0xf0]  ;;  %v9452_v25 = vor.u32 %v13581_v22, %v9451_v20  ;;  %1254 = vmatpush.bf16.msra.mxu1 %v9196_v17 }
   0xa   :  { %v9179_v26 = vld [vmem:[%s21990_s3 + $0x1a0] sm:$0xf]  ;;  %v13513_v27 = vld [vmem:[%s21990_s3 + $0x1ac] sm:$0xf0]  ;;  %v9052_v29 = vor.u32 %v13481_v24, %v9051_v23  ;;  %1268 = vmatpush.bf16.msra.mxu2 %v9324_v21 }
   0xb   :  { %v9307_v28 = vld [vmem:[%s21990_s3 + $0x2a0] sm:$0xf]  ;;  %v13545_v30 = vld [vmem:[%s21990_s3 + $0x2ac] sm:$0xf0]  ;;  %v9180_v33 = vor.u32 %v13513_v27, %v9179_v26  ;;  %1282 = vmatpush.bf16.msra.mxu3 %v9452_v25 }
   0xc   :  { %v9435_v31 = vld [vmem:[%s21990_s3 + $0x3a0] sm:$0xf]  ;;  %v13577_v32 = vld [vmem:[%s21990_s3 + $0x3ac] sm:$0xf0]  ;;  %v9308_v34 = vor.u32 %v13545_v30, %v9307_v28  ;;  %1241 = vmatpush.bf16.msra.mxu0 %v9052_v29 }
   0xd   :  { %v9035_v35 = vld [vmem:[%s21990_s3 + $0x80] sm:$0xf]  ;;  %v13477_v36 = vld [vmem:[%s21990_s3 + $0x8c] sm:$0xf0]  ;;  %v9436_v38 = vor.u32 %v13577_v32, %v9435_v31  ;;  %1255 = vmatpush.bf16.msra.mxu1 %v9180_v33  ;;  %v13487_v33 = vld [vmem:[%s21990_s3 + $0xe4] sm:$0xf] }
   0xe   :  { %v9163_v37 = vld [vmem:[%s21990_s3 + $0x180] sm:$0xf]  ;;  %v13509_v39 = vld [vmem:[%s21990_s3 + $0x18c] sm:$0xf0]  ;;  %v9036_v44 = vor.u32 %v13477_v36, %v9035_v35  ;;  %1269 = vmatpush.bf16.msra.mxu2 %v9308_v34  ;;  %v9085_v34 = vld [vmem:[%s21990_s3 + $0xf0] sm:$0xf0] }
   0xf   :  { %v9291_v40 = vld [vmem:[%s21990_s3 + $0x280] sm:$0xf]  ;;  %v13541_v41 = vld [vmem:[%s21990_s3 + $0x28c] sm:$0xf0]  ;;  %v9164_v45 = vor.u32 %v13509_v39, %v9163_v37  ;;  %1283 = vmatpush.bf16.msra.mxu3 %v9436_v38  ;;  %v13519_v37 = vld [vmem:[%s21990_s3 + $0x1e4] sm:$0xf] }
  0x10   :  { %v9419_v42 = vld [vmem:[%s21990_s3 + $0x380] sm:$0xf]  ;;  %v13573_v43 = vld [vmem:[%s21990_s3 + $0x38c] sm:$0xf0]  ;;  %v9292_v46 = vor.u32 %v13541_v41, %v9291_v40  ;;  %1242 = vmatpush.bf16.msra.mxu0 %v9036_v44  ;;  %v9213_v38 = vld [vmem:[%s21990_s3 + $0x1f0] sm:$0xf0] }
  0x11   :  { %v9019_v47 = vld [vmem:[%s21990_s3 + $0x60] sm:$0xf]  ;;  %v13473_v48 = vld [vmem:[%s21990_s3 + $0x6c] sm:$0xf0]  ;;  %v9420_v50 = vor.u32 %v13573_v43, %v9419_v42  ;;  %1256 = vmatpush.bf16.msra.mxu1 %v9164_v45  ;;  %v9088_v43 = vor.u32 %v13487_v33, %v9085_v34  ;;  %v9021_v33 = vld [vmem:[%s21990_s3 + $0x70] sm:$0xf0] }
  0x12   :  { %v9147_v49 = vld [vmem:[%s21990_s3 + $0x160] sm:$0xf]  ;;  %v13505_v51 = vld [vmem:[%s21990_s3 + $0x16c] sm:$0xf0]  ;;  %v9020_v56 = vor.u32 %v13473_v48, %v9019_v47  ;;  %1270 = vmatpush.bf16.msra.mxu2 %v9292_v46  ;;  %v9216_v47 = vor.u32 %v13519_v37, %v9213_v38  ;;  %v13483_v48 = vld [vmem:[%s21990_s3 + $0xc4] sm:$0xf] }
  0x13   :  { %v9275_v52 = vld [vmem:[%s21990_s3 + $0x260] sm:$0xf]  ;;  %v13537_v53 = vld [vmem:[%s21990_s3 + $0x26c] sm:$0xf0]  ;;  %v9148_v57 = vor.u32 %v13505_v51, %v9147_v49  ;;  %1284 = vmatpush.bf16.msra.mxu3 %v9420_v50  ;;  %v9069_v49 = vld [vmem:[%s21990_s3 + $0xd0] sm:$0xf0] }
  0x14   :  { %v9403_v54 = vld [vmem:[%s21990_s3 + $0x360] sm:$0xf]  ;;  %v13569_v55 = vld [vmem:[%s21990_s3 + $0x36c] sm:$0xf0]  ;;  %v9276_v58 = vor.u32 %v13537_v53, %v9275_v52  ;;  %1243 = vmatpush.bf16.msra.mxu0 %v9020_v56  ;;  %v13515_v50 = vld [vmem:[%s21990_s3 + $0x1c4] sm:$0xf] }
  0x15   :  { %v9003_v59 = vld [vmem:[%s21990_s3 + $0x40] sm:$0xf]  ;;  %v13469_v60 = vld [vmem:[%s21990_s3 + $0x4c] sm:$0xf0]  ;;  %v9404_v62 = vor.u32 %v13569_v55, %v9403_v54  ;;  %1257 = vmatpush.bf16.msra.mxu1 %v9148_v57  ;;  %v9197_v51 = vld [vmem:[%s21990_s3 + $0x1d0] sm:$0xf0] }
  0x16   :  { %v9131_v61 = vld [vmem:[%s21990_s3 + $0x140] sm:$0xf]  ;;  %v13501_v63 = vld [vmem:[%s21990_s3 + $0x14c] sm:$0xf0]  ;;  %v9004_v4 = vor.u32 %v13469_v60, %v9003_v59  ;;  %1271 = vmatpush.bf16.msra.mxu2 %v9276_v58  ;;  %v13456_v53 = vld [vmem:[%s21991_s0 + $0x14] sm:$0xf0]  ;;  %v9072_v59 = vor.u32 %v13483_v48, %v9069_v49 }
  0x17   :  { %v9259_v0 = vld [vmem:[%s21990_s3 + $0x240] sm:$0xf]  ;;  %v13533_v1 = vld [vmem:[%s21990_s3 + $0x24c] sm:$0xf0]  ;;  %v9132_v5 = vor.u32 %v13501_v63, %v9131_v61  ;;  %1285 = vmatpush.bf16.msra.mxu3 %v9404_v62  ;;  %v13479_v62 = vld [vmem:[%s21990_s3 + $0xa4] sm:$0xf]  ;;  %v9200_v63 = vor.u32 %v13515_v50, %v9197_v51 }
  0x18   :  { %v9387_v2 = vld [vmem:[%s21990_s3 + $0x340] sm:$0xf]  ;;  %v13565_v3 = vld [vmem:[%s21990_s3 + $0x34c] sm:$0xf0]  ;;  %v9260_v6 = vor.u32 %v13533_v1, %v9259_v0  ;;  %1244 = vmatpush.bf16.msra.mxu0 %v9004_v4  ;;  %v9053_v0 = vld [vmem:[%s21990_s3 + $0xb0] sm:$0xf0] }
  0x19   :  { %v8987_v7 = vld [vmem:[%s21990_s3 + $0x20] sm:$0xf]  ;;  %v13465_v8 = vld [vmem:[%s21990_s3 + $0x2c] sm:$0xf0]  ;;  %v9388_v10 = vor.u32 %v13565_v3, %v9387_v2  ;;  %1258 = vmatpush.bf16.msra.mxu1 %v9132_v5  ;;  %v13453_v1 = vld [vmem:[%s21991_s0 + $0x4] sm:$0xf] }
  0x1a   :  { %v9115_v9 = vld [vmem:[%s21990_s3 + $0x120] sm:$0xf]  ;;  %v13497_v11 = vld [vmem:[%s21990_s3 + $0x12c] sm:$0xf0]  ;;  %v8988_v16 = vor.u32 %v13465_v8, %v8987_v7  ;;  %1272 = vmatpush.bf16.msra.mxu2 %v9260_v6  ;;  %v8949_v2 = vld [vmem:[%s21991_s0 + $0x18] sm:$0xf0] }
  0x1b   :  { %v9243_v12 = vld [vmem:[%s21990_s3 + $0x220] sm:$0xf]  ;;  %v13529_v13 = vld [vmem:[%s21990_s3 + $0x22c] sm:$0xf0]  ;;  %v9116_v19 = vor.u32 %v13497_v11, %v9115_v9  ;;  %1286 = vmatpush.bf16.msra.mxu3 %v9388_v10  ;;  %v13511_v3 = vld [vmem:[%s21990_s3 + $0x1a4] sm:$0xf]  ;;  %v14932_v6 = vor.u32 %v13453_v1, %v8949_v2 }
  0x1c   :  { %v9371_v14 = vld [vmem:[%s21990_s3 + $0x320] sm:$0xf]  ;;  %v13561_v15 = vld [vmem:[%s21990_s3 + $0x32c] sm:$0xf0]  ;;  %v9244_v20 = vor.u32 %v13529_v13, %v9243_v12  ;;  %1245 = vmatpush.bf16.msra.mxu0 %v8988_v16  ;;  %v9181_v4 = vld [vmem:[%s21990_s3 + $0x1b0] sm:$0xf0]  ;;  %v9056_v12 = vor.u32 %v13479_v62, %v9053_v0 }
  0x1d   :  { %v8971_v17 = vld [vmem:[%s21990_s3] sm:$0xf]  ;;  %v13461_v18 = vld [vmem:[%s21990_s3 + $0xc] sm:$0xf0]  ;;  %v9372_v24 = vor.u32 %v13561_v15, %v9371_v14  ;;  %1259 = vmatpush.bf16.msra.mxu1 %v9116_v19  ;;  %v13475_v13 = vld [vmem:[%s21990_s3 + $0x84] sm:$0xf]  ;;  %v9184_v16 = vor.u32 %v13511_v3, %v9181_v4 }
  0x1e   :  { %v9099_v21 = vld [vmem:[%s21990_s3 + $0x100] sm:$0xf]  ;;  %v13493_v22 = vld [vmem:[%s21990_s3 + $0x10c] sm:$0xf0]  ;;  %v8972_v31 = vor.u32 %v13461_v18, %v8971_v17  ;;  %1273 = vmatpush.bf16.msra.mxu2 %v9244_v20  ;;  %v9037_v14 = vld [vmem:[%s21990_s3 + $0x90] sm:$0xf0] }
  0x1f   :  { %v9227_v23 = vld [vmem:[%s21990_s3 + $0x200] sm:$0xf]  ;;  %v13525_v25 = vld [vmem:[%s21990_s3 + $0x20c] sm:$0xf0]  ;;  %v9100_v35 = vor.u32 %v13493_v22, %v9099_v21  ;;  %1287 = vmatpush.bf16.msra.mxu3 %v9372_v24  ;;  %v8955_v15 = vld [vmem:[%s21991_s0 + $0x8] sm:$0xf] }
  0x20   :  { %v9355_v26 = vld [vmem:[%s21990_s3 + $0x300] sm:$0xf]  ;;  %v13557_v27 = vld [vmem:[%s21990_s3 + $0x30c] sm:$0xf0]  ;;  %v9228_v36 = vor.u32 %v13525_v25, %v9227_v23  ;;  %1246 = vmatpush.bf16.msra.mxu0 %v8972_v31  ;;  %v13454_v18 = vld [vmem:[%s21991_s0 + $0xc] sm:$0xf] }
  0x21   :  { %v9595_v28 = vld [vmem:[%s21990_s3 + $0x4e0] sm:$0xf]  ;;  %v13617_v29 = vld [vmem:[%s21990_s3 + $0x4ec] sm:$0xf0]  ;;  %v9356_v39 = vor.u32 %v13557_v27, %v9355_v26  ;;  %1260 = vmatpush.bf16.msra.mxu1 %v9100_v35  ;;  %v8957_v19 = vld [vmem:[%s21991_s0 + $0x20] sm:$0xf0]  ;;  %v9040_v26 = vor.u32 %v13475_v13, %v9037_v14 }
  0x22   :  { %v9723_v30 = vld [vmem:[%s21990_s3 + $0x5e0] sm:$0xf]  ;;  %v13649_v32 = vld [vmem:[%s21990_s3 + $0x5ec] sm:$0xf0]  ;;  %v9596_v40 = vor.u32 %v13617_v29, %v9595_v28  ;;  %1274 = vmatpush.bf16.msra.mxu2 %v9228_v36  ;;  %v13507_v20 = vld [vmem:[%s21990_s3 + $0x184] sm:$0xf]  ;;  %v14970_v23 = vor.u32 %v13454_v18, %v8957_v19 }
  0x23   :  { %v9579_v41 = vld [vmem:[%s21990_s3 + $0x4c0] sm:$0xf]  ;;  %v9724_v42 = vor.u32 %v13649_v32, %v9723_v30  ;;  %v13613_v44 = vld [vmem:[%s21990_s3 + $0x4cc] sm:$0xf0]  ;;  %1288 = vmatpush.bf16.msra.mxu3 %v9356_v39  ;;  %v9165_v21 = vld [vmem:[%s21990_s3 + $0x190] sm:$0xf0] }
  0x24   :  { %v9707_v45 = vld [vmem:[%s21990_s3 + $0x5c0] sm:$0xf]  ;;  %v13645_v46 = vld [vmem:[%s21990_s3 + $0x5cc] sm:$0xf0]  ;;  %1295 = vmatpush.bf16.msrb.mxu0 %v9596_v40  ;;  %v9580_v54 = vor.u32 %v13613_v44, %v9579_v41  ;;  %1261 = vmatmul.bf16.vlgmr.msra.gmra.mxu1 %v14932_v6  ;;  %v9168_v30 = vor.u32 %v13507_v20, %v9165_v21  ;;  %v13471_v32 = vld [vmem:[%s21990_s3 + $0x64] sm:$0xf] }
  0x25   :  { %v8947_v52 = vld [vmem:[%s21991_s0] sm:$0xf]  ;;  %v13609_v56 = vld [vmem:[%s21990_s3 + $0x4ac] sm:$0xf0]  ;;  %1309 = vmatpush.bf16.msrb.mxu1 %v9724_v42  ;;  %v9708_v58 = vor.u32 %v13645_v46, %v9707_v45  ;;  %v13503_v34 = vld [vmem:[%s21990_s3 + $0x164] sm:$0xf]  ;;  %v9024_v38 = vor.u32 %v13471_v32, %v9021_v33 }
  0x26   :  { %v9563_v55 = vld [vmem:[%s21990_s3 + $0x4a0] sm:$0xf]  ;;  %v14902_v57 = vor.u32 %v13456_v53, %v8947_v52  ;;  %1323 = vmatpush.bf16.msrb.mxu2 %v9088_v43  ;;  %v13641_v61 = vld [vmem:[%s21990_s3 + $0x5ac] sm:$0xf0]  ;;  %v9149_v35 = vld [vmem:[%s21990_s3 + $0x170] sm:$0xf0]  ;;  %1289 = vmatmul.bf16.vlgmr.msra.gmra.mxu3 %v14970_v23 }
  0x27   :  { %v9691_v60 = vld [vmem:[%s21990_s3 + $0x5a0] sm:$0xf]  ;;  %1337 = vmatpush.bf16.msrb.mxu3 %v9216_v47  ;;  %v9564_v7 = vor.u32 %v13609_v56, %v9563_v55  ;;  %v13605_v8 = vld [vmem:[%s21990_s3 + $0x48c] sm:$0xf0]  ;;  %v9152_v42 = vor.u32 %v13503_v34, %v9149_v35  ;;  %v13467_v44 = vld [vmem:[%s21990_s3 + $0x44] sm:$0xf] }
  0x28   :  { %1247 = vmatmul.bf16.vlgmr.msra.gmra.mxu0 %v14902_v57  ;;  %v9547_v5 = vld [vmem:[%s21990_s3 + $0x480] sm:$0xf]  ;;  %v13637_v10 = vld [vmem:[%s21990_s3 + $0x58c] sm:$0xf0]  ;;  %v9692_v11 = vor.u32 %v13641_v61, %v9691_v60  ;;  %v9005_v45 = vld [vmem:[%s21990_s3 + $0x50] sm:$0xf0] }
  0x29   :  { %1296 = vmatpush.bf16.msrb.mxu0 %v9580_v54  ;;  %v9675_v9 = vld [vmem:[%s21990_s3 + $0x580] sm:$0xf]  ;;  %1310 = vmatpush.bf16.msrb.mxu1 %v9708_v58  ;;  %v9548_v24 = vor.u32 %v13605_v8, %v9547_v5  ;;  %v13601_v28 = vld [vmem:[%s21990_s3 + $0x46c] sm:$0xf0]  ;;  %v13499_v46 = vld [vmem:[%s21990_s3 + $0x144] sm:$0xf]  ;;  %v9008_v50 = vor.u32 %v13467_v44, %v9005_v45 }
  0x2a   :  { %1324 = vmatpush.bf16.msrb.mxu2 %v9072_v59  ;;  %v13457_v17 = vld [vmem:[%s21991_s0 + $0x1c] sm:$0xf0]  ;;  %v9676_v25 = vor.u32 %v13637_v10, %v9675_v9  ;;  %v13633_v31 = vld [vmem:[%s21990_s3 + $0x56c] sm:$0xf0]  ;;  %v9133_v47 = vld [vmem:[%s21990_s3 + $0x150] sm:$0xf0] }
  0x2b   :  { %1338 = vmatpush.bf16.msrb.mxu3 %v9200_v63  ;;  %v14968_v22 = vor.u32 %v13457_v17, %v8955_v15  ;;  %v9531_v27 = vld [vmem:[%s21990_s3 + $0x460] sm:$0xf]  ;;  %v13597_v40 = vld [vmem:[%s21990_s3 + $0x44c] sm:$0xf0]  ;;  %v9136_v54 = vor.u32 %v13499_v46, %v9133_v47  ;;  %v13463_v56 = vld [vmem:[%s21990_s3 + $0x24] sm:$0xf] }
  0x2c   :  { %v9659_v29 = vld [vmem:[%s21990_s3 + $0x560] sm:$0xf]  ;;  %v9532_v36 = vor.u32 %v13601_v28, %v9531_v27  ;;  %v13629_v43 = vld [vmem:[%s21990_s3 + $0x54c] sm:$0xf0]  ;;  %v8989_v58 = vld [vmem:[%s21990_s3 + $0x30] sm:$0xf0] }
  0x2d   :  { %1297 = vmatpush.bf16.msrb.mxu0 %v9564_v7  ;;  %1311 = vmatpush.bf16.msrb.mxu1 %v9692_v11  ;;  %v9660_v37 = vor.u32 %v13633_v31, %v9659_v29  ;;  %v9515_v39 = vld [vmem:[%s21990_s3 + $0x440] sm:$0xf]  ;;  %v13593_v52 = vld [vmem:[%s21990_s3 + $0x42c] sm:$0xf0]  ;;  %v13495_v59 = vld [vmem:[%s21990_s3 + $0x124] sm:$0xf]  ;;  %v8992_v2 = vor.u32 %v13463_v56, %v8989_v58 }
  0x2e   :  { %1325 = vmatpush.bf16.msrb.mxu2 %v9056_v12  ;;  %v9643_v41 = vld [vmem:[%s21990_s3 + $0x540] sm:$0xf]  ;;  %v9516_v48 = vor.u32 %v13597_v40, %v9515_v39  ;;  %v13625_v55 = vld [vmem:[%s21990_s3 + $0x52c] sm:$0xf0]  ;;  %v9117_v60 = vld [vmem:[%s21990_s3 + $0x130] sm:$0xf0] }
  0x2f   :  { %1339 = vmatpush.bf16.msrb.mxu3 %v9184_v16  ;;  %1275 = vmatmul.bf16.vlgmr.msra.gmra.mxu2 %v14968_v22  ;;  %v9644_v49 = vor.u32 %v13629_v43, %v9643_v41  ;;  %v9499_v51 = vld [vmem:[%s21990_s3 + $0x420] sm:$0xf]  ;;  %v13589_v63 = vld [vmem:[%s21990_s3 + $0x40c] sm:$0xf0]  ;;  %v13459_v4 = vld [vmem:[%s21990_s3 + $0x4] sm:$0xf]  ;;  %v9120_v7 = vor.u32 %v13495_v59, %v9117_v60 }
  0x30   :  { %v9627_v53 = vld [vmem:[%s21990_s3 + $0x520] sm:$0xf]  ;;  %v9500_v61 = vor.u32 %v13593_v52, %v9499_v51  ;;  %v13621_v3 = vld [vmem:[%s21990_s3 + $0x50c] sm:$0xf0]  ;;  %v8973_v5 = vld [vmem:[%s21990_s3 + $0x10] sm:$0xf0] }
  0x31   :  { %1298 = vmatpush.bf16.msrb.mxu0 %v9548_v24  ;;  %1312 = vmatpush.bf16.msrb.mxu1 %v9676_v25  ;;  %v9483_v62 = vld [vmem:[%s21990_s3 + $0x400] sm:$0xf]  ;;  %v9628_v1 = vor.u32 %v13625_v55, %v9627_v53  ;;  %v13491_v8 = vld [vmem:[%s21990_s3 + $0x104] sm:$0xf]  ;;  %v9101_v9 = vld [vmem:[%s21990_s3 + $0x110] sm:$0xf0]  ;;  %v8976_v19 = vor.u32 %v13459_v4, %v8973_v5 }
  0x32   :  { %1326 = vmatpush.bf16.msrb.mxu2 %v9040_v26  ;;  %v9611_v0 = vld [vmem:[%s21990_s3 + $0x500] sm:$0xf]  ;;  %v13551_v10 = vld [vmem:[%s21990_s3 + $0x2e4] sm:$0xf]  ;;  %v9341_v11 = vld [vmem:[%s21990_s3 + $0x2f0] sm:$0xf0]  ;;  %v9484_v14 = vor.u32 %v13589_v63, %v9483_v62  ;;  %v9104_v25 = vor.u32 %v13491_v8, %v9101_v9 }
  0x33   :  { %1340 = vmatpush.bf16.msrb.mxu3 %v9168_v30  ;;  %v13583_v12 = vld [vmem:[%s21990_s3 + $0x3e4] sm:$0xf]  ;;  %v9469_v13 = vld [vmem:[%s21990_s3 + $0x3f0] sm:$0xf0]  ;;  %v9612_v18 = vor.u32 %v13621_v3, %v9611_v0  ;;  %v8963_v21 = vld [vmem:[%s21991_s0 + $0x10] sm:$0xf]  ;;  %v9344_v26 = vor.u32 %v13551_v10, %v9341_v11 }
  0x34   :  { %v13615_v15 = vld [vmem:[%s21990_s3 + $0x4e4] sm:$0xf]  ;;  %v9597_v16 = vld [vmem:[%s21990_s3 + $0x4f0] sm:$0xf0]  ;;  %v13458_v24 = vld [vmem:[%s21991_s0 + $0x24] sm:$0xf0]  ;;  %v9472_v29 = vor.u32 %v13583_v12, %v9469_v13 }
  0x35   :  { %1299 = vmatpush.bf16.msrb.mxu0 %v9532_v36  ;;  %1313 = vmatpush.bf16.msrb.mxu1 %v9660_v37  ;;  %v13647_v17 = vld [vmem:[%s21990_s3 + $0x5e4] sm:$0xf]  ;;  %v9725_v20 = vld [vmem:[%s21990_s3 + $0x5f0] sm:$0xf0]  ;;  %v8965_v28 = vld [vmem:[%s21991_s0 + $0x28] sm:$0xf0]  ;;  %v9600_v30 = vor.u32 %v13615_v15, %v9597_v16  ;;  %v15115_v35 = vor.u32 %v13458_v24, %v8963_v21 }
  0x36   :  { %1327 = vmatpush.bf16.msrb.mxu2 %v9024_v38  ;;  %v13455_v27 = vld [vmem:[%s21991_s0 + $0x14] sm:$0xf]  ;;  %v13547_v31 = vld [vmem:[%s21990_s3 + $0x2c4] sm:$0xf]  ;;  %v9728_v34 = vor.u32 %v13647_v17, %v9725_v20 }
  0x37   :  { %1341 = vmatpush.bf16.msrb.mxu3 %v9152_v42  ;;  %v9325_v32 = vld [vmem:[%s21990_s3 + $0x2d0] sm:$0xf0]  ;;  %v13579_v33 = vld [vmem:[%s21990_s3 + $0x3c4] sm:$0xf]  ;;  %v15126_v39 = vor.u32 %v13455_v27, %v8965_v28 }
  0x38   :  { %v9453_v36 = vld [vmem:[%s21990_s3 + $0x3d0] sm:$0xf0]  ;;  %v13611_v37 = vld [vmem:[%s21990_s3 + $0x4c4] sm:$0xf]  ;;  %v9328_v42 = vor.u32 %v13547_v31, %v9325_v32 }
  0x39   :  { %1300 = vmatpush.bf16.msrb.mxu0 %v9516_v48  ;;  %1314 = vmatpush.bf16.msrb.mxu1 %v9644_v49  ;;  %v9581_v38 = vld [vmem:[%s21990_s3 + $0x4d0] sm:$0xf0]  ;;  %v13643_v40 = vld [vmem:[%s21990_s3 + $0x5c4] sm:$0xf]  ;;  %v9456_v43 = vor.u32 %v13579_v33, %v9453_v36 }
  0x3a   :  { %1328 = vmatpush.bf16.msrb.mxu2 %v9008_v50  ;;  %v9709_v41 = vld [vmem:[%s21990_s3 + $0x5d0] sm:$0xf0]  ;;  %v9584_v44 = vor.u32 %v13611_v37, %v9581_v38  ;;  %v13543_v45 = vld [vmem:[%s21990_s3 + $0x2a4] sm:$0xf] }
  0x3b   :  { %1342 = vmatpush.bf16.msrb.mxu3 %v9136_v54  ;;  %v9309_v46 = vld [vmem:[%s21990_s3 + $0x2b0] sm:$0xf0]  ;;  %v13575_v47 = vld [vmem:[%s21990_s3 + $0x3a4] sm:$0xf]  ;;  %v9712_v48 = vor.u32 %v13643_v40, %v9709_v41 }
  0x3c   :  { %v9437_v49 = vld [vmem:[%s21990_s3 + $0x3b0] sm:$0xf0]  ;;  %v13607_v50 = vld [vmem:[%s21990_s3 + $0x4a4] sm:$0xf]  ;;  %v9312_v54 = vor.u32 %v13543_v45, %v9309_v46 }
  0x3d   :  { %1301 = vmatpush.bf16.msrb.mxu0 %v9500_v61  ;;  %1315 = vmatpush.bf16.msrb.mxu1 %v9628_v1  ;;  %v9565_v51 = vld [vmem:[%s21990_s3 + $0x4b0] sm:$0xf0]  ;;  %v13639_v52 = vld [vmem:[%s21990_s3 + $0x5a4] sm:$0xf]  ;;  %v9440_v55 = vor.u32 %v13575_v47, %v9437_v49 }
  0x3e   :  { %1329 = vmatpush.bf16.msrb.mxu2 %v8992_v2  ;;  %v9693_v53 = vld [vmem:[%s21990_s3 + $0x5b0] sm:$0xf0]  ;;  %v9568_v56 = vor.u32 %v13607_v50, %v9565_v51  ;;  %v13539_v58 = vld [vmem:[%s21990_s3 + $0x284] sm:$0xf] }
  0x3f   :  { %1343 = vmatpush.bf16.msrb.mxu3 %v9120_v7  ;;  %v9293_v59 = vld [vmem:[%s21990_s3 + $0x290] sm:$0xf0]  ;;  %v13571_v60 = vld [vmem:[%s21990_s3 + $0x384] sm:$0xf]  ;;  %v9696_v61 = vor.u32 %v13639_v52, %v9693_v53 }
  0x40   :  { %v9421_v62 = vld [vmem:[%s21990_s3 + $0x390] sm:$0xf0]  ;;  %v13603_v63 = vld [vmem:[%s21990_s3 + $0x484] sm:$0xf]  ;;  %v9296_v3 = vor.u32 %v13539_v58, %v9293_v59  ;;  %v13490_v58 = vld [vmem:[%s21990_s3 + $0xf4] sm:$0xf0] }
  0x41   :  { %1302 = vmatpush.bf16.msrb.mxu0 %v9484_v14  ;;  %1316 = vmatpush.bf16.msrb.mxu1 %v9612_v18  ;;  %v9549_v0 = vld [vmem:[%s21990_s3 + $0x490] sm:$0xf0]  ;;  %v13635_v1 = vld [vmem:[%s21990_s3 + $0x584] sm:$0xf]  ;;  %v9424_v4 = vor.u32 %v13571_v60, %v9421_v62  ;;  %v9219_v59 = vld [vmem:[%s21990_s3 + $0x1e8] sm:$0xf] }
  0x42   :  { %1330 = vmatpush.bf16.msrb.mxu2 %v8976_v19  ;;  %v9677_v2 = vld [vmem:[%s21990_s3 + $0x590] sm:$0xf0]  ;;  %v9552_v5 = vor.u32 %v13603_v63, %v9549_v0  ;;  %v13535_v7 = vld [vmem:[%s21990_s3 + $0x264] sm:$0xf]  ;;  %v9347_v62 = vld [vmem:[%s21990_s3 + $0x2e8] sm:$0xf] }
  0x43   :  { %1344 = vmatpush.bf16.msrb.mxu3 %v9104_v25  ;;  %v9277_v8 = vld [vmem:[%s21990_s3 + $0x270] sm:$0xf0]  ;;  %v13567_v9 = vld [vmem:[%s21990_s3 + $0x364] sm:$0xf]  ;;  %v9680_v10 = vor.u32 %v13635_v1, %v9677_v2  ;;  %v13554_v63 = vld [vmem:[%s21990_s3 + $0x2f4] sm:$0xf0] }
  0x44   :  { %1303 = vmatmul.bf16.vlgmr.msrb.gmra.mxu0 %v15115_v35  ;;  %1317 = vmatmul.bf16.vlgmr.msrb.gmra.mxu1 %v15126_v39  ;;  %v9405_v11 = vld [vmem:[%s21990_s3 + $0x370] sm:$0xf0]  ;;  %v13599_v12 = vld [vmem:[%s21990_s3 + $0x464] sm:$0xf]  ;;  %v9280_v16 = vor.u32 %v13535_v7, %v9277_v8  ;;  %v9475_v2 = vld [vmem:[%s21990_s3 + $0x3e8] sm:$0xf]  ;;  %v9348_v8 = vor.u32 %v13554_v63, %v9347_v62 }
  0x45   :  { %1351 = vmatpush.bf16.msra.mxu0 %v9344_v26  ;;  %1365 = vmatpush.bf16.msra.mxu1 %v9472_v29  ;;  %v9533_v13 = vld [vmem:[%s21990_s3 + $0x470] sm:$0xf0]  ;;  %v13631_v14 = vld [vmem:[%s21990_s3 + $0x564] sm:$0xf]  ;;  %v9408_v17 = vor.u32 %v13567_v9, %v9405_v11  ;;  %v9075_v9 = vld [vmem:[%s21990_s3 + $0xc8] sm:$0xf] }
  0x46   :  { %1379 = vmatpush.bf16.msra.mxu2 %v9600_v30  ;;  %1345 = vmatmul.bf16.vlgmr.msrb.gmra.mxu3 %v14932_v6  ;;  %v9661_v15 = vld [vmem:[%s21990_s3 + $0x570] sm:$0xf0]  ;;  %v9536_v18 = vor.u32 %v13599_v12, %v9533_v13  ;;  %v13531_v19 = vld [vmem:[%s21990_s3 + $0x244] sm:$0xf]  ;;  %v9203_v11 = vld [vmem:[%s21990_s3 + $0x1c8] sm:$0xf] }
  0x47   :  { %1393 = vmatpush.bf16.msra.mxu3 %v9728_v34  ;;  %1331 = vmatmul.bf16.vlgmr.msrb.gmra.mxu2 %v14902_v57  ;;  %v9261_v20 = vld [vmem:[%s21990_s3 + $0x250] sm:$0xf0]  ;;  %v13563_v21 = vld [vmem:[%s21990_s3 + $0x344] sm:$0xf]  ;;  %v9664_v24 = vor.u32 %v13631_v14, %v9661_v15  ;;  %v13518_v13 = vld [vmem:[%s21990_s3 + $0x1d4] sm:$0xf0] }
  0x48   :  { %v9389_v25 = vld [vmem:[%s21990_s3 + $0x350] sm:$0xf0]  ;;  %v13595_v26 = vld [vmem:[%s21990_s3 + $0x444] sm:$0xf]  ;;  %v9264_v30 = vor.u32 %v13531_v19, %v9261_v20  ;;  %v9331_v14 = vld [vmem:[%s21990_s3 + $0x2c8] sm:$0xf]  ;;  %v9204_v19 = vor.u32 %v13518_v13, %v9203_v11 }
  0x49   :  { %1352 = vmatpush.bf16.msra.mxu0 %v9328_v42  ;;  %1366 = vmatpush.bf16.msra.mxu1 %v9456_v43  ;;  %v9517_v27 = vld [vmem:[%s21990_s3 + $0x450] sm:$0xf0]  ;;  %v13627_v28 = vld [vmem:[%s21990_s3 + $0x544] sm:$0xf]  ;;  %v9392_v31 = vor.u32 %v13563_v21, %v9389_v25  ;;  %v13550_v15 = vld [vmem:[%s21990_s3 + $0x2d4] sm:$0xf0] }
  0x4a   :  { %1380 = vmatpush.bf16.msra.mxu2 %v9584_v44  ;;  %v9645_v29 = vld [vmem:[%s21990_s3 + $0x550] sm:$0xf0]  ;;  %v9520_v32 = vor.u32 %v13595_v26, %v9517_v27  ;;  %v13527_v33 = vld [vmem:[%s21990_s3 + $0x224] sm:$0xf]  ;;  %v9332_v20 = vor.u32 %v13550_v15, %v9331_v14  ;;  %v9059_v21 = vld [vmem:[%s21990_s3 + $0xa8] sm:$0xf] }
  0x4b   :  { %1394 = vmatpush.bf16.msra.mxu3 %v9712_v48  ;;  %v9245_v34 = vld [vmem:[%s21990_s3 + $0x230] sm:$0xf0]  ;;  %v13559_v36 = vld [vmem:[%s21990_s3 + $0x324] sm:$0xf]  ;;  %v9648_v37 = vor.u32 %v13627_v28, %v9645_v29  ;;  %v9187_v25 = vld [vmem:[%s21990_s3 + $0x1a8] sm:$0xf] }
  0x4c   :  { %v9373_v38 = vld [vmem:[%s21990_s3 + $0x330] sm:$0xf0]  ;;  %v13591_v40 = vld [vmem:[%s21990_s3 + $0x424] sm:$0xf]  ;;  %v9248_v44 = vor.u32 %v13527_v33, %v9245_v34  ;;  %v13514_v27 = vld [vmem:[%s21990_s3 + $0x1b4] sm:$0xf0] }
  0x4d   :  { %1353 = vmatpush.bf16.msra.mxu0 %v9312_v54  ;;  %1367 = vmatpush.bf16.msra.mxu1 %v9440_v55  ;;  %v9501_v41 = vld [vmem:[%s21990_s3 + $0x430] sm:$0xf0]  ;;  %v13623_v42 = vld [vmem:[%s21990_s3 + $0x524] sm:$0xf]  ;;  %v9376_v47 = vor.u32 %v13559_v36, %v9373_v38  ;;  %v9315_v28 = vld [vmem:[%s21990_s3 + $0x2a8] sm:$0xf]  ;;  %v9188_v33 = vor.u32 %v13514_v27, %v9187_v25 }
  0x4e   :  { %1381 = vmatpush.bf16.msra.mxu2 %v9568_v56  ;;  %v9629_v43 = vld [vmem:[%s21990_s3 + $0x530] sm:$0xf0]  ;;  %v13523_v45 = vld [vmem:[%s21990_s3 + $0x204] sm:$0xf]  ;;  %v9504_v48 = vor.u32 %v13591_v40, %v9501_v41  ;;  %v9091_v56 = vld [vmem:[%s21990_s3 + $0xe8] sm:$0xf] }
  0x4f   :  { %1395 = vmatpush.bf16.msra.mxu3 %v9696_v61  ;;  %v9229_v46 = vld [vmem:[%s21990_s3 + $0x210] sm:$0xf0]  ;;  %v13555_v49 = vld [vmem:[%s21990_s3 + $0x304] sm:$0xf]  ;;  %v9632_v52 = vor.u32 %v13623_v42, %v9629_v43  ;;  %v13522_v61 = vld [vmem:[%s21990_s3 + $0x1f4] sm:$0xf0] }
  0x50   :  { %v9357_v50 = vld [vmem:[%s21990_s3 + $0x310] sm:$0xf0]  ;;  %v13587_v51 = vld [vmem:[%s21990_s3 + $0x404] sm:$0xf]  ;;  %v9232_v60 = vor.u32 %v13523_v45, %v9229_v46  ;;  %v9220_v7 = vor.u32 %v13522_v61, %v9219_v59  ;;  %v13546_v29 = vld [vmem:[%s21990_s3 + $0x2b4] sm:$0xf0] }
  0x51   :  { %1354 = vmatpush.bf16.msra.mxu0 %v9296_v3  ;;  %1368 = vmatpush.bf16.msra.mxu1 %v9424_v4  ;;  %v9485_v53 = vld [vmem:[%s21990_s3 + $0x410] sm:$0xf0]  ;;  %v13619_v54 = vld [vmem:[%s21990_s3 + $0x504] sm:$0xf]  ;;  %v9360_v0 = vor.u32 %v13555_v49, %v9357_v50  ;;  %v13586_v3 = vld [vmem:[%s21990_s3 + $0x3f4] sm:$0xf0]  ;;  %v9316_v34 = vor.u32 %v13546_v29, %v9315_v28 }
  0x52   :  { %1382 = vmatpush.bf16.msra.mxu2 %v9552_v5  ;;  %v9613_v55 = vld [vmem:[%s21990_s3 + $0x510] sm:$0xf0]  ;;  %v9488_v1 = vor.u32 %v13587_v51, %v9485_v53  ;;  %v9092_v5 = vor.u32 %v13490_v58, %v9091_v56  ;;  %v9476_v12 = vor.u32 %v13586_v3, %v9475_v2  ;;  %v9043_v36 = vld [vmem:[%s21990_s3 + $0x88] sm:$0xf]  ;;  %v13510_v41 = vld [vmem:[%s21990_s3 + $0x194] sm:$0xf0] }
  0x53   :  { %1396 = vmatpush.bf16.msra.mxu3 %v9680_v10  ;;  %v9616_v4 = vor.u32 %v13619_v54, %v9613_v55  ;;  %v13486_v10 = vld [vmem:[%s21990_s3 + $0xd4] sm:$0xf0]  ;;  %v9171_v38 = vld [vmem:[%s21990_s3 + $0x188] sm:$0xf] }
  0x54   :  { %v9299_v42 = vld [vmem:[%s21990_s3 + $0x288] sm:$0xf]  ;;  %v13542_v43 = vld [vmem:[%s21990_s3 + $0x294] sm:$0xf0] }
  0x55   :  { %1355 = vmatpush.bf16.msra.mxu0 %v9280_v16  ;;  %1369 = vmatpush.bf16.msra.mxu1 %v9408_v17  ;;  %v9459_v16 = vld [vmem:[%s21990_s3 + $0x3c8] sm:$0xf]  ;;  %v13582_v17 = vld [vmem:[%s21990_s3 + $0x3d4] sm:$0xf0] }
  0x56   :  { %1383 = vmatpush.bf16.msra.mxu2 %v9536_v18  ;;  %v9076_v18 = vor.u32 %v13486_v10, %v9075_v9  ;;  %v9460_v26 = vor.u32 %v13582_v17, %v9459_v16  ;;  %v13574_v45 = vld [vmem:[%s21990_s3 + $0x394] sm:$0xf0]  ;;  %v9027_v49 = vld [vmem:[%s21990_s3 + $0x68] sm:$0xf] }
  0x57   :  { %1397 = vmatpush.bf16.msra.mxu3 %v9664_v24  ;;  %v13482_v24 = vld [vmem:[%s21990_s3 + $0xb4] sm:$0xf0]  ;;  %v9155_v51 = vld [vmem:[%s21990_s3 + $0x168] sm:$0xf] }
  0x58   :  { %v13474_v50 = vld [vmem:[%s21990_s3 + $0x74] sm:$0xf0]  ;;  %v9283_v54 = vld [vmem:[%s21990_s3 + $0x268] sm:$0xf] }
  0x59   :  { %1356 = vmatpush.bf16.msra.mxu0 %v9264_v30  ;;  %1370 = vmatpush.bf16.msra.mxu1 %v9392_v31  ;;  %v9443_v30 = vld [vmem:[%s21990_s3 + $0x3a8] sm:$0xf]  ;;  %v13578_v31 = vld [vmem:[%s21990_s3 + $0x3b4] sm:$0xf0]  ;;  %v9028_v59 = vor.u32 %v13474_v50, %v9027_v49 }
  0x5a   :  { %1384 = vmatpush.bf16.msra.mxu2 %v9520_v32  ;;  %v9060_v32 = vor.u32 %v13482_v24, %v9059_v21  ;;  %v9444_v40 = vor.u32 %v13578_v31, %v9443_v30  ;;  %v13506_v53 = vld [vmem:[%s21990_s3 + $0x174] sm:$0xf0]  ;;  %v9411_v56 = vld [vmem:[%s21990_s3 + $0x368] sm:$0xf] }
  0x5b   :  { %1398 = vmatpush.bf16.msra.mxu3 %v9648_v37  ;;  %v13478_v37 = vld [vmem:[%s21990_s3 + $0x94] sm:$0xf0]  ;;  %v9011_v62 = vld [vmem:[%s21990_s3 + $0x48] sm:$0xf] }
  0x5c   :  { %v9044_v46 = vor.u32 %v13478_v37, %v9043_v36  ;;  %v13538_v55 = vld [vmem:[%s21990_s3 + $0x274] sm:$0xf0]  ;;  %v9267_v3 = vld [vmem:[%s21990_s3 + $0x248] sm:$0xf] }
  0x5d   :  { %1357 = vmatpush.bf16.msra.mxu0 %v9248_v44  ;;  %1371 = vmatpush.bf16.msra.mxu1 %v9376_v47  ;;  %v9427_v44 = vld [vmem:[%s21990_s3 + $0x388] sm:$0xf]  ;;  %v9172_v47 = vor.u32 %v13510_v41, %v9171_v38  ;;  %v13570_v58 = vld [vmem:[%s21990_s3 + $0x374] sm:$0xf0]  ;;  %v9284_v61 = vor.u32 %v13538_v55, %v9283_v54  ;;  %v13488_v41 = vld [vmem:[%s21990_s3 + $0xec] sm:$0xf] }
  0x5e   :  { %1385 = vmatpush.bf16.msra.mxu2 %v9504_v48  ;;  %v9300_v48 = vor.u32 %v13542_v43, %v9299_v42  ;;  %v13470_v63 = vld [vmem:[%s21990_s3 + $0x54] sm:$0xf0]  ;;  %v8995_v11 = vld [vmem:[%s21990_s3 + $0x28] sm:$0xf]  ;;  %v9093_v42 = vld [vmem:[%s21990_s3 + $0xf8] sm:$0xf0] }
  0x5f   :  { %1399 = vmatpush.bf16.msra.mxu3 %v9632_v52  ;;  %v9428_v52 = vor.u32 %v13574_v45, %v9427_v44  ;;  %v13502_v2 = vld [vmem:[%s21990_s3 + $0x154] sm:$0xf0]  ;;  %v9123_v13 = vld [vmem:[%s21990_s3 + $0x128] sm:$0xf]  ;;  %v13520_v45 = vld [vmem:[%s21990_s3 + $0x1ec] sm:$0xf]  ;;  %v9096_v50 = vor.u32 %v13488_v41, %v9093_v42 }
  0x60   :  { %v13498_v15 = vld [vmem:[%s21990_s3 + $0x134] sm:$0xf0]  ;;  %v9251_v16 = vld [vmem:[%s21990_s3 + $0x228] sm:$0xf] }
  0x61   :  { %1358 = vmatpush.bf16.msra.mxu0 %v9232_v60  ;;  %1372 = vmatpush.bf16.msra.mxu1 %v9360_v0  ;;  %v9156_v60 = vor.u32 %v13506_v53, %v9155_v51  ;;  %v9139_v0 = vld [vmem:[%s21990_s3 + $0x148] sm:$0xf]  ;;  %v13530_v17 = vld [vmem:[%s21990_s3 + $0x234] sm:$0xf0]  ;;  %v9124_v25 = vor.u32 %v13498_v15, %v9123_v13 }
  0x62   :  { %1386 = vmatpush.bf16.msra.mxu2 %v9488_v1  ;;  %v9412_v1 = vor.u32 %v13570_v58, %v9411_v56  ;;  %v9140_v9 = vor.u32 %v13502_v2, %v9139_v0  ;;  %v8979_v21 = vld [vmem:[%s21990_s3 + $0x8] sm:$0xf]  ;;  %v13462_v24 = vld [vmem:[%s21990_s3 + $0x14] sm:$0xf0]  ;;  %v13484_v56 = vld [vmem:[%s21990_s3 + $0xcc] sm:$0xf] }
  0x63   :  { %1400 = vmatpush.bf16.msra.mxu3 %v9616_v4  ;;  %v13534_v4 = vld [vmem:[%s21990_s3 + $0x254] sm:$0xf0]  ;;  %v9107_v27 = vld [vmem:[%s21990_s3 + $0x108] sm:$0xf]  ;;  %v8980_v38 = vor.u32 %v13462_v24, %v8979_v21  ;;  %v9077_v58 = vld [vmem:[%s21990_s3 + $0xd8] sm:$0xf0] }
  0x64   :  { %1359 = vmatmul.bf16.vlgmr.msra.gmra.mxu0 %v14968_v22  ;;  %1373 = vmatmul.bf16.vlgmr.msra.gmra.mxu1 %v14970_v23  ;;  %v9268_v10 = vor.u32 %v13534_v4, %v9267_v3  ;;  %v13494_v28 = vld [vmem:[%s21990_s3 + $0x114] sm:$0xf0]  ;;  %v9235_v29 = vld [vmem:[%s21990_s3 + $0x208] sm:$0xf]  ;;  %v9173_v21 = vld [vmem:[%s21990_s3 + $0x198] sm:$0xf0] }
  0x65   :  { %1407 = vmatpush.bf16.msrb.mxu0 %v9092_v5  ;;  %1421 = vmatpush.bf16.msrb.mxu1 %v9220_v7  ;;  %v9395_v5 = vld [vmem:[%s21990_s3 + $0x348] sm:$0xf]  ;;  %v13566_v7 = vld [vmem:[%s21990_s3 + $0x354] sm:$0xf0]  ;;  %v9108_v43 = vor.u32 %v13494_v28, %v9107_v27 }
  0x66   :  { %1435 = vmatpush.bf16.msrb.mxu2 %v9348_v8  ;;  %1401 = vmatmul.bf16.vlgmr.msra.gmra.mxu3 %v15126_v39  ;;  %v9012_v8 = vor.u32 %v13470_v63, %v9011_v62  ;;  %v9396_v14 = vor.u32 %v13566_v7, %v9395_v5  ;;  %v13526_v31 = vld [vmem:[%s21990_s3 + $0x214] sm:$0xf0]  ;;  %v9731_v37 = vld [vmem:[%s21990_s3 + $0x5e8] sm:$0xf]  ;;  %v9080_v63 = vor.u32 %v13484_v56, %v9077_v58  ;;  %v13480_v5 = vld [vmem:[%s21990_s3 + $0xac] sm:$0xf] }
  0x67   :  { %1449 = vmatpush.bf16.msrb.mxu3 %v9476_v12  ;;  %1387 = vmatmul.bf16.vlgmr.msra.gmra.mxu2 %v15115_v35  ;;  %v13466_v12 = vld [vmem:[%s21990_s3 + $0x34] sm:$0xf0]  ;;  %v9236_v44 = vor.u32 %v13526_v31, %v9235_v29  ;;  %v9587_v51 = vld [vmem:[%s21990_s3 + $0x4c8] sm:$0xf]  ;;  %v9061_v7 = vld [vmem:[%s21990_s3 + $0xb8] sm:$0xf0] }
  0x68   :  { %v13618_v36 = vld [vmem:[%s21990_s3 + $0x4f4] sm:$0xf0]  ;;  %v9715_v53 = vld [vmem:[%s21990_s3 + $0x5c8] sm:$0xf] }
  0x69   :  { %1408 = vmatpush.bf16.msrb.mxu0 %v9076_v18  ;;  %1422 = vmatpush.bf16.msrb.mxu1 %v9204_v19  ;;  %v9379_v18 = vld [vmem:[%s21990_s3 + $0x328] sm:$0xf]  ;;  %v13562_v19 = vld [vmem:[%s21990_s3 + $0x334] sm:$0xf0] }
  0x6a   :  { %1436 = vmatpush.bf16.msrb.mxu2 %v9332_v20  ;;  %v8996_v20 = vor.u32 %v13466_v12, %v8995_v11  ;;  %v9380_v30 = vor.u32 %v13562_v19, %v9379_v18  ;;  %v13646_v55 = vld [vmem:[%s21990_s3 + $0x5d4] sm:$0xf0]  ;;  %v9571_v0 = vld [vmem:[%s21990_s3 + $0x4a8] sm:$0xf]  ;;  %v9064_v12 = vor.u32 %v13480_v5, %v9061_v7  ;;  %v13476_v18 = vld [vmem:[%s21990_s3 + $0x8c] sm:$0xf] }
  0x6b   :  { %1450 = vmatpush.bf16.msrb.mxu3 %v9460_v26  ;;  %v9252_v26 = vor.u32 %v13530_v17, %v9251_v16  ;;  %v9716_v62 = vor.u32 %v13646_v55, %v9715_v53  ;;  %v9699_v2 = vld [vmem:[%s21990_s3 + $0x5a8] sm:$0xf]  ;;  %v13642_v4 = vld [vmem:[%s21990_s3 + $0x5b4] sm:$0xf0]  ;;  %v9045_v19 = vld [vmem:[%s21990_s3 + $0x98] sm:$0xf0] }
  0x6c   :  { %v9700_v11 = vor.u32 %v13642_v4, %v9699_v2  ;;  %v9555_v13 = vld [vmem:[%s21990_s3 + $0x488] sm:$0xf]  ;;  %v13638_v17 = vld [vmem:[%s21990_s3 + $0x594] sm:$0xf0]  ;;  %v13460_v7 = vld [vmem:[%s21990_s3 + $0xc] sm:$0xf] }
  0x6d   :  { %1409 = vmatpush.bf16.msrb.mxu0 %v9060_v32  ;;  %1423 = vmatpush.bf16.msrb.mxu1 %v9188_v33  ;;  %v9363_v32 = vld [vmem:[%s21990_s3 + $0x308] sm:$0xf]  ;;  %v13558_v33 = vld [vmem:[%s21990_s3 + $0x314] sm:$0xf0] }
  0x6e   :  { %1437 = vmatpush.bf16.msrb.mxu2 %v9316_v34  ;;  %v9603_v34 = vld [vmem:[%s21990_s3 + $0x4e8] sm:$0xf]  ;;  %v13602_v28 = vld [vmem:[%s21990_s3 + $0x474] sm:$0xf0] }
  0x6f   :  { %1451 = vmatpush.bf16.msrb.mxu3 %v9444_v40  ;;  %v13650_v40 = vld [vmem:[%s21990_s3 + $0x5f4] sm:$0xf0]  ;;  %v9683_v15 = vld [vmem:[%s21990_s3 + $0x588] sm:$0xf] }
  0x70   :  { %v9732_v49 = vor.u32 %v13650_v40, %v9731_v37  ;;  %v9539_v27 = vld [vmem:[%s21990_s3 + $0x468] sm:$0xf]  ;;  %v13634_v31 = vld [vmem:[%s21990_s3 + $0x574] sm:$0xf0] }
  0x71   :  { %1410 = vmatpush.bf16.msrb.mxu0 %v9044_v46  ;;  %1424 = vmatpush.bf16.msrb.mxu1 %v9172_v47  ;;  %v9221_v46 = vld [vmem:[%s21990_s3 + $0x1f8] sm:$0xf0]  ;;  %v9364_v47 = vor.u32 %v13558_v33, %v9363_v32  ;;  %v9667_v29 = vld [vmem:[%s21990_s3 + $0x568] sm:$0xf]  ;;  %v13472_v32 = vld [vmem:[%s21990_s3 + $0x6c] sm:$0xf]  ;;  %v9540_v37 = vor.u32 %v13602_v28, %v9539_v27 }
  0x72   :  { %1438 = vmatpush.bf16.msrb.mxu2 %v9300_v48  ;;  %v9604_v48 = vor.u32 %v13618_v36, %v9603_v34  ;;  %v9224_v54 = vor.u32 %v13520_v45, %v9221_v46  ;;  %v9029_v33 = vld [vmem:[%s21990_s3 + $0x78] sm:$0xf0]  ;;  %v13504_v34 = vld [vmem:[%s21990_s3 + $0x16c] sm:$0xf]  ;;  %v9523_v41 = vld [vmem:[%s21990_s3 + $0x448] sm:$0xf] }
  0x73   :  { %1452 = vmatpush.bf16.msrb.mxu3 %v9428_v52  ;;  %v13614_v52 = vld [vmem:[%s21990_s3 + $0x4d4] sm:$0xf0]  ;;  %v9157_v36 = vld [vmem:[%s21990_s3 + $0x178] sm:$0xf0]  ;;  %v9032_v40 = vor.u32 %v13472_v32, %v9029_v33  ;;  %v13468_v46 = vld [vmem:[%s21990_s3 + $0x4c] sm:$0xf] }
  0x74   :  { %v13598_v42 = vld [vmem:[%s21990_s3 + $0x454] sm:$0xf0]  ;;  %v9507_v53 = vld [vmem:[%s21990_s3 + $0x428] sm:$0xf]  ;;  %v9461_v33 = vld [vmem:[%s21990_s3 + $0x3d8] sm:$0xf0] }
  0x75   :  { %1411 = vmatpush.bf16.msrb.mxu0 %v9028_v59  ;;  %1425 = vmatpush.bf16.msrb.mxu1 %v9156_v60  ;;  %v13516_v59 = vld [vmem:[%s21990_s3 + $0x1cc] sm:$0xf]  ;;  %v9205_v60 = vld [vmem:[%s21990_s3 + $0x1d8] sm:$0xf0]  ;;  %v13630_v45 = vld [vmem:[%s21990_s3 + $0x554] sm:$0xf0] }
  0x76   :  { %1439 = vmatpush.bf16.msrb.mxu2 %v9284_v61  ;;  %v9588_v61 = vor.u32 %v13614_v52, %v9587_v51  ;;  %v9208_v3 = vor.u32 %v13516_v59, %v9205_v60  ;;  %v9635_v55 = vld [vmem:[%s21990_s3 + $0x528] sm:$0xf]  ;;  %v13626_v58 = vld [vmem:[%s21990_s3 + $0x534] sm:$0xf0]  ;;  %v13464_v59 = vld [vmem:[%s21990_s3 + $0x2c] sm:$0xf] }
  0x77   :  { %1453 = vmatpush.bf16.msrb.mxu3 %v9412_v1  ;;  %v13610_v1 = vld [vmem:[%s21990_s3 + $0x4b4] sm:$0xf0]  ;;  %v8997_v60 = vld [vmem:[%s21990_s3 + $0x38] sm:$0xf0]  ;;  %v9636_v2 = vor.u32 %v13626_v58, %v9635_v55  ;;  %v9619_v4 = vld [vmem:[%s21990_s3 + $0x508] sm:$0xf] }
  0x78   :  { %v13622_v5 = vld [vmem:[%s21990_s3 + $0x514] sm:$0xf0]  ;;  %v13540_v58 = vld [vmem:[%s21990_s3 + $0x28c] sm:$0xf] }
  0x79   :  { %1412 = vmatpush.bf16.msrb.mxu0 %v9012_v8  ;;  %1426 = vmatpush.bf16.msrb.mxu1 %v9140_v9  ;;  %v13512_v8 = vld [vmem:[%s21990_s3 + $0x1ac] sm:$0xf]  ;;  %v9189_v9 = vld [vmem:[%s21990_s3 + $0x1b8] sm:$0xf0] }
  0x7a   :  { %1440 = vmatpush.bf16.msrb.mxu2 %v9268_v10  ;;  %v9572_v10 = vor.u32 %v13610_v1, %v9571_v0  ;;  %v9192_v16 = vor.u32 %v13512_v8, %v9189_v9  ;;  %v9491_v0 = vld [vmem:[%s21990_s3 + $0x408] sm:$0xf]  ;;  %v13590_v1 = vld [vmem:[%s21990_s3 + $0x414] sm:$0xf0]  ;;  %v8981_v9 = vld [vmem:[%s21990_s3 + $0x18] sm:$0xf0] }
  0x7b   :  { %1454 = vmatpush.bf16.msrb.mxu3 %v9396_v14  ;;  %v13606_v14 = vld [vmem:[%s21990_s3 + $0x494] sm:$0xf0] }
  0x7c   :  { %v9556_v24 = vor.u32 %v13606_v14, %v9555_v13  ;;  %v9349_v13 = vld [vmem:[%s21990_s3 + $0x2f8] sm:$0xf0]  ;;  %v13584_v14 = vld [vmem:[%s21990_s3 + $0x3ec] sm:$0xf] }
  0x7d   :  { %1413 = vmatpush.bf16.msrb.mxu0 %v8996_v20  ;;  %1427 = vmatpush.bf16.msrb.mxu1 %v9124_v25  ;;  %v13508_v20 = vld [vmem:[%s21990_s3 + $0x18c] sm:$0xf]  ;;  %v9684_v25 = vor.u32 %v13638_v17, %v9683_v15  ;;  %v9492_v15 = vor.u32 %v13590_v1, %v9491_v0  ;;  %v9685_v0 = vld [vmem:[%s21990_s3 + $0x598] sm:$0xf0] }
  0x7e   :  { %1441 = vmatpush.bf16.msrb.mxu2 %v9252_v26  ;;  %v9048_v26 = vor.u32 %v13476_v18, %v9045_v19  ;;  %v13616_v17 = vld [vmem:[%s21990_s3 + $0x4ec] sm:$0xf]  ;;  %v9605_v18 = vld [vmem:[%s21990_s3 + $0x4f8] sm:$0xf0]  ;;  %v9620_v19 = vor.u32 %v13622_v5, %v9619_v4 }
  0x7f   :  { %1455 = vmatpush.bf16.msrb.mxu3 %v9380_v30  ;;  %v9176_v30 = vor.u32 %v13508_v20, %v9173_v21  ;;  %v8984_v20 = vor.u32 %v13460_v7, %v8981_v9  ;;  %v13648_v21 = vld [vmem:[%s21990_s3 + $0x5ec] sm:$0xf]  ;;  %v9608_v28 = vor.u32 %v13616_v17, %v9605_v18 }
  0x80   :  { %v13536_v7 = vld [vmem:[%s21990_s3 + $0x26c] sm:$0xf] }
  0x81   :  { %1414 = vmatpush.bf16.msrb.mxu0 %v8980_v38  ;;  %1428 = vmatpush.bf16.msrb.mxu1 %v9108_v43  ;;  %v9668_v38 = vor.u32 %v13634_v31, %v9667_v29  ;;  %v9651_v43 = vld [vmem:[%s21990_s3 + $0x548] sm:$0xf]  ;;  %v13548_v29 = vld [vmem:[%s21990_s3 + $0x2cc] sm:$0xf] }
  0x82   :  { %1442 = vmatpush.bf16.msrb.mxu2 %v9236_v44  ;;  %v9160_v44 = vor.u32 %v13504_v34, %v9157_v36  ;;  %v9652_v51 = vor.u32 %v13630_v45, %v9651_v43  ;;  %v13580_v31 = vld [vmem:[%s21990_s3 + $0x3cc] sm:$0xf]  ;;  %v9589_v36 = vld [vmem:[%s21990_s3 + $0x4d8] sm:$0xf0] }
  0x83   :  { %1456 = vmatpush.bf16.msrb.mxu3 %v9364_v47  ;;  %v9013_v47 = vld [vmem:[%s21990_s3 + $0x58] sm:$0xf0]  ;;  %v13612_v34 = vld [vmem:[%s21990_s3 + $0x4cc] sm:$0xf] }
  0x84   :  { %1415 = vmatmul.bf16.vlgmr.msrb.gmra.mxu0 %v14902_v57  ;;  %1429 = vmatmul.bf16.vlgmr.msrb.gmra.mxu1 %v14932_v6  ;;  %v9016_v52 = vor.u32 %v13468_v46, %v9013_v47  ;;  %v9592_v43 = vor.u32 %v13612_v34, %v9589_v36  ;;  %v13576_v45 = vld [vmem:[%s21990_s3 + $0x3ac] sm:$0xf]  ;;  %v15734_v46 = vld [vmem:[%s21992_s4] sm:$0xf] }
  0x85   :  { %1463 = vmatpush.bf16.msra.mxu0 %v9604_v48  ;;  %1477 = vmatpush.bf16.msra.mxu1 %v9732_v49  ;;  %v13500_v48 = vld [vmem:[%s21990_s3 + $0x14c] sm:$0xf]  ;;  %v9141_v49 = vld [vmem:[%s21990_s3 + $0x158] sm:$0xf0]  ;;  %22012 = vst [vmem:[#allocation2_spill] sm:$0xff] %v15734_v46 }
  0x86   :  { %1491 = vmatpush.bf16.msra.mxu2 %v9096_v50  ;;  %1457 = vmatmul.bf16.vlgmr.msrb.gmra.mxu3 %v14970_v23  ;;  %v9524_v50 = vor.u32 %v13598_v42, %v9523_v41  ;;  %v9144_v56 = vor.u32 %v13500_v48, %v9141_v49  ;;  %v13544_v41 = vld [vmem:[%s21990_s3 + $0x2ac] sm:$0xf]  ;;  %v9464_v42 = vor.u32 %v13580_v31, %v9461_v33  ;;  %v9445_v48 = vld [vmem:[%s21990_s3 + $0x3b8] sm:$0xf0] }
  0x87   :  { %1505 = vmatpush.bf16.msra.mxu3 %v9224_v54  ;;  %1443 = vmatmul.bf16.vlgmr.msrb.gmra.mxu2 %v14968_v22  ;;  %v13594_v54 = vld [vmem:[%s21990_s3 + $0x434] sm:$0xf0]  ;;  %v13608_v49 = vld [vmem:[%s21990_s3 + $0x4ac] sm:$0xf]  ;;  %v9448_v55 = vor.u32 %v13576_v45, %v9445_v48  ;;  %v9653_v31 = vld [vmem:[%s21990_s3 + $0x558] sm:$0xf0] }
  0x88   :  { %v13568_v9 = vld [vmem:[%s21990_s3 + $0x36c] sm:$0xf]  ;;  %v9637_v45 = vld [vmem:[%s21990_s3 + $0x538] sm:$0xf0] }
  0x89   :  { %1464 = vmatpush.bf16.msra.mxu0 %v9588_v61  ;;  %1478 = vmatpush.bf16.msra.mxu1 %v9716_v62  ;;  %v13496_v61 = vld [vmem:[%s21990_s3 + $0x12c] sm:$0xf]  ;;  %v9125_v62 = vld [vmem:[%s21990_s3 + $0x138] sm:$0xf0] }
  0x8a   :  { %1492 = vmatpush.bf16.msra.mxu2 %v9080_v63  ;;  %v9508_v63 = vor.u32 %v13594_v54, %v9507_v53  ;;  %v9128_v8 = vor.u32 %v13496_v61, %v9125_v62  ;;  %v22006_v54 = vperm.slane %v15734_v46, 0  ;;  %v13604_v61 = vld [vmem:[%s21990_s3 + $0x48c] sm:$0xf]  ;;  %v9557_v62 = vld [vmem:[%s21990_s3 + $0x498] sm:$0xf0] }
  0x8b   :  { %1506 = vmatpush.bf16.msra.mxu3 %v9208_v3  ;;  %v9000_v3 = vor.u32 %v13464_v59, %v8997_v60  ;;  %v9301_v59 = vld [vmem:[%s21990_s3 + $0x298] sm:$0xf0]  ;;  %v9560_v5 = vor.u32 %v13604_v61, %v9557_v62  ;;  %v13528_v36 = vld [vmem:[%s21990_s3 + $0x22c] sm:$0xf]  ;;  %v10191_v61 = vld [vmem:[%s21993_s2 + $0x380] sm:$0xf] }
  0x8c   :  { %v9429_v60 = vld [vmem:[%s21990_s3 + $0x398] sm:$0xf0]  ;;  %v13524_v48 = vld [vmem:[%s21990_s3 + $0x20c] sm:$0xf]  ;;  %v13772_v62 = vld [vmem:[%s21993_s2 + $0x3bc] sm:$0xf0] }
  0x8d   :  { %1465 = vmatpush.bf16.msra.mxu0 %v9572_v10  ;;  %1479 = vmatpush.bf16.msra.mxu1 %v9700_v11  ;;  %v13492_v10 = vld [vmem:[%s21990_s3 + $0x10c] sm:$0xf]  ;;  %v9109_v11 = vld [vmem:[%s21990_s3 + $0x118] sm:$0xf0] }
  0x8e   :  { %1493 = vmatpush.bf16.msra.mxu2 %v9064_v12  ;;  %v13552_v12 = vld [vmem:[%s21990_s3 + $0x2ec] sm:$0xf] }
  0x8f   :  { %1507 = vmatpush.bf16.msra.mxu3 %v9192_v16  ;;  %v9477_v16 = vld [vmem:[%s21990_s3 + $0x3f8] sm:$0xf0] }
  0x90   :  { %v9480_v27 = vor.u32 %v13584_v14, %v9477_v16  ;;  %v13632_v14 = vld [vmem:[%s21990_s3 + $0x56c] sm:$0xf] }
  0x91   :  { %1466 = vmatpush.bf16.msra.mxu0 %v9556_v24  ;;  %1480 = vmatpush.bf16.msra.mxu1 %v9684_v25  ;;  %v9733_v24 = vld [vmem:[%s21990_s3 + $0x5f8] sm:$0xf0]  ;;  %v9112_v25 = vor.u32 %v13492_v10, %v9109_v11 }
  0x92   :  { %1494 = vmatpush.bf16.msra.mxu2 %v9048_v26  ;;  %v9352_v26 = vor.u32 %v13552_v12, %v9349_v13  ;;  %v9736_v32 = vor.u32 %v13648_v21, %v9733_v24  ;;  %v9413_v11 = vld [vmem:[%s21990_s3 + $0x378] sm:$0xf0]  ;;  %v13600_v12 = vld [vmem:[%s21990_s3 + $0x46c] sm:$0xf] }
  0x93   :  { %1508 = vmatpush.bf16.msra.mxu3 %v9176_v30  ;;  %v9333_v30 = vld [vmem:[%s21990_s3 + $0x2d8] sm:$0xf0]  ;;  %v13532_v21 = vld [vmem:[%s21990_s3 + $0x24c] sm:$0xf] }
  0x94   :  { %v9541_v13 = vld [vmem:[%s21990_s3 + $0x478] sm:$0xf0] }
  0x95   :  { %1467 = vmatpush.bf16.msra.mxu0 %v9540_v37  ;;  %1481 = vmatpush.bf16.msra.mxu1 %v9668_v38  ;;  %v13644_v37 = vld [vmem:[%s21990_s3 + $0x5cc] sm:$0xf]  ;;  %v9717_v38 = vld [vmem:[%s21990_s3 + $0x5d8] sm:$0xf0] }
  0x96   :  { %1495 = vmatpush.bf16.msra.mxu2 %v9032_v40  ;;  %v9336_v40 = vor.u32 %v13548_v29, %v9333_v30  ;;  %v9720_v47 = vor.u32 %v13644_v37, %v9717_v38  ;;  %v9269_v24 = vld [vmem:[%s21990_s3 + $0x258] sm:$0xf0]  ;;  %v13628_v30 = vld [vmem:[%s21990_s3 + $0x54c] sm:$0xf] }
  0x97   :  { %1509 = vmatpush.bf16.msra.mxu3 %v9160_v44  ;;  %v9317_v44 = vld [vmem:[%s21990_s3 + $0x2b8] sm:$0xf0]  ;;  %v13560_v38 = vld [vmem:[%s21990_s3 + $0x32c] sm:$0xf] }
  0x98   :  { %v9320_v53 = vor.u32 %v13544_v41, %v9317_v44  ;;  %v9525_v29 = vld [vmem:[%s21990_s3 + $0x458] sm:$0xf0]  ;;  %v13624_v44 = vld [vmem:[%s21990_s3 + $0x52c] sm:$0xf] }
  0x99   :  { %1468 = vmatpush.bf16.msra.mxu0 %v9524_v50  ;;  %1482 = vmatpush.bf16.msra.mxu1 %v9652_v51  ;;  %v9573_v50 = vld [vmem:[%s21990_s3 + $0x4b8] sm:$0xf0]  ;;  %v13640_v51 = vld [vmem:[%s21990_s3 + $0x5ac] sm:$0xf] }
  0x9a   :  { %1496 = vmatpush.bf16.msra.mxu2 %v9016_v52  ;;  %v9701_v52 = vld [vmem:[%s21990_s3 + $0x5b8] sm:$0xf0] }
  0x9b   :  { %1510 = vmatpush.bf16.msra.mxu3 %v9144_v56  ;;  %v9576_v56 = vor.u32 %v13608_v49, %v9573_v50  ;;  %v9253_v37 = vld [vmem:[%s21990_s3 + $0x238] sm:$0xf0] }
  0x9c   :  { %v9381_v41 = vld [vmem:[%s21990_s3 + $0x338] sm:$0xf0] }
  0x9d   :  { %1469 = vmatpush.bf16.msra.mxu0 %v9508_v63  ;;  %1483 = vmatpush.bf16.msra.mxu1 %v9636_v2  ;;  %v13636_v63 = vld [vmem:[%s21990_s3 + $0x58c] sm:$0xf]  ;;  %v9304_v2 = vor.u32 %v13540_v58, %v9301_v59  ;;  %v9237_v49 = vld [vmem:[%s21990_s3 + $0x218] sm:$0xf0]  ;;  %v9384_v50 = vor.u32 %v13560_v38, %v9381_v41  ;;  %v9640_v58 = vor.u32 %v13624_v44, %v9637_v45  ;;  %v13741_v38 = vld [vmem:[%s21993_s2 + $0x2c4] sm:$0xf0] }
  0x9e   :  { %1497 = vmatpush.bf16.msra.mxu2 %v9000_v3  ;;  %v9688_v10 = vor.u32 %v13636_v63, %v9685_v0  ;;  %v9493_v59 = vld [vmem:[%s21990_s3 + $0x418] sm:$0xf0]  ;;  %v13764_v63 = vld [vmem:[%s21993_s2 + $0x384] sm:$0xf] }
  0x9f   :  { %1511 = vmatpush.bf16.msra.mxu3 %v9128_v8  ;;  %v9285_v8 = vld [vmem:[%s21990_s3 + $0x278] sm:$0xf0]  ;;  %v13716_v44 = vld [vmem:[%s21993_s2 + $0x204] sm:$0xf] }
  0xa0   :  { %v9288_v17 = vor.u32 %v13536_v7, %v9285_v8  ;;  %v10001_v45 = vld [vmem:[%s21993_s2 + $0x240] sm:$0xf0] }
  0xa1   :  { %1470 = vmatpush.bf16.msra.mxu0 %v9492_v15  ;;  %1484 = vmatpush.bf16.msra.mxu1 %v9620_v19  ;;  %v9669_v15 = vld [vmem:[%s21990_s3 + $0x578] sm:$0xf0]  ;;  %v1262_v16 = vpop.f32.mrf.mxu1  ;;  %v9416_v19 = vor.u32 %v13568_v9, %v9413_v11  ;;  %v13765_v9 = vld [vmem:[%s21993_s2 + $0x38c] sm:$0xf] }
  0xa2   :  { %1498 = vmatpush.bf16.msra.mxu2 %v8984_v20  ;;  %v9544_v20 = vor.u32 %v13600_v12, %v9541_v13  ;;  %v10192_v12 = vor.u32 %v13772_v62, %v10191_v61  ;;  %v13700_v61 = vld [vmem:[%s21993_s2 + $0x184] sm:$0xf] }
  0xa3   :  { %1512 = vmatpush.bf16.msra.mxu3 %v9112_v25  ;;  %v13564_v25 = vld [vmem:[%s21990_s3 + $0x34c] sm:$0xf] }
  0xa4   :  { %1471 = vmatmul.bf16.vlgmr.msra.gmra.mxu0 %v15115_v35  ;;  %1485 = vmatmul.bf16.vlgmr.msra.gmra.mxu1 %v15126_v39 }
  0xa5   :  { %1519 = vmatpush.bf16.msrb.mxu0 %v9352_v26  ;;  %1533 = vmatpush.bf16.msrb.mxu1 %v9480_v27  ;;  %v1248_v1 = vpop.f32.mrf.mxu0  ;;  %v9672_v26 = vor.u32 %v13632_v14, %v9669_v15  ;;  %v9397_v27 = vld [vmem:[%s21990_s3 + $0x358] sm:$0xf0] }
  0xa6   :  { %1547 = vmatpush.bf16.msrb.mxu2 %v9608_v28  ;;  %1513 = vmatmul.bf16.vlgmr.msra.gmra.mxu3 %v14932_v6  ;;  %v9704_v6 = vor.u32 %v13640_v51, %v9701_v52  ;;  %v1249_v3 = vadd.f32 %v1248_v1, %v22006_v54  ;;  %v13596_v28 = vld [vmem:[%s21990_s3 + $0x44c] sm:$0xf]  ;;  %v9400_v33 = vor.u32 %v13564_v25, %v9397_v27 }
  0xa7   :  { %1561 = vmatpush.bf16.msrb.mxu3 %v9736_v32  ;;  %1499 = vmatmul.bf16.vlgmr.msra.gmra.mxu2 %v14902_v57  ;;  %v13572_v57 = vld [vmem:[%s21990_s3 + $0x38c] sm:$0xf]  ;;  %v9272_v32 = vor.u32 %v13532_v21, %v9269_v24  ;;  %v9528_v34 = vor.u32 %v13596_v28, %v9525_v29  ;;  %v9240_v1 = vor.u32 %v13524_v48, %v9237_v49  ;;  %v10135_v21 = vld [vmem:[%s21993_s2 + $0x308] sm:$0xf] }
  0xa8   :  { %v9432_v4 = vor.u32 %v13572_v57, %v9429_v60  ;;  %v1263_v18 = vadd.f32 %v1262_v16, %v1249_v3  ;;  %v13556_v52 = vld [vmem:[%s21990_s3 + $0x30c] sm:$0xf]  ;;  %v10199_v3 = vld [vmem:[%s21993_s2 + $0x388] sm:$0xf]  ;;  %v10127_v16 = vld [vmem:[%s21993_s2 + $0x300] sm:$0xf] }
  0xa9   :  { %1520 = vmatpush.bf16.msrb.mxu0 %v9336_v40  ;;  %1534 = vmatpush.bf16.msrb.mxu1 %v9464_v42  ;;  %v9656_v40 = vor.u32 %v13628_v30, %v9653_v31  ;;  %v13592_v42 = vld [vmem:[%s21990_s3 + $0x42c] sm:$0xf]  ;;  %v1290_v0 = vpop.f32.mrf.mxu3  ;;  %v13757_v24 = vld [vmem:[%s21993_s2 + $0x344] sm:$0xf0]  ;;  %v15930_v27 = vpop.f32.mrf.mxu1  ;;  %v10063_v31 = vld [vmem:[%s21993_s2 + $0x280] sm:$0xf] }
  0xaa   :  { %1548 = vmatpush.bf16.msrb.mxu2 %v9592_v43  ;;  %v9509_v43 = vld [vmem:[%s21990_s3 + $0x438] sm:$0xf0]  ;;  %v13620_v57 = vld [vmem:[%s21990_s3 + $0x50c] sm:$0xf]  ;;  %22014 = vst [vmem:[#allocation4_spill] sm:$0xff] %v15930_v27  ;;  %v10136_v30 = vor.u32 %v13757_v24, %v10135_v21 }
  0xab   :  { %1562 = vmatpush.bf16.msrb.mxu3 %v9720_v47  ;;  %v9256_v47 = vor.u32 %v13528_v36, %v9253_v37  ;;  %v9512_v51 = vor.u32 %v13592_v42, %v9509_v43  ;;  %v13749_v25 = vld [vmem:[%s21993_s2 + $0x30c] sm:$0xf]  ;;  %v10065_v36 = vld [vmem:[%s21993_s2 + $0x2c0] sm:$0xf0]  ;;  %v10071_v37 = vld [vmem:[%s21993_s2 + $0x288] sm:$0xf] }
  0xac   :  { %v10072_v43 = vor.u32 %v13741_v38, %v10071_v37  ;;  %v13725_v48 = vld [vmem:[%s21993_s2 + $0x244] sm:$0xf0]  ;;  %v13669_v38 = vld [vmem:[%s21993_s2 + $0x8c] sm:$0xf] }
  0xad   :  { %1521 = vmatpush.bf16.msrb.mxu0 %v9320_v53  ;;  %1535 = vmatpush.bf16.msrb.mxu1 %v9448_v55  ;;  %v9365_v53 = vld [vmem:[%s21990_s3 + $0x318] sm:$0xf0]  ;;  %v13588_v55 = vld [vmem:[%s21990_s3 + $0x40c] sm:$0xf]  ;;  %v15904_v15 = vpop.f32.mrf.mxu0  ;;  %v13677_v37 = vld [vmem:[%s21993_s2 + $0xc4] sm:$0xf0] }
  0xae   :  { %1549 = vmatpush.bf16.msrb.mxu2 %v9576_v56  ;;  %v9368_v7 = vor.u32 %v13556_v52, %v9365_v53  ;;  %v9496_v8 = vor.u32 %v13588_v55, %v9493_v59  ;;  %22013 = vst [vmem:[#allocation3_spill] sm:$0xff] %v15904_v15  ;;  %v10009_v52 = vld [vmem:[%s21993_s2 + $0x248] sm:$0xf0] }
  0xaf   :  { %1563 = vmatpush.bf16.msrb.mxu3 %v9704_v6  ;;  %v9621_v6 = vld [vmem:[%s21990_s3 + $0x518] sm:$0xf0] }
  0xb0   :  { %v9624_v11 = vor.u32 %v13620_v57, %v9621_v6  ;;  %v9935_v6 = vld [vmem:[%s21993_s2 + $0x180] sm:$0xf] }
  0xb1   :  { %1522 = vmatpush.bf16.msrb.mxu0 %v9304_v2  ;;  %1536 = vmatpush.bf16.msrb.mxu1 %v9432_v4  ;;  %v10193_v2 = vld [vmem:[%s21993_s2 + $0x3c0] sm:$0xf0]  ;;  %v13773_v4 = vld [vmem:[%s21993_s2 + $0x3c4] sm:$0xf0] }
  0xb2   :  { %1550 = vmatpush.bf16.msrb.mxu2 %v9560_v5  ;;  %v1276_v56 = vpop.f32.mrf.mxu2  ;;  %v10196_v13 = vor.u32 %v13764_v63, %v10193_v2  ;;  %v10200_v14 = vor.u32 %v13773_v4, %v10199_v3  ;;  %v13709_v2 = vld [vmem:[%s21993_s2 + $0x1c4] sm:$0xf0]  ;;  %v13701_v3 = vld [vmem:[%s21993_s2 + $0x18c] sm:$0xf] }
  0xb3   :  { %1564 = vmatpush.bf16.msrb.mxu3 %v9688_v10  ;;  %v1277_v60 = vadd.f32 %v1276_v56, %v1263_v18  ;;  %v10201_v10 = vld [vmem:[%s21993_s2 + $0x3c8] sm:$0xf0]  ;;  %v13748_v18 = vld [vmem:[%s21993_s2 + $0x304] sm:$0xf]  ;;  %v15987_v56 = vpop.f32.mrf.mxu3 }
  0xb4   :  { %22016 = vst [vmem:[#allocation6_spill] sm:$0xff] %v15987_v56  ;;  %v9945_v4 = vld [vmem:[%s21993_s2 + $0x1c8] sm:$0xf0] }
  0xb5   :  { %1523 = vmatpush.bf16.msrb.mxu0 %v9288_v17  ;;  %1537 = vmatpush.bf16.msrb.mxu1 %v9416_v19  ;;  %v15896_v5 = vadd.f32 %v1290_v0, %v1277_v60  ;;  %v13756_v17 = vld [vmem:[%s21993_s2 + $0x33c] sm:$0xf0]  ;;  %v10204_v19 = vor.u32 %v13765_v9, %v10201_v10  ;;  %v9937_v0 = vld [vmem:[%s21993_s2 + $0x1c0] sm:$0xf0] }
  0xb6   :  { %1551 = vmatpush.bf16.msrb.mxu2 %v9544_v20  ;;  %v10129_v20 = vld [vmem:[%s21993_s2 + $0x340] sm:$0xf0]  ;;  %v10128_v28 = vor.u32 %v13756_v17, %v10127_v16  ;;  %v13708_v60 = vld [vmem:[%s21993_s2 + $0x1bc] sm:$0xf0]  ;;  %v9879_v16 = vld [vmem:[%s21993_s2 + $0x108] sm:$0xf] }
  0xb7   :  { %1565 = vmatpush.bf16.msrb.mxu3 %v9672_v26  ;;  %v10137_v26 = vld [vmem:[%s21993_s2 + $0x348] sm:$0xf0]  ;;  %v10132_v29 = vor.u32 %v13748_v18, %v10129_v20  ;;  %v9871_v10 = vld [vmem:[%s21993_s2 + $0x100] sm:$0xf]  ;;  %v13693_v17 = vld [vmem:[%s21993_s2 + $0x144] sm:$0xf0] }
  0xb8   :  { %v9881_v20 = vld [vmem:[%s21993_s2 + $0x148] sm:$0xf0] }
  0xb9   :  { %1524 = vmatpush.bf16.msrb.mxu0 %v9272_v32  ;;  %1538 = vmatpush.bf16.msrb.mxu1 %v9400_v33  ;;  %v13740_v32 = vld [vmem:[%s21993_s2 + $0x2bc] sm:$0xf0]  ;;  %v13732_v33 = vld [vmem:[%s21993_s2 + $0x284] sm:$0xf] }
  0xba   :  { %1552 = vmatpush.bf16.msrb.mxu2 %v9528_v34  ;;  %v10140_v34 = vor.u32 %v13749_v25, %v10137_v26  ;;  %v10064_v41 = vor.u32 %v13740_v32, %v10063_v31  ;;  %v10068_v42 = vor.u32 %v13732_v33, %v10065_v36  ;;  %v15978_v49 = vpop.f32.mrf.mxu2  ;;  %v13668_v31 = vld [vmem:[%s21993_s2 + $0x84] sm:$0xf]  ;;  %v9815_v36 = vld [vmem:[%s21993_s2 + $0x88] sm:$0xf] }
  0xbb   :  { %1566 = vmatpush.bf16.msrb.mxu3 %v9656_v40  ;;  %v10073_v40 = vld [vmem:[%s21993_s2 + $0x2c8] sm:$0xf0]  ;;  %22015 = vst [vmem:[#allocation5_spill] sm:$0xff] %v15978_v49 }
  0xbd   :  { %1525 = vmatpush.bf16.msrb.mxu0 %v9256_v47  ;;  %1539 = vmatpush.bf16.msrb.mxu1 %v9384_v50  ;;  %v10007_v47 = vld [vmem:[%s21993_s2 + $0x208] sm:$0xf] }
  0xbe   :  { %1553 = vmatpush.bf16.msrb.mxu2 %v9512_v51  ;;  %v13717_v51 = vld [vmem:[%s21993_s2 + $0x20c] sm:$0xf]  ;;  %v10008_v59 = vor.u32 %v13725_v48, %v10007_v47  ;;  %v13661_v47 = vld [vmem:[%s21993_s2 + $0x44] sm:$0xf0] }
  0xbf   :  { %1567 = vmatpush.bf16.msrb.mxu3 %v9640_v58  ;;  %v10004_v58 = vor.u32 %v13716_v44, %v10001_v45  ;;  %v10012_v62 = vor.u32 %v13717_v51, %v10009_v52  ;;  %v9745_v44 = vld [vmem:[%s21993_s2 + $0x40] sm:$0xf0]  ;;  %v13653_v48 = vld [vmem:[%s21993_s2 + $0xc] sm:$0xf]  ;;  %v10207_v51 = vld [vmem:[%s21993_s2 + $0x390] sm:$0xf] }
  0xc0   :  { %v13774_v52 = vld [vmem:[%s21993_s2 + $0x3cc] sm:$0xf0] }
  0xc1   :  { %1526 = vmatpush.bf16.msrb.mxu0 %v9240_v1  ;;  %1540 = vmatpush.bf16.msrb.mxu1 %v9368_v7  ;;  %v1304_v50 = vpop.f32.mrf.mxu0  ;;  %v1318_v57 = vpop.f32.mrf.mxu1  ;;  %v9943_v1 = vld [vmem:[%s21993_s2 + $0x188] sm:$0xf]  ;;  %v9936_v7 = vor.u32 %v13708_v60, %v9935_v6 }
  0xc2   :  { %1554 = vmatpush.bf16.msrb.mxu2 %v9496_v8  ;;  %v1305_v53 = vadd.f32 %v1304_v50, %v15896_v5  ;;  %v22005_v5 = vperm.slane %v15734_v46, 1  ;;  %v9940_v8 = vor.u32 %v13700_v61, %v9937_v0  ;;  %v9944_v9 = vor.u32 %v13709_v2, %v9943_v1  ;;  %v9753_v50 = vld [vmem:[%s21993_s2 + $0x48] sm:$0xf0]  ;;  %v13767_v61 = vld [vmem:[%s21993_s2 + $0x39c] sm:$0xf]  ;;  %v16119_v2 = vld [vmem:[%s21994_s1] sm:$0xff] }
  0xc3   :  { %1568 = vmatpush.bf16.msrb.mxu3 %v9624_v11  ;;  %v13692_v11 = vld [vmem:[%s21993_s2 + $0x13c] sm:$0xf0]  ;;  %v9756_v0 = vor.u32 %v13653_v48, %v9753_v50  ;;  %v10208_v1 = vor.u32 %v13774_v52, %v10207_v51  ;;  %v10025_v48 = vld [vmem:[%s21993_s2 + $0x258] sm:$0xf0] }
  0xc4   :  { %1527 = vmatmul.bf16.vlgmr.msrb.gmra.mxu0 %v14968_v22  ;;  %1541 = vmatmul.bf16.vlgmr.msrb.gmra.mxu1 %v14970_v23  ;;  %v13733_v22 = vld [vmem:[%s21993_s2 + $0x28c] sm:$0xf]  ;;  %v9999_v23 = vld [vmem:[%s21993_s2 + $0x200] sm:$0xf]  ;;  %v15998_v63 = vadd.f32 %v1318_v57, %v1305_v53  ;;  %v9872_v24 = vor.u32 %v13692_v11, %v9871_v10  ;;  %v13766_v53 = vld [vmem:[%s21993_s2 + $0x394] sm:$0xf] }
  0xc5   :  { %2355 = vmatpush.bf16.msra.mxu0 %v10192_v12  ;;  %2369 = vmatpush.bf16.msra.mxu1 %v10196_v13  ;;  %v13684_v12 = vld [vmem:[%s21993_s2 + $0x104] sm:$0xf]  ;;  %v9948_v13 = vor.u32 %v13701_v3, %v9945_v4  ;;  %v13775_v57 = vld [vmem:[%s21993_s2 + $0x3d4] sm:$0xf0]  ;;  %v10145_v11 = vld [vmem:[%s21993_s2 + $0x350] sm:$0xf0] }
  0xc6   :  { %2383 = vmatpush.bf16.msra.mxu2 %v10200_v14  ;;  %1569 = vmatmul.bf16.vlgmr.msrb.gmra.mxu3 %v15126_v39  ;;  %v10076_v39 = vor.u32 %v13733_v22, %v10073_v40  ;;  %22017 = vst [vmem:[#allocation7_spill] sm:$0xff] %v15998_v63  ;;  %v9873_v14 = vld [vmem:[%s21993_s2 + $0x140] sm:$0xf0]  ;;  %v9817_v22 = vld [vmem:[%s21993_s2 + $0xc8] sm:$0xf0] }
  0xc7   :  { %2397 = vmatpush.bf16.msra.mxu3 %v10204_v19  ;;  %1555 = vmatmul.bf16.vlgmr.msrb.gmra.mxu2 %v15115_v35  ;;  %v13724_v35 = vld [vmem:[%s21993_s2 + $0x23c] sm:$0xf0]  ;;  %v13685_v19 = vld [vmem:[%s21993_s2 + $0x10c] sm:$0xf]  ;;  %v9876_v26 = vor.u32 %v13684_v12, %v9873_v14  ;;  %v9820_v45 = vor.u32 %v13669_v38, %v9817_v22  ;;  %v10151_v12 = vld [vmem:[%s21993_s2 + $0x318] sm:$0xf] }
  0xc8   :  { %v10000_v55 = vor.u32 %v13724_v35, %v9999_v23  ;;  %v9884_v33 = vor.u32 %v13685_v19, %v9881_v20  ;;  %v9816_v23 = vor.u32 %v13677_v37, %v9815_v36  ;;  %v13652_v35 = vld [vmem:[%s21993_s2 + $0x4] sm:$0xf] }
  0xc9   :  { %2356 = vmatpush.bf16.msra.mxu0 %v10128_v28  ;;  %2370 = vmatpush.bf16.msra.mxu1 %v10132_v29  ;;  %v1346_v25 = vpop.f32.mrf.mxu3  ;;  %v9880_v28 = vor.u32 %v13693_v17, %v9879_v16  ;;  %v9807_v29 = vld [vmem:[%s21993_s2 + $0x80] sm:$0xf]  ;;  %v9748_v6 = vor.u32 %v13652_v35, %v9745_v44  ;;  %v16139_v14 = vpop.f32.mrf.mxu0  ;;  %v13751_v16 = vld [vmem:[%s21993_s2 + $0x31c] sm:$0xf]  ;;  %v10017_v35 = vld [vmem:[%s21993_s2 + $0x250] sm:$0xf0] }
  0xca   :  { %2384 = vmatpush.bf16.msra.mxu2 %v10136_v30  ;;  %v1332_v18 = vpop.f32.mrf.mxu2  ;;  %v13676_v30 = vld [vmem:[%s21993_s2 + $0xbc] sm:$0xf0]  ;;  %22018 = vst [vmem:[#allocation8_spill] sm:$0xff] %v16139_v14  ;;  %v10153_v17 = vld [vmem:[%s21993_s2 + $0x358] sm:$0xf0]  ;;  %v16147_v19 = vpop.f32.mrf.mxu1 }
  0xcb   :  { %2398 = vmatpush.bf16.msra.mxu3 %v10140_v34  ;;  %v1333_v21 = vadd.f32 %v1332_v18, %v22005_v5  ;;  %v9809_v34 = vld [vmem:[%s21993_s2 + $0xc0] sm:$0xf0]  ;;  %v9808_v40 = vor.u32 %v13676_v30, %v9807_v29  ;;  %22019 = vst [vmem:[#allocation9_spill] sm:$0xff] %v16147_v19  ;;  %v10081_v29 = vld [vmem:[%s21993_s2 + $0x2d0] sm:$0xf0] }
  0xcc   :  { %v10087_v30 = vld [vmem:[%s21993_s2 + $0x298] sm:$0xf] }
  0xcd   :  { %2357 = vmatpush.bf16.msra.mxu0 %v10064_v41  ;;  %2371 = vmatpush.bf16.msra.mxu1 %v10068_v42  ;;  %v16051_v32 = vadd.f32 %v1346_v25, %v1333_v21  ;;  %v9743_v41 = vld [vmem:[%s21993_s2] sm:$0xf]  ;;  %v13742_v25 = vld [vmem:[%s21993_s2 + $0x2cc] sm:$0xf0]  ;;  %v10023_v44 = vld [vmem:[%s21993_s2 + $0x218] sm:$0xf] }
  0xce   :  { %2385 = vmatpush.bf16.msra.mxu2 %v10072_v43  ;;  %v13660_v42 = vld [vmem:[%s21993_s2 + $0x3c] sm:$0xf0]  ;;  %v9812_v43 = vor.u32 %v13668_v31, %v9809_v34  ;;  %v13743_v31 = vld [vmem:[%s21993_s2 + $0x2d4] sm:$0xf0]  ;;  %v10089_v34 = vld [vmem:[%s21993_s2 + $0x2d8] sm:$0xf0] }
  0xcf   :  { %2399 = vmatpush.bf16.msra.mxu3 %v10076_v39  ;;  %v9751_v39 = vld [vmem:[%s21993_s2 + $0x8] sm:$0xf]  ;;  %v10088_v22 = vor.u32 %v13743_v31, %v10087_v30  ;;  %v9823_v30 = vld [vmem:[%s21993_s2 + $0x90] sm:$0xf] }
  0xd0   :  { %v9752_v60 = vor.u32 %v13661_v47, %v9751_v39  ;;  %v13727_v39 = vld [vmem:[%s21993_s2 + $0x254] sm:$0xf0]  ;;  %v13719_v47 = vld [vmem:[%s21993_s2 + $0x21c] sm:$0xf]  ;;  %v13678_v31 = vld [vmem:[%s21993_s2 + $0xcc] sm:$0xf0] }
  0xd1   :  { %2358 = vmatpush.bf16.msra.mxu0 %v10000_v55  ;;  %2372 = vmatpush.bf16.msra.mxu1 %v10004_v58  ;;  %v9744_v55 = vor.u32 %v13660_v42, %v9743_v41  ;;  %v10209_v58 = vld [vmem:[%s21993_s2 + $0x3d0] sm:$0xf0]  ;;  %v13726_v41 = vld [vmem:[%s21993_s2 + $0x24c] sm:$0xf0] }
  0xd2   :  { %2386 = vmatpush.bf16.msra.mxu2 %v10008_v59  ;;  %v10215_v59 = vld [vmem:[%s21993_s2 + $0x398] sm:$0xf]  ;;  %v10212_v3 = vor.u32 %v13766_v53, %v10209_v58  ;;  %v16177_v37 = vpop.f32.mrf.mxu2  ;;  %v13718_v42 = vld [vmem:[%s21993_s2 + $0x214] sm:$0xf]  ;;  %v10024_v53 = vor.u32 %v13727_v39, %v10023_v44  ;;  %v9951_v58 = vld [vmem:[%s21993_s2 + $0x190] sm:$0xf] }
  0xd3   :  { %2400 = vmatpush.bf16.msra.mxu3 %v10012_v62  ;;  %v10217_v62 = vld [vmem:[%s21993_s2 + $0x3d8] sm:$0xf0]  ;;  %v10216_v4 = vor.u32 %v13775_v57, %v10215_v59  ;;  %22020 = vst [vmem:[#allocation10_spill] sm:$0xff] %v16177_v37  ;;  %v10020_v52 = vor.u32 %v13718_v42, %v10017_v35  ;;  %v13710_v59 = vld [vmem:[%s21993_s2 + $0x1cc] sm:$0xf0]  ;;  %v9824_v42 = vor.u32 %v13678_v31, %v9823_v30 }
  0xd4   :  { %v10220_v10 = vor.u32 %v13767_v61, %v10217_v62  ;;  %v13702_v57 = vld [vmem:[%s21993_s2 + $0x194] sm:$0xf]  ;;  %v9959_v61 = vld [vmem:[%s21993_s2 + $0x198] sm:$0xf]  ;;  %v13662_v35 = vld [vmem:[%s21993_s2 + $0x4c] sm:$0xf0] }
  0xd5   :  { %2359 = vmatpush.bf16.msra.mxu0 %v9936_v7  ;;  %2373 = vmatpush.bf16.msra.mxu1 %v9940_v8  ;;  %v10143_v7 = vld [vmem:[%s21993_s2 + $0x310] sm:$0xf]  ;;  %v13711_v62 = vld [vmem:[%s21993_s2 + $0x1d4] sm:$0xf0]  ;;  %v10095_v30 = vld [vmem:[%s21993_s2 + $0x2a0] sm:$0xf] }
  0xd6   :  { %2387 = vmatpush.bf16.msra.mxu2 %v9944_v9  ;;  %v13758_v8 = vld [vmem:[%s21993_s2 + $0x34c] sm:$0xf0]  ;;  %v13750_v9 = vld [vmem:[%s21993_s2 + $0x314] sm:$0xf]  ;;  %v13744_v31 = vld [vmem:[%s21993_s2 + $0x2dc] sm:$0xf0] }
  0xd7   :  { %2401 = vmatpush.bf16.msra.mxu3 %v9948_v13  ;;  %v13759_v13 = vld [vmem:[%s21993_s2 + $0x354] sm:$0xf0]  ;;  %v10144_v18 = vor.u32 %v13758_v8, %v10143_v7  ;;  %v10148_v20 = vor.u32 %v13750_v9, %v10145_v11  ;;  %v9960_v7 = vor.u32 %v13711_v62, %v9959_v61  ;;  %v9887_v8 = vld [vmem:[%s21993_s2 + $0x110] sm:$0xf] }
  0xd8   :  { %v10152_v21 = vor.u32 %v13759_v13, %v10151_v12  ;;  %v13694_v9 = vld [vmem:[%s21993_s2 + $0x14c] sm:$0xf0]  ;;  %v9889_v13 = vld [vmem:[%s21993_s2 + $0x150] sm:$0xf0] }
  0xd9   :  { %2360 = vmatpush.bf16.msra.mxu0 %v9872_v24  ;;  %2374 = vmatpush.bf16.msra.mxu1 %v9876_v26  ;;  %v10079_v24 = vld [vmem:[%s21993_s2 + $0x290] sm:$0xf]  ;;  %v13734_v26 = vld [vmem:[%s21993_s2 + $0x294] sm:$0xf] }
  0xda   :  { %2388 = vmatpush.bf16.msra.mxu2 %v9880_v28  ;;  %v10156_v28 = vor.u32 %v13751_v16, %v10153_v17  ;;  %v10080_v36 = vor.u32 %v13742_v25, %v10079_v24  ;;  %v10084_v38 = vor.u32 %v13734_v26, %v10081_v29  ;;  %v9895_v16 = vld [vmem:[%s21993_s2 + $0x118] sm:$0xf]  ;;  %v9888_v25 = vor.u32 %v13694_v9, %v9887_v8  ;;  %v10159_v9 = vld [vmem:[%s21993_s2 + $0x320] sm:$0xf] }
  0xdb   :  { %2402 = vmatpush.bf16.msra.mxu3 %v9884_v33  ;;  %v13735_v33 = vld [vmem:[%s21993_s2 + $0x29c] sm:$0xf]  ;;  %v13695_v17 = vld [vmem:[%s21993_s2 + $0x154] sm:$0xf0] }
  0xdc   :  { %v9896_v29 = vor.u32 %v13695_v17, %v9895_v16  ;;  %v10167_v16 = vld [vmem:[%s21993_s2 + $0x328] sm:$0xf] }
  0xdd   :  { %2361 = vmatpush.bf16.msra.mxu0 %v9808_v40  ;;  %2375 = vmatpush.bf16.msra.mxu1 %v9812_v43  ;;  %v10015_v40 = vld [vmem:[%s21993_s2 + $0x210] sm:$0xf]  ;;  %v10092_v43 = vor.u32 %v13735_v33, %v10089_v34  ;;  %v13670_v33 = vld [vmem:[%s21993_s2 + $0x94] sm:$0xf]  ;;  %v13761_v17 = vld [vmem:[%s21993_s2 + $0x364] sm:$0xf0] }
  0xde   :  { %2389 = vmatpush.bf16.msra.mxu2 %v9816_v23  ;;  %v16188_v23 = vpop.f32.mrf.mxu3  ;;  %v10016_v51 = vor.u32 %v13726_v41, %v10015_v40  ;;  %v13671_v40 = vld [vmem:[%s21993_s2 + $0x9c] sm:$0xf] }
  0xdf   :  { %2403 = vmatpush.bf16.msra.mxu3 %v9820_v45  ;;  %22021 = vst [vmem:[#allocation11_spill] sm:$0xff] %v16188_v23  ;;  %v9833_v41 = vld [vmem:[%s21993_s2 + $0xd8] sm:$0xf0] }
  0xe1   :  { %2362 = vmatpush.bf16.msra.mxu0 %v9744_v55  ;;  %2376 = vmatpush.bf16.msra.mxu1 %v9748_v6  ;;  %v1360_v45 = vpop.f32.mrf.mxu0  ;;  %v1374_v55 = vpop.f32.mrf.mxu1 }
  0xe2   :  { %2390 = vmatpush.bf16.msra.mxu2 %v9752_v60  ;;  %v1361_v50 = vadd.f32 %v1360_v45, %v16051_v32  ;;  %v10028_v32 = vor.u32 %v13719_v47, %v10025_v48  ;;  %v9953_v60 = vld [vmem:[%s21993_s2 + $0x1d0] sm:$0xf0]  ;;  %v9767_v48 = vld [vmem:[%s21993_s2 + $0x18] sm:$0xf] }
  0xe3   :  { %2404 = vmatpush.bf16.msra.mxu3 %v9756_v0  ;;  %v13703_v0 = vld [vmem:[%s21993_s2 + $0x19c] sm:$0xf]  ;;  %v13654_v45 = vld [vmem:[%s21993_s2 + $0x14] sm:$0xf] }
  0xe4   :  { %2363 = vmatmul.bf16.vlgmr.msra.gmra.mxu0 %v16119_v2  ;;  %2377 = vmatmul.bf16.vlgmr.msra.gmra.mxu1 %v16119_v2  ;;  %v1375_v6 = vadd.f32 %v1374_v55, %v1361_v50  ;;  %v9761_v47 = vld [vmem:[%s21993_s2 + $0x50] sm:$0xf0]  ;;  %v9836_v50 = vor.u32 %v13671_v40, %v9833_v41  ;;  %v10223_v55 = vld [vmem:[%s21993_s2 + $0x3a0] sm:$0xf]  ;;  %v13737_v40 = vld [vmem:[%s21993_s2 + $0x2ac] sm:$0xf] }
  0xe5   :  { %2411 = vmatpush.bf16.msrb.mxu0 %v10208_v1  ;;  %2425 = vmatpush.bf16.msrb.mxu1 %v10212_v3  ;;  %v9961_v1 = vld [vmem:[%s21993_s2 + $0x1d8] sm:$0xf0]  ;;  %v9952_v3 = vor.u32 %v13710_v59, %v9951_v58  ;;  %v13776_v58 = vld [vmem:[%s21993_s2 + $0x3dc] sm:$0xf0]  ;;  %v13768_v59 = vld [vmem:[%s21993_s2 + $0x3a4] sm:$0xf]  ;;  %v9764_v61 = vor.u32 %v13654_v45, %v9761_v47 }
  0xe6   :  { %2439 = vmatpush.bf16.msrb.mxu2 %v10216_v4  ;;  %2405 = vmatmul.bf16.vlgmr.msra.gmra.mxu3 %v16119_v2  ;;  %v9956_v4 = vor.u32 %v13702_v57, %v9953_v60  ;;  %v9964_v11 = vor.u32 %v13703_v0, %v9961_v1  ;;  %v13777_v60 = vld [vmem:[%s21993_s2 + $0x3e4] sm:$0xf0]  ;;  %v13769_v0 = vld [vmem:[%s21993_s2 + $0x3ac] sm:$0xf]  ;;  %v13728_v45 = vld [vmem:[%s21993_s2 + $0x25c] sm:$0xf0] }
  0xe7   :  { %2453 = vmatpush.bf16.msrb.mxu3 %v10220_v10  ;;  %2391 = vmatmul.bf16.vlgmr.msra.gmra.mxu2 %v16119_v2  ;;  %v13686_v10 = vld [vmem:[%s21993_s2 + $0x114] sm:$0xf]  ;;  %v10233_v1 = vld [vmem:[%s21993_s2 + $0x3e8] sm:$0xf0]  ;;  %v13720_v47 = vld [vmem:[%s21993_s2 + $0x224] sm:$0xf] }
  0xe8   :  { %v10105_v41 = vld [vmem:[%s21993_s2 + $0x2e8] sm:$0xf0] }
  0xe9   :  { %2412 = vmatpush.bf16.msrb.mxu0 %v10144_v18  ;;  %2426 = vmatpush.bf16.msrb.mxu1 %v10148_v20  ;;  %v13687_v20 = vld [vmem:[%s21993_s2 + $0x11c] sm:$0xf]  ;;  %v1402_v24 = vpop.f32.mrf.mxu3 }
  0xea   :  { %2440 = vmatpush.bf16.msrb.mxu2 %v10152_v21  ;;  %v1388_v12 = vpop.f32.mrf.mxu2  ;;  %v9897_v21 = vld [vmem:[%s21993_s2 + $0x158] sm:$0xf0] }
  0xeb   :  { %2454 = vmatpush.bf16.msrb.mxu3 %v10156_v28  ;;  %v1389_v18 = vadd.f32 %v1388_v12, %v1375_v6  ;;  %v9892_v28 = vor.u32 %v13686_v10, %v9889_v13  ;;  %v9900_v34 = vor.u32 %v13687_v20, %v9897_v21  ;;  %v10231_v6 = vld [vmem:[%s21993_s2 + $0x3a8] sm:$0xf]  ;;  %v13760_v10 = vld [vmem:[%s21993_s2 + $0x35c] sm:$0xf0]  ;;  %v10236_v12 = vor.u32 %v13769_v0, %v10233_v1  ;;  %v10161_v13 = vld [vmem:[%s21993_s2 + $0x360] sm:$0xf0] }
  0xec   :  { %v10232_v8 = vor.u32 %v13777_v60, %v10231_v6  ;;  %v13753_v20 = vld [vmem:[%s21993_s2 + $0x32c] sm:$0xf]  ;;  %v13712_v0 = vld [vmem:[%s21993_s2 + $0x1dc] sm:$0xf0]  ;;  %v13704_v1 = vld [vmem:[%s21993_s2 + $0x1a4] sm:$0xf] }
  0xed   :  { %2413 = vmatpush.bf16.msrb.mxu0 %v10080_v36  ;;  %2427 = vmatpush.bf16.msrb.mxu1 %v10084_v38  ;;  %v16254_v26 = vadd.f32 %v1402_v24, %v1389_v18  ;;  %v9825_v36 = vld [vmem:[%s21993_s2 + $0xd0] sm:$0xf0]  ;;  %v9831_v38 = vld [vmem:[%s21993_s2 + $0x98] sm:$0xf]  ;;  %v16346_v18 = vpop.f32.mrf.mxu0  ;;  %v10169_v21 = vld [vmem:[%s21993_s2 + $0x368] sm:$0xf0]  ;;  %v10160_v24 = vor.u32 %v13760_v10, %v10159_v9 }
  0xee   :  { %2441 = vmatpush.bf16.msrb.mxu2 %v10088_v22  ;;  %v13679_v22 = vld [vmem:[%s21993_s2 + $0xd4] sm:$0xf0]  ;;  %v9828_v44 = vor.u32 %v13670_v33, %v9825_v36  ;;  %22023 = vst [vmem:[#allocation13_spill] sm:$0xff] %v16346_v18  ;;  %v13736_v33 = vld [vmem:[%s21993_s2 + $0x2a4] sm:$0xf] }
  0xef   :  { %2455 = vmatpush.bf16.msrb.mxu3 %v10092_v43  ;;  %22022 = vst [vmem:[#allocation12_spill] sm:$0xff] %v16254_v26  ;;  %v9759_v43 = vld [vmem:[%s21993_s2 + $0x10] sm:$0xf]  ;;  %v9832_v39 = vor.u32 %v13679_v22, %v9831_v38  ;;  %v10097_v36 = vld [vmem:[%s21993_s2 + $0x2e0] sm:$0xf0] }
  0xf0   :  { %v9760_v57 = vor.u32 %v13662_v35, %v9759_v43  ;;  %v10103_v38 = vld [vmem:[%s21993_s2 + $0x2a8] sm:$0xf]  ;;  %v22004_v43 = vperm.slane %v15734_v46, 2  ;;  %v10100_v35 = vor.u32 %v13736_v33, %v10097_v36  ;;  %v9913_v36 = vld [vmem:[%s21993_s2 + $0x168] sm:$0xf0] }
  0xf1   :  { %2414 = vmatpush.bf16.msrb.mxu0 %v10016_v51  ;;  %2428 = vmatpush.bf16.msrb.mxu1 %v10020_v52  ;;  %v13663_v51 = vld [vmem:[%s21993_s2 + $0x54] sm:$0xf0]  ;;  %v13655_v52 = vld [vmem:[%s21993_s2 + $0x1c] sm:$0xf]  ;;  %v13745_v22 = vld [vmem:[%s21993_s2 + $0x2e4] sm:$0xf0] }
  0xf2   :  { %2442 = vmatpush.bf16.msrb.mxu2 %v10024_v53  ;;  %v9769_v53 = vld [vmem:[%s21993_s2 + $0x58] sm:$0xf0]  ;;  %v9768_v62 = vor.u32 %v13663_v51, %v9767_v48  ;;  %v16394_v48 = vpop.f32.mrf.mxu2  ;;  %v10033_v51 = vld [vmem:[%s21993_s2 + $0x260] sm:$0xf0]  ;;  %v13713_v9 = vld [vmem:[%s21993_s2 + $0x1e4] sm:$0xf0] }
  0xf3   :  { %2456 = vmatpush.bf16.msrb.mxu3 %v10028_v32  ;;  %v10225_v32 = vld [vmem:[%s21993_s2 + $0x3e0] sm:$0xf0]  ;;  %22025 = vst [vmem:[#allocation15_spill] sm:$0xff] %v16394_v48  ;;  %v10036_v60 = vor.u32 %v13720_v47, %v10033_v51  ;;  %v9847_v51 = vld [vmem:[%s21993_s2 + $0xa8] sm:$0xf] }
  0xf5   :  { %2415 = vmatpush.bf16.msrb.mxu0 %v9952_v3  ;;  %2429 = vmatpush.bf16.msrb.mxu1 %v9956_v4  ;;  %v9772_v3 = vor.u32 %v13655_v52, %v9769_v53  ;;  %v10224_v4 = vor.u32 %v13776_v58, %v10223_v55  ;;  %v10039_v52 = vld [vmem:[%s21993_s2 + $0x228] sm:$0xf]  ;;  %v13721_v55 = vld [vmem:[%s21993_s2 + $0x22c] sm:$0xf] }
  0xf6   :  { %2443 = vmatpush.bf16.msrb.mxu2 %v9960_v7  ;;  %v10228_v7 = vor.u32 %v13768_v59, %v10225_v32  ;;  %v13729_v53 = vld [vmem:[%s21993_s2 + $0x264] sm:$0xf0]  ;;  %v10041_v58 = vld [vmem:[%s21993_s2 + $0x268] sm:$0xf0] }
  0xf7   :  { %2457 = vmatpush.bf16.msrb.mxu3 %v9964_v11  ;;  %v13752_v11 = vld [vmem:[%s21993_s2 + $0x324] sm:$0xf] }
  0xf9   :  { %2416 = vmatpush.bf16.msrb.mxu0 %v9888_v25  ;;  %2430 = vmatpush.bf16.msrb.mxu1 %v9892_v28  ;;  %v16354_v25 = vpop.f32.mrf.mxu1  ;;  %v10164_v28 = vor.u32 %v13752_v11, %v10161_v13  ;;  %v13705_v11 = vld [vmem:[%s21993_s2 + $0x1ac] sm:$0xf] }
  0xfa   :  { %2444 = vmatpush.bf16.msrb.mxu2 %v9896_v29  ;;  %22024 = vst [vmem:[#allocation14_spill] sm:$0xff] %v16354_v25  ;;  %v10168_v29 = vor.u32 %v13761_v17, %v10167_v16 }
  0xfb   :  { %2458 = vmatpush.bf16.msrb.mxu3 %v9900_v34  ;;  %v10172_v34 = vor.u32 %v13753_v20, %v10169_v21  ;;  %v9903_v20 = vld [vmem:[%s21993_s2 + $0x120] sm:$0xf] }
  0xfc   :  { %v13696_v21 = vld [vmem:[%s21993_s2 + $0x15c] sm:$0xf0] }
  0xfd   :  { %2417 = vmatpush.bf16.msrb.mxu0 %v9824_v42  ;;  %2431 = vmatpush.bf16.msrb.mxu1 %v9828_v44  ;;  %v10096_v42 = vor.u32 %v13744_v31, %v10095_v30  ;;  %v10104_v44 = vor.u32 %v13745_v22, %v10103_v38  ;;  %v9911_v30 = vld [vmem:[%s21993_s2 + $0x128] sm:$0xf]  ;;  %v9904_v22 = vor.u32 %v13696_v21, %v9903_v20  ;;  %v13771_v21 = vld [vmem:[%s21993_s2 + $0x3bc] sm:$0xf] }
  0xfe   :  { %2445 = vmatpush.bf16.msrb.mxu2 %v9832_v39  ;;  %v10031_v39 = vld [vmem:[%s21993_s2 + $0x220] sm:$0xf]  ;;  %v13697_v31 = vld [vmem:[%s21993_s2 + $0x164] sm:$0xf0] }
  0xff   :  { %2459 = vmatpush.bf16.msrb.mxu3 %v9836_v50  ;;  %v10108_v50 = vor.u32 %v13737_v40, %v10105_v41  ;;  %v10032_v32 = vor.u32 %v13728_v45, %v10031_v39  ;;  %v13672_v39 = vld [vmem:[%s21993_s2 + $0xa4] sm:$0xf] }
 0x101   :  { %2418 = vmatpush.bf16.msrb.mxu0 %v9760_v57  ;;  %2432 = vmatpush.bf16.msrb.mxu1 %v9764_v61  ;;  %v1416_v59 = vpop.f32.mrf.mxu0  ;;  %v16411_v57 = vpop.f32.mrf.mxu3  ;;  %v10040_v61 = vor.u32 %v13729_v53, %v10039_v52  ;;  %v13681_v52 = vld [vmem:[%s21993_s2 + $0xe4] sm:$0xf0]  ;;  %v13673_v53 = vld [vmem:[%s21993_s2 + $0xac] sm:$0xf] }
 0x102   :  { %2446 = vmatpush.bf16.msrb.mxu2 %v9768_v62  ;;  %22026 = vst [vmem:[#allocation16_spill] sm:$0xff] %v16411_v57  ;;  %v1417_v6 = vadd.f32 %v1416_v59, %v22004_v43  ;;  %v9967_v62 = vld [vmem:[%s21993_s2 + $0x1a0] sm:$0xf] }
 0x103   :  { %2460 = vmatpush.bf16.msrb.mxu3 %v9772_v3  ;;  %v1430_v3 = vpop.f32.mrf.mxu1  ;;  %v9968_v13 = vor.u32 %v13712_v0, %v9967_v62  ;;  %v9775_v59 = vld [vmem:[%s21993_s2 + $0x20] sm:$0xf]  ;;  %v9777_v62 = vld [vmem:[%s21993_s2 + $0x60] sm:$0xf0]  ;;  %v9783_v0 = vld [vmem:[%s21993_s2 + $0x28] sm:$0xf] }
 0x104   :  { %2419 = vmatmul.bf16.vlgmr.msrb.gmra.mxu0 %v16119_v2  ;;  %2433 = vmatmul.bf16.vlgmr.msrb.gmra.mxu1 %v16119_v2  ;;  %v1431_v10 = vadd.f32 %v1430_v3, %v1417_v6  ;;  %v13665_v3 = vld [vmem:[%s21993_s2 + $0x64] sm:$0xf0] }
 0x105   :  { %2467 = vmatpush.bf16.msra.mxu0 %v10224_v4  ;;  %2481 = vmatpush.bf16.msra.mxu1 %v10228_v7  ;;  %v10044_v4 = vor.u32 %v13721_v55, %v10041_v58  ;;  %v9969_v7 = vld [vmem:[%s21993_s2 + $0x1e0] sm:$0xf0]  ;;  %v9849_v55 = vld [vmem:[%s21993_s2 + $0xe8] sm:$0xf0]  ;;  %v9784_v20 = vor.u32 %v13665_v3, %v9783_v0  ;;  %v10047_v3 = vld [vmem:[%s21993_s2 + $0x230] sm:$0xf] }
 0x106   :  { %2495 = vmatpush.bf16.msra.mxu2 %v10232_v8  ;;  %2461 = vmatmul.bf16.vlgmr.msrb.gmra.mxu3 %v16119_v2  ;;  %v9975_v8 = vld [vmem:[%s21993_s2 + $0x1a8] sm:$0xf]  ;;  %v9972_v16 = vor.u32 %v13704_v1, %v9969_v7  ;;  %v9852_v1 = vor.u32 %v13673_v53, %v9849_v55  ;;  %v9785_v7 = vld [vmem:[%s21993_s2 + $0x68] sm:$0xf0]  ;;  %v13746_v53 = vld [vmem:[%s21993_s2 + $0x2ec] sm:$0xf0] }
 0x107   :  { %2509 = vmatpush.bf16.msra.mxu3 %v10236_v12  ;;  %2447 = vmatmul.bf16.vlgmr.msrb.gmra.mxu2 %v16119_v2  ;;  %v9977_v12 = vld [vmem:[%s21993_s2 + $0x1e8] sm:$0xf0]  ;;  %v9976_v17 = vor.u32 %v13713_v9, %v9975_v8  ;;  %v10239_v8 = vld [vmem:[%s21993_s2 + $0x3b0] sm:$0xf]  ;;  %v13738_v55 = vld [vmem:[%s21993_s2 + $0x2b4] sm:$0xf] }
 0x108   :  { %v13778_v9 = vld [vmem:[%s21993_s2 + $0x3ec] sm:$0xf0] }
 0x109   :  { %2468 = vmatpush.bf16.msra.mxu0 %v10160_v24  ;;  %2482 = vmatpush.bf16.msra.mxu1 %v10164_v28  ;;  %v13688_v24 = vld [vmem:[%s21993_s2 + $0x124] sm:$0xf]  ;;  %v9980_v28 = vor.u32 %v13705_v11, %v9977_v12  ;;  %v1458_v40 = vpop.f32.mrf.mxu3  ;;  %v10241_v12 = vld [vmem:[%s21993_s2 + $0x3f0] sm:$0xf0] }
 0x10a   :  { %2496 = vmatpush.bf16.msra.mxu2 %v10168_v29  ;;  %v9905_v29 = vld [vmem:[%s21993_s2 + $0x160] sm:$0xf0]  ;;  %v1444_v33 = vpop.f32.mrf.mxu2 }
 0x10b   :  { %2510 = vmatpush.bf16.msra.mxu3 %v10172_v34  ;;  %v13689_v34 = vld [vmem:[%s21993_s2 + $0x12c] sm:$0xf]  ;;  %v1445_v38 = vadd.f32 %v1444_v33, %v1431_v10  ;;  %v9908_v41 = vor.u32 %v13688_v24, %v9905_v29  ;;  %v13770_v10 = vld [vmem:[%s21993_s2 + $0x3b4] sm:$0xf]  ;;  %v10249_v24 = vld [vmem:[%s21993_s2 + $0x3f8] sm:$0xf0]  ;;  %v10240_v29 = vor.u32 %v13778_v9, %v10239_v8  ;;  %v16537_v33 = vpop.f32.mrf.mxu0 }
 0x10c   :  { %v9916_v47 = vor.u32 %v13689_v34, %v9913_v36  ;;  %22027 = vst [vmem:[#allocation17_spill] sm:$0xff] %v16537_v33  ;;  %v10175_v34 = vld [vmem:[%s21993_s2 + $0x330] sm:$0xf]  ;;  %v10049_v9 = vld [vmem:[%s21993_s2 + $0x270] sm:$0xf0] }
 0x10d   :  { %2469 = vmatpush.bf16.msra.mxu0 %v10096_v42  ;;  %2483 = vmatpush.bf16.msra.mxu1 %v10100_v35  ;;  %v9912_v42 = vor.u32 %v13697_v31, %v9911_v30  ;;  %v9839_v35 = vld [vmem:[%s21993_s2 + $0xa0] sm:$0xf]  ;;  %v16472_v45 = vadd.f32 %v1458_v40, %v1445_v38  ;;  %v10244_v30 = vor.u32 %v13770_v10, %v10241_v12  ;;  %v13762_v36 = vld [vmem:[%s21993_s2 + $0x36c] sm:$0xf0]  ;;  %v13754_v38 = vld [vmem:[%s21993_s2 + $0x334] sm:$0xf] }
 0x10e   :  { %2497 = vmatpush.bf16.msra.mxu2 %v10104_v44  ;;  %v13680_v44 = vld [vmem:[%s21993_s2 + $0xdc] sm:$0xf0]  ;;  %v10177_v40 = vld [vmem:[%s21993_s2 + $0x370] sm:$0xf0]  ;;  %v10055_v10 = vld [vmem:[%s21993_s2 + $0x238] sm:$0xf] }
 0x10f   :  { %2511 = vmatpush.bf16.msra.mxu3 %v10108_v50  ;;  %v9841_v50 = vld [vmem:[%s21993_s2 + $0xe0] sm:$0xf0]  ;;  %v9840_v58 = vor.u32 %v13680_v44, %v9839_v35  ;;  %v13755_v35 = vld [vmem:[%s21993_s2 + $0x33c] sm:$0xf] }
 0x110   :  { %v9844_v6 = vor.u32 %v13672_v39, %v9841_v50  ;;  %v10185_v44 = vld [vmem:[%s21993_s2 + $0x378] sm:$0xf0]  ;;  %v16563_v39 = vpop.f32.mrf.mxu1  ;;  %v10180_v50 = vor.u32 %v13754_v38, %v10177_v40  ;;  %v9991_v40 = vld [vmem:[%s21993_s2 + $0x1b8] sm:$0xf] }
 0x111   :  { %2470 = vmatpush.bf16.msra.mxu0 %v10032_v32  ;;  %2484 = vmatpush.bf16.msra.mxu1 %v10036_v60  ;;  %v13664_v32 = vld [vmem:[%s21993_s2 + $0x5c] sm:$0xf0]  ;;  %v9848_v60 = vor.u32 %v13681_v52, %v9847_v51  ;;  %22028 = vst [vmem:[#allocation18_spill] sm:$0xff] %v16563_v39  ;;  %v10111_v52 = vld [vmem:[%s21993_s2 + $0x2b0] sm:$0xf] }
 0x112   :  { %2498 = vmatpush.bf16.msra.mxu2 %v10040_v61  ;;  %v13656_v61 = vld [vmem:[%s21993_s2 + $0x24] sm:$0xf]  ;;  %v9776_v11 = vor.u32 %v13664_v32, %v9775_v59  ;;  %v10113_v59 = vld [vmem:[%s21993_s2 + $0x2f0] sm:$0xf0]  ;;  %v10119_v32 = vld [vmem:[%s21993_s2 + $0x2b8] sm:$0xf]  ;;  %v16611_v12 = vpop.f32.mrf.mxu2 }
 0x113   :  { %2512 = vmatpush.bf16.msra.mxu3 %v10044_v4  ;;  %v13657_v4 = vld [vmem:[%s21993_s2 + $0x2c] sm:$0xf]  ;;  %v10116_v0 = vor.u32 %v13738_v55, %v10113_v59  ;;  %22029 = vst [vmem:[#allocation19_spill] sm:$0xff] %v16611_v12  ;;  %v13698_v55 = vld [vmem:[%s21993_s2 + $0x16c] sm:$0xf0] }
 0x114   :  { %v10791_v12 = vld [vmem:[%s21995_s5 + $0x428] sm:$0xf] }
 0x115   :  { %2471 = vmatpush.bf16.msra.mxu0 %v9968_v13  ;;  %2485 = vmatpush.bf16.msra.mxu1 %v9972_v16  ;;  %v10247_v13 = vld [vmem:[%s21993_s2 + $0x3b8] sm:$0xf] }
 0x116   :  { %2499 = vmatpush.bf16.msra.mxu2 %v9976_v17  ;;  %v13779_v16 = vld [vmem:[%s21993_s2 + $0x3f4] sm:$0xf0]  ;;  %v9780_v17 = vor.u32 %v13656_v61, %v9777_v62  ;;  %v10121_v61 = vld [vmem:[%s21993_s2 + $0x2f8] sm:$0xf0]  ;;  %v10112_v62 = vor.u32 %v13746_v53, %v10111_v52  ;;  %v9919_v53 = vld [vmem:[%s21993_s2 + $0x130] sm:$0xf] }
 0x117   :  { %2513 = vmatpush.bf16.msra.mxu3 %v9980_v28  ;;  %v9788_v28 = vor.u32 %v13657_v4, %v9785_v7  ;;  %v10248_v31 = vor.u32 %v13779_v16, %v10247_v13  ;;  %v13730_v4 = vld [vmem:[%s21993_s2 + $0x26c] sm:$0xf0]  ;;  %v13722_v7 = vld [vmem:[%s21993_s2 + $0x234] sm:$0xf]  ;;  %v13723_v16 = vld [vmem:[%s21993_s2 + $0x23c] sm:$0xf] }
 0x119   :  { %2472 = vmatpush.bf16.msra.mxu0 %v9904_v22  ;;  %2486 = vmatpush.bf16.msra.mxu1 %v9908_v41  ;;  %v10252_v22 = vor.u32 %v13771_v21, %v10249_v24  ;;  %v10183_v41 = vld [vmem:[%s21993_s2 + $0x338] sm:$0xf]  ;;  %v10048_v21 = vor.u32 %v13730_v4, %v10047_v3  ;;  %v16620_v24 = vpop.f32.mrf.mxu3  ;;  %v9920_v3 = vor.u32 %v13698_v55, %v9919_v53  ;;  %v13810_v53 = vld [vmem:[%s21995_s5 + $0xec] sm:$0xf0]  ;;  %v10495_v55 = vld [vmem:[%s21995_s5 + $0x1e0] sm:$0xf] }
 0x11a   :  { %2500 = vmatpush.bf16.msra.mxu2 %v9912_v42  ;;  %v13763_v42 = vld [vmem:[%s21993_s2 + $0x374] sm:$0xf0]  ;;  %22030 = vst [vmem:[#allocation20_spill] sm:$0xff] %v16620_v24 }
 0x11b   :  { %2514 = vmatpush.bf16.msra.mxu3 %v9916_v47  ;;  %v10176_v47 = vor.u32 %v13762_v36, %v10175_v34  ;;  %v10184_v51 = vor.u32 %v13763_v42, %v10183_v41  ;;  %v13714_v34 = vld [vmem:[%s21993_s2 + $0x1ec] sm:$0xf0]  ;;  %v13715_v41 = vld [vmem:[%s21993_s2 + $0x1f4] sm:$0xf0]  ;;  %v13707_v42 = vld [vmem:[%s21993_s2 + $0x1bc] sm:$0xf] }
 0x11c   :  { %v9992_v52 = vor.u32 %v13715_v41, %v9991_v40  ;;  %v9793_v40 = vld [vmem:[%s21993_s2 + $0x70] sm:$0xf0]  ;;  %v9799_v41 = vld [vmem:[%s21993_s2 + $0x38] sm:$0xf] }
 0x11d   :  { %2473 = vmatpush.bf16.msra.mxu0 %v9840_v58  ;;  %2487 = vmatpush.bf16.msra.mxu1 %v9844_v6  ;;  %v10188_v58 = vor.u32 %v13755_v35, %v10185_v44  ;;  %v13747_v6 = vld [vmem:[%s21993_s2 + $0x2f4] sm:$0xf0]  ;;  %v9993_v35 = vld [vmem:[%s21993_s2 + $0x1f8] sm:$0xf0]  ;;  %v16651_v44 = vld [vmem:[%s21992_s4] sm:$0xf] }
 0x11e   :  { %2501 = vmatpush.bf16.msra.mxu2 %v9848_v60  ;;  %v13739_v60 = vld [vmem:[%s21993_s2 + $0x2bc] sm:$0xf]  ;;  %22032 = vst [vmem:[#allocation22_spill] sm:$0xff] %v16651_v44  ;;  %v9996_v59 = vor.u32 %v13707_v42, %v9993_v35  ;;  %v13667_v35 = vld [vmem:[%s21993_s2 + $0x74] sm:$0xf0] }
 0x11f   :  { %2515 = vmatpush.bf16.msra.mxu3 %v9852_v1  ;;  %v10120_v1 = vor.u32 %v13747_v6, %v10119_v32  ;;  %v10124_v8 = vor.u32 %v13739_v60, %v10121_v61  ;;  %v9921_v32 = vld [vmem:[%s21993_s2 + $0x170] sm:$0xf0]  ;;  %v9927_v6 = vld [vmem:[%s21993_s2 + $0x138] sm:$0xf] }
 0x120   :  { %v13699_v60 = vld [vmem:[%s21993_s2 + $0x174] sm:$0xf0] }
 0x121   :  { %2474 = vmatpush.bf16.msra.mxu0 %v9776_v11  ;;  %2488 = vmatpush.bf16.msra.mxu1 %v9780_v17  ;;  %v13731_v11 = vld [vmem:[%s21993_s2 + $0x274] sm:$0xf0]  ;;  %v1472_v13 = vpop.f32.mrf.mxu0  ;;  %v10057_v17 = vld [vmem:[%s21993_s2 + $0x278] sm:$0xf0] }
 0x122   :  { %2502 = vmatpush.bf16.msra.mxu2 %v9784_v20  ;;  %v1473_v20 = vadd.f32 %v1472_v13, %v16472_v45  ;;  %v13706_v45 = vld [vmem:[%s21993_s2 + $0x1b4] sm:$0xf]  ;;  %v10060_v36 = vor.u32 %v13723_v16, %v10057_v17 }
 0x123   :  { %2516 = vmatpush.bf16.msra.mxu3 %v9788_v28  ;;  %v10052_v28 = vor.u32 %v13722_v7, %v10049_v9  ;;  %v9855_v9 = vld [vmem:[%s21993_s2 + $0xb0] sm:$0xf]  ;;  %v9857_v17 = vld [vmem:[%s21993_s2 + $0xf0] sm:$0xf0] }
 0x124   :  { %2475 = vmatmul.bf16.vlgmr.msra.gmra.mxu0 %v16119_v2  ;;  %2489 = vmatmul.bf16.vlgmr.msra.gmra.mxu1 %v16119_v2 }
 0x125   :  { %2523 = vmatpush.bf16.msrb.mxu0 %v10240_v29  ;;  %2537 = vmatpush.bf16.msrb.mxu1 %v10244_v30  ;;  %v10056_v29 = vor.u32 %v13731_v11, %v10055_v10  ;;  %v1486_v30 = vpop.f32.mrf.mxu1  ;;  %v13682_v10 = vld [vmem:[%s21993_s2 + $0xec] sm:$0xf0]  ;;  %v13674_v11 = vld [vmem:[%s21993_s2 + $0xb4] sm:$0xf] }
 0x126   :  { %2551 = vmatpush.bf16.msrb.mxu2 %v10248_v31  ;;  %2517 = vmatmul.bf16.vlgmr.msra.gmra.mxu3 %v16119_v2  ;;  %v9983_v31 = vld [vmem:[%s21993_s2 + $0x1b0] sm:$0xf]  ;;  %v16631_v38 = vadd.f32 %v1486_v30, %v1473_v20  ;;  %v9863_v20 = vld [vmem:[%s21993_s2 + $0xb8] sm:$0xf]  ;;  %v9856_v30 = vor.u32 %v13682_v10, %v9855_v9  ;;  %v10479_v10 = vld [vmem:[%s21995_s5 + $0x1c0] sm:$0xf] }
 0x127   :  { %2565 = vmatpush.bf16.msrb.mxu3 %v10252_v22  ;;  %2503 = vmatmul.bf16.vlgmr.msra.gmra.mxu2 %v16119_v2  ;;  %v9985_v22 = vld [vmem:[%s21993_s2 + $0x1f0] sm:$0xf0]  ;;  %v13806_v9 = vld [vmem:[%s21995_s5 + $0xcc] sm:$0xf0] }
 0x128   :  { %22031 = vst [vmem:[#allocation21_spill] sm:$0xff] %v16631_v38 }
 0x129   :  { %2524 = vmatpush.bf16.msrb.mxu0 %v10176_v47  ;;  %2538 = vmatpush.bf16.msrb.mxu1 %v10180_v50  ;;  %v22003_v47 = vperm.slane %v16651_v44, 3  ;;  %v9984_v50 = vor.u32 %v13714_v34, %v9983_v31  ;;  %v1514_v4 = vpop.f32.mrf.mxu3  ;;  %v9791_v31 = vld [vmem:[%s21993_s2 + $0x30] sm:$0xf] }
 0x12a   :  { %2552 = vmatpush.bf16.msrb.mxu2 %v10184_v51  ;;  %v9988_v51 = vor.u32 %v13706_v45, %v9985_v22  ;;  %v1500_v61 = vpop.f32.mrf.mxu2  ;;  %v13666_v34 = vld [vmem:[%s21993_s2 + $0x6c] sm:$0xf0]  ;;  %v9860_v45 = vor.u32 %v13674_v11, %v9857_v17  ;;  %v13658_v22 = vld [vmem:[%s21993_s2 + $0x34] sm:$0xf]  ;;  %v10607_v17 = vld [vmem:[%s21995_s5 + $0x2c0] sm:$0xf] }
 0x12b   :  { %2566 = vmatpush.bf16.msrb.mxu3 %v10188_v58  ;;  %v13690_v58 = vld [vmem:[%s21993_s2 + $0x134] sm:$0xf] }
 0x12c   :  { %v9924_v7 = vor.u32 %v13690_v58, %v9921_v32  ;;  %v9792_v58 = vor.u32 %v13666_v34, %v9791_v31  ;;  %v10623_v32 = vld [vmem:[%s21995_s5 + $0x2e0] sm:$0xf] }
 0x12d   :  { %2525 = vmatpush.bf16.msrb.mxu0 %v10112_v62  ;;  %2539 = vmatpush.bf16.msrb.mxu1 %v10116_v0  ;;  %v13691_v62 = vld [vmem:[%s21993_s2 + $0x13c] sm:$0xf]  ;;  %v16780_v31 = vpop.f32.mrf.mxu1 }
 0x12e   :  { %2553 = vmatpush.bf16.msrb.mxu2 %v10120_v1  ;;  %v9929_v0 = vld [vmem:[%s21993_s2 + $0x178] sm:$0xf0]  ;;  %v1501_v1 = vadd.f32 %v1500_v61, %v22003_v47  ;;  %v9800_v61 = vor.u32 %v13667_v35, %v9799_v41  ;;  %22034 = vst [vmem:[#allocation24_spill] sm:$0xff] %v16780_v31  ;;  %v10591_v35 = vld [vmem:[%s21995_s5 + $0x2a0] sm:$0xf] }
 0x12f   :  { %2567 = vmatpush.bf16.msrb.mxu3 %v10124_v8  ;;  %v9928_v8 = vor.u32 %v13699_v60, %v9927_v6  ;;  %v9932_v16 = vor.u32 %v13691_v62, %v9929_v0  ;;  %v13874_v6 = vld [vmem:[%s21995_s5 + $0x2ec] sm:$0xf0]  ;;  %v9796_v60 = vor.u32 %v13658_v22, %v9793_v40  ;;  %v10751_v62 = vld [vmem:[%s21995_s5 + $0x3e0] sm:$0xf] }
 0x130   :  { %v16689_v13 = vadd.f32 %v1514_v4, %v1501_v1  ;;  %v13906_v0 = vld [vmem:[%s21995_s5 + $0x3ec] sm:$0xf0]  ;;  %v10463_v40 = vld [vmem:[%s21995_s5 + $0x1a0] sm:$0xf] }
 0x131   :  { %2526 = vmatpush.bf16.msrb.mxu0 %v10048_v21  ;;  %2540 = vmatpush.bf16.msrb.mxu1 %v10052_v28  ;;  %v13683_v21 = vld [vmem:[%s21993_s2 + $0xf4] sm:$0xf0]  ;;  %v13675_v28 = vld [vmem:[%s21993_s2 + $0xbc] sm:$0xf]  ;;  %v10752_v11 = vor.u32 %v13906_v0, %v10751_v62  ;;  %v13802_v22 = vld [vmem:[%s21995_s5 + $0xac] sm:$0xf0] }
 0x132   :  { %2554 = vmatpush.bf16.msrb.mxu2 %v10056_v29  ;;  %v9865_v29 = vld [vmem:[%s21993_s2 + $0xf8] sm:$0xf0]  ;;  %v13830_v62 = vld [vmem:[%s21995_s5 + $0x18c] sm:$0xf0]  ;;  %v10575_v0 = vld [vmem:[%s21995_s5 + $0x280] sm:$0xf] }
 0x133   :  { %2568 = vmatpush.bf16.msrb.mxu3 %v10060_v36  ;;  %v9864_v36 = vor.u32 %v13683_v21, %v9863_v20  ;;  %v9868_v42 = vor.u32 %v13675_v28, %v9865_v29  ;;  %v13870_v20 = vld [vmem:[%s21995_s5 + $0x2cc] sm:$0xf0]  ;;  %v16772_v21 = vpop.f32.mrf.mxu0  ;;  %v10735_v28 = vld [vmem:[%s21995_s5 + $0x3c0] sm:$0xf] }
 0x134   :  { %22033 = vst [vmem:[#allocation23_spill] sm:$0xff] %v16772_v21  ;;  %v13902_v29 = vld [vmem:[%s21995_s5 + $0x3cc] sm:$0xf0] }
 0x135   :  { %2527 = vmatpush.bf16.msrb.mxu0 %v9984_v50  ;;  %2541 = vmatpush.bf16.msrb.mxu1 %v9988_v51  ;;  %v13659_v50 = vld [vmem:[%s21993_s2 + $0x3c] sm:$0xf]  ;;  %v10736_v41 = vor.u32 %v13902_v29, %v10735_v28  ;;  %v10431_v28 = vld [vmem:[%s21995_s5 + $0x160] sm:$0xf] }
 0x136   :  { %2555 = vmatpush.bf16.msrb.mxu2 %v9992_v52  ;;  %v9801_v51 = vld [vmem:[%s21993_s2 + $0x78] sm:$0xf0]  ;;  %v10367_v52 = vld [vmem:[%s21995_s5 + $0xe0] sm:$0xf] }
 0x137   :  { %2569 = vmatpush.bf16.msrb.mxu3 %v9996_v59  ;;  %v13842_v59 = vld [vmem:[%s21995_s5 + $0x1ec] sm:$0xf0]  ;;  %v9804_v1 = vor.u32 %v13659_v50, %v9801_v51  ;;  %v10719_v51 = vld [vmem:[%s21995_s5 + $0x3a0] sm:$0xf] }
 0x138   :  { %v10496_v4 = vor.u32 %v13842_v59, %v10495_v55  ;;  %v13866_v50 = vld [vmem:[%s21995_s5 + $0x2ac] sm:$0xf0]  ;;  %v16810_v55 = vpop.f32.mrf.mxu2 }
 0x139   :  { %2528 = vmatpush.bf16.msrb.mxu0 %v9920_v3  ;;  %2542 = vmatpush.bf16.msrb.mxu1 %v9924_v7  ;;  %v10368_v3 = vor.u32 %v13810_v53, %v10367_v52  ;;  %v10624_v7 = vor.u32 %v13874_v6, %v10623_v32  ;;  %v13898_v52 = vld [vmem:[%s21995_s5 + $0x3ac] sm:$0xf0]  ;;  %22035 = vst [vmem:[#allocation25_spill] sm:$0xff] %v16810_v55  ;;  %v10319_v32 = vld [vmem:[%s21995_s5 + $0x80] sm:$0xf] }
 0x13a   :  { %2556 = vmatpush.bf16.msrb.mxu2 %v9928_v8  ;;  %v10351_v8 = vld [vmem:[%s21995_s5 + $0xc0] sm:$0xf]  ;;  %v10592_v59 = vor.u32 %v13866_v50, %v10591_v35  ;;  %v13798_v6 = vld [vmem:[%s21995_s5 + $0x8c] sm:$0xf0] }
 0x13b   :  { %2570 = vmatpush.bf16.msrb.mxu3 %v9932_v16  ;;  %v13838_v16 = vld [vmem:[%s21995_s5 + $0x1cc] sm:$0xf0]  ;;  %v10287_v35 = vld [vmem:[%s21995_s5 + $0x40] sm:$0xf] }
 0x13c   :  { %v10480_v34 = vor.u32 %v13838_v16, %v10479_v10  ;;  %v13790_v50 = vld [vmem:[%s21995_s5 + $0x4c] sm:$0xf0] }
 0x13d   :  { %2529 = vmatpush.bf16.msrb.mxu0 %v9856_v30  ;;  %2543 = vmatpush.bf16.msrb.mxu1 %v9860_v45  ;;  %v10352_v30 = vor.u32 %v13806_v9, %v10351_v8  ;;  %v10608_v45 = vor.u32 %v13870_v20, %v10607_v17  ;;  %v10320_v9 = vor.u32 %v13798_v6, %v10319_v32  ;;  %v10303_v17 = vld [vmem:[%s21995_s5 + $0x60] sm:$0xf]  ;;  %v13794_v20 = vld [vmem:[%s21995_s5 + $0x6c] sm:$0xf0] }
 0x13e   :  { %2557 = vmatpush.bf16.msrb.mxu2 %v9864_v36  ;;  %v10335_v36 = vld [vmem:[%s21995_s5 + $0xa0] sm:$0xf]  ;;  %v13854_v32 = vld [vmem:[%s21995_s5 + $0x24c] sm:$0xf0] }
 0x13f   :  { %2571 = vmatpush.bf16.msrb.mxu3 %v9868_v42  ;;  %v13834_v42 = vld [vmem:[%s21995_s5 + $0x1ac] sm:$0xf0]  ;;  %v10336_v53 = vor.u32 %v13802_v22, %v10335_v36  ;;  %v10687_v36 = vld [vmem:[%s21995_s5 + $0x360] sm:$0xf] }
 0x140   :  { %v13890_v22 = vld [vmem:[%s21995_s5 + $0x36c] sm:$0xf0] }
 0x141   :  { %2530 = vmatpush.bf16.msrb.mxu0 %v9792_v58  ;;  %2544 = vmatpush.bf16.msrb.mxu1 %v9796_v60  ;;  %v10464_v58 = vor.u32 %v13834_v42, %v10463_v40  ;;  %v10720_v60 = vor.u32 %v13898_v52, %v10719_v51  ;;  %v10304_v40 = vor.u32 %v13794_v20, %v10303_v17  ;;  %v10415_v51 = vld [vmem:[%s21995_s5 + $0x140] sm:$0xf]  ;;  %v13850_v17 = vld [vmem:[%s21995_s5 + $0x22c] sm:$0xf0] }
 0x142   :  { %2558 = vmatpush.bf16.msrb.mxu2 %v9800_v61  ;;  %v16821_v61 = vpop.f32.mrf.mxu3  ;;  %v10655_v20 = vld [vmem:[%s21995_s5 + $0x320] sm:$0xf] }
 0x143   :  { %2572 = vmatpush.bf16.msrb.mxu3 %v9804_v1  ;;  %22036 = vst [vmem:[#allocation26_spill] sm:$0xff] %v16821_v61  ;;  %v13862_v1 = vld [vmem:[%s21995_s5 + $0x28c] sm:$0xf0] }
 0x144   :  { %2531 = vmatmul.bf16.vlgmr.msrb.gmra.mxu0 %v16119_v2  ;;  %2545 = vmatmul.bf16.vlgmr.msrb.gmra.mxu1 %v16119_v2  ;;  %v10576_v16 = vor.u32 %v13862_v1, %v10575_v0  ;;  %v10288_v0 = vor.u32 %v13790_v50, %v10287_v35  ;;  %v10639_v35 = vld [vmem:[%s21995_s5 + $0x300] sm:$0xf]  ;;  %v13878_v50 = vld [vmem:[%s21995_s5 + $0x30c] sm:$0xf0] }
 0x145   :  { %5709 = vmatpush.bf16.msra.mxu0 %v10368_v3  ;;  %5723 = vmatpush.bf16.msra.mxu1 %v10496_v4  ;;  %v1528_v3 = vpop.f32.mrf.mxu0  ;;  %v10703_v4 = vld [vmem:[%s21995_s5 + $0x380] sm:$0xf] }
 0x146   :  { %5737 = vmatpush.bf16.msra.mxu2 %v10624_v7  ;;  %2573 = vmatmul.bf16.vlgmr.msrb.gmra.mxu3 %v16119_v2  ;;  %v13894_v7 = vld [vmem:[%s21995_s5 + $0x38c] sm:$0xf0]  ;;  %v1529_v8 = vadd.f32 %v1528_v3, %v16689_v13 }
 0x147   :  { %5751 = vmatpush.bf16.msra.mxu3 %v10752_v11  ;;  %2559 = vmatmul.bf16.vlgmr.msrb.gmra.mxu2 %v16119_v2  ;;  %v10447_v2 = vld [vmem:[%s21995_s5 + $0x180] sm:$0xf]  ;;  %v1542_v11 = vpop.f32.mrf.mxu1  ;;  %v10704_v29 = vor.u32 %v13894_v7, %v10703_v4 }
 0x148   :  { %v10448_v10 = vor.u32 %v13830_v62, %v10447_v2  ;;  %v1543_v13 = vadd.f32 %v1542_v11, %v1529_v8  ;;  %v10671_v2 = vld [vmem:[%s21995_s5 + $0x340] sm:$0xf]  ;;  %v13786_v8 = vld [vmem:[%s21995_s5 + $0x2c] sm:$0xf0] }
 0x149   :  { %5710 = vmatpush.bf16.msra.mxu0 %v10352_v30  ;;  %5724 = vmatpush.bf16.msra.mxu1 %v10480_v34  ;;  %v13826_v30 = vld [vmem:[%s21995_s5 + $0x16c] sm:$0xf0]  ;;  %v10559_v34 = vld [vmem:[%s21995_s5 + $0x260] sm:$0xf] }
 0x14a   :  { %5738 = vmatpush.bf16.msra.mxu2 %v10608_v45  ;;  %v13858_v45 = vld [vmem:[%s21995_s5 + $0x26c] sm:$0xf0]  ;;  %v1556_v52 = vpop.f32.mrf.mxu2  ;;  %v1570_v62 = vpop.f32.mrf.mxu3  ;;  %v10271_v7 = vld [vmem:[%s21995_s5 + $0x20] sm:$0xf] }
 0x14b   :  { %5752 = vmatpush.bf16.msra.mxu3 %v10736_v41  ;;  %v10432_v41 = vor.u32 %v13826_v30, %v10431_v28  ;;  %v10560_v42 = vor.u32 %v13858_v45, %v10559_v34  ;;  %v1557_v6 = vadd.f32 %v1556_v52, %v1543_v13  ;;  %v13818_v11 = vld [vmem:[%s21995_s5 + $0x12c] sm:$0xf0]  ;;  %v10272_v13 = vor.u32 %v13786_v8, %v10271_v7 }
 0x14c   :  { %v13882_v28 = vld [vmem:[%s21995_s5 + $0x32c] sm:$0xf0] }
 0x14d   :  { %5711 = vmatpush.bf16.msra.mxu0 %v10336_v53  ;;  %5725 = vmatpush.bf16.msra.mxu1 %v10464_v58  ;;  %v10688_v53 = vor.u32 %v13890_v22, %v10687_v36  ;;  %v13822_v58 = vld [vmem:[%s21995_s5 + $0x14c] sm:$0xf0]  ;;  %v16887_v1 = vadd.f32 %v1570_v62, %v1557_v6  ;;  %v10383_v36 = vld [vmem:[%s21995_s5 + $0x100] sm:$0xf] }
 0x14e   :  { %5739 = vmatpush.bf16.msra.mxu2 %v10592_v59  ;;  %v10543_v59 = vld [vmem:[%s21995_s5 + $0x240] sm:$0xf]  ;;  %v10416_v3 = vor.u32 %v13822_v58, %v10415_v51  ;;  %v13782_v30 = vld [vmem:[%s21995_s5 + $0xc] sm:$0xf0] }
 0x14f   :  { %5753 = vmatpush.bf16.msra.mxu3 %v10720_v60  ;;  %v13886_v60 = vld [vmem:[%s21995_s5 + $0x34c] sm:$0xf0]  ;;  %22037 = vst [vmem:[#allocation27_spill] sm:$0xff] %v16887_v1  ;;  %v10544_v4 = vor.u32 %v13854_v32, %v10543_v59  ;;  %v10879_v51 = vld [vmem:[%s21995_s5 + $0x4e0] sm:$0xf] }
 0x150   :  { %v13814_v22 = vld [vmem:[%s21995_s5 + $0x10c] sm:$0xf0]  ;;  %v11135_v32 = vld [vmem:[%s21995_s5 + $0x6e0] sm:$0xf] }
 0x151   :  { %5712 = vmatpush.bf16.msra.mxu0 %v10320_v9  ;;  %5726 = vmatpush.bf16.msra.mxu1 %v10448_v10  ;;  %v10399_v9 = vld [vmem:[%s21995_s5 + $0x120] sm:$0xf]  ;;  %v10672_v10 = vor.u32 %v13886_v60, %v10671_v2  ;;  %v13938_v52 = vld [vmem:[%s21995_s5 + $0x4ec] sm:$0xf0]  ;;  %v10384_v2 = vor.u32 %v13814_v22, %v10383_v36 }
 0x152   :  { %5740 = vmatpush.bf16.msra.mxu2 %v10576_v16  ;;  %v10527_v16 = vld [vmem:[%s21995_s5 + $0x220] sm:$0xf]  ;;  %v10400_v34 = vor.u32 %v13818_v11, %v10399_v9  ;;  %v13970_v59 = vld [vmem:[%s21995_s5 + $0x5ec] sm:$0xf0] }
 0x153   :  { %5754 = vmatpush.bf16.msra.mxu3 %v10704_v29  ;;  %v10255_v29 = vld [vmem:[%s21995_s5] sm:$0xf]  ;;  %v10528_v45 = vor.u32 %v13850_v17, %v10527_v16  ;;  %v14002_v6 = vld [vmem:[%s21995_s5 + $0x6ec] sm:$0xf0] }
 0x154   :  { %v10256_v58 = vor.u32 %v13782_v30, %v10255_v29  ;;  %v11263_v62 = vld [vmem:[%s21995_s5 + $0x7e0] sm:$0xf]  ;;  %v11136_v8 = vor.u32 %v14002_v6, %v11135_v32  ;;  %v13966_v17 = vld [vmem:[%s21995_s5 + $0x5cc] sm:$0xf0] }
 0x155   :  { %5713 = vmatpush.bf16.msra.mxu0 %v10304_v40  ;;  %5727 = vmatpush.bf16.msra.mxu1 %v10432_v41  ;;  %v10511_v40 = vld [vmem:[%s21995_s5 + $0x200] sm:$0xf]  ;;  %v10656_v41 = vor.u32 %v13882_v28, %v10655_v20  ;;  %v13998_v28 = vld [vmem:[%s21995_s5 + $0x6cc] sm:$0xf0] }
 0x156   :  { %5741 = vmatpush.bf16.msra.mxu2 %v10560_v42  ;;  %v13846_v42 = vld [vmem:[%s21995_s5 + $0x20c] sm:$0xf0]  ;;  %v10863_v9 = vld [vmem:[%s21995_s5 + $0x4c0] sm:$0xf] }
 0x157   :  { %5755 = vmatpush.bf16.msra.mxu3 %v10688_v53  ;;  %v11007_v53 = vld [vmem:[%s21995_s5 + $0x5e0] sm:$0xf]  ;;  %v10512_v60 = vor.u32 %v13846_v42, %v10511_v40  ;;  %v14030_v30 = vld [vmem:[%s21995_s5 + $0x7cc] sm:$0xf0] }
 0x158   :  { %v11008_v7 = vor.u32 %v13970_v59, %v11007_v53  ;;  %v10991_v11 = vld [vmem:[%s21995_s5 + $0x5c0] sm:$0xf] }
 0x159   :  { %5714 = vmatpush.bf16.msra.mxu0 %v10288_v0  ;;  %5728 = vmatpush.bf16.msra.mxu1 %v10416_v3  ;;  %v14034_v0 = vld [vmem:[%s21995_s5 + $0x7ec] sm:$0xf0]  ;;  %v10640_v3 = vor.u32 %v13878_v50, %v10639_v35  ;;  %v11119_v20 = vld [vmem:[%s21995_s5 + $0x6c0] sm:$0xf]  ;;  %v10992_v36 = vor.u32 %v13966_v17, %v10991_v11 }
 0x15a   :  { %5742 = vmatpush.bf16.msra.mxu2 %v10544_v4  ;;  %v10880_v4 = vor.u32 %v13938_v52, %v10879_v51  ;;  %v11264_v16 = vor.u32 %v14034_v0, %v11263_v62  ;;  %v11247_v29 = vld [vmem:[%s21995_s5 + $0x7c0] sm:$0xf]  ;;  %v11120_v22 = vor.u32 %v13998_v28, %v11119_v20  ;;  %v13962_v50 = vld [vmem:[%s21995_s5 + $0x5ac] sm:$0xf0]  ;;  %v17022_v0 = vpop.f32.mrf.mxu2 }
 0x15b   :  { %5756 = vmatpush.bf16.msra.mxu3 %v10672_v10  ;;  %v13934_v10 = vld [vmem:[%s21995_s5 + $0x4cc] sm:$0xf0]  ;;  %v10847_v40 = vld [vmem:[%s21995_s5 + $0x4a0] sm:$0xf]  ;;  %v11248_v35 = vor.u32 %v14030_v30, %v11247_v29  ;;  %22040 = vst [vmem:[#allocation30_spill] sm:$0xff] %v17022_v0 }
 0x15c   :  { %v10975_v42 = vld [vmem:[%s21995_s5 + $0x5a0] sm:$0xf]  ;;  %v13994_v52 = vld [vmem:[%s21995_s5 + $0x6ac] sm:$0xf0] }
 0x15d   :  { %5715 = vmatpush.bf16.msra.mxu0 %v10272_v13  ;;  %5729 = vmatpush.bf16.msra.mxu1 %v10400_v34  ;;  %v16979_v13 = vpop.f32.mrf.mxu0  ;;  %v16987_v34 = vpop.f32.mrf.mxu1  ;;  %v11103_v51 = vld [vmem:[%s21995_s5 + $0x6a0] sm:$0xf]  ;;  %v10976_v32 = vor.u32 %v13962_v50, %v10975_v42  ;;  %v13986_v42 = vld [vmem:[%s21995_s5 + $0x66c] sm:$0xf0] }
 0x15e   :  { %5743 = vmatpush.bf16.msra.mxu2 %v10528_v45  ;;  %22038 = vst [vmem:[#allocation28_spill] sm:$0xff] %v16979_v13  ;;  %v10864_v45 = vor.u32 %v13934_v10, %v10863_v9  ;;  %v11231_v53 = vld [vmem:[%s21995_s5 + $0x7a0] sm:$0xf]  ;;  %v11104_v6 = vor.u32 %v13994_v52, %v11103_v51  ;;  %v17033_v9 = vpop.f32.mrf.mxu3  ;;  %v14018_v50 = vld [vmem:[%s21995_s5 + $0x76c] sm:$0xf0] }
 0x15f   :  { %5757 = vmatpush.bf16.msra.mxu3 %v10656_v41  ;;  %22039 = vst [vmem:[#allocation29_spill] sm:$0xff] %v16987_v34  ;;  %v13930_v41 = vld [vmem:[%s21995_s5 + $0x4ac] sm:$0xf0]  ;;  %v10959_v62 = vld [vmem:[%s21995_s5 + $0x580] sm:$0xf] }
 0x160   :  { %v10848_v59 = vor.u32 %v13930_v41, %v10847_v40  ;;  %22041 = vst [vmem:[#allocation31_spill] sm:$0xff] %v17033_v9  ;;  %v11215_v11 = vld [vmem:[%s21995_s5 + $0x780] sm:$0xf]  ;;  %v13954_v40 = vld [vmem:[%s21995_s5 + $0x56c] sm:$0xf0] }
 0x161   :  { %5716 = vmatpush.bf16.msra.mxu0 %v10256_v58  ;;  %5730 = vmatpush.bf16.msra.mxu1 %v10384_v2  ;;  %v14026_v58 = vld [vmem:[%s21995_s5 + $0x7ac] sm:$0xf0]  ;;  %v10831_v2 = vld [vmem:[%s21995_s5 + $0x480] sm:$0xf] }
 0x162   :  { %5744 = vmatpush.bf16.msra.mxu2 %v10512_v60  ;;  %v13926_v60 = vld [vmem:[%s21995_s5 + $0x48c] sm:$0xf0]  ;;  %v10815_v30 = vld [vmem:[%s21995_s5 + $0x460] sm:$0xf] }
 0x163   :  { %5758 = vmatpush.bf16.msra.mxu3 %v10640_v3  ;;  %v11232_v3 = vor.u32 %v14026_v58, %v11231_v53  ;;  %v10832_v20 = vor.u32 %v13926_v60, %v10831_v2  ;;  %v11071_v41 = vld [vmem:[%s21995_s5 + $0x660] sm:$0xf] }
 0x164   :  { %v10799_v52 = vld [vmem:[%s21995_s5 + $0x440] sm:$0xf]  ;;  %v11072_v58 = vor.u32 %v13986_v42, %v11071_v41 }
 0x165   :  { %5765 = vmatpush.bf16.msrb.mxu0 %v10880_v4  ;;  %5779 = vmatpush.bf16.msrb.mxu1 %v11008_v7  ;;  %v13958_v4 = vld [vmem:[%s21995_s5 + $0x58c] sm:$0xf0]  ;;  %v11087_v7 = vld [vmem:[%s21995_s5 + $0x680] sm:$0xf]  ;;  %v2364_v10 = vpop.f32.mrf.mxu0  ;;  %v2378_v17 = vpop.f32.mrf.mxu1 }
 0x166   :  { %5793 = vmatpush.bf16.msrb.mxu2 %v11136_v8  ;;  %v13990_v8 = vld [vmem:[%s21995_s5 + $0x68c] sm:$0xf0]  ;;  %v10960_v28 = vor.u32 %v13958_v4, %v10959_v62  ;;  %v2579_v2 = vmax.f32 %v2364_v10, 0.0  ;;  %v11183_v10 = vld [vmem:[%s21995_s5 + $0x740] sm:$0xf] }
 0x167   :  { %5807 = vmatpush.bf16.msrb.mxu3 %v11264_v16  ;;  %v14022_v16 = vld [vmem:[%s21995_s5 + $0x78c] sm:$0xf0]  ;;  %v11088_v29 = vor.u32 %v13990_v8, %v11087_v7  ;;  %v2580_v7 = vmax.f32 %v2378_v17, 0.0 }
 0x168   :  { %v13982_v4 = vld [vmem:[%s21995_s5 + $0x64c] sm:$0xf0] }
 0x169   :  { %5766 = vmatpush.bf16.msrb.mxu0 %v10864_v45  ;;  %5780 = vmatpush.bf16.msrb.mxu1 %v10992_v36  ;;  %v13922_v45 = vld [vmem:[%s21995_s5 + $0x46c] sm:$0xf0]  ;;  %v10943_v36 = vld [vmem:[%s21995_s5 + $0x560] sm:$0xf]  ;;  %v17085_v8 = vpop.f32.mrf.mxu3 }
 0x16a   :  { %5794 = vmatpush.bf16.msrb.mxu2 %v11120_v22  ;;  %v11216_v22 = vor.u32 %v14022_v16, %v11215_v11  ;;  %v10816_v51 = vor.u32 %v13922_v45, %v10815_v30  ;;  %v10944_v53 = vor.u32 %v13954_v40, %v10943_v36  ;;  %v17077_v60 = vpop.f32.mrf.mxu2  ;;  %v14014_v16 = vld [vmem:[%s21995_s5 + $0x74c] sm:$0xf0]  ;;  %v10783_v30 = vld [vmem:[%s21995_s5 + $0x420] sm:$0xf] }
 0x16b   :  { %5808 = vmatpush.bf16.msrb.mxu3 %v11248_v35  ;;  %v11199_v35 = vld [vmem:[%s21995_s5 + $0x760] sm:$0xf]  ;;  %v11184_v42 = vor.u32 %v14014_v16, %v11183_v10 }
 0x16c   :  { %v11200_v62 = vor.u32 %v14018_v50, %v11199_v35  ;;  %v10911_v40 = vld [vmem:[%s21995_s5 + $0x520] sm:$0xf]  ;;  %v13946_v35 = vld [vmem:[%s21995_s5 + $0x52c] sm:$0xf0] }
 0x16d   :  { %5767 = vmatpush.bf16.msrb.mxu0 %v10848_v59  ;;  %5781 = vmatpush.bf16.msrb.mxu1 %v10976_v32  ;;  %v13918_v59 = vld [vmem:[%s21995_s5 + $0x44c] sm:$0xf0]  ;;  %v10927_v32 = vld [vmem:[%s21995_s5 + $0x540] sm:$0xf]  ;;  %v2366_v11 = vpop.f32.mrf.mxu0 }
 0x16e   :  { %5795 = vmatpush.bf16.msrb.mxu2 %v11104_v6  ;;  %v13950_v6 = vld [vmem:[%s21995_s5 + $0x54c] sm:$0xf0]  ;;  %v11039_v50 = vld [vmem:[%s21995_s5 + $0x620] sm:$0xf] }
 0x16f   :  { %5809 = vmatpush.bf16.msrb.mxu3 %v11232_v3  ;;  %v11055_v3 = vld [vmem:[%s21995_s5 + $0x640] sm:$0xf]  ;;  %v10928_v45 = vor.u32 %v13950_v6, %v10927_v32  ;;  %v13910_v6 = vld [vmem:[%s21995_s5 + $0x40c] sm:$0xf0] }
 0x170   :  { %v11056_v36 = vor.u32 %v13982_v4, %v11055_v3  ;;  %v10912_v3 = vor.u32 %v13946_v35, %v10911_v40  ;;  %v11151_v10 = vld [vmem:[%s21995_s5 + $0x700] sm:$0xf]  ;;  %v14098_v40 = vld [vmem:[%s21995_s5 + $0x9ec] sm:$0xf0] }
 0x171   :  { %5768 = vmatpush.bf16.msrb.mxu0 %v10832_v20  ;;  %5782 = vmatpush.bf16.msrb.mxu1 %v10960_v28  ;;  %v2595_v20 = vmax.f32 %v2366_v11, 0.0  ;;  %v2380_v28 = vpop.f32.mrf.mxu1  ;;  %v13974_v11 = vld [vmem:[%s21995_s5 + $0x60c] sm:$0xf0] }
 0x172   :  { %5796 = vmatpush.bf16.msrb.mxu2 %v11088_v29  ;;  %v10800_v29 = vor.u32 %v13918_v59, %v10799_v52  ;;  %v2596_v17 = vmax.f32 %v2380_v28, 0.0  ;;  %v10767_v59 = vld [vmem:[%s21995_s5 + $0x400] sm:$0xf]  ;;  %v2394_v16 = vpop.f32.mrf.mxu2  ;;  %v14006_v28 = vld [vmem:[%s21995_s5 + $0x70c] sm:$0xf0] }
 0x173   :  { %5810 = vmatpush.bf16.msrb.mxu3 %v11216_v22  ;;  %v13914_v22 = vld [vmem:[%s21995_s5 + $0x42c] sm:$0xf0]  ;;  %v17102_v41 = vpack.c.bf16 %v2595_v20, %v2579_v2  ;;  %v10895_v2 = vld [vmem:[%s21995_s5 + $0x500] sm:$0xf] }
 0x174   :  { %v17113_v52 = vpack.c.bf16 %v2596_v17, %v2580_v7  ;;  %v10784_v32 = vor.u32 %v13914_v22, %v10783_v30  ;;  %v11023_v7 = vld [vmem:[%s21995_s5 + $0x600] sm:$0xf]  ;;  %v14066_v30 = vld [vmem:[%s21995_s5 + $0x8ec] sm:$0xf0]  ;;  %v2581_v17 = vmax.f32 %v17077_v60, 0.0 }
 0x175   :  { %5769 = vmatpush.bf16.msrb.mxu0 %v10816_v51  ;;  %5783 = vmatpush.bf16.msrb.mxu1 %v10944_v53  ;;  %v13978_v51 = vld [vmem:[%s21995_s5 + $0x62c] sm:$0xf0]  ;;  %v11167_v53 = vld [vmem:[%s21995_s5 + $0x720] sm:$0xf] }
 0x176   :  { %5797 = vmatpush.bf16.msrb.mxu2 %v11072_v58  ;;  %v14010_v58 = vld [vmem:[%s21995_s5 + $0x72c] sm:$0xf0]  ;;  %v11040_v4 = vor.u32 %v13978_v51, %v11039_v50  ;;  %5717 = vmatmul.bf16.vlgmr.msra.gmra.mxu0 %v17102_v41  ;;  %v11519_v22 = vld [vmem:[%s21995_s5 + $0x9e0] sm:$0xf]  ;;  %v10768_v50 = vor.u32 %v13910_v6, %v10767_v59  ;;  %v11152_v6 = vor.u32 %v14006_v28, %v11151_v10 }
 0x177   :  { %5811 = vmatpush.bf16.msrb.mxu3 %v11200_v62  ;;  %v13942_v62 = vld [vmem:[%s21995_s5 + $0x50c] sm:$0xf0]  ;;  %v11168_v20 = vor.u32 %v14010_v58, %v11167_v53  ;;  %5731 = vmatmul.bf16.vlgmr.msra.gmra.mxu1 %v17113_v52  ;;  %v11647_v60 = vld [vmem:[%s21995_s5 + $0xae0] sm:$0xf]  ;;  %v11520_v47 = vor.u32 %v14098_v40, %v11519_v22 }
 0x178   :  { %v14130_v51 = vld [vmem:[%s21995_s5 + $0xaec] sm:$0xf0]  ;;  %v10896_v58 = vor.u32 %v13942_v62, %v10895_v2  ;;  %v11375_v2 = vld [vmem:[%s21995_s5 + $0x8c0] sm:$0xf] }
 0x179   :  { %5770 = vmatpush.bf16.msrb.mxu0 %v10800_v29  ;;  %5784 = vmatpush.bf16.msrb.mxu1 %v10928_v45  ;;  %v11391_v29 = vld [vmem:[%s21995_s5 + $0x8e0] sm:$0xf]  ;;  %v2597_v45 = vmax.f32 %v2394_v16, 0.0  ;;  %v11024_v16 = vor.u32 %v13974_v11, %v11023_v7  ;;  %v14162_v59 = vld [vmem:[%s21995_s5 + $0xbec] sm:$0xf0] }
 0x17a   :  { %5798 = vmatpush.bf16.msrb.mxu2 %v11056_v36  ;;  %v2408_v36 = vpop.f32.mrf.mxu3  ;;  %v14062_v62 = vld [vmem:[%s21995_s5 + $0x8cc] sm:$0xf0]  ;;  %v11631_v10 = vld [vmem:[%s21995_s5 + $0xac0] sm:$0xf] }
 0x17b   :  { %5812 = vmatpush.bf16.msrb.mxu3 %v11184_v42  ;;  %v2582_v42 = vmax.f32 %v17085_v8, 0.0  ;;  %v2598_v35 = vmax.f32 %v2408_v36, 0.0  ;;  %v17167_v53 = vpack.c.bf16 %v2597_v45, %v2581_v17  ;;  %v11775_v8 = vld [vmem:[%s21995_s5 + $0xbe0] sm:$0xf]  ;;  %v11392_v36 = vor.u32 %v14066_v30, %v11391_v29  ;;  %v14094_v11 = vld [vmem:[%s21995_s5 + $0x9cc] sm:$0xf0] }
 0x17c   :  { %v11776_v7 = vor.u32 %v14162_v59, %v11775_v8  ;;  %v11759_v28 = vld [vmem:[%s21995_s5 + $0xbc0] sm:$0xf]  ;;  %v14158_v29 = vld [vmem:[%s21995_s5 + $0xbcc] sm:$0xf0]  ;;  %v11376_v30 = vor.u32 %v14062_v62, %v11375_v2 }
 0x17d   :  { %5771 = vmatpush.bf16.msrb.mxu0 %v10784_v32  ;;  %5785 = vmatpush.bf16.msrb.mxu1 %v10912_v3  ;;  %v17175_v32 = vpack.c.bf16 %v2598_v35, %v2582_v42  ;;  %v11648_v3 = vor.u32 %v14130_v51, %v11647_v60  ;;  %v11359_v22 = vld [vmem:[%s21995_s5 + $0x8a0] sm:$0xf]  ;;  %v14058_v40 = vld [vmem:[%s21995_s5 + $0x8ac] sm:$0xf0]  ;;  %v11760_v35 = vor.u32 %v14158_v29, %v11759_v28 }
 0x17e   :  { %5799 = vmatpush.bf16.msrb.mxu2 %v11040_v4  ;;  %v11503_v4 = vld [vmem:[%s21995_s5 + $0x9c0] sm:$0xf]  ;;  %v14122_v60 = vld [vmem:[%s21995_s5 + $0xaac] sm:$0xf0] }
 0x17f   :  { %5813 = vmatpush.bf16.msrb.mxu3 %v11168_v20  ;;  %5745 = vmatmul.bf16.vlgmr.msra.gmra.mxu2 %v17167_v53  ;;  %v14126_v20 = vld [vmem:[%s21995_s5 + $0xacc] sm:$0xf0]  ;;  %v11504_v17 = vor.u32 %v14094_v11, %v11503_v4  ;;  %v11487_v42 = vld [vmem:[%s21995_s5 + $0x9a0] sm:$0xf] }
 0x180   :  { %5759 = vmatmul.bf16.vlgmr.msra.gmra.mxu3 %v17175_v32  ;;  %v11632_v45 = vor.u32 %v14126_v20, %v11631_v10  ;;  %v11743_v51 = vld [vmem:[%s21995_s5 + $0xba0] sm:$0xf]  ;;  %v14086_v62 = vld [vmem:[%s21995_s5 + $0x98c] sm:$0xf0] }
 0x181   :  { %5772 = vmatpush.bf16.msrb.mxu0 %v10768_v50  ;;  %5786 = vmatpush.bf16.msrb.mxu1 %v10896_v58  ;;  %v11615_v50 = vld [vmem:[%s21995_s5 + $0xaa0] sm:$0xf]  ;;  %v14154_v58 = vld [vmem:[%s21995_s5 + $0xbac] sm:$0xf0]  ;;  %v2420_v11 = vpop.f32.mrf.mxu0  ;;  %v2434_v28 = vpop.f32.mrf.mxu1 }
 0x182   :  { %5800 = vmatpush.bf16.msrb.mxu2 %v11024_v16  ;;  %v11360_v16 = vor.u32 %v14058_v40, %v11359_v22  ;;  %v11616_v59 = vor.u32 %v14122_v60, %v11615_v50  ;;  %v11744_v2 = vor.u32 %v14154_v58, %v11743_v51  ;;  %v11599_v4 = vld [vmem:[%s21995_s5 + $0xa80] sm:$0xf]  ;;  %v14150_v20 = vld [vmem:[%s21995_s5 + $0xb8c] sm:$0xf0] }
 0x183   :  { %5814 = vmatpush.bf16.msrb.mxu3 %v11152_v6  ;;  %v11343_v6 = vld [vmem:[%s21995_s5 + $0x880] sm:$0xf]  ;;  %v14050_v22 = vld [vmem:[%s21995_s5 + $0x86c] sm:$0xf0] }
 0x184   :  { %v11727_v10 = vld [vmem:[%s21995_s5 + $0xb80] sm:$0xf]  ;;  %v14114_v50 = vld [vmem:[%s21995_s5 + $0xa6c] sm:$0xf0] }
 0x185   :  { %5821 = vmatpush.bf16.msra.mxu0 %v11392_v36  ;;  %5835 = vmatpush.bf16.msra.mxu1 %v11520_v47  ;;  %v14090_v47 = vld [vmem:[%s21995_s5 + $0x9ac] sm:$0xf0]  ;;  %v11455_v40 = vld [vmem:[%s21995_s5 + $0x960] sm:$0xf] }
 0x186   :  { %5849 = vmatpush.bf16.msra.mxu2 %v11648_v3  ;;  %v11488_v8 = vor.u32 %v14090_v47, %v11487_v42  ;;  %v14054_v36 = vld [vmem:[%s21995_s5 + $0x88c] sm:$0xf0]  ;;  %v11471_v3 = vld [vmem:[%s21995_s5 + $0x980] sm:$0xf]  ;;  %v11728_v42 = vor.u32 %v14150_v20, %v11727_v10  ;;  %v2584_v20 = vmax.f32 %v2434_v28, 0.0 }
 0x187   :  { %5863 = vmatpush.bf16.msra.mxu3 %v11776_v7  ;;  %v14118_v7 = vld [vmem:[%s21995_s5 + $0xa8c] sm:$0xf0]  ;;  %v11344_v29 = vor.u32 %v14054_v36, %v11343_v6  ;;  %v11583_v47 = vld [vmem:[%s21995_s5 + $0xa60] sm:$0xf] }
 0x188   :  { %v11711_v60 = vld [vmem:[%s21995_s5 + $0xb60] sm:$0xf]  ;;  %v14146_v51 = vld [vmem:[%s21995_s5 + $0xb6c] sm:$0xf0] }
 0x189   :  { %5822 = vmatpush.bf16.msra.mxu0 %v11376_v30  ;;  %5836 = vmatpush.bf16.msra.mxu1 %v11504_v17  ;;  %v11472_v30 = vor.u32 %v14086_v62, %v11471_v3  ;;  %v11600_v17 = vor.u32 %v14118_v7, %v11599_v4  ;;  %v14046_v6 = vld [vmem:[%s21995_s5 + $0x84c] sm:$0xf0]  ;;  %v11439_v36 = vld [vmem:[%s21995_s5 + $0x940] sm:$0xf]  ;;  %v11712_v4 = vor.u32 %v14146_v51, %v11711_v60 }
 0x18a   :  { %5850 = vmatpush.bf16.msra.mxu2 %v11632_v45  ;;  %v11327_v45 = vld [vmem:[%s21995_s5 + $0x860] sm:$0xf]  ;;  %v14078_v3 = vld [vmem:[%s21995_s5 + $0x94c] sm:$0xf0]  ;;  %v17287_v62 = vpop.f32.mrf.mxu2 }
 0x18b   :  { %5864 = vmatpush.bf16.msra.mxu3 %v11760_v35  ;;  %v14082_v35 = vld [vmem:[%s21995_s5 + $0x96c] sm:$0xf0]  ;;  %v11328_v58 = vor.u32 %v14050_v22, %v11327_v45  ;;  %v11567_v7 = vld [vmem:[%s21995_s5 + $0xa40] sm:$0xf]  ;;  %v2436_v22 = vpop.f32.mrf.mxu1 }
 0x18c   :  { %v14110_v10 = vld [vmem:[%s21995_s5 + $0xa4c] sm:$0xf0]  ;;  %v2600_v28 = vmax.f32 %v2436_v22, 0.0  ;;  %v11423_v60 = vld [vmem:[%s21995_s5 + $0x920] sm:$0xf] }
 0x18d   :  { %5823 = vmatpush.bf16.msra.mxu0 %v11360_v16  ;;  %5837 = vmatpush.bf16.msra.mxu1 %v11488_v8  ;;  %v11311_v16 = vld [vmem:[%s21995_s5 + $0x840] sm:$0xf]  ;;  %v11456_v8 = vor.u32 %v14082_v35, %v11455_v40  ;;  %v11440_v35 = vor.u32 %v14078_v3, %v11439_v36  ;;  %v14138_v3 = vld [vmem:[%s21995_s5 + $0xb2c] sm:$0xf0] }
 0x18e   :  { %5851 = vmatpush.bf16.msra.mxu2 %v11616_v59  ;;  %v11584_v59 = vor.u32 %v14114_v50, %v11583_v47  ;;  %v11312_v40 = vor.u32 %v14046_v6, %v11311_v16  ;;  %v11568_v47 = vor.u32 %v14110_v10, %v11567_v7  ;;  %v14042_v50 = vld [vmem:[%s21995_s5 + $0x82c] sm:$0xf0]  ;;  %v17323_v6 = vpack.c.bf16 %v2600_v28, %v2584_v20  ;;  %v11679_v36 = vld [vmem:[%s21995_s5 + $0xb20] sm:$0xf] }
 0x18f   :  { %5865 = vmatpush.bf16.msra.mxu3 %v11744_v2  ;;  %v2583_v2 = vmax.f32 %v2420_v11, 0.0  ;;  %v11695_v11 = vld [vmem:[%s21995_s5 + $0xb40] sm:$0xf]  ;;  %v14074_v16 = vld [vmem:[%s21995_s5 + $0x92c] sm:$0xf0] }
 0x190   :  { %v14038_v7 = vld [vmem:[%s21995_s5 + $0x80c] sm:$0xf0]  ;;  %v11407_v10 = vld [vmem:[%s21995_s5 + $0x900] sm:$0xf]  ;;  %5787 = vmatmul.bf16.vlgmr.msrb.gmra.mxu1 %v17323_v6 }
 0x191   :  { %5824 = vmatpush.bf16.msra.mxu0 %v11344_v29  ;;  %5838 = vmatpush.bf16.msra.mxu1 %v11472_v30  ;;  %v17295_v29 = vpop.f32.mrf.mxu3  ;;  %v2422_v30 = vpop.f32.mrf.mxu0  ;;  %v14070_v20 = vld [vmem:[%s21995_s5 + $0x90c] sm:$0xf0]  ;;  %v11663_v22 = vld [vmem:[%s21995_s5 + $0xb00] sm:$0xf] }
 0x192   :  { %5852 = vmatpush.bf16.msra.mxu2 %v11600_v17  ;;  %v14142_v17 = vld [vmem:[%s21995_s5 + $0xb4c] sm:$0xf0]  ;;  %v2599_v45 = vmax.f32 %v2422_v30, 0.0  ;;  %v11424_v30 = vor.u32 %v14074_v16, %v11423_v60  ;;  %v12031_v16 = vld [vmem:[%s21995_s5 + $0xde0] sm:$0xf]  ;;  %v11408_v5 = vor.u32 %v14070_v20, %v11407_v10 }
 0x193   :  { %5866 = vmatpush.bf16.msra.mxu3 %v11728_v42  ;;  %v11295_v42 = vld [vmem:[%s21995_s5 + $0x820] sm:$0xf]  ;;  %v14134_v28 = vld [vmem:[%s21995_s5 + $0xb0c] sm:$0xf0] }
 0x194   :  { %v17312_v51 = vpack.c.bf16 %v2599_v45, %v2583_v2  ;;  %v11279_v2 = vld [vmem:[%s21995_s5 + $0x800] sm:$0xf]  ;;  %v14102_v45 = vld [vmem:[%s21995_s5 + $0xa0c] sm:$0xf0] }
 0x195   :  { %5825 = vmatpush.bf16.msra.mxu0 %v11328_v58  ;;  %5839 = vmatpush.bf16.msra.mxu1 %v11456_v8  ;;  %v11696_v58 = vor.u32 %v14142_v17, %v11695_v11  ;;  %v11551_v8 = vld [vmem:[%s21995_s5 + $0xa20] sm:$0xf]  ;;  %v14190_v20 = vld [vmem:[%s21995_s5 + $0xccc] sm:$0xf0] }
 0x196   :  { %5853 = vmatpush.bf16.msra.mxu2 %v11584_v59  ;;  %v14106_v59 = vld [vmem:[%s21995_s5 + $0xa2c] sm:$0xf0]  ;;  %v11535_v17 = vld [vmem:[%s21995_s5 + $0xa00] sm:$0xf]  ;;  %5773 = vmatmul.bf16.vlgmr.msrb.gmra.mxu0 %v17312_v51 }
 0x197   :  { %5867 = vmatpush.bf16.msra.mxu3 %v11712_v4  ;;  %v11296_v4 = vor.u32 %v14042_v50, %v11295_v42  ;;  %v11552_v11 = vor.u32 %v14106_v59, %v11551_v8  ;;  %v11680_v42 = vor.u32 %v14138_v3, %v11679_v36  ;;  %v2585_v50 = vmax.f32 %v17287_v62, 0.0  ;;  %v14226_v8 = vld [vmem:[%s21995_s5 + $0xdec] sm:$0xf0]  ;;  %v12159_v62 = vld [vmem:[%s21995_s5 + $0xee0] sm:$0xf] }
 0x198   :  { %v2586_v59 = vmax.f32 %v17295_v29, 0.0  ;;  %v11280_v3 = vor.u32 %v14038_v7, %v11279_v2  ;;  %v11536_v54 = vor.u32 %v14102_v45, %v11535_v17  ;;  %v12287_v29 = vld [vmem:[%s21995_s5 + $0xfe0] sm:$0xf]  ;;  %v14290_v2 = vld [vmem:[%s21995_s5 + $0xfec] sm:$0xf0]  ;;  %v11664_v7 = vor.u32 %v14134_v28, %v11663_v22 }
 0x199   :  { %5826 = vmatpush.bf16.msra.mxu0 %v11312_v40  ;;  %5840 = vmatpush.bf16.msra.mxu1 %v11440_v35  ;;  %v2450_v40 = vpop.f32.mrf.mxu2  ;;  %v11903_v35 = vld [vmem:[%s21995_s5 + $0xce0] sm:$0xf]  ;;  %v12032_v1 = vor.u32 %v14226_v8, %v12031_v16  ;;  %v12288_v17 = vor.u32 %v14290_v2, %v12287_v29  ;;  %v14222_v45 = vld [vmem:[%s21995_s5 + $0xdcc] sm:$0xf0] }
 0x19a   :  { %5854 = vmatpush.bf16.msra.mxu2 %v11568_v47  ;;  %v14194_v47 = vld [vmem:[%s21995_s5 + $0xcec] sm:$0xf0]  ;;  %v2601_v60 = vmax.f32 %v2450_v40, 0.0  ;;  %v11887_v10 = vld [vmem:[%s21995_s5 + $0xcc0] sm:$0xf] }
 0x19b   :  { %5868 = vmatpush.bf16.msra.mxu3 %v11696_v58  ;;  %v2464_v58 = vpop.f32.mrf.mxu3  ;;  %v14258_v40 = vld [vmem:[%s21995_s5 + $0xeec] sm:$0xf0]  ;;  %v12143_v22 = vld [vmem:[%s21995_s5 + $0xec0] sm:$0xf] }
 0x19c   :  { %v2602_v36 = vmax.f32 %v2464_v58, 0.0  ;;  %v17377_v43 = vpack.c.bf16 %v2601_v60, %v2585_v50  ;;  %v11904_v58 = vor.u32 %v14194_v47, %v11903_v35  ;;  %v12271_v28 = vld [vmem:[%s21995_s5 + $0xfc0] sm:$0xf]  ;;  %v14286_v35 = vld [vmem:[%s21995_s5 + $0xfcc] sm:$0xf0]  ;;  %v11888_v47 = vor.u32 %v14190_v20, %v11887_v10 }
 0x19d   :  { %5827 = vmatpush.bf16.msra.mxu0 %v11296_v4  ;;  %5841 = vmatpush.bf16.msra.mxu1 %v11424_v30  ;;  %v12160_v30 = vor.u32 %v14258_v40, %v12159_v62  ;;  %v11999_v16 = vld [vmem:[%s21995_s5 + $0xda0] sm:$0xf]  ;;  %v12272_v8 = vor.u32 %v14286_v35, %v12271_v28  ;;  %v14282_v62 = vld [vmem:[%s21995_s5 + $0xfac] sm:$0xf0] }
 0x19e   :  { %5855 = vmatpush.bf16.msra.mxu2 %v11552_v11  ;;  %v17385_v4 = vpack.c.bf16 %v2602_v36, %v2586_v59  ;;  %v12015_v11 = vld [vmem:[%s21995_s5 + $0xdc0] sm:$0xf]  ;;  %v14250_v36 = vld [vmem:[%s21995_s5 + $0xeac] sm:$0xf0] }
 0x19f   :  { %5869 = vmatpush.bf16.msra.mxu3 %v11680_v42  ;;  %5801 = vmatmul.bf16.vlgmr.msrb.gmra.mxu2 %v17377_v43  ;;  %v14254_v42 = vld [vmem:[%s21995_s5 + $0xecc] sm:$0xf0]  ;;  %v12016_v50 = vor.u32 %v14222_v45, %v12015_v11  ;;  %v12127_v59 = vld [vmem:[%s21995_s5 + $0xea0] sm:$0xf] }
 0x1a0   :  { %5815 = vmatmul.bf16.vlgmr.msrb.gmra.mxu3 %v17385_v4  ;;  %v12144_v60 = vor.u32 %v14254_v42, %v12143_v22  ;;  %v12128_v2 = vor.u32 %v14250_v36, %v12127_v59  ;;  %v14214_v20 = vld [vmem:[%s21995_s5 + $0xd8c] sm:$0xf0]  ;;  %v12111_v11 = vld [vmem:[%s21995_s5 + $0xe80] sm:$0xf] }
 0x1a1   :  { %5828 = vmatpush.bf16.msra.mxu0 %v11280_v3  ;;  %5842 = vmatpush.bf16.msra.mxu1 %v11408_v5  ;;  %v11871_v5 = vld [vmem:[%s21995_s5 + $0xca0] sm:$0xf]  ;;  %v2476_v45 = vpop.f32.mrf.mxu0  ;;  %v14278_v42 = vld [vmem:[%s21995_s5 + $0xf8c] sm:$0xf0]  ;;  %v2490_v28 = vpop.f32.mrf.mxu1 }
 0x1a2   :  { %5856 = vmatpush.bf16.msra.mxu2 %v11536_v54  ;;  %v14186_v54 = vld [vmem:[%s21995_s5 + $0xcac] sm:$0xf0]  ;;  %v12255_v3 = vld [vmem:[%s21995_s5 + $0xfa0] sm:$0xf] }
 0x1a3   :  { %5870 = vmatpush.bf16.msra.mxu3 %v11664_v7  ;;  %v11872_v40 = vor.u32 %v14186_v54, %v11871_v5  ;;  %v11855_v7 = vld [vmem:[%s21995_s5 + $0xc80] sm:$0xf]  ;;  %v12256_v10 = vor.u32 %v14282_v62, %v12255_v3  ;;  %v14178_v5 = vld [vmem:[%s21995_s5 + $0xc6c] sm:$0xf0] }
 0x1a4   :  { %v12239_v22 = vld [vmem:[%s21995_s5 + $0xf80] sm:$0xf]  ;;  %v14242_v59 = vld [vmem:[%s21995_s5 + $0xe6c] sm:$0xf0] }
 0x1a5   :  { %5877 = vmatpush.bf16.msrb.mxu0 %v11904_v58  ;;  %5891 = vmatpush.bf16.msrb.mxu1 %v12032_v1  ;;  %v14218_v1 = vld [vmem:[%s21995_s5 + $0xdac] sm:$0xf0]  ;;  %v11967_v54 = vld [vmem:[%s21995_s5 + $0xd60] sm:$0xf] }
 0x1a6   :  { %5905 = vmatpush.bf16.msrb.mxu2 %v12160_v30  ;;  %v12000_v29 = vor.u32 %v14218_v1, %v11999_v16  ;;  %v14182_v58 = vld [vmem:[%s21995_s5 + $0xc8c] sm:$0xf0]  ;;  %v11983_v30 = vld [vmem:[%s21995_s5 + $0xd80] sm:$0xf]  ;;  %v12240_v16 = vor.u32 %v14278_v42, %v12239_v22  ;;  %v2588_v42 = vmax.f32 %v2490_v28, 0.0 }
 0x1a7   :  { %5919 = vmatpush.bf16.msrb.mxu3 %v12288_v17  ;;  %v14246_v17 = vld [vmem:[%s21995_s5 + $0xe8c] sm:$0xf0]  ;;  %v11856_v35 = vor.u32 %v14182_v58, %v11855_v7  ;;  %v12095_v1 = vld [vmem:[%s21995_s5 + $0xe60] sm:$0xf] }
 0x1a8   :  { %v12223_v36 = vld [vmem:[%s21995_s5 + $0xf60] sm:$0xf]  ;;  %v14274_v3 = vld [vmem:[%s21995_s5 + $0xf6c] sm:$0xf0] }
 0x1a9   :  { %5878 = vmatpush.bf16.msrb.mxu0 %v11888_v47  ;;  %5892 = vmatpush.bf16.msrb.mxu1 %v12016_v50  ;;  %v11984_v47 = vor.u32 %v14214_v20, %v11983_v30  ;;  %v12112_v50 = vor.u32 %v14246_v17, %v12111_v11  ;;  %v14174_v7 = vld [vmem:[%s21995_s5 + $0xc4c] sm:$0xf0]  ;;  %v11951_v58 = vld [vmem:[%s21995_s5 + $0xd40] sm:$0xf]  ;;  %v12224_v11 = vor.u32 %v14274_v3, %v12223_v36 }
 0x1aa   :  { %5906 = vmatpush.bf16.msrb.mxu2 %v12144_v60  ;;  %v11839_v60 = vld [vmem:[%s21995_s5 + $0xc60] sm:$0xf]  ;;  %v14206_v30 = vld [vmem:[%s21995_s5 + $0xd4c] sm:$0xf0]  ;;  %v17497_v20 = vpop.f32.mrf.mxu2 }
 0x1ab   :  { %5920 = vmatpush.bf16.msrb.mxu3 %v12272_v8  ;;  %v14210_v8 = vld [vmem:[%s21995_s5 + $0xd6c] sm:$0xf0]  ;;  %v11840_v62 = vor.u32 %v14178_v5, %v11839_v60  ;;  %v12079_v17 = vld [vmem:[%s21995_s5 + $0xe40] sm:$0xf]  ;;  %v2492_v5 = vpop.f32.mrf.mxu1 }
 0x1ac   :  { %v14238_v22 = vld [vmem:[%s21995_s5 + $0xe4c] sm:$0xf0]  ;;  %v2604_v28 = vmax.f32 %v2492_v5, 0.0  ;;  %v11935_v36 = vld [vmem:[%s21995_s5 + $0xd20] sm:$0xf] }
 0x1ad   :  { %5879 = vmatpush.bf16.msrb.mxu0 %v11872_v40  ;;  %5893 = vmatpush.bf16.msrb.mxu1 %v12000_v29  ;;  %v11823_v40 = vld [vmem:[%s21995_s5 + $0xc40] sm:$0xf]  ;;  %v11968_v29 = vor.u32 %v14210_v8, %v11967_v54  ;;  %v11952_v8 = vor.u32 %v14206_v30, %v11951_v58  ;;  %v14266_v30 = vld [vmem:[%s21995_s5 + $0xf2c] sm:$0xf0] }
 0x1ae   :  { %5907 = vmatpush.bf16.msrb.mxu2 %v12128_v2  ;;  %v12096_v2 = vor.u32 %v14242_v59, %v12095_v1  ;;  %v11824_v54 = vor.u32 %v14174_v7, %v11823_v40  ;;  %v12080_v1 = vor.u32 %v14238_v22, %v12079_v17  ;;  %v14170_v59 = vld [vmem:[%s21995_s5 + $0xc2c] sm:$0xf0]  ;;  %v17533_v7 = vpack.c.bf16 %v2604_v28, %v2588_v42  ;;  %v12191_v58 = vld [vmem:[%s21995_s5 + $0xf20] sm:$0xf] }
 0x1af   :  { %5921 = vmatpush.bf16.msrb.mxu3 %v12256_v10  ;;  %v2587_v10 = vmax.f32 %v2476_v45, 0.0  ;;  %v12207_v45 = vld [vmem:[%s21995_s5 + $0xf40] sm:$0xf]  ;;  %v14202_v40 = vld [vmem:[%s21995_s5 + $0xd2c] sm:$0xf0] }
 0x1b0   :  { %v14166_v17 = vld [vmem:[%s21995_s5 + $0xc0c] sm:$0xf0]  ;;  %v11919_v22 = vld [vmem:[%s21995_s5 + $0xd00] sm:$0xf]  ;;  %5843 = vmatmul.bf16.vlgmr.msra.gmra.mxu1 %v17533_v7 }
 0x1b1   :  { %5880 = vmatpush.bf16.msrb.mxu0 %v11856_v35  ;;  %5894 = vmatpush.bf16.msrb.mxu1 %v11984_v47  ;;  %v17505_v35 = vpop.f32.mrf.mxu3  ;;  %v2478_v47 = vpop.f32.mrf.mxu0  ;;  %v14198_v42 = vld [vmem:[%s21995_s5 + $0xd0c] sm:$0xf0]  ;;  %v12175_v5 = vld [vmem:[%s21995_s5 + $0xf00] sm:$0xf] }
 0x1b2   :  { %5908 = vmatpush.bf16.msrb.mxu2 %v12112_v50  ;;  %v14270_v50 = vld [vmem:[%s21995_s5 + $0xf4c] sm:$0xf0]  ;;  %v2603_v60 = vmax.f32 %v2478_v47, 0.0  ;;  %v11936_v47 = vor.u32 %v14202_v40, %v11935_v36  ;;  %v13840_v40 = vld [vmem:[%s21995_s5 + $0x1e4] sm:$0xf]  ;;  %v11920_v0 = vor.u32 %v14198_v42, %v11919_v22 }
 0x1b3   :  { %5922 = vmatpush.bf16.msrb.mxu3 %v12240_v16  ;;  %v11807_v16 = vld [vmem:[%s21995_s5 + $0xc20] sm:$0xf]  ;;  %v14262_v28 = vld [vmem:[%s21995_s5 + $0xf0c] sm:$0xf0]  ;;  %v13804_v22 = vld [vmem:[%s21995_s5 + $0xc4] sm:$0xf] }
 0x1b4   :  { %v17522_v3 = vpack.c.bf16 %v2603_v60, %v2587_v10  ;;  %v11791_v10 = vld [vmem:[%s21995_s5 + $0xc00] sm:$0xf]  ;;  %v14230_v60 = vld [vmem:[%s21995_s5 + $0xe0c] sm:$0xf0]  ;;  %v10353_v42 = vld [vmem:[%s21995_s5 + $0xd0] sm:$0xf0] }
 0x1b5   :  { %5881 = vmatpush.bf16.msrb.mxu0 %v11840_v62  ;;  %5895 = vmatpush.bf16.msrb.mxu1 %v11968_v29  ;;  %v12208_v62 = vor.u32 %v14270_v50, %v12207_v45  ;;  %v12063_v29 = vld [vmem:[%s21995_s5 + $0xe20] sm:$0xf] }
 0x1b6   :  { %5909 = vmatpush.bf16.msrb.mxu2 %v12096_v2  ;;  %v14234_v2 = vld [vmem:[%s21995_s5 + $0xe2c] sm:$0xf0]  ;;  %v12047_v50 = vld [vmem:[%s21995_s5 + $0xe00] sm:$0xf]  ;;  %5829 = vmatmul.bf16.vlgmr.msra.gmra.mxu0 %v17522_v3 }
 0x1b7   :  { %5923 = vmatpush.bf16.msrb.mxu3 %v12224_v11  ;;  %v11808_v11 = vor.u32 %v14170_v59, %v11807_v16  ;;  %v12064_v45 = vor.u32 %v14234_v2, %v12063_v29  ;;  %v12192_v16 = vor.u32 %v14266_v30, %v12191_v58  ;;  %v2589_v59 = vmax.f32 %v17497_v20, 0.0  ;;  %v10497_v29 = vld [vmem:[%s21995_s5 + $0x1f0] sm:$0xf0]  ;;  %v13872_v20 = vld [vmem:[%s21995_s5 + $0x2e4] sm:$0xf] }
 0x1b8   :  { %v2590_v2 = vmax.f32 %v17505_v35, 0.0  ;;  %v11792_v30 = vor.u32 %v14166_v17, %v11791_v10  ;;  %v12048_v34 = vor.u32 %v14230_v60, %v12047_v50  ;;  %v13904_v35 = vld [vmem:[%s21995_s5 + $0x3e4] sm:$0xf]  ;;  %v10753_v10 = vld [vmem:[%s21995_s5 + $0x3f0] sm:$0xf0]  ;;  %v12176_v17 = vor.u32 %v14262_v28, %v12175_v5 }
 0x1b9   :  { %5882 = vmatpush.bf16.msrb.mxu0 %v11824_v54  ;;  %5896 = vmatpush.bf16.msrb.mxu1 %v11952_v8  ;;  %v2506_v54 = vpop.f32.mrf.mxu2  ;;  %v13808_v8 = vld [vmem:[%s21995_s5 + $0xe4] sm:$0xf]  ;;  %v10500_v13 = vor.u32 %v13840_v40, %v10497_v29  ;;  %v10756_v50 = vor.u32 %v13904_v35, %v10753_v10  ;;  %v10481_v60 = vld [vmem:[%s21995_s5 + $0x1d0] sm:$0xf0] }
 0x1ba   :  { %5910 = vmatpush.bf16.msrb.mxu2 %v12080_v1  ;;  %v10369_v1 = vld [vmem:[%s21995_s5 + $0xf0] sm:$0xf0]  ;;  %v2605_v36 = vmax.f32 %v2506_v54, 0.0  ;;  %v13868_v5 = vld [vmem:[%s21995_s5 + $0x2c4] sm:$0xf] }
 0x1bb   :  { %5924 = vmatpush.bf16.msrb.mxu3 %v12208_v62  ;;  %v2520_v62 = vpop.f32.mrf.mxu3  ;;  %v10625_v54 = vld [vmem:[%s21995_s5 + $0x2f0] sm:$0xf0]  ;;  %v13900_v28 = vld [vmem:[%s21995_s5 + $0x3c4] sm:$0xf] }
 0x1bc   :  { %v2606_v58 = vmax.f32 %v2520_v62, 0.0  ;;  %v17587_v9 = vpack.c.bf16 %v2605_v36, %v2589_v59  ;;  %v10372_v62 = vor.u32 %v13808_v8, %v10369_v1  ;;  %v10737_v8 = vld [vmem:[%s21995_s5 + $0x3d0] sm:$0xf0]  ;;  %v10356_v1 = vor.u32 %v13804_v22, %v10353_v42  ;;  %v13832_v40 = vld [vmem:[%s21995_s5 + $0x1a4] sm:$0xf] }
 0x1bd   :  { %5883 = vmatpush.bf16.msrb.mxu0 %v11808_v11  ;;  %5897 = vmatpush.bf16.msrb.mxu1 %v11936_v47  ;;  %v10628_v47 = vor.u32 %v13872_v20, %v10625_v54  ;;  %v10740_v29 = vor.u32 %v13900_v28, %v10737_v8  ;;  %v10721_v20 = vld [vmem:[%s21995_s5 + $0x3b0] sm:$0xf0] }
 0x1be   :  { %5911 = vmatpush.bf16.msrb.mxu2 %v12064_v45  ;;  %v17595_v11 = vpack.c.bf16 %v2606_v58, %v2590_v2  ;;  %v13836_v45 = vld [vmem:[%s21995_s5 + $0x1c4] sm:$0xf]  ;;  %v10593_v58 = vld [vmem:[%s21995_s5 + $0x2b0] sm:$0xf0] }
 0x1bf   :  { %5925 = vmatpush.bf16.msrb.mxu3 %v12192_v16  ;;  %5857 = vmatmul.bf16.vlgmr.msra.gmra.mxu2 %v17587_v9  ;;  %v10609_v16 = vld [vmem:[%s21995_s5 + $0x2d0] sm:$0xf0]  ;;  %v10484_v59 = vor.u32 %v13836_v45, %v10481_v60  ;;  %v13864_v2 = vld [vmem:[%s21995_s5 + $0x2a4] sm:$0xf] }
 0x1c0   :  { %5871 = vmatmul.bf16.vlgmr.msra.gmra.mxu3 %v17595_v11  ;;  %v10612_v36 = vor.u32 %v13868_v5, %v10609_v16  ;;  %v10596_v10 = vor.u32 %v13864_v2, %v10593_v58  ;;  %v10449_v42 = vld [vmem:[%s21995_s5 + $0x190] sm:$0xf0]  ;;  %v13860_v45 = vld [vmem:[%s21995_s5 + $0x284] sm:$0xf] }
 0x1c1   :  { %5884 = vmatpush.bf16.msrb.mxu0 %v11792_v30  ;;  %5898 = vmatpush.bf16.msrb.mxu1 %v11920_v0  ;;  %v13800_v0 = vld [vmem:[%s21995_s5 + $0xa4] sm:$0xf]  ;;  %v2532_v60 = vpop.f32.mrf.mxu0  ;;  %v10705_v16 = vld [vmem:[%s21995_s5 + $0x390] sm:$0xf0]  ;;  %v2546_v28 = vpop.f32.mrf.mxu1 }
 0x1c2   :  { %5912 = vmatpush.bf16.msrb.mxu2 %v12048_v34  ;;  %v10337_v34 = vld [vmem:[%s21995_s5 + $0xb0] sm:$0xf0]  ;;  %v13896_v30 = vld [vmem:[%s21995_s5 + $0x3a4] sm:$0xf] }
 0x1c3   :  { %5926 = vmatpush.bf16.msrb.mxu3 %v12176_v17  ;;  %v10340_v54 = vor.u32 %v13800_v0, %v10337_v34  ;;  %v13796_v17 = vld [vmem:[%s21995_s5 + $0x84] sm:$0xf]  ;;  %v10724_v22 = vor.u32 %v13896_v30, %v10721_v20  ;;  %v10305_v0 = vld [vmem:[%s21995_s5 + $0x70] sm:$0xf0] }
 0x1c4   :  { %v13892_v5 = vld [vmem:[%s21995_s5 + $0x384] sm:$0xf]  ;;  %v10561_v2 = vld [vmem:[%s21995_s5 + $0x270] sm:$0xf0] }
 0x1c5   :  { %5933 = vmatpush.bf16.msra.mxu0 %v10372_v62  ;;  %5947 = vmatpush.bf16.msra.mxu1 %v10500_v13  ;;  %v10465_v13 = vld [vmem:[%s21995_s5 + $0x1b0] sm:$0xf0]  ;;  %v13824_v34 = vld [vmem:[%s21995_s5 + $0x164] sm:$0xf] }
 0x1c6   :  { %5961 = vmatpush.bf16.msra.mxu2 %v10628_v47  ;;  %v10468_v35 = vor.u32 %v13832_v40, %v10465_v13  ;;  %v10321_v62 = vld [vmem:[%s21995_s5 + $0x90] sm:$0xf0]  ;;  %v13828_v47 = vld [vmem:[%s21995_s5 + $0x184] sm:$0xf]  ;;  %v10708_v40 = vor.u32 %v13892_v5, %v10705_v16  ;;  %v2592_v16 = vmax.f32 %v2546_v28, 0.0 }
 0x1c7   :  { %5975 = vmatpush.bf16.msra.mxu3 %v10756_v50  ;;  %v10577_v50 = vld [vmem:[%s21995_s5 + $0x290] sm:$0xf0]  ;;  %v10324_v8 = vor.u32 %v13796_v17, %v10321_v62  ;;  %v13856_v13 = vld [vmem:[%s21995_s5 + $0x264] sm:$0xf] }
 0x1c8   :  { %v13888_v58 = vld [vmem:[%s21995_s5 + $0x364] sm:$0xf]  ;;  %v10689_v30 = vld [vmem:[%s21995_s5 + $0x370] sm:$0xf0] }
 0x1c9   :  { %5934 = vmatpush.bf16.msra.mxu0 %v10356_v1  ;;  %5948 = vmatpush.bf16.msra.mxu1 %v10484_v59  ;;  %v10452_v1 = vor.u32 %v13828_v47, %v10449_v42  ;;  %v10580_v59 = vor.u32 %v13860_v45, %v10577_v50  ;;  %v10289_v17 = vld [vmem:[%s21995_s5 + $0x50] sm:$0xf0]  ;;  %v13820_v62 = vld [vmem:[%s21995_s5 + $0x144] sm:$0xf]  ;;  %v10692_v45 = vor.u32 %v13888_v58, %v10689_v30 }
 0x1ca   :  { %5962 = vmatpush.bf16.msra.mxu2 %v10612_v36  ;;  %v13792_v36 = vld [vmem:[%s21995_s5 + $0x64] sm:$0xf]  ;;  %v10417_v47 = vld [vmem:[%s21995_s5 + $0x150] sm:$0xf0]  ;;  %v17707_v42 = vpop.f32.mrf.mxu2 }
 0x1cb   :  { %5976 = vmatpush.bf16.msra.mxu3 %v10740_v29  ;;  %v10433_v29 = vld [vmem:[%s21995_s5 + $0x170] sm:$0xf0]  ;;  %v10308_v20 = vor.u32 %v13792_v36, %v10305_v0  ;;  %v13852_v50 = vld [vmem:[%s21995_s5 + $0x244] sm:$0xf]  ;;  %v2548_v0 = vpop.f32.mrf.mxu1 }
 0x1cc   :  { %v10545_v5 = vld [vmem:[%s21995_s5 + $0x250] sm:$0xf0]  ;;  %v2608_v28 = vmax.f32 %v2548_v0, 0.0  ;;  %v13816_v58 = vld [vmem:[%s21995_s5 + $0x124] sm:$0xf] }
 0x1cd   :  { %5935 = vmatpush.bf16.msra.mxu0 %v10340_v54  ;;  %5949 = vmatpush.bf16.msra.mxu1 %v10468_v35  ;;  %v13788_v54 = vld [vmem:[%s21995_s5 + $0x44] sm:$0xf]  ;;  %v10436_v35 = vor.u32 %v13824_v34, %v10433_v29  ;;  %v10420_v29 = vor.u32 %v13820_v62, %v10417_v47  ;;  %v10657_v47 = vld [vmem:[%s21995_s5 + $0x330] sm:$0xf0] }
 0x1ce   :  { %5963 = vmatpush.bf16.msra.mxu2 %v10596_v10  ;;  %v10564_v10 = vor.u32 %v13856_v13, %v10561_v2  ;;  %v10292_v34 = vor.u32 %v13788_v54, %v10289_v17  ;;  %v10548_v13 = vor.u32 %v13852_v50, %v10545_v5  ;;  %v10273_v2 = vld [vmem:[%s21995_s5 + $0x30] sm:$0xf0]  ;;  %v17743_v17 = vpack.c.bf16 %v2608_v28, %v2592_v16  ;;  %v13880_v62 = vld [vmem:[%s21995_s5 + $0x324] sm:$0xf] }
 0x1cf   :  { %5977 = vmatpush.bf16.msra.mxu3 %v10724_v22  ;;  %v2591_v22 = vmax.f32 %v2532_v60, 0.0  ;;  %v13884_v60 = vld [vmem:[%s21995_s5 + $0x344] sm:$0xf]  ;;  %v10401_v54 = vld [vmem:[%s21995_s5 + $0x130] sm:$0xf0] }
 0x1d0   :  { %v10257_v50 = vld [vmem:[%s21995_s5 + $0x10] sm:$0xf0]  ;;  %v13812_v5 = vld [vmem:[%s21995_s5 + $0x104] sm:$0xf]  ;;  %5899 = vmatmul.bf16.vlgmr.msrb.gmra.mxu1 %v17743_v17 }
 0x1d1   :  { %5936 = vmatpush.bf16.msra.mxu0 %v10324_v8  ;;  %5950 = vmatpush.bf16.msra.mxu1 %v10452_v1  ;;  %v17715_v8 = vpop.f32.mrf.mxu3  ;;  %v2534_v1 = vpop.f32.mrf.mxu0  ;;  %v10385_v16 = vld [vmem:[%s21995_s5 + $0x110] sm:$0xf0]  ;;  %v13876_v0 = vld [vmem:[%s21995_s5 + $0x304] sm:$0xf] }
 0x1d2   :  { %5964 = vmatpush.bf16.msra.mxu2 %v10580_v59  ;;  %v10673_v59 = vld [vmem:[%s21995_s5 + $0x350] sm:$0xf0]  ;;  %v2607_v36 = vmax.f32 %v2534_v1, 0.0  ;;  %v10404_v1 = vor.u32 %v13816_v58, %v10401_v54  ;;  %v13968_v54 = vld [vmem:[%s21995_s5 + $0x5e4] sm:$0xf]  ;;  %v10388_v55 = vor.u32 %v13812_v5, %v10385_v16 }
 0x1d3   :  { %5978 = vmatpush.bf16.msra.mxu3 %v10708_v40  ;;  %v13784_v40 = vld [vmem:[%s21995_s5 + $0x24] sm:$0xf]  ;;  %v10641_v28 = vld [vmem:[%s21995_s5 + $0x310] sm:$0xf0] }
 0x1d4   :  { %v17732_v30 = vpack.c.bf16 %v2607_v36, %v2591_v22  ;;  %v13780_v22 = vld [vmem:[%s21995_s5 + $0x4] sm:$0xf]  ;;  %v10513_v36 = vld [vmem:[%s21995_s5 + $0x210] sm:$0xf0] }
 0x1d5   :  { %5937 = vmatpush.bf16.msra.mxu0 %v10308_v20  ;;  %5951 = vmatpush.bf16.msra.mxu1 %v10436_v35  ;;  %v10676_v20 = vor.u32 %v13884_v60, %v10673_v59  ;;  %v13848_v35 = vld [vmem:[%s21995_s5 + $0x224] sm:$0xf]  ;;  %v10865_v16 = vld [vmem:[%s21995_s5 + $0x4d0] sm:$0xf0] }
 0x1d6   :  { %5965 = vmatpush.bf16.msra.mxu2 %v10564_v10  ;;  %v10529_v10 = vld [vmem:[%s21995_s5 + $0x230] sm:$0xf0]  ;;  %v13844_v59 = vld [vmem:[%s21995_s5 + $0x204] sm:$0xf]  ;;  %5885 = vmatmul.bf16.vlgmr.msrb.gmra.mxu0 %v17732_v30 }
 0x1d7   :  { %5979 = vmatpush.bf16.msra.mxu3 %v10692_v45  ;;  %v10276_v45 = vor.u32 %v13784_v40, %v10273_v2  ;;  %v10532_v60 = vor.u32 %v13848_v35, %v10529_v10  ;;  %v10660_v40 = vor.u32 %v13880_v62, %v10657_v47  ;;  %v2593_v2 = vmax.f32 %v17707_v42, 0.0  ;;  %v11009_v35 = vld [vmem:[%s21995_s5 + $0x5f0] sm:$0xf0]  ;;  %v14000_v42 = vld [vmem:[%s21995_s5 + $0x6e4] sm:$0xf] }
 0x1d8   :  { %v2594_v10 = vmax.f32 %v17715_v8, 0.0  ;;  %v10260_v47 = vor.u32 %v13780_v22, %v10257_v50  ;;  %v10516_v44 = vor.u32 %v13844_v59, %v10513_v36  ;;  %v14032_v8 = vld [vmem:[%s21995_s5 + $0x7e4] sm:$0xf]  ;;  %v11265_v22 = vld [vmem:[%s21995_s5 + $0x7f0] sm:$0xf0]  ;;  %v10644_v50 = vor.u32 %v13876_v0, %v10641_v28 }
 0x1d9   :  { %5938 = vmatpush.bf16.msra.mxu0 %v10292_v34  ;;  %5952 = vmatpush.bf16.msra.mxu1 %v10420_v29  ;;  %v2562_v34 = vpop.f32.mrf.mxu2  ;;  %v13936_v29 = vld [vmem:[%s21995_s5 + $0x4e4] sm:$0xf]  ;;  %v11012_v38 = vor.u32 %v13968_v54, %v11009_v35  ;;  %v11268_v59 = vor.u32 %v14032_v8, %v11265_v22  ;;  %v10993_v36 = vld [vmem:[%s21995_s5 + $0x5d0] sm:$0xf0] }
 0x1da   :  { %5966 = vmatpush.bf16.msra.mxu2 %v10548_v13  ;;  %v10881_v13 = vld [vmem:[%s21995_s5 + $0x4f0] sm:$0xf0]  ;;  %v2609_v58 = vmax.f32 %v2562_v34, 0.0  ;;  %v13932_v5 = vld [vmem:[%s21995_s5 + $0x4c4] sm:$0xf] }
 0x1db   :  { %5980 = vmatpush.bf16.msra.mxu3 %v10676_v20  ;;  %v2576_v20 = vpop.f32.mrf.mxu3  ;;  %v11137_v34 = vld [vmem:[%s21995_s5 + $0x6f0] sm:$0xf0]  ;;  %v13996_v0 = vld [vmem:[%s21995_s5 + $0x6c4] sm:$0xf] }
 0x1dc   :  { %v2610_v62 = vmax.f32 %v2576_v20, 0.0  ;;  %v17797_v61 = vpack.c.bf16 %v2609_v58, %v2593_v2  ;;  %v10884_v20 = vor.u32 %v13936_v29, %v10881_v13  ;;  %v14028_v28 = vld [vmem:[%s21995_s5 + $0x7c4] sm:$0xf]  ;;  %v11249_v29 = vld [vmem:[%s21995_s5 + $0x7d0] sm:$0xf0]  ;;  %v10868_v13 = vor.u32 %v13932_v5, %v10865_v16 }
 0x1dd   :  { %5939 = vmatpush.bf16.msra.mxu0 %v10276_v45  ;;  %5953 = vmatpush.bf16.msra.mxu1 %v10404_v1  ;;  %v11140_v1 = vor.u32 %v14000_v42, %v11137_v34  ;;  %v13960_v54 = vld [vmem:[%s21995_s5 + $0x5a4] sm:$0xf]  ;;  %v11252_v35 = vor.u32 %v14028_v28, %v11249_v29  ;;  %v11233_v42 = vld [vmem:[%s21995_s5 + $0x7b0] sm:$0xf0] }
 0x1de   :  { %5967 = vmatpush.bf16.msra.mxu2 %v10532_v60  ;;  %v17805_v45 = vpack.c.bf16 %v2610_v62, %v2594_v10  ;;  %v13964_v60 = vld [vmem:[%s21995_s5 + $0x5c4] sm:$0xf]  ;;  %v11105_v62 = vld [vmem:[%s21995_s5 + $0x6b0] sm:$0xf0] }
 0x1df   :  { %5981 = vmatpush.bf16.msra.mxu3 %v10660_v40  ;;  %5913 = vmatmul.bf16.vlgmr.msrb.gmra.mxu2 %v17797_v61  ;;  %v11121_v40 = vld [vmem:[%s21995_s5 + $0x6d0] sm:$0xf0]  ;;  %v10996_v2 = vor.u32 %v13964_v60, %v10993_v36  ;;  %v13992_v10 = vld [vmem:[%s21995_s5 + $0x6a4] sm:$0xf] }
 0x1e0   :  { %5927 = vmatmul.bf16.vlgmr.msrb.gmra.mxu3 %v17805_v45  ;;  %v11124_v58 = vor.u32 %v13996_v0, %v11121_v40  ;;  %v11108_v22 = vor.u32 %v13992_v10, %v11105_v62  ;;  %v10961_v16 = vld [vmem:[%s21995_s5 + $0x590] sm:$0xf0]  ;;  %v13988_v60 = vld [vmem:[%s21995_s5 + $0x684] sm:$0xf] }
 0x1e1   :  { %5940 = vmatpush.bf16.msra.mxu0 %v10260_v47  ;;  %5954 = vmatpush.bf16.msra.mxu1 %v10388_v55  ;;  %v13928_v55 = vld [vmem:[%s21995_s5 + $0x4a4] sm:$0xf]  ;;  %v11217_v0 = vld [vmem:[%s21995_s5 + $0x790] sm:$0xf0] }
 0x1e2   :  { %5968 = vmatpush.bf16.msra.mxu2 %v10516_v44  ;;  %v10849_v44 = vld [vmem:[%s21995_s5 + $0x4b0] sm:$0xf0]  ;;  %v14024_v47 = vld [vmem:[%s21995_s5 + $0x7a4] sm:$0xf] }
 0x1e3   :  { %5982 = vmatpush.bf16.msra.mxu3 %v10644_v50  ;;  %v10852_v34 = vor.u32 %v13928_v55, %v10849_v44  ;;  %v13924_v50 = vld [vmem:[%s21995_s5 + $0x484] sm:$0xf]  ;;  %v11236_v5 = vor.u32 %v14024_v47, %v11233_v42  ;;  %v10945_v44 = vld [vmem:[%s21995_s5 + $0x570] sm:$0xf0] }
 0x1e4   :  { %v14020_v36 = vld [vmem:[%s21995_s5 + $0x784] sm:$0xf]  ;;  %5955 = vmatmul.bf16.vlgmr.msra.gmra.mxu1 %v17113_v52  ;;  %v11201_v10 = vld [vmem:[%s21995_s5 + $0x770] sm:$0xf0] }
 0x1e5   :  { %5989 = vmatpush.bf16.msrb.mxu0 %v10884_v20  ;;  %6003 = vmatpush.bf16.msrb.mxu1 %v11012_v38  ;;  %v10977_v38 = vld [vmem:[%s21995_s5 + $0x5b0] sm:$0xf0]  ;;  %v11220_v55 = vor.u32 %v14020_v36, %v11217_v0 }
 0x1e6   :  { %6017 = vmatpush.bf16.msrb.mxu2 %v11140_v1  ;;  %v10980_v8 = vor.u32 %v13960_v54, %v10977_v38  ;;  %v10833_v20 = vld [vmem:[%s21995_s5 + $0x490] sm:$0xf0]  ;;  %v13956_v1 = vld [vmem:[%s21995_s5 + $0x584] sm:$0xf]  ;;  %5941 = vmatmul.bf16.vlgmr.msra.gmra.mxu0 %v17102_v41 }
 0x1e7   :  { %6031 = vmatpush.bf16.msrb.mxu3 %v11268_v59  ;;  %v11089_v59 = vld [vmem:[%s21995_s5 + $0x690] sm:$0xf0]  ;;  %v10836_v40 = vor.u32 %v13924_v50, %v10833_v20  ;;  %v10964_v28 = vor.u32 %v13956_v1, %v10961_v16  ;;  %v13984_v54 = vld [vmem:[%s21995_s5 + $0x664] sm:$0xf] }
 0x1e8   :  { %v11092_v29 = vor.u32 %v13988_v60, %v11089_v59  ;;  %v14016_v38 = vld [vmem:[%s21995_s5 + $0x764] sm:$0xf]  ;;  %v10929_v20 = vld [vmem:[%s21995_s5 + $0x550] sm:$0xf0] }
 0x1e9   :  { %5990 = vmatpush.bf16.msrb.mxu0 %v10868_v13  ;;  %6004 = vmatpush.bf16.msrb.mxu1 %v10996_v2  ;;  %v13920_v13 = vld [vmem:[%s21995_s5 + $0x464] sm:$0xf]  ;;  %v10817_v2 = vld [vmem:[%s21995_s5 + $0x470] sm:$0xf0]  ;;  %v11204_v50 = vor.u32 %v14016_v38, %v11201_v10 }
 0x1ea   :  { %6018 = vmatpush.bf16.msrb.mxu2 %v11124_v58  ;;  %v13952_v58 = vld [vmem:[%s21995_s5 + $0x564] sm:$0xf]  ;;  %v10820_v62 = vor.u32 %v13920_v13, %v10817_v2  ;;  %v11185_v60 = vld [vmem:[%s21995_s5 + $0x750] sm:$0xf0] }
 0x1eb   :  { %6032 = vmatpush.bf16.msrb.mxu3 %v11252_v35  ;;  %v11073_v35 = vld [vmem:[%s21995_s5 + $0x670] sm:$0xf0]  ;;  %v10948_v47 = vor.u32 %v13952_v58, %v10945_v44  ;;  %v13980_v1 = vld [vmem:[%s21995_s5 + $0x644] sm:$0xf] }
 0x1ec   :  { %v11076_v42 = vor.u32 %v13984_v54, %v11073_v35  ;;  %v14012_v16 = vld [vmem:[%s21995_s5 + $0x744] sm:$0xf]  ;;  %v10913_v2 = vld [vmem:[%s21995_s5 + $0x530] sm:$0xf0] }
 0x1ed   :  { %5991 = vmatpush.bf16.msrb.mxu0 %v10852_v34  ;;  %6005 = vmatpush.bf16.msrb.mxu1 %v10980_v8  ;;  %v13916_v34 = vld [vmem:[%s21995_s5 + $0x444] sm:$0xf]  ;;  %v10801_v8 = vld [vmem:[%s21995_s5 + $0x450] sm:$0xf0]  ;;  %v11188_v13 = vor.u32 %v14012_v16, %v11185_v60 }
 0x1ee   :  { %6019 = vmatpush.bf16.msrb.mxu2 %v11108_v22  ;;  %v13948_v22 = vld [vmem:[%s21995_s5 + $0x544] sm:$0xf]  ;;  %v10804_v59 = vor.u32 %v13916_v34, %v10801_v8  ;;  %v11169_v54 = vld [vmem:[%s21995_s5 + $0x730] sm:$0xf0] }
 0x1ef   :  { %6033 = vmatpush.bf16.msrb.mxu3 %v11236_v5  ;;  %5969 = vmatmul.bf16.vlgmr.msra.gmra.mxu2 %v17167_v53  ;;  %v11057_v5 = vld [vmem:[%s21995_s5 + $0x650] sm:$0xf0]  ;;  %v10932_v36 = vor.u32 %v13948_v22, %v10929_v20  ;;  %v13976_v58 = vld [vmem:[%s21995_s5 + $0x624] sm:$0xf] }
 0x1f0   :  { %5983 = vmatmul.bf16.vlgmr.msra.gmra.mxu3 %v17175_v32  ;;  %v11060_v0 = vor.u32 %v13980_v1, %v11057_v5  ;;  %v14008_v44 = vld [vmem:[%s21995_s5 + $0x724] sm:$0xf]  ;;  %v10769_v10 = vld [vmem:[%s21995_s5 + $0x410] sm:$0xf0] }
 0x1f1   :  { %5992 = vmatpush.bf16.msrb.mxu0 %v10836_v40  ;;  %6006 = vmatpush.bf16.msrb.mxu1 %v10964_v28  ;;  %v13912_v40 = vld [vmem:[%s21995_s5 + $0x424] sm:$0xf]  ;;  %v10785_v28 = vld [vmem:[%s21995_s5 + $0x430] sm:$0xf0]  ;;  %v11172_v20 = vor.u32 %v14008_v44, %v11169_v54 }
 0x1f2   :  { %6020 = vmatpush.bf16.msrb.mxu2 %v11092_v29  ;;  %v13944_v29 = vld [vmem:[%s21995_s5 + $0x524] sm:$0xf]  ;;  %v10788_v38 = vor.u32 %v13912_v40, %v10785_v28  ;;  %v11025_v22 = vld [vmem:[%s21995_s5 + $0x610] sm:$0xf0] }
 0x1f3   :  { %6034 = vmatpush.bf16.msrb.mxu3 %v11220_v55  ;;  %v11041_v55 = vld [vmem:[%s21995_s5 + $0x630] sm:$0xf0]  ;;  %v13908_v35 = vld [vmem:[%s21995_s5 + $0x404] sm:$0xf] }
 0x1f4   :  { %v11044_v34 = vor.u32 %v13976_v58, %v11041_v55  ;;  %v13972_v8 = vld [vmem:[%s21995_s5 + $0x604] sm:$0xf]  ;;  %v11153_v5 = vld [vmem:[%s21995_s5 + $0x710] sm:$0xf0] }
 0x1f5   :  { %5993 = vmatpush.bf16.msrb.mxu0 %v10820_v62  ;;  %6007 = vmatpush.bf16.msrb.mxu1 %v10948_v47  ;;  %v13940_v62 = vld [vmem:[%s21995_s5 + $0x504] sm:$0xf]  ;;  %v10897_v47 = vld [vmem:[%s21995_s5 + $0x510] sm:$0xf0] }
 0x1f6   :  { %6021 = vmatpush.bf16.msrb.mxu2 %v11076_v42  ;;  %v10916_v42 = vor.u32 %v13944_v29, %v10913_v2  ;;  %v14004_v1 = vld [vmem:[%s21995_s5 + $0x704] sm:$0xf]  ;;  %v11393_v60 = vld [vmem:[%s21995_s5 + $0x8f0] sm:$0xf0]  ;;  %v11028_v2 = vor.u32 %v13972_v8, %v11025_v22 }
 0x1f7   :  { %6035 = vmatpush.bf16.msrb.mxu3 %v11204_v50  ;;  %v17978_v50 = vld [vmem:[%s21996_s6] sm:$0xf]  ;;  %v14064_v16 = vld [vmem:[%s21995_s5 + $0x8e4] sm:$0xf]  ;;  %v11649_v28 = vld [vmem:[%s21995_s5 + $0xaf0] sm:$0xf0]  ;;  %v11156_v44 = vor.u32 %v14004_v1, %v11153_v5  ;;  %v5732_v5 = vpop.f32.mrf.mxu1 }
 0x1f8   :  { %v14128_v40 = vld [vmem:[%s21995_s5 + $0xae4] sm:$0xf]  ;;  %v22008_v29 = vperm.slane %v17978_v50, 0  ;;  %v11777_v55 = vld [vmem:[%s21995_s5 + $0xbf0] sm:$0xf0]  ;;  %v11396_v54 = vor.u32 %v14064_v16, %v11393_v60 }
 0x1f9   :  { %5994 = vmatpush.bf16.msrb.mxu0 %v10804_v59  ;;  %6008 = vmatpush.bf16.msrb.mxu1 %v10932_v36  ;;  %v14096_v59 = vld [vmem:[%s21995_s5 + $0x9e4] sm:$0xf]  ;;  %v11521_v36 = vld [vmem:[%s21995_s5 + $0x9f0] sm:$0xf0] }
 0x1fa   :  { %6022 = vmatpush.bf16.msrb.mxu2 %v11060_v0  ;;  %v10772_v0 = vor.u32 %v13908_v35, %v10769_v10  ;;  %v14160_v58 = vld [vmem:[%s21995_s5 + $0xbe4] sm:$0xf]  ;;  %v11524_v35 = vor.u32 %v14096_v59, %v11521_v36  ;;  %v5718_v10 = vpop.f32.mrf.mxu0  ;;  %v11505_v22 = vld [vmem:[%s21995_s5 + $0x9d0] sm:$0xf0] }
 0x1fb   :  { %6036 = vmatpush.bf16.msrb.mxu3 %v11188_v13  ;;  %v10900_v13 = vor.u32 %v13940_v62, %v10897_v47  ;;  %v11377_v62 = vld [vmem:[%s21995_s5 + $0x8d0] sm:$0xf0]  ;;  %v14092_v47 = vld [vmem:[%s21995_s5 + $0x9c4] sm:$0xf]  ;;  %v5719_v8 = vadd.f32 %v5718_v10, %v22008_v29 }
 0x1fc   :  { %v11633_v1 = vld [vmem:[%s21995_s5 + $0xad0] sm:$0xf0]  ;;  %v14156_v16 = vld [vmem:[%s21995_s5 + $0xbc4] sm:$0xf] }
 0x1fd   :  { %5995 = vmatpush.bf16.msrb.mxu0 %v10788_v38  ;;  %6009 = vmatpush.bf16.msrb.mxu1 %v10916_v42  ;;  %v11652_v38 = vor.u32 %v14128_v40, %v11649_v28  ;;  %v14060_v42 = vld [vmem:[%s21995_s5 + $0x8c4] sm:$0xf]  ;;  %v11761_v60 = vld [vmem:[%s21995_s5 + $0xbd0] sm:$0xf0]  ;;  %v5733_v59 = vadd.f32 %v5732_v5, %v5719_v8 }
 0x1fe   :  { %6023 = vmatpush.bf16.msrb.mxu2 %v11044_v34  ;;  %v11780_v34 = vor.u32 %v14160_v58, %v11777_v55  ;;  %v11380_v36 = vor.u32 %v14060_v42, %v11377_v62  ;;  %v14056_v28 = vld [vmem:[%s21995_s5 + $0x8a4] sm:$0xf]  ;;  %v11764_v58 = vor.u32 %v14156_v16, %v11761_v60  ;;  %v11489_v55 = vld [vmem:[%s21995_s5 + $0x9b0] sm:$0xf0] }
 0x1ff   :  { %6037 = vmatpush.bf16.msrb.mxu3 %v11172_v20  ;;  %v14124_v20 = vld [vmem:[%s21995_s5 + $0xac4] sm:$0xf]  ;;  %v11601_v5 = vld [vmem:[%s21995_s5 + $0xa90] sm:$0xf0] }
 0x200   :  { %v11636_v40 = vor.u32 %v14124_v20, %v11633_v1  ;;  %v14084_v8 = vld [vmem:[%s21995_s5 + $0x984] sm:$0xf]  ;;  %v11473_v20 = vld [vmem:[%s21995_s5 + $0x990] sm:$0xf0] }
 0x201   :  { %5996 = vmatpush.bf16.msrb.mxu0 %v10772_v0  ;;  %6010 = vmatpush.bf16.msrb.mxu1 %v10900_v13  ;;  %v11508_v0 = vor.u32 %v14092_v47, %v11505_v22  ;;  %v11361_v13 = vld [vmem:[%s21995_s5 + $0x8b0] sm:$0xf0]  ;;  %v14052_v47 = vld [vmem:[%s21995_s5 + $0x884] sm:$0xf] }
 0x202   :  { %6024 = vmatpush.bf16.msrb.mxu2 %v11028_v2  ;;  %v14088_v2 = vld [vmem:[%s21995_s5 + $0x9a4] sm:$0xf]  ;;  %v11364_v10 = vor.u32 %v14056_v28, %v11361_v13  ;;  %v11729_v60 = vld [vmem:[%s21995_s5 + $0xb90] sm:$0xf0] }
 0x203   :  { %6038 = vmatpush.bf16.msrb.mxu3 %v11156_v44  ;;  %v14120_v44 = vld [vmem:[%s21995_s5 + $0xaa4] sm:$0xf]  ;;  %v11492_v42 = vor.u32 %v14088_v2, %v11489_v55 }
 0x204   :  { %5997 = vmatmul.bf16.vlgmr.msrb.gmra.mxu0 %v17312_v51  ;;  %6011 = vmatmul.bf16.vlgmr.msrb.gmra.mxu1 %v17323_v6  ;;  %v14116_v1 = vld [vmem:[%s21995_s5 + $0xa84] sm:$0xf] }
 0x205   :  { %6045 = vmatpush.bf16.msra.mxu0 %v11396_v54  ;;  %6059 = vmatpush.bf16.msra.mxu1 %v11524_v35  ;;  %v11617_v54 = vld [vmem:[%s21995_s5 + $0xab0] sm:$0xf0]  ;;  %v14152_v35 = vld [vmem:[%s21995_s5 + $0xba4] sm:$0xf]  ;;  %v11604_v28 = vor.u32 %v14116_v1, %v11601_v5 }
 0x206   :  { %6073 = vmatpush.bf16.msra.mxu2 %v11652_v38  ;;  %v11745_v38 = vld [vmem:[%s21995_s5 + $0xbb0] sm:$0xf0]  ;;  %6039 = vmatmul.bf16.vlgmr.msrb.gmra.mxu3 %v17385_v4  ;;  %v11620_v62 = vor.u32 %v14120_v44, %v11617_v54  ;;  %v14148_v16 = vld [vmem:[%s21995_s5 + $0xb84] sm:$0xf]  ;;  %v5760_v54 = vpop.f32.mrf.mxu3 }
 0x207   :  { %6087 = vmatpush.bf16.msra.mxu3 %v11780_v34  ;;  %6025 = vmatmul.bf16.vlgmr.msrb.gmra.mxu2 %v17377_v43  ;;  %v11345_v34 = vld [vmem:[%s21995_s5 + $0x890] sm:$0xf0]  ;;  %v11748_v22 = vor.u32 %v14152_v35, %v11745_v38  ;;  %v14048_v2 = vld [vmem:[%s21995_s5 + $0x864] sm:$0xf]  ;;  %v11732_v44 = vor.u32 %v14148_v16, %v11729_v60 }
 0x208   :  { %v14080_v55 = vld [vmem:[%s21995_s5 + $0x964] sm:$0xf]  ;;  %v11457_v35 = vld [vmem:[%s21995_s5 + $0x970] sm:$0xf0] }
 0x209   :  { %6046 = vmatpush.bf16.msra.mxu0 %v11380_v36  ;;  %6060 = vmatpush.bf16.msra.mxu1 %v11508_v0  ;;  %v11348_v36 = vor.u32 %v14052_v47, %v11345_v34  ;;  %v5746_v0 = vpop.f32.mrf.mxu2  ;;  %v11585_v38 = vld [vmem:[%s21995_s5 + $0xa70] sm:$0xf0]  ;;  %v11460_v34 = vor.u32 %v14080_v55, %v11457_v35  ;;  %v14076_v1 = vld [vmem:[%s21995_s5 + $0x944] sm:$0xf] }
 0x20a   :  { %6074 = vmatpush.bf16.msra.mxu2 %v11636_v40  ;;  %v11476_v40 = vor.u32 %v14084_v8, %v11473_v20  ;;  %v5747_v13 = vadd.f32 %v5746_v0, %v5733_v59  ;;  %v14112_v59 = vld [vmem:[%s21995_s5 + $0xa64] sm:$0xf]  ;;  %v11313_v20 = vld [vmem:[%s21995_s5 + $0x850] sm:$0xf0] }
 0x20b   :  { %6088 = vmatpush.bf16.msra.mxu3 %v11764_v58  ;;  %v11329_v58 = vld [vmem:[%s21995_s5 + $0x870] sm:$0xf0]  ;;  %v11588_v8 = vor.u32 %v14112_v59, %v11585_v38  ;;  %v14108_v60 = vld [vmem:[%s21995_s5 + $0xa44] sm:$0xf] }
 0x20c   :  { %v11332_v47 = vor.u32 %v14048_v2, %v11329_v58  ;;  %v11441_v16 = vld [vmem:[%s21995_s5 + $0x950] sm:$0xf0]  ;;  %v14140_v0 = vld [vmem:[%s21995_s5 + $0xb44] sm:$0xf] }
 0x20d   :  { %6047 = vmatpush.bf16.msra.mxu0 %v11364_v10  ;;  %6061 = vmatpush.bf16.msra.mxu1 %v11492_v42  ;;  %v18107_v10 = vadd.f32 %v5760_v54, %v5747_v13  ;;  %v14144_v42 = vld [vmem:[%s21995_s5 + $0xb64] sm:$0xf]  ;;  %v11444_v13 = vor.u32 %v14076_v1, %v11441_v16  ;;  %v11297_v55 = vld [vmem:[%s21995_s5 + $0x830] sm:$0xf0] }
 0x20e   :  { %6075 = vmatpush.bf16.msra.mxu2 %v11620_v62  ;;  %v11713_v62 = vld [vmem:[%s21995_s5 + $0xb70] sm:$0xf0]  ;;  %v14040_v58 = vld [vmem:[%s21995_s5 + $0x824] sm:$0xf] }
 0x20f   :  { %6089 = vmatpush.bf16.msra.mxu3 %v11748_v22  ;;  %v14044_v22 = vld [vmem:[%s21995_s5 + $0x844] sm:$0xf]  ;;  %v11716_v5 = vor.u32 %v14144_v42, %v11713_v62  ;;  %v11425_v35 = vld [vmem:[%s21995_s5 + $0x930] sm:$0xf0]  ;;  %v18157_v42 = vpop.f32.mrf.mxu0 }
 0x210   :  { %v14104_v59 = vld [vmem:[%s21995_s5 + $0xa24] sm:$0xf]  ;;  %v11553_v38 = vld [vmem:[%s21995_s5 + $0xa30] sm:$0xf0] }
 0x211   :  { %6048 = vmatpush.bf16.msra.mxu0 %v11348_v36  ;;  %6062 = vmatpush.bf16.msra.mxu1 %v11476_v40  ;;  %v11569_v36 = vld [vmem:[%s21995_s5 + $0xa50] sm:$0xf0]  ;;  %v14136_v62 = vld [vmem:[%s21995_s5 + $0xb24] sm:$0xf] }
 0x212   :  { %6076 = vmatpush.bf16.msra.mxu2 %v11604_v28  ;;  %v11697_v40 = vld [vmem:[%s21995_s5 + $0xb50] sm:$0xf0]  ;;  %v11316_v28 = vor.u32 %v14044_v22, %v11313_v20  ;;  %v11572_v2 = vor.u32 %v14108_v60, %v11569_v36  ;;  %v18171_v20 = vpop.f32.mrf.mxu1  ;;  %v14068_v16 = vld [vmem:[%s21995_s5 + $0x904] sm:$0xf] }
 0x213   :  { %6090 = vmatpush.bf16.msra.mxu3 %v11732_v44  ;;  %v14072_v44 = vld [vmem:[%s21995_s5 + $0x924] sm:$0xf]  ;;  %v11700_v54 = vor.u32 %v14140_v0, %v11697_v40  ;;  %v11281_v22 = vld [vmem:[%s21995_s5 + $0x810] sm:$0xf0] }
 0x214   :  { %v11428_v1 = vor.u32 %v14072_v44, %v11425_v35  ;;  %v11409_v60 = vld [vmem:[%s21995_s5 + $0x910] sm:$0xf0]  ;;  %v14100_v36 = vld [vmem:[%s21995_s5 + $0xa04] sm:$0xf] }
 0x215   :  { %6049 = vmatpush.bf16.msra.mxu0 %v11332_v47  ;;  %6063 = vmatpush.bf16.msra.mxu1 %v11460_v34  ;;  %v11681_v47 = vld [vmem:[%s21995_s5 + $0xb30] sm:$0xf0]  ;;  %v11300_v34 = vor.u32 %v14040_v58, %v11297_v55  ;;  %v14224_v55 = vld [vmem:[%s21995_s5 + $0xde4] sm:$0xf] }
 0x216   :  { %6077 = vmatpush.bf16.msra.mxu2 %v11588_v8  ;;  %v14036_v8 = vld [vmem:[%s21995_s5 + $0x804] sm:$0xf]  ;;  %v11684_v0 = vor.u32 %v14136_v62, %v11681_v47  ;;  %v11537_v40 = vld [vmem:[%s21995_s5 + $0xa10] sm:$0xf0] }
 0x217   :  { %6091 = vmatpush.bf16.msra.mxu3 %v11716_v5  ;;  %v11556_v5 = vor.u32 %v14104_v59, %v11553_v38  ;;  %v11905_v58 = vld [vmem:[%s21995_s5 + $0xcf0] sm:$0xf0]  ;;  %v11284_v44 = vor.u32 %v14036_v8, %v11281_v22  ;;  %v14256_v35 = vld [vmem:[%s21995_s5 + $0xee4] sm:$0xf]  ;;  %v11412_v38 = vor.u32 %v14068_v16, %v11409_v60  ;;  %v11540_v62 = vor.u32 %v14100_v36, %v11537_v40  ;;  %v5774_v63 = vpop.f32.mrf.mxu0 }
 0x218   :  { %v12161_v59 = vld [vmem:[%s21995_s5 + $0xef0] sm:$0xf0]  ;;  %v14288_v47 = vld [vmem:[%s21995_s5 + $0xfe4] sm:$0xf]  ;;  %v5775_v36 = vadd.f32 %v5774_v63, %v18107_v10  ;;  %v18240_v10 = vpop.f32.mrf.mxu2 }
 0x219   :  { %6050 = vmatpush.bf16.msra.mxu0 %v11316_v28  ;;  %6064 = vmatpush.bf16.msra.mxu1 %v11444_v13  ;;  %v14132_v28 = vld [vmem:[%s21995_s5 + $0xb04] sm:$0xf]  ;;  %v11665_v13 = vld [vmem:[%s21995_s5 + $0xb10] sm:$0xf0]  ;;  %v12164_v26 = vor.u32 %v14256_v35, %v12161_v59 }
 0x21a   :  { %6078 = vmatpush.bf16.msra.mxu2 %v11572_v2  ;;  %v14192_v2 = vld [vmem:[%s21995_s5 + $0xce4] sm:$0xf]  ;;  %v11668_v8 = vor.u32 %v14132_v28, %v11665_v13  ;;  %v12145_v28 = vld [vmem:[%s21995_s5 + $0xed0] sm:$0xf0]  ;;  %v5788_v13 = vpop.f32.mrf.mxu1 }
 0x21b   :  { %6092 = vmatpush.bf16.msra.mxu3 %v11700_v54  ;;  %v12033_v54 = vld [vmem:[%s21995_s5 + $0xdf0] sm:$0xf0]  ;;  %v11908_v22 = vor.u32 %v14192_v2, %v11905_v58  ;;  %v14220_v16 = vld [vmem:[%s21995_s5 + $0xdc4] sm:$0xf]  ;;  %v5789_v58 = vadd.f32 %v5788_v13, %v5775_v36 }
 0x21c   :  { %v12036_v29 = vor.u32 %v14224_v55, %v12033_v54  ;;  %v14252_v40 = vld [vmem:[%s21995_s5 + $0xec4] sm:$0xf]  ;;  %v12273_v63 = vld [vmem:[%s21995_s5 + $0xfd0] sm:$0xf0] }
 0x21d   :  { %6051 = vmatpush.bf16.msra.mxu0 %v11300_v34  ;;  %6065 = vmatpush.bf16.msra.mxu1 %v11428_v1  ;;  %v12289_v34 = vld [vmem:[%s21995_s5 + $0xff0] sm:$0xf0]  ;;  %v14188_v1 = vld [vmem:[%s21995_s5 + $0xcc4] sm:$0xf]  ;;  %v12148_v54 = vor.u32 %v14252_v40, %v12145_v28 }
 0x21e   :  { %6079 = vmatpush.bf16.msra.mxu2 %v11556_v5  ;;  %v11889_v5 = vld [vmem:[%s21995_s5 + $0xcd0] sm:$0xf0]  ;;  %v12292_v60 = vor.u32 %v14288_v47, %v12289_v34  ;;  %v14284_v2 = vld [vmem:[%s21995_s5 + $0xfc4] sm:$0xf] }
 0x21f   :  { %6093 = vmatpush.bf16.msra.mxu3 %v11684_v0  ;;  %v12017_v0 = vld [vmem:[%s21995_s5 + $0xdd0] sm:$0xf0]  ;;  %v11892_v55 = vor.u32 %v14188_v1, %v11889_v5  ;;  %v14184_v35 = vld [vmem:[%s21995_s5 + $0xca4] sm:$0xf] }
 0x220   :  { %v11873_v59 = vld [vmem:[%s21995_s5 + $0xcb0] sm:$0xf0]  ;;  %v14248_v47 = vld [vmem:[%s21995_s5 + $0xea4] sm:$0xf] }
 0x221   :  { %6052 = vmatpush.bf16.msra.mxu0 %v11284_v44  ;;  %6066 = vmatpush.bf16.msra.mxu1 %v11412_v38  ;;  %v12020_v44 = vor.u32 %v14220_v16, %v12017_v0  ;;  %v14216_v38 = vld [vmem:[%s21995_s5 + $0xda4] sm:$0xf]  ;;  %v12129_v34 = vld [vmem:[%s21995_s5 + $0xeb0] sm:$0xf0]  ;;  %v11876_v1 = vor.u32 %v14184_v35, %v11873_v59 }
 0x222   :  { %6080 = vmatpush.bf16.msra.mxu2 %v11540_v62  ;;  %v18251_v62 = vpop.f32.mrf.mxu3  ;;  %v12132_v16 = vor.u32 %v14248_v47, %v12129_v34  ;;  %v11857_v36 = vld [vmem:[%s21995_s5 + $0xc90] sm:$0xf0]  ;;  %v14212_v0 = vld [vmem:[%s21995_s5 + $0xd84] sm:$0xf] }
 0x223   :  { %6094 = vmatpush.bf16.msra.mxu3 %v11668_v8  ;;  %v14280_v8 = vld [vmem:[%s21995_s5 + $0xfa4] sm:$0xf]  ;;  %v11985_v28 = vld [vmem:[%s21995_s5 + $0xd90] sm:$0xf0] }
 0x224   :  { %6053 = vmatmul.bf16.vlgmr.msra.gmra.mxu0 %v17522_v3  ;;  %6067 = vmatmul.bf16.vlgmr.msra.gmra.mxu1 %v17533_v7  ;;  %v14244_v13 = vld [vmem:[%s21995_s5 + $0xe84] sm:$0xf]  ;;  %v11988_v35 = vor.u32 %v14212_v0, %v11985_v28 }
 0x225   :  { %6101 = vmatpush.bf16.msrb.mxu0 %v11908_v22  ;;  %6115 = vmatpush.bf16.msrb.mxu1 %v12036_v29  ;;  %v12001_v29 = vld [vmem:[%s21995_s5 + $0xdb0] sm:$0xf0]  ;;  %v14208_v47 = vld [vmem:[%s21995_s5 + $0xd64] sm:$0xf] }
 0x226   :  { %6129 = vmatpush.bf16.msrb.mxu2 %v12164_v26  ;;  %v12276_v26 = vor.u32 %v14284_v2, %v12273_v63  ;;  %v12257_v22 = vld [vmem:[%s21995_s5 + $0xfb0] sm:$0xf0]  ;;  %6095 = vmatmul.bf16.vlgmr.msra.gmra.mxu3 %v17595_v11  ;;  %v12004_v5 = vor.u32 %v14216_v38, %v12001_v29  ;;  %v14276_v63 = vld [vmem:[%s21995_s5 + $0xf84] sm:$0xf] }
 0x227   :  { %6143 = vmatpush.bf16.msrb.mxu3 %v12292_v60  ;;  %6081 = vmatmul.bf16.vlgmr.msra.gmra.mxu2 %v17587_v9  ;;  %v14180_v60 = vld [vmem:[%s21995_s5 + $0xc84] sm:$0xf]  ;;  %v12260_v40 = vor.u32 %v14280_v8, %v12257_v22  ;;  %v12113_v2 = vld [vmem:[%s21995_s5 + $0xe90] sm:$0xf0] }
 0x228   :  { %v12116_v59 = vor.u32 %v14244_v13, %v12113_v2  ;;  %v11841_v29 = vld [vmem:[%s21995_s5 + $0xc70] sm:$0xf0]  ;;  %v14172_v28 = vld [vmem:[%s21995_s5 + $0xc44] sm:$0xf] }
 0x229   :  { %6102 = vmatpush.bf16.msrb.mxu0 %v11892_v55  ;;  %6116 = vmatpush.bf16.msrb.mxu1 %v12020_v44  ;;  %v12241_v55 = vld [vmem:[%s21995_s5 + $0xf90] sm:$0xf0]  ;;  %v11860_v44 = vor.u32 %v14180_v60, %v11857_v36  ;;  %v14204_v2 = vld [vmem:[%s21995_s5 + $0xd44] sm:$0xf] }
 0x22a   :  { %6130 = vmatpush.bf16.msrb.mxu2 %v12148_v54  ;;  %v5802_v54 = vpop.f32.mrf.mxu2  ;;  %v12244_v34 = vor.u32 %v14276_v63, %v12241_v55  ;;  %v5816_v8 = vpop.f32.mrf.mxu3  ;;  %v11969_v22 = vld [vmem:[%s21995_s5 + $0xd70] sm:$0xf0] }
 0x22b   :  { %6144 = vmatpush.bf16.msrb.mxu3 %v12276_v26  ;;  %v5803_v38 = vadd.f32 %v5802_v54, %v5789_v58  ;;  %v14176_v26 = vld [vmem:[%s21995_s5 + $0xc64] sm:$0xf]  ;;  %v12225_v60 = vld [vmem:[%s21995_s5 + $0xf70] sm:$0xf0]  ;;  %v11972_v0 = vor.u32 %v14208_v47, %v11969_v22 }
 0x22c   :  { %v14240_v58 = vld [vmem:[%s21995_s5 + $0xe64] sm:$0xf]  ;;  %v11844_v36 = vor.u32 %v14176_v26, %v11841_v29  ;;  %v11825_v13 = vld [vmem:[%s21995_s5 + $0xc50] sm:$0xf0] }
 0x22d   :  { %6103 = vmatpush.bf16.msrb.mxu0 %v11876_v1  ;;  %6117 = vmatpush.bf16.msrb.mxu1 %v12004_v5  ;;  %v12097_v1 = vld [vmem:[%s21995_s5 + $0xe70] sm:$0xf0]  ;;  %v18314_v5 = vadd.f32 %v5816_v8, %v5803_v38  ;;  %v11828_v38 = vor.u32 %v14172_v28, %v11825_v13  ;;  %v14168_v47 = vld [vmem:[%s21995_s5 + $0xc24] sm:$0xf] }
 0x22e   :  { %6131 = vmatpush.bf16.msrb.mxu2 %v12132_v16  ;;  %v14272_v16 = vld [vmem:[%s21995_s5 + $0xf64] sm:$0xf]  ;;  %v11953_v55 = vld [vmem:[%s21995_s5 + $0xd50] sm:$0xf0] }
 0x22f   :  { %6145 = vmatpush.bf16.msrb.mxu3 %v12260_v40  ;;  %v12100_v40 = vor.u32 %v14240_v58, %v12097_v1  ;;  %v12228_v63 = vor.u32 %v14272_v16, %v12225_v60  ;;  %v12081_v54 = vld [vmem:[%s21995_s5 + $0xe50] sm:$0xf0]  ;;  %v11956_v26 = vor.u32 %v14204_v2, %v11953_v55  ;;  %v14200_v8 = vld [vmem:[%s21995_s5 + $0xd24] sm:$0xf]  ;;  %v18364_v60 = vpop.f32.mrf.mxu0  ;;  %v18378_v2 = vpop.f32.mrf.mxu1 }
 0x230   :  { %v11937_v58 = vld [vmem:[%s21995_s5 + $0xd30] sm:$0xf0]  ;;  %v14232_v1 = vld [vmem:[%s21995_s5 + $0xe24] sm:$0xf] }
 0x231   :  { %6104 = vmatpush.bf16.msrb.mxu0 %v11860_v44  ;;  %6118 = vmatpush.bf16.msrb.mxu1 %v11988_v35  ;;  %v14236_v44 = vld [vmem:[%s21995_s5 + $0xe44] sm:$0xf]  ;;  %v12065_v16 = vld [vmem:[%s21995_s5 + $0xe30] sm:$0xf0] }
 0x232   :  { %6132 = vmatpush.bf16.msrb.mxu2 %v12116_v59  ;;  %v14268_v35 = vld [vmem:[%s21995_s5 + $0xf44] sm:$0xf]  ;;  %v12209_v59 = vld [vmem:[%s21995_s5 + $0xf50] sm:$0xf0]  ;;  %v12084_v29 = vor.u32 %v14236_v44, %v12081_v54  ;;  %v12068_v55 = vor.u32 %v14232_v1, %v12065_v16  ;;  %v10631_v1 = vld [vmem:[%s21995_s5 + $0x2e8] sm:$0xf] }
 0x233   :  { %6146 = vmatpush.bf16.msrb.mxu3 %v12244_v34  ;;  %v11809_v34 = vld [vmem:[%s21995_s5 + $0xc30] sm:$0xf0]  ;;  %v12212_v22 = vor.u32 %v14268_v35, %v12209_v59  ;;  %v14164_v28 = vld [vmem:[%s21995_s5 + $0xc04] sm:$0xf]  ;;  %v13875_v16 = vld [vmem:[%s21995_s5 + $0x2f4] sm:$0xf0] }
 0x234   :  { %v11793_v13 = vld [vmem:[%s21995_s5 + $0xc10] sm:$0xf0]  ;;  %v14196_v44 = vld [vmem:[%s21995_s5 + $0xd04] sm:$0xf]  ;;  %v10632_v19 = vor.u32 %v13875_v16, %v10631_v1  ;;  %v10343_v1 = vld [vmem:[%s21995_s5 + $0xa8] sm:$0xf] }
 0x235   :  { %6105 = vmatpush.bf16.msrb.mxu0 %v11844_v36  ;;  %6119 = vmatpush.bf16.msrb.mxu1 %v11972_v0  ;;  %v14264_v36 = vld [vmem:[%s21995_s5 + $0xf24] sm:$0xf]  ;;  %v12193_v0 = vld [vmem:[%s21995_s5 + $0xf30] sm:$0xf0]  ;;  %v13803_v16 = vld [vmem:[%s21995_s5 + $0xb4] sm:$0xf0] }
 0x236   :  { %6133 = vmatpush.bf16.msrb.mxu2 %v12100_v40  ;;  %v11812_v40 = vor.u32 %v14168_v47, %v11809_v34  ;;  %v11921_v54 = vld [vmem:[%s21995_s5 + $0xd10] sm:$0xf0]  ;;  %v14228_v35 = vld [vmem:[%s21995_s5 + $0xe04] sm:$0xf]  ;;  %v12196_v59 = vor.u32 %v14264_v36, %v12193_v0  ;;  %v10375_v47 = vld [vmem:[%s21995_s5 + $0xe8] sm:$0xf] }
 0x237   :  { %6147 = vmatpush.bf16.msrb.mxu3 %v12228_v63  ;;  %v11940_v63 = vor.u32 %v14200_v8, %v11937_v58  ;;  %v13811_v34 = vld [vmem:[%s21995_s5 + $0xf4] sm:$0xf0]  ;;  %v10503_v8 = vld [vmem:[%s21995_s5 + $0x1e8] sm:$0xf]  ;;  %v11924_v36 = vor.u32 %v14196_v44, %v11921_v54  ;;  %v5830_v21 = vpop.f32.mrf.mxu0 }
 0x238   :  { %v13843_v58 = vld [vmem:[%s21995_s5 + $0x1f4] sm:$0xf0]  ;;  %v10376_v31 = vor.u32 %v13811_v34, %v10375_v47  ;;  %v10487_v44 = vld [vmem:[%s21995_s5 + $0x1c8] sm:$0xf] }
 0x239   :  { %6106 = vmatpush.bf16.msrb.mxu0 %v11828_v38  ;;  %6120 = vmatpush.bf16.msrb.mxu1 %v11956_v26  ;;  %v12049_v38 = vld [vmem:[%s21995_s5 + $0xe10] sm:$0xf0]  ;;  %v14260_v26 = vld [vmem:[%s21995_s5 + $0xf04] sm:$0xf]  ;;  %v10504_v57 = vor.u32 %v13843_v58, %v10503_v8  ;;  %v10743_v47 = vld [vmem:[%s21995_s5 + $0x3c8] sm:$0xf] }
 0x23a   :  { %6134 = vmatpush.bf16.msrb.mxu2 %v12084_v29  ;;  %v12177_v29 = vld [vmem:[%s21995_s5 + $0xf10] sm:$0xf0]  ;;  %v12052_v0 = vor.u32 %v14228_v35, %v12049_v38  ;;  %v5831_v35 = vadd.f32 %v5830_v21, %v18314_v5  ;;  %v10615_v38 = vld [vmem:[%s21995_s5 + $0x2c8] sm:$0xf]  ;;  %v13903_v21 = vld [vmem:[%s21995_s5 + $0x3d4] sm:$0xf0]  ;;  %v18447_v5 = vpop.f32.mrf.mxu2 }
 0x23b   :  { %6148 = vmatpush.bf16.msrb.mxu3 %v12212_v22  ;;  %v11796_v22 = vor.u32 %v14164_v28, %v11793_v13  ;;  %v13907_v28 = vld [vmem:[%s21995_s5 + $0x3f4] sm:$0xf0]  ;;  %v12180_v13 = vor.u32 %v14260_v26, %v12177_v29  ;;  %v5844_v29 = vpop.f32.mrf.mxu1 }
 0x23c   :  { %v13871_v26 = vld [vmem:[%s21995_s5 + $0x2d4] sm:$0xf0]  ;;  %v5845_v34 = vadd.f32 %v5844_v29, %v5831_v35  ;;  %v10583_v29 = vld [vmem:[%s21995_s5 + $0x288] sm:$0xf] }
 0x23d   :  { %6107 = vmatpush.bf16.msrb.mxu0 %v11812_v40  ;;  %6121 = vmatpush.bf16.msrb.mxu1 %v11940_v63  ;;  %v10759_v40 = vld [vmem:[%s21995_s5 + $0x3e8] sm:$0xf]  ;;  %v10616_v58 = vor.u32 %v13871_v26, %v10615_v38  ;;  %v13799_v35 = vld [vmem:[%s21995_s5 + $0x94] sm:$0xf0] }
 0x23e   :  { %6135 = vmatpush.bf16.msrb.mxu2 %v12068_v55  ;;  %v10359_v63 = vld [vmem:[%s21995_s5 + $0xc8] sm:$0xf]  ;;  %v13807_v55 = vld [vmem:[%s21995_s5 + $0xd4] sm:$0xf0]  ;;  %v10760_v54 = vor.u32 %v13907_v28, %v10759_v40 }
 0x23f   :  { %6149 = vmatpush.bf16.msrb.mxu3 %v12196_v59  ;;  %v13839_v59 = vld [vmem:[%s21995_s5 + $0x1d4] sm:$0xf0]  ;;  %v10360_v8 = vor.u32 %v13807_v55, %v10359_v63  ;;  %v10727_v28 = vld [vmem:[%s21995_s5 + $0x3a8] sm:$0xf]  ;;  %v10344_v63 = vor.u32 %v13803_v16, %v10343_v1 }
 0x240   :  { %v13867_v40 = vld [vmem:[%s21995_s5 + $0x2b4] sm:$0xf0] }
 0x241   :  { %6108 = vmatpush.bf16.msrb.mxu0 %v11796_v22  ;;  %6122 = vmatpush.bf16.msrb.mxu1 %v11924_v36  ;;  %v10488_v22 = vor.u32 %v13839_v59, %v10487_v44  ;;  %v10471_v36 = vld [vmem:[%s21995_s5 + $0x1a8] sm:$0xf]  ;;  %v13831_v26 = vld [vmem:[%s21995_s5 + $0x194] sm:$0xf0] }
 0x242   :  { %6136 = vmatpush.bf16.msrb.mxu2 %v12052_v0  ;;  %v18458_v0 = vpop.f32.mrf.mxu3  ;;  %v10455_v59 = vld [vmem:[%s21995_s5 + $0x188] sm:$0xf] }
 0x243   :  { %6150 = vmatpush.bf16.msrb.mxu3 %v12180_v13  ;;  %v13899_v13 = vld [vmem:[%s21995_s5 + $0x3b4] sm:$0xf0]  ;;  %v10456_v1 = vor.u32 %v13831_v26, %v10455_v59  ;;  %v10295_v26 = vld [vmem:[%s21995_s5 + $0x48] sm:$0xf] }
 0x244   :  { %6109 = vmatmul.bf16.vlgmr.msrb.gmra.mxu0 %v17732_v30  ;;  %6123 = vmatmul.bf16.vlgmr.msrb.gmra.mxu1 %v17743_v17  ;;  %v10728_v38 = vor.u32 %v13899_v13, %v10727_v28  ;;  %v13827_v13 = vld [vmem:[%s21995_s5 + $0x174] sm:$0xf0] }
 0x245   :  { %6157 = vmatpush.bf16.msra.mxu0 %v10376_v31  ;;  %6171 = vmatpush.bf16.msra.mxu1 %v10504_v57  ;;  %v13835_v57 = vld [vmem:[%s21995_s5 + $0x1b4] sm:$0xf0]  ;;  %v10599_v31 = vld [vmem:[%s21995_s5 + $0x2a8] sm:$0xf] }
 0x246   :  { %6185 = vmatpush.bf16.msra.mxu2 %v10632_v19  ;;  %v10744_v19 = vor.u32 %v13903_v21, %v10743_v47  ;;  %6151 = vmatmul.bf16.vlgmr.msrb.gmra.mxu3 %v17805_v45  ;;  %v10472_v55 = vor.u32 %v13835_v57, %v10471_v36  ;;  %v10600_v44 = vor.u32 %v13867_v40, %v10599_v31  ;;  %v13863_v47 = vld [vmem:[%s21995_s5 + $0x294] sm:$0xf0]  ;;  %v10711_v21 = vld [vmem:[%s21995_s5 + $0x388] sm:$0xf] }
 0x247   :  { %6199 = vmatpush.bf16.msra.mxu3 %v10760_v54  ;;  %6137 = vmatmul.bf16.vlgmr.msrb.gmra.mxu2 %v17797_v61  ;;  %v10327_v54 = vld [vmem:[%s21995_s5 + $0x88] sm:$0xf]  ;;  %v10584_v16 = vor.u32 %v13863_v47, %v10583_v29  ;;  %v13795_v57 = vld [vmem:[%s21995_s5 + $0x74] sm:$0xf0] }
 0x248   :  { %v10439_v31 = vld [vmem:[%s21995_s5 + $0x168] sm:$0xf]  ;;  %v13791_v29 = vld [vmem:[%s21995_s5 + $0x54] sm:$0xf0] }
 0x249   :  { %6158 = vmatpush.bf16.msra.mxu0 %v10360_v8  ;;  %6172 = vmatpush.bf16.msra.mxu1 %v10488_v22  ;;  %v13895_v8 = vld [vmem:[%s21995_s5 + $0x394] sm:$0xf0]  ;;  %v10328_v22 = vor.u32 %v13799_v35, %v10327_v54  ;;  %v10440_v59 = vor.u32 %v13827_v13, %v10439_v31  ;;  %v10423_v47 = vld [vmem:[%s21995_s5 + $0x148] sm:$0xf] }
 0x24a   :  { %6186 = vmatpush.bf16.msra.mxu2 %v10616_v58  ;;  %v5858_v58 = vpop.f32.mrf.mxu2  ;;  %v10712_v40 = vor.u32 %v13895_v8, %v10711_v21  ;;  %v5872_v28 = vpop.f32.mrf.mxu3  ;;  %v13891_v54 = vld [vmem:[%s21995_s5 + $0x374] sm:$0xf0]  ;;  %v10279_v31 = vld [vmem:[%s21995_s5 + $0x28] sm:$0xf] }
 0x24b   :  { %6200 = vmatpush.bf16.msra.mxu3 %v10744_v19  ;;  %v5859_v36 = vadd.f32 %v5858_v58, %v5845_v34  ;;  %v10311_v19 = vld [vmem:[%s21995_s5 + $0x68] sm:$0xf]  ;;  %v13823_v8 = vld [vmem:[%s21995_s5 + $0x154] sm:$0xf0] }
 0x24c   :  { %v10567_v34 = vld [vmem:[%s21995_s5 + $0x268] sm:$0xf]  ;;  %v10312_v35 = vor.u32 %v13795_v57, %v10311_v19  ;;  %v13855_v58 = vld [vmem:[%s21995_s5 + $0x254] sm:$0xf0]  ;;  %v10424_v19 = vor.u32 %v13823_v8, %v10423_v47 }
 0x24d   :  { %6159 = vmatpush.bf16.msra.mxu0 %v10344_v63  ;;  %6173 = vmatpush.bf16.msra.mxu1 %v10472_v55  ;;  %v13859_v63 = vld [vmem:[%s21995_s5 + $0x274] sm:$0xf0]  ;;  %v18521_v55 = vadd.f32 %v5872_v28, %v5859_v36  ;;  %v10296_v36 = vor.u32 %v13791_v29, %v10295_v26  ;;  %v10407_v28 = vld [vmem:[%s21995_s5 + $0x128] sm:$0xf] }
 0x24e   :  { %6187 = vmatpush.bf16.msra.mxu2 %v10600_v44  ;;  %v10695_v44 = vld [vmem:[%s21995_s5 + $0x368] sm:$0xf]  ;;  %v13783_v47 = vld [vmem:[%s21995_s5 + $0x14] sm:$0xf0] }
 0x24f   :  { %6201 = vmatpush.bf16.msra.mxu3 %v10728_v38  ;;  %v10568_v38 = vor.u32 %v13859_v63, %v10567_v34  ;;  %v10696_v21 = vor.u32 %v13891_v54, %v10695_v44  ;;  %v13819_v34 = vld [vmem:[%s21995_s5 + $0x134] sm:$0xf0]  ;;  %v10535_v63 = vld [vmem:[%s21995_s5 + $0x228] sm:$0xf]  ;;  %v18571_v54 = vpop.f32.mrf.mxu0 }
 0x250   :  { %v13851_v44 = vld [vmem:[%s21995_s5 + $0x234] sm:$0xf0]  ;;  %v10263_v29 = vld [vmem:[%s21995_s5 + $0x8] sm:$0xf] }
 0x251   :  { %6160 = vmatpush.bf16.msra.mxu0 %v10328_v22  ;;  %6174 = vmatpush.bf16.msra.mxu1 %v10456_v1  ;;  %v10551_v22 = vld [vmem:[%s21995_s5 + $0x248] sm:$0xf]  ;;  %v10536_v8 = vor.u32 %v13851_v44, %v10535_v63  ;;  %v14003_v44 = vld [vmem:[%s21995_s5 + $0x6f4] sm:$0xf0] }
 0x252   :  { %6188 = vmatpush.bf16.msra.mxu2 %v10584_v16  ;;  %v10679_v1 = vld [vmem:[%s21995_s5 + $0x348] sm:$0xf]  ;;  %v13887_v16 = vld [vmem:[%s21995_s5 + $0x354] sm:$0xf0]  ;;  %v10552_v57 = vor.u32 %v13855_v58, %v10551_v22 }
 0x253   :  { %6202 = vmatpush.bf16.msra.mxu3 %v10712_v40  ;;  %v13787_v40 = vld [vmem:[%s21995_s5 + $0x34] sm:$0xf0]  ;;  %v10680_v13 = vor.u32 %v13887_v16, %v10679_v1  ;;  %v10391_v22 = vld [vmem:[%s21995_s5 + $0x108] sm:$0xf] }
 0x254   :  { %v10280_v26 = vor.u32 %v13787_v40, %v10279_v31  ;;  %v13815_v58 = vld [vmem:[%s21995_s5 + $0x114] sm:$0xf0]  ;;  %v10519_v1 = vld [vmem:[%s21995_s5 + $0x208] sm:$0xf] }
 0x255   :  { %6161 = vmatpush.bf16.msra.mxu0 %v10312_v35  ;;  %6175 = vmatpush.bf16.msra.mxu1 %v10440_v59  ;;  %v10663_v35 = vld [vmem:[%s21995_s5 + $0x328] sm:$0xf]  ;;  %v13883_v59 = vld [vmem:[%s21995_s5 + $0x334] sm:$0xf0] }
 0x256   :  { %6189 = vmatpush.bf16.msra.mxu2 %v10568_v38  ;;  %v18579_v38 = vpop.f32.mrf.mxu1  ;;  %v10664_v16 = vor.u32 %v13883_v59, %v10663_v35  ;;  %v10887_v31 = vld [vmem:[%s21995_s5 + $0x4e8] sm:$0xf]  ;;  %v13939_v40 = vld [vmem:[%s21995_s5 + $0x4f4] sm:$0xf0]  ;;  %v10392_v35 = vor.u32 %v13815_v58, %v10391_v22 }
 0x257   :  { %6203 = vmatpush.bf16.msra.mxu3 %v10696_v21  ;;  %v10408_v21 = vor.u32 %v13819_v34, %v10407_v28  ;;  %v11015_v28 = vld [vmem:[%s21995_s5 + $0x5e8] sm:$0xf]  ;;  %v13971_v34 = vld [vmem:[%s21995_s5 + $0x5f4] sm:$0xf0]  ;;  %v10888_v48 = vor.u32 %v13939_v40, %v10887_v31  ;;  %v5886_v25 = vpop.f32.mrf.mxu0 }
 0x258   :  { %v11143_v63 = vld [vmem:[%s21995_s5 + $0x6e8] sm:$0xf]  ;;  %v11016_v14 = vor.u32 %v13971_v34, %v11015_v28 }
 0x259   :  { %6162 = vmatpush.bf16.msra.mxu0 %v10296_v36  ;;  %6176 = vmatpush.bf16.msra.mxu1 %v10424_v19  ;;  %v13847_v36 = vld [vmem:[%s21995_s5 + $0x214] sm:$0xf0]  ;;  %v10647_v19 = vld [vmem:[%s21995_s5 + $0x308] sm:$0xf]  ;;  %v11144_v24 = vor.u32 %v14003_v44, %v11143_v63 }
 0x25a   :  { %6190 = vmatpush.bf16.msra.mxu2 %v10552_v57  ;;  %v13879_v57 = vld [vmem:[%s21995_s5 + $0x314] sm:$0xf0]  ;;  %v10520_v59 = vor.u32 %v13847_v36, %v10519_v1  ;;  %v10999_v22 = vld [vmem:[%s21995_s5 + $0x5c8] sm:$0xf]  ;;  %v5887_v1 = vadd.f32 %v5886_v25, %v18521_v55  ;;  %v18654_v55 = vpop.f32.mrf.mxu2 }
 0x25b   :  { %6204 = vmatpush.bf16.msra.mxu3 %v10680_v13  ;;  %v10264_v13 = vor.u32 %v13783_v47, %v10263_v29  ;;  %v14035_v29 = vld [vmem:[%s21995_s5 + $0x7f4] sm:$0xf0]  ;;  %v10648_v47 = vor.u32 %v13879_v57, %v10647_v19  ;;  %v11127_v19 = vld [vmem:[%s21995_s5 + $0x6c8] sm:$0xf] }
 0x25c   :  { %v13967_v36 = vld [vmem:[%s21995_s5 + $0x5d4] sm:$0xf0]  ;;  %v11255_v31 = vld [vmem:[%s21995_s5 + $0x7c8] sm:$0xf] }
 0x25d   :  { %6163 = vmatpush.bf16.msra.mxu0 %v10280_v26  ;;  %6177 = vmatpush.bf16.msra.mxu1 %v10408_v21  ;;  %v11271_v26 = vld [vmem:[%s21995_s5 + $0x7e8] sm:$0xf]  ;;  %v13999_v57 = vld [vmem:[%s21995_s5 + $0x6d4] sm:$0xf0]  ;;  %v11000_v34 = vor.u32 %v13967_v36, %v10999_v22 }
 0x25e   :  { %6191 = vmatpush.bf16.msra.mxu2 %v10536_v8  ;;  %v10871_v21 = vld [vmem:[%s21995_s5 + $0x4c8] sm:$0xf]  ;;  %v13935_v8 = vld [vmem:[%s21995_s5 + $0x4d4] sm:$0xf0]  ;;  %v11272_v58 = vor.u32 %v14035_v29, %v11271_v26  ;;  %v11128_v63 = vor.u32 %v13999_v57, %v11127_v19 }
 0x25f   :  { %6205 = vmatpush.bf16.msra.mxu3 %v10664_v16  ;;  %v5900_v16 = vpop.f32.mrf.mxu1  ;;  %v14031_v25 = vld [vmem:[%s21995_s5 + $0x7d4] sm:$0xf0]  ;;  %v10872_v28 = vor.u32 %v13935_v8, %v10871_v21  ;;  %v10855_v44 = vld [vmem:[%s21995_s5 + $0x4a8] sm:$0xf] }
 0x260   :  { %v5901_v40 = vadd.f32 %v5900_v16, %v5887_v1  ;;  %v13995_v26 = vld [vmem:[%s21995_s5 + $0x6b4] sm:$0xf0]  ;;  %v11239_v29 = vld [vmem:[%s21995_s5 + $0x7a8] sm:$0xf] }
 0x261   :  { %6164 = vmatpush.bf16.msra.mxu0 %v10264_v13  ;;  %6178 = vmatpush.bf16.msra.mxu1 %v10392_v35  ;;  %v18656_v13 = vpop.f32.mrf.mxu3  ;;  %v13931_v35 = vld [vmem:[%s21995_s5 + $0x4b4] sm:$0xf0]  ;;  %v10839_v1 = vld [vmem:[%s21995_s5 + $0x488] sm:$0xf] }
 0x262   :  { %6192 = vmatpush.bf16.msra.mxu2 %v10520_v59  ;;  %22042 = vst [vmem:[#allocation32_spill] sm:$0xff] %v18656_v13  ;;  %v11256_v59 = vor.u32 %v14031_v25, %v11255_v31  ;;  %v10856_v21 = vor.u32 %v13931_v35, %v10855_v44  ;;  %v13927_v16 = vld [vmem:[%s21995_s5 + $0x494] sm:$0xf0]  ;;  %v10967_v36 = vld [vmem:[%s21995_s5 + $0x588] sm:$0xf]  ;;  %v5914_v35 = vpop.f32.mrf.mxu2 }
 0x263   :  { %6206 = vmatpush.bf16.msra.mxu3 %v10648_v47  ;;  %v14027_v47 = vld [vmem:[%s21995_s5 + $0x7b4] sm:$0xf0]  ;;  %v11095_v31 = vld [vmem:[%s21995_s5 + $0x688] sm:$0xf]  ;;  %v10840_v44 = vor.u32 %v13927_v16, %v10839_v1 }
 0x264   :  { %6165 = vmatmul.bf16.vlgmr.msra.gmra.mxu0 %v17102_v41  ;;  %6179 = vmatmul.bf16.vlgmr.msra.gmra.mxu1 %v17113_v52  ;;  %v11240_v19 = vor.u32 %v14027_v47, %v11239_v29  ;;  %v13959_v57 = vld [vmem:[%s21995_s5 + $0x594] sm:$0xf0]  ;;  %v10951_v47 = vld [vmem:[%s21995_s5 + $0x568] sm:$0xf] }
 0x265   :  { %6213 = vmatpush.bf16.msrb.mxu0 %v10888_v48  ;;  %6227 = vmatpush.bf16.msrb.mxu1 %v11016_v14  ;;  %v10983_v48 = vld [vmem:[%s21995_s5 + $0x5a8] sm:$0xf]  ;;  %v13963_v14 = vld [vmem:[%s21995_s5 + $0x5b4] sm:$0xf0] }
 0x266   :  { %6241 = vmatpush.bf16.msrb.mxu2 %v11144_v24  ;;  %v11111_v24 = vld [vmem:[%s21995_s5 + $0x6a8] sm:$0xf]  ;;  %6207 = vmatmul.bf16.vlgmr.msra.gmra.mxu3 %v17175_v32  ;;  %v10984_v8 = vor.u32 %v13963_v14, %v10983_v48  ;;  %v13991_v25 = vld [vmem:[%s21995_s5 + $0x694] sm:$0xf0]  ;;  %v10968_v48 = vor.u32 %v13959_v57, %v10967_v36  ;;  %v5915_v14 = vadd.f32 %v5914_v35, %v5901_v40  ;;  %v18743_v57 = vld [vmem:[%s21996_s6] sm:$0xf] }
 0x267   :  { %6255 = vmatpush.bf16.msrb.mxu3 %v11272_v58  ;;  %6193 = vmatmul.bf16.vlgmr.msra.gmra.mxu2 %v17167_v53  ;;  %v11112_v22 = vor.u32 %v13995_v26, %v11111_v24  ;;  %v18686_v58 = vpop.f32.mrf.mxu0  ;;  %v10823_v26 = vld [vmem:[%s21995_s5 + $0x468] sm:$0xf]  ;;  %v13923_v29 = vld [vmem:[%s21995_s5 + $0x474] sm:$0xf0] }
 0x268   :  { %22043 = vst [vmem:[#allocation33_spill] sm:$0xff] %v18686_v58  ;;  %v11079_v40 = vld [vmem:[%s21995_s5 + $0x668] sm:$0xf]  ;;  %v14019_v36 = vld [vmem:[%s21995_s5 + $0x774] sm:$0xf0] }
 0x269   :  { %6214 = vmatpush.bf16.msrb.mxu0 %v10872_v28  ;;  %6228 = vmatpush.bf16.msrb.mxu1 %v11000_v34  ;;  %v18706_v28 = vpop.f32.mrf.mxu1  ;;  %v11223_v34 = vld [vmem:[%s21995_s5 + $0x788] sm:$0xf]  ;;  %v5928_v24 = vpop.f32.mrf.mxu3 }
 0x26a   :  { %6242 = vmatpush.bf16.msrb.mxu2 %v11128_v63  ;;  %22044 = vst [vmem:[#allocation34_spill] sm:$0xff] %v18706_v28  ;;  %v14023_v63 = vld [vmem:[%s21995_s5 + $0x794] sm:$0xf0]  ;;  %v18732_v1 = vadd.f32 %v5928_v24, %v5915_v14  ;;  %v11207_v16 = vld [vmem:[%s21995_s5 + $0x768] sm:$0xf] }
 0x26b   :  { %6256 = vmatpush.bf16.msrb.mxu3 %v11256_v59  ;;  %v11096_v59 = vor.u32 %v13991_v25, %v11095_v31  ;;  %v22009_v31 = vperm.slane %v18743_v57, 1  ;;  %v10935_v35 = vld [vmem:[%s21995_s5 + $0x548] sm:$0xf]  ;;  %v11208_v14 = vor.u32 %v14019_v36, %v11207_v16  ;;  %v13983_v24 = vld [vmem:[%s21995_s5 + $0x654] sm:$0xf0] }
 0x26c   :  { %22045 = vst [vmem:[#allocation35_spill] sm:$0xff] %v18732_v1 }
 0x26d   :  { %6215 = vmatpush.bf16.msrb.mxu0 %v10856_v21  ;;  %6229 = vmatpush.bf16.msrb.mxu1 %v10984_v8  ;;  %v11224_v21 = vor.u32 %v14023_v63, %v11223_v34  ;;  %v13955_v8 = vld [vmem:[%s21995_s5 + $0x574] sm:$0xf0]  ;;  %v10807_v63 = vld [vmem:[%s21995_s5 + $0x448] sm:$0xf] }
 0x26e   :  { %6243 = vmatpush.bf16.msrb.mxu2 %v11112_v22  ;;  %v13987_v22 = vld [vmem:[%s21995_s5 + $0x674] sm:$0xf0]  ;;  %v10952_v25 = vor.u32 %v13955_v8, %v10951_v47 }
 0x26f   :  { %6257 = vmatpush.bf16.msrb.mxu3 %v11240_v19  ;;  %v10824_v19 = vor.u32 %v13923_v29, %v10823_v26  ;;  %v11080_v34 = vor.u32 %v13987_v22, %v11079_v40  ;;  %v5942_v26 = vpop.f32.mrf.mxu0  ;;  %v11191_v29 = vld [vmem:[%s21995_s5 + $0x748] sm:$0xf]  ;;  %v14015_v47 = vld [vmem:[%s21995_s5 + $0x754] sm:$0xf0]  ;;  %v18772_v40 = vpop.f32.mrf.mxu2 }
 0x270   :  { %22046 = vst [vmem:[#allocation36_spill] sm:$0xff] %v18772_v40 }
 0x271   :  { %6216 = vmatpush.bf16.msrb.mxu0 %v10840_v44  ;;  %6230 = vmatpush.bf16.msrb.mxu1 %v10968_v48  ;;  %v13919_v44 = vld [vmem:[%s21995_s5 + $0x454] sm:$0xf0]  ;;  %v5956_v22 = vpop.f32.mrf.mxu1  ;;  %v18774_v56 = vpop.f32.mrf.mxu3 }
 0x272   :  { %6244 = vmatpush.bf16.msrb.mxu2 %v11096_v59  ;;  %v13951_v48 = vld [vmem:[%s21995_s5 + $0x554] sm:$0xf0]  ;;  %v11063_v59 = vld [vmem:[%s21995_s5 + $0x648] sm:$0xf]  ;;  %v10808_v8 = vor.u32 %v13919_v44, %v10807_v63  ;;  %22047 = vst [vmem:[#allocation37_spill] sm:$0xff] %v18774_v56 }
 0x273   :  { %6258 = vmatpush.bf16.msrb.mxu3 %v11224_v21  ;;  %v5943_v21 = vadd.f32 %v5942_v26, %v22009_v31  ;;  %v10936_v16 = vor.u32 %v13951_v48, %v10935_v35  ;;  %v11064_v36 = vor.u32 %v13983_v24, %v11063_v59  ;;  %v10919_v63 = vld [vmem:[%s21995_s5 + $0x528] sm:$0xf]  ;;  %v13947_v44 = vld [vmem:[%s21995_s5 + $0x534] sm:$0xf0] }
 0x274   :  { %v11047_v35 = vld [vmem:[%s21995_s5 + $0x628] sm:$0xf]  ;;  %v13979_v48 = vld [vmem:[%s21995_s5 + $0x634] sm:$0xf0] }
 0x275   :  { %6217 = vmatpush.bf16.msrb.mxu0 %v10824_v19  ;;  %6231 = vmatpush.bf16.msrb.mxu1 %v10952_v25  ;;  %v13915_v19 = vld [vmem:[%s21995_s5 + $0x434] sm:$0xf0]  ;;  %v5957_v25 = vadd.f32 %v5956_v22, %v5943_v21  ;;  %v11175_v59 = vld [vmem:[%s21995_s5 + $0x728] sm:$0xf]  ;;  %v11048_v21 = vor.u32 %v13979_v48, %v11047_v35 }
 0x276   :  { %6245 = vmatpush.bf16.msrb.mxu2 %v11080_v34  ;;  %v11192_v34 = vor.u32 %v14015_v47, %v11191_v29  ;;  %v10792_v24 = vor.u32 %v13915_v19, %v10791_v12  ;;  %v10775_v26 = vld [vmem:[%s21995_s5 + $0x408] sm:$0xf]  ;;  %v13911_v29 = vld [vmem:[%s21995_s5 + $0x414] sm:$0xf0]  ;;  %v10920_v47 = vor.u32 %v13947_v44, %v10919_v63 }
 0x277   :  { %6259 = vmatpush.bf16.msrb.mxu3 %v11208_v14  ;;  %v14011_v14 = vld [vmem:[%s21995_s5 + $0x734] sm:$0xf0]  ;;  %v10903_v22 = vld [vmem:[%s21995_s5 + $0x508] sm:$0xf]  ;;  %v10776_v48 = vor.u32 %v13911_v29, %v10775_v26  ;;  %v5970_v29 = vpop.f32.mrf.mxu2 }
 0x278   :  { %v13943_v12 = vld [vmem:[%s21995_s5 + $0x514] sm:$0xf0]  ;;  %v11176_v19 = vor.u32 %v14011_v14, %v11175_v59  ;;  %v11399_v44 = vld [vmem:[%s21995_s5 + $0x8e8] sm:$0xf]  ;;  %v5971_v27 = vadd.f32 %v5970_v29, %v5957_v25 }
 0x279   :  { %6218 = vmatpush.bf16.msrb.mxu0 %v10808_v8  ;;  %6232 = vmatpush.bf16.msrb.mxu1 %v10936_v16  ;;  %v11031_v8 = vld [vmem:[%s21995_s5 + $0x608] sm:$0xf]  ;;  %v13975_v16 = vld [vmem:[%s21995_s5 + $0x614] sm:$0xf0]  ;;  %v10904_v18 = vor.u32 %v13943_v12, %v10903_v22  ;;  %v5984_v33 = vpop.f32.mrf.mxu3 }
 0x27a   :  { %6246 = vmatpush.bf16.msrb.mxu2 %v11064_v36  ;;  %v11159_v36 = vld [vmem:[%s21995_s5 + $0x708] sm:$0xf]  ;;  %v14007_v63 = vld [vmem:[%s21995_s5 + $0x714] sm:$0xf0]  ;;  %v11032_v49 = vor.u32 %v13975_v16, %v11031_v8  ;;  %v5985_v8 = vadd.f32 %v5984_v33, %v5971_v27  ;;  %v18866_v16 = vpop.f32.mrf.mxu0 }
 0x27b   :  { %6260 = vmatpush.bf16.msrb.mxu3 %v11192_v34  ;;  %v14067_v34 = vld [vmem:[%s21995_s5 + $0x8f4] sm:$0xf0]  ;;  %v11527_v35 = vld [vmem:[%s21995_s5 + $0x9e8] sm:$0xf]  ;;  %v11160_v39 = vor.u32 %v14007_v63, %v11159_v36  ;;  %v18874_v63 = vpop.f32.mrf.mxu1 }
 0x27c   :  { %v14099_v59 = vld [vmem:[%s21995_s5 + $0x9f4] sm:$0xf0]  ;;  %v11655_v14 = vld [vmem:[%s21995_s5 + $0xae8] sm:$0xf]  ;;  %v11400_v23 = vor.u32 %v14067_v34, %v11399_v44 }
 0x27d   :  { %6219 = vmatpush.bf16.msrb.mxu0 %v10792_v24  ;;  %v14131_v31 = vld [vmem:[%s21995_s5 + $0xaf4] sm:$0xf0]  ;;  %6233 = vmatpush.bf16.msrb.mxu1 %v10920_v47  ;;  %v11783_v24 = vld [vmem:[%s21995_s5 + $0xbe8] sm:$0xf]  ;;  %v11528_v37 = vor.u32 %v14099_v59, %v11527_v35 }
 0x27e   :  { %6247 = vmatpush.bf16.msrb.mxu2 %v11048_v21  ;;  %v14163_v26 = vld [vmem:[%s21995_s5 + $0xbf4] sm:$0xf0]  ;;  %v11656_v15 = vor.u32 %v14131_v31, %v11655_v14  ;;  %v11383_v47 = vld [vmem:[%s21995_s5 + $0x8c8] sm:$0xf] }
 0x27f   :  { %6261 = vmatpush.bf16.msrb.mxu3 %v11176_v19  ;;  %v14063_v21 = vld [vmem:[%s21995_s5 + $0x8d4] sm:$0xf0]  ;;  %v11511_v22 = vld [vmem:[%s21995_s5 + $0x9c8] sm:$0xf]  ;;  %v11784_v12 = vor.u32 %v14163_v26, %v11783_v24  ;;  %v18904_v24 = vpop.f32.mrf.mxu2 }
 0x280   :  { %v14095_v25 = vld [vmem:[%s21995_s5 + $0x9d4] sm:$0xf0]  ;;  %v11639_v31 = vld [vmem:[%s21995_s5 + $0xac8] sm:$0xf]  ;;  %v11384_v36 = vor.u32 %v14063_v21, %v11383_v47 }
 0x281   :  { %6220 = vmatpush.bf16.msrb.mxu0 %v10776_v48  ;;  %v14127_v19 = vld [vmem:[%s21995_s5 + $0xad4] sm:$0xf0]  ;;  %6234 = vmatpush.bf16.msrb.mxu1 %v10904_v18  ;;  %v11767_v27 = vld [vmem:[%s21995_s5 + $0xbc8] sm:$0xf]  ;;  %v11512_v44 = vor.u32 %v14095_v25, %v11511_v22  ;;  %v18915_v25 = vpop.f32.mrf.mxu3 }
 0x282   :  { %6248 = vmatpush.bf16.msrb.mxu2 %v11032_v49  ;;  %v14159_v33 = vld [vmem:[%s21995_s5 + $0xbd4] sm:$0xf0]  ;;  %v11640_v34 = vor.u32 %v14127_v19, %v11639_v31  ;;  %v11367_v49 = vld [vmem:[%s21995_s5 + $0x8a8] sm:$0xf] }
 0x283   :  { %6262 = vmatpush.bf16.msrb.mxu3 %v11160_v39  ;;  %v14059_v18 = vld [vmem:[%s21995_s5 + $0x8b4] sm:$0xf0]  ;;  %v11495_v39 = vld [vmem:[%s21995_s5 + $0x9a8] sm:$0xf] }
 0x284   :  { %6221 = vmatmul.bf16.vlgmr.msrb.gmra.mxu0 %v17312_v51  ;;  %v14123_v35 = vld [vmem:[%s21995_s5 + $0xab4] sm:$0xf0]  ;;  %6235 = vmatmul.bf16.vlgmr.msrb.gmra.mxu1 %v17323_v6  ;;  %v11751_v48 = vld [vmem:[%s21995_s5 + $0xba8] sm:$0xf]  ;;  %v11368_v14 = vor.u32 %v14059_v18, %v11367_v49  ;;  %v6012_v18 = vpop.f32.mrf.mxu1 }
 0x285   :  { %6269 = vmatpush.bf16.msra.mxu0 %v11400_v23  ;;  %6283 = vmatpush.bf16.msra.mxu1 %v11528_v37  ;;  %v11768_v23 = vor.u32 %v14159_v33, %v11767_v27  ;;  %v11623_v37 = vld [vmem:[%s21995_s5 + $0xaa8] sm:$0xf]  ;;  %v14155_v59 = vld [vmem:[%s21995_s5 + $0xbb4] sm:$0xf0]  ;;  %v5998_v33 = vpop.f32.mrf.mxu0 }
 0x286   :  { %6297 = vmatpush.bf16.msra.mxu2 %v11656_v15  ;;  %v14091_v15 = vld [vmem:[%s21995_s5 + $0x9b4] sm:$0xf0]  ;;  %6263 = vmatmul.bf16.vlgmr.msrb.gmra.mxu3 %v17385_v4  ;;  %v11624_v29 = vor.u32 %v14123_v35, %v11623_v37  ;;  %v11351_v47 = vld [vmem:[%s21995_s5 + $0x888] sm:$0xf] }
 0x287   :  { %6311 = vmatpush.bf16.msra.mxu3 %v11784_v12  ;;  %6249 = vmatmul.bf16.vlgmr.msrb.gmra.mxu2 %v17377_v43  ;;  %v11496_v26 = vor.u32 %v14091_v15, %v11495_v39  ;;  %v14055_v21 = vld [vmem:[%s21995_s5 + $0x894] sm:$0xf0]  ;;  %v11479_v22 = vld [vmem:[%s21995_s5 + $0x988] sm:$0xf]  ;;  %v11752_v12 = vor.u32 %v14155_v59, %v11751_v48 }
 0x288   :  { %v14087_v31 = vld [vmem:[%s21995_s5 + $0x994] sm:$0xf0]  ;;  %v11607_v19 = vld [vmem:[%s21995_s5 + $0xa88] sm:$0xf]  ;;  %v11352_v49 = vor.u32 %v14055_v21, %v11351_v47 }
 0x289   :  { %6270 = vmatpush.bf16.msra.mxu0 %v11384_v36  ;;  %6284 = vmatpush.bf16.msra.mxu1 %v11512_v44  ;;  %v14119_v27 = vld [vmem:[%s21995_s5 + $0xa94] sm:$0xf0]  ;;  %v11735_v36 = vld [vmem:[%s21995_s5 + $0xb88] sm:$0xf]  ;;  %v11480_v39 = vor.u32 %v14087_v31, %v11479_v22 }
 0x28a   :  { %6298 = vmatpush.bf16.msra.mxu2 %v11640_v34  ;;  %v14151_v44 = vld [vmem:[%s21995_s5 + $0xb94] sm:$0xf0]  ;;  %v5999_v34 = vadd.f32 %v5998_v33, %v5985_v8  ;;  %v11335_v15 = vld [vmem:[%s21995_s5 + $0x868] sm:$0xf] }
 0x28b   :  { %6312 = vmatpush.bf16.msra.mxu3 %v11768_v23  ;;  %v11608_v23 = vor.u32 %v14119_v27, %v11607_v19  ;;  %v14051_v37 = vld [vmem:[%s21995_s5 + $0x874] sm:$0xf0]  ;;  %v11463_v35 = vld [vmem:[%s21995_s5 + $0x968] sm:$0xf]  ;;  %v11736_v48 = vor.u32 %v14151_v44, %v11735_v36  ;;  %v6026_v36 = vpop.f32.mrf.mxu2 }
 0x28c   :  { %v6013_v8 = vadd.f32 %v6012_v18, %v5999_v34  ;;  %v14083_v59 = vld [vmem:[%s21995_s5 + $0x974] sm:$0xf0]  ;;  %v11336_v21 = vor.u32 %v14051_v37, %v11335_v15  ;;  %v11319_v31 = vld [vmem:[%s21995_s5 + $0x848] sm:$0xf]  ;;  %v6040_v15 = vpop.f32.mrf.mxu3 }
 0x28d   :  { %6271 = vmatpush.bf16.msra.mxu0 %v11368_v14  ;;  %6285 = vmatpush.bf16.msra.mxu1 %v11496_v26  ;;  %v11591_v14 = vld [vmem:[%s21995_s5 + $0xa68] sm:$0xf]  ;;  %v14115_v26 = vld [vmem:[%s21995_s5 + $0xa74] sm:$0xf0]  ;;  %v11464_v22 = vor.u32 %v14083_v59, %v11463_v35 }
 0x28e   :  { %6299 = vmatpush.bf16.msra.mxu2 %v11624_v29  ;;  %v11719_v29 = vld [vmem:[%s21995_s5 + $0xb68] sm:$0xf]  ;;  %v14147_v47 = vld [vmem:[%s21995_s5 + $0xb74] sm:$0xf0]  ;;  %v6027_v18 = vadd.f32 %v6026_v36, %v6013_v8 }
 0x28f   :  { %6313 = vmatpush.bf16.msra.mxu3 %v11752_v12  ;;  %v11592_v12 = vor.u32 %v14115_v26, %v11591_v14  ;;  %v14047_v19 = vld [vmem:[%s21995_s5 + $0x854] sm:$0xf0]  ;;  %v11447_v27 = vld [vmem:[%s21995_s5 + $0x948] sm:$0xf]  ;;  %v11720_v33 = vor.u32 %v14147_v47, %v11719_v29 }
 0x290   :  { %v14079_v44 = vld [vmem:[%s21995_s5 + $0x954] sm:$0xf0]  ;;  %v11575_v34 = vld [vmem:[%s21995_s5 + $0xa48] sm:$0xf]  ;;  %v11320_v37 = vor.u32 %v14047_v19, %v11319_v31  ;;  %v18980_v35 = vadd.f32 %v6040_v15, %v6027_v18 }
 0x291   :  { %6272 = vmatpush.bf16.msra.mxu0 %v11352_v49  ;;  %6286 = vmatpush.bf16.msra.mxu1 %v11480_v39  ;;  %v14111_v49 = vld [vmem:[%s21995_s5 + $0xa54] sm:$0xf0]  ;;  %v11703_v39 = vld [vmem:[%s21995_s5 + $0xb48] sm:$0xf] }
 0x292   :  { %6300 = vmatpush.bf16.msra.mxu2 %v11608_v23  ;;  %v14143_v23 = vld [vmem:[%s21995_s5 + $0xb54] sm:$0xf0]  ;;  %v11576_v59 = vor.u32 %v14111_v49, %v11575_v34  ;;  %v11303_v8 = vld [vmem:[%s21995_s5 + $0x828] sm:$0xf] }
 0x293   :  { %6314 = vmatpush.bf16.msra.mxu3 %v11736_v48  ;;  %v11448_v48 = vor.u32 %v14079_v44, %v11447_v27  ;;  %v14043_v14 = vld [vmem:[%s21995_s5 + $0x834] sm:$0xf0]  ;;  %v11431_v26 = vld [vmem:[%s21995_s5 + $0x928] sm:$0xf]  ;;  %v11704_v29 = vor.u32 %v14143_v23, %v11703_v39 }
 0x294   :  { %v14075_v47 = vld [vmem:[%s21995_s5 + $0x934] sm:$0xf0]  ;;  %v11304_v19 = vor.u32 %v14043_v14, %v11303_v8  ;;  %v11287_v27 = vld [vmem:[%s21995_s5 + $0x808] sm:$0xf] }
 0x295   :  { %6273 = vmatpush.bf16.msra.mxu0 %v11336_v21  ;;  %6287 = vmatpush.bf16.msra.mxu1 %v11464_v22  ;;  %v11559_v21 = vld [vmem:[%s21995_s5 + $0xa28] sm:$0xf]  ;;  %v14107_v22 = vld [vmem:[%s21995_s5 + $0xa34] sm:$0xf0]  ;;  %v11432_v36 = vor.u32 %v14075_v47, %v11431_v26 }
 0x296   :  { %6301 = vmatpush.bf16.msra.mxu2 %v11592_v12  ;;  %v11687_v12 = vld [vmem:[%s21995_s5 + $0xb28] sm:$0xf]  ;;  %v14139_v31 = vld [vmem:[%s21995_s5 + $0xb34] sm:$0xf0]  ;;  %v11560_v44 = vor.u32 %v14107_v22, %v11559_v21 }
 0x297   :  { %6315 = vmatpush.bf16.msra.mxu3 %v11720_v33  ;;  %v14039_v33 = vld [vmem:[%s21995_s5 + $0x814] sm:$0xf0]  ;;  %v11415_v34 = vld [vmem:[%s21995_s5 + $0x908] sm:$0xf]  ;;  %v11688_v39 = vor.u32 %v14139_v31, %v11687_v12 }
 0x298   :  { %v14071_v49 = vld [vmem:[%s21995_s5 + $0x914] sm:$0xf0]  ;;  %v11543_v18 = vld [vmem:[%s21995_s5 + $0xa08] sm:$0xf]  ;;  %v11288_v14 = vor.u32 %v14039_v33, %v11287_v27 }
 0x299   :  { %6274 = vmatpush.bf16.msra.mxu0 %v11320_v37  ;;  %6288 = vmatpush.bf16.msra.mxu1 %v11448_v48  ;;  %v14103_v23 = vld [vmem:[%s21995_s5 + $0xa14] sm:$0xf0]  ;;  %v11671_v15 = vld [vmem:[%s21995_s5 + $0xb08] sm:$0xf]  ;;  %v11416_v21 = vor.u32 %v14071_v49, %v11415_v34 }
 0x29a   :  { %6302 = vmatpush.bf16.msra.mxu2 %v11576_v59  ;;  %v14135_v37 = vld [vmem:[%s21995_s5 + $0xb14] sm:$0xf0]  ;;  %v11911_v48 = vld [vmem:[%s21995_s5 + $0xce8] sm:$0xf]  ;;  %v11544_v22 = vor.u32 %v14103_v23, %v11543_v18 }
 0x29b   :  { %6316 = vmatpush.bf16.msra.mxu3 %v11704_v29  ;;  %v14195_v59 = vld [vmem:[%s21995_s5 + $0xcf4] sm:$0xf0]  ;;  %v12039_v8 = vld [vmem:[%s21995_s5 + $0xde8] sm:$0xf] }
 0x29c   :  { %v14227_v26 = vld [vmem:[%s21995_s5 + $0xdf4] sm:$0xf0]  ;;  %v12167_v29 = vld [vmem:[%s21995_s5 + $0xee8] sm:$0xf]  ;;  %v11912_v27 = vor.u32 %v14195_v59, %v11911_v48 }
 0x29d   :  { %6275 = vmatpush.bf16.msra.mxu0 %v11304_v19  ;;  %v14259_v47 = vld [vmem:[%s21995_s5 + $0xef4] sm:$0xf0]  ;;  %6289 = vmatpush.bf16.msra.mxu1 %v11432_v36  ;;  %v12295_v12 = vld [vmem:[%s21995_s5 + $0xfe8] sm:$0xf]  ;;  %v11672_v19 = vor.u32 %v14135_v37, %v11671_v15  ;;  %v12040_v33 = vor.u32 %v14227_v26, %v12039_v8  ;;  %v19072_v15 = vpop.f32.mrf.mxu0  ;;  %v19080_v8 = vpop.f32.mrf.mxu1 }
 0x29e   :  { %6303 = vmatpush.bf16.msra.mxu2 %v11560_v44  ;;  %v14291_v31 = vld [vmem:[%s21995_s5 + $0xff4] sm:$0xf0]  ;;  %v12168_v46 = vor.u32 %v14259_v47, %v12167_v29  ;;  %v11895_v36 = vld [vmem:[%s21995_s5 + $0xcc8] sm:$0xf] }
 0x29f   :  { %6317 = vmatpush.bf16.msra.mxu3 %v11688_v39  ;;  %v14191_v44 = vld [vmem:[%s21995_s5 + $0xcd4] sm:$0xf0]  ;;  %v12023_v34 = vld [vmem:[%s21995_s5 + $0xdc8] sm:$0xf]  ;;  %v12296_v49 = vor.u32 %v14291_v31, %v12295_v12 }
 0x2a0   :  { %v14223_v18 = vld [vmem:[%s21995_s5 + $0xdd4] sm:$0xf0]  ;;  %v12151_v39 = vld [vmem:[%s21995_s5 + $0xec8] sm:$0xf]  ;;  %v11896_v59 = vor.u32 %v14191_v44, %v11895_v36 }
 0x2a1   :  { %6276 = vmatpush.bf16.msra.mxu0 %v11288_v14  ;;  %v14255_v23 = vld [vmem:[%s21995_s5 + $0xed4] sm:$0xf0]  ;;  %6290 = vmatpush.bf16.msra.mxu1 %v11416_v21  ;;  %v12279_v37 = vld [vmem:[%s21995_s5 + $0xfc8] sm:$0xf]  ;;  %v12024_v14 = vor.u32 %v14223_v18, %v12023_v34 }
 0x2a2   :  { %6304 = vmatpush.bf16.msra.mxu2 %v11544_v22  ;;  %v14287_v48 = vld [vmem:[%s21995_s5 + $0xfd4] sm:$0xf0]  ;;  %v12152_v26 = vor.u32 %v14255_v23, %v12151_v39  ;;  %v11879_v29 = vld [vmem:[%s21995_s5 + $0xca8] sm:$0xf]  ;;  %v19119_v39 = vpop.f32.mrf.mxu2 }
 0x2a3   :  { %6318 = vmatpush.bf16.msra.mxu3 %v11672_v19  ;;  %v14187_v47 = vld [vmem:[%s21995_s5 + $0xcb4] sm:$0xf0]  ;;  %v12007_v21 = vld [vmem:[%s21995_s5 + $0xda8] sm:$0xf]  ;;  %v12280_v22 = vor.u32 %v14287_v48, %v12279_v37 }
 0x2a4   :  { %6277 = vmatmul.bf16.vlgmr.msra.gmra.mxu0 %v17522_v3  ;;  %v12135_v12 = vld [vmem:[%s21995_s5 + $0xea8] sm:$0xf]  ;;  %v14251_v31 = vld [vmem:[%s21995_s5 + $0xeb4] sm:$0xf0]  ;;  %6291 = vmatmul.bf16.vlgmr.msra.gmra.mxu1 %v17533_v7 }
 0x2a5   :  { %6325 = vmatpush.bf16.msrb.mxu0 %v11912_v27  ;;  %6339 = vmatpush.bf16.msrb.mxu1 %v12040_v33  ;;  %v12263_v19 = vld [vmem:[%s21995_s5 + $0xfa8] sm:$0xf]  ;;  %v14283_v27 = vld [vmem:[%s21995_s5 + $0xfb4] sm:$0xf0]  ;;  %v11880_v33 = vor.u32 %v14187_v47, %v11879_v29  ;;  %v12136_v44 = vor.u32 %v14251_v31, %v12135_v12  ;;  %v19136_v47 = vpop.f32.mrf.mxu3 }
 0x2a6   :  { %6353 = vmatpush.bf16.msrb.mxu2 %v12168_v46  ;;  %v14219_v46 = vld [vmem:[%s21995_s5 + $0xdb4] sm:$0xf0]  ;;  %6319 = vmatmul.bf16.vlgmr.msra.gmra.mxu3 %v17595_v11  ;;  %v11863_v34 = vld [vmem:[%s21995_s5 + $0xc88] sm:$0xf]  ;;  %v12264_v23 = vor.u32 %v14283_v27, %v12263_v19 }
 0x2a7   :  { %6367 = vmatpush.bf16.msrb.mxu3 %v12296_v49  ;;  %6305 = vmatmul.bf16.vlgmr.msra.gmra.mxu2 %v17587_v9  ;;  %v12008_v36 = vor.u32 %v14219_v46, %v12007_v21  ;;  %v14183_v49 = vld [vmem:[%s21995_s5 + $0xc94] sm:$0xf0]  ;;  %v11991_v18 = vld [vmem:[%s21995_s5 + $0xd88] sm:$0xf]  ;;  %v6068_v46 = vpop.f32.mrf.mxu1 }
 0x2a8   :  { %v14215_v37 = vld [vmem:[%s21995_s5 + $0xd94] sm:$0xf0]  ;;  %v12119_v48 = vld [vmem:[%s21995_s5 + $0xe88] sm:$0xf] }
 0x2a9   :  { %6326 = vmatpush.bf16.msrb.mxu0 %v11896_v59  ;;  %6340 = vmatpush.bf16.msrb.mxu1 %v12024_v14  ;;  %v14247_v59 = vld [vmem:[%s21995_s5 + $0xe94] sm:$0xf0]  ;;  %v6054_v14 = vpop.f32.mrf.mxu0  ;;  %v11992_v12 = vor.u32 %v14215_v37, %v11991_v18  ;;  %v11847_v19 = vld [vmem:[%s21995_s5 + $0xc68] sm:$0xf] }
 0x2aa   :  { %6354 = vmatpush.bf16.msrb.mxu2 %v12152_v26  ;;  %v12247_v26 = vld [vmem:[%s21995_s5 + $0xf88] sm:$0xf]  ;;  %v14279_v29 = vld [vmem:[%s21995_s5 + $0xf94] sm:$0xf0]  ;;  %v6055_v21 = vadd.f32 %v6054_v14, %v18980_v35  ;;  %v12120_v31 = vor.u32 %v14247_v59, %v12119_v48 }
 0x2ab   :  { %6368 = vmatpush.bf16.msrb.mxu3 %v12280_v22  ;;  %v11864_v22 = vor.u32 %v14183_v49, %v11863_v34  ;;  %v14179_v27 = vld [vmem:[%s21995_s5 + $0xc74] sm:$0xf0]  ;;  %v12248_v34 = vor.u32 %v14279_v29, %v12247_v26  ;;  %v12231_v18 = vld [vmem:[%s21995_s5 + $0xf68] sm:$0xf] }
 0x2ac   :  { %v6069_v35 = vadd.f32 %v6068_v46, %v6055_v21  ;;  %v14243_v49 = vld [vmem:[%s21995_s5 + $0xe74] sm:$0xf0]  ;;  %v11848_v37 = vor.u32 %v14179_v27, %v11847_v19  ;;  %v11831_v14 = vld [vmem:[%s21995_s5 + $0xc48] sm:$0xf] }
 0x2ad   :  { %6327 = vmatpush.bf16.msrb.mxu0 %v11880_v33  ;;  %6341 = vmatpush.bf16.msrb.mxu1 %v12008_v36  ;;  %v11975_v33 = vld [vmem:[%s21995_s5 + $0xd68] sm:$0xf]  ;;  %v14211_v36 = vld [vmem:[%s21995_s5 + $0xd74] sm:$0xf0] }
 0x2ae   :  { %6355 = vmatpush.bf16.msrb.mxu2 %v12136_v44  ;;  %v12103_v44 = vld [vmem:[%s21995_s5 + $0xe68] sm:$0xf]  ;;  %v11976_v48 = vor.u32 %v14211_v36, %v11975_v33  ;;  %v14175_v26 = vld [vmem:[%s21995_s5 + $0xc54] sm:$0xf0] }
 0x2af   :  { %6369 = vmatpush.bf16.msrb.mxu3 %v12264_v23  ;;  %v14275_v23 = vld [vmem:[%s21995_s5 + $0xf74] sm:$0xf0]  ;;  %v12104_v59 = vor.u32 %v14243_v49, %v12103_v44  ;;  %v11959_v29 = vld [vmem:[%s21995_s5 + $0xd48] sm:$0xf]  ;;  %v11832_v36 = vor.u32 %v14175_v26, %v11831_v14 }
 0x2b0   :  { %v12232_v21 = vor.u32 %v14275_v23, %v12231_v18  ;;  %v14207_v46 = vld [vmem:[%s21995_s5 + $0xd54] sm:$0xf0]  ;;  %v12215_v27 = vld [vmem:[%s21995_s5 + $0xf48] sm:$0xf] }
 0x2b1   :  { %6328 = vmatpush.bf16.msrb.mxu0 %v11864_v22  ;;  %6342 = vmatpush.bf16.msrb.mxu1 %v11992_v12  ;;  %v6082_v22 = vpop.f32.mrf.mxu2  ;;  %v12087_v12 = vld [vmem:[%s21995_s5 + $0xe48] sm:$0xf]  ;;  %v14271_v33 = vld [vmem:[%s21995_s5 + $0xf54] sm:$0xf0]  ;;  %v11960_v49 = vor.u32 %v14207_v46, %v11959_v29 }
 0x2b2   :  { %6356 = vmatpush.bf16.msrb.mxu2 %v12120_v31  ;;  %v14239_v31 = vld [vmem:[%s21995_s5 + $0xe54] sm:$0xf0]  ;;  %v6083_v19 = vadd.f32 %v6082_v22, %v6069_v35  ;;  %v11815_v35 = vld [vmem:[%s21995_s5 + $0xc28] sm:$0xf]  ;;  %v12216_v14 = vor.u32 %v14271_v33, %v12215_v27 }
 0x2b3   :  { %6370 = vmatpush.bf16.msrb.mxu3 %v12248_v34  ;;  %v6096_v34 = vpop.f32.mrf.mxu3  ;;  %v12088_v18 = vor.u32 %v14239_v31, %v12087_v12  ;;  %v14171_v23 = vld [vmem:[%s21995_s5 + $0xc34] sm:$0xf0]  ;;  %v12199_v29 = vld [vmem:[%s21995_s5 + $0xf28] sm:$0xf] }
 0x2b4   :  { %v19187_v44 = vadd.f32 %v6096_v34, %v6083_v19  ;;  %v14235_v26 = vld [vmem:[%s21995_s5 + $0xe34] sm:$0xf0]  ;;  %v11816_v22 = vor.u32 %v14171_v23, %v11815_v35  ;;  %v11799_v46 = vld [vmem:[%s21995_s5 + $0xc08] sm:$0xf]  ;;  %v13809_v23 = vld [vmem:[%s21995_s5 + $0xec] sm:$0xf] }
 0x2b5   :  { %6329 = vmatpush.bf16.msrb.mxu0 %v11848_v37  ;;  %6343 = vmatpush.bf16.msrb.mxu1 %v11976_v48  ;;  %v11943_v37 = vld [vmem:[%s21995_s5 + $0xd28] sm:$0xf]  ;;  %v14203_v48 = vld [vmem:[%s21995_s5 + $0xd34] sm:$0xf0] }
 0x2b6   :  { %6357 = vmatpush.bf16.msrb.mxu2 %v12104_v59  ;;  %v12071_v59 = vld [vmem:[%s21995_s5 + $0xe28] sm:$0xf]  ;;  %v14167_v12 = vld [vmem:[%s21995_s5 + $0xc14] sm:$0xf0]  ;;  %v11944_v31 = vor.u32 %v14203_v48, %v11943_v37  ;;  %v10377_v37 = vld [vmem:[%s21995_s5 + $0xf8] sm:$0xf0] }
 0x2b7   :  { %6371 = vmatpush.bf16.msrb.mxu3 %v12232_v21  ;;  %v14267_v21 = vld [vmem:[%s21995_s5 + $0xf34] sm:$0xf0]  ;;  %v12072_v19 = vor.u32 %v14235_v26, %v12071_v59  ;;  %v11927_v27 = vld [vmem:[%s21995_s5 + $0xd08] sm:$0xf]  ;;  %v11800_v48 = vor.u32 %v14167_v12, %v11799_v46  ;;  %v10505_v59 = vld [vmem:[%s21995_s5 + $0x1f8] sm:$0xf0]  ;;  %v10380_v56 = vor.u32 %v13809_v23, %v10377_v37 }
 0x2b8   :  { %v14199_v33 = vld [vmem:[%s21995_s5 + $0xd14] sm:$0xf0]  ;;  %v12055_v34 = vld [vmem:[%s21995_s5 + $0xe08] sm:$0xf]  ;;  %v13873_v26 = vld [vmem:[%s21995_s5 + $0x2ec] sm:$0xf] }
 0x2b9   :  { %6330 = vmatpush.bf16.msrb.mxu0 %v11832_v36  ;;  %6344 = vmatpush.bf16.msrb.mxu1 %v11960_v49  ;;  %v12200_v36 = vor.u32 %v14267_v21, %v12199_v29  ;;  %v14231_v49 = vld [vmem:[%s21995_s5 + $0xe14] sm:$0xf0]  ;;  %v10633_v29 = vld [vmem:[%s21995_s5 + $0x2f8] sm:$0xf0]  ;;  %v11928_v21 = vor.u32 %v14199_v33, %v11927_v27  ;;  %v13837_v27 = vld [vmem:[%s21995_s5 + $0x1cc] sm:$0xf] }
 0x2ba   :  { %6358 = vmatpush.bf16.msrb.mxu2 %v12088_v18  ;;  %v12183_v18 = vld [vmem:[%s21995_s5 + $0xf08] sm:$0xf]  ;;  %v14263_v35 = vld [vmem:[%s21995_s5 + $0xf14] sm:$0xf0]  ;;  %v12056_v1 = vor.u32 %v14231_v49, %v12055_v34  ;;  %v10761_v46 = vld [vmem:[%s21995_s5 + $0x3f8] sm:$0xf0]  ;;  %v10636_v28 = vor.u32 %v13873_v26, %v10633_v29 }
 0x2bb   :  { %6372 = vmatpush.bf16.msrb.mxu3 %v12216_v14  ;;  %v13841_v14 = vld [vmem:[%s21995_s5 + $0x1ec] sm:$0xf]  ;;  %v12184_v12 = vor.u32 %v14263_v35, %v12183_v18  ;;  %v10489_v34 = vld [vmem:[%s21995_s5 + $0x1d8] sm:$0xf0]  ;;  %v19279_v18 = vpop.f32.mrf.mxu0 }
 0x2bc   :  { %v10508_v40 = vor.u32 %v13841_v14, %v10505_v59  ;;  %v10617_v49 = vld [vmem:[%s21995_s5 + $0x2d8] sm:$0xf0]  ;;  %v13901_v35 = vld [vmem:[%s21995_s5 + $0x3cc] sm:$0xf]  ;;  %v19287_v14 = vpop.f32.mrf.mxu1 }
 0x2bd   :  { %6331 = vmatpush.bf16.msrb.mxu0 %v11816_v22  ;;  %6345 = vmatpush.bf16.msrb.mxu1 %v11944_v31  ;;  %v13905_v22 = vld [vmem:[%s21995_s5 + $0x3ec] sm:$0xf]  ;;  %v10745_v23 = vld [vmem:[%s21995_s5 + $0x3d8] sm:$0xf0] }
 0x2be   :  { %6359 = vmatpush.bf16.msrb.mxu2 %v12072_v19  ;;  %v13805_v31 = vld [vmem:[%s21995_s5 + $0xcc] sm:$0xf]  ;;  %v10361_v19 = vld [vmem:[%s21995_s5 + $0xd8] sm:$0xf0]  ;;  %v10764_v33 = vor.u32 %v13905_v22, %v10761_v46 }
 0x2bf   :  { %6373 = vmatpush.bf16.msrb.mxu3 %v12200_v36  ;;  %v13869_v36 = vld [vmem:[%s21995_s5 + $0x2cc] sm:$0xf]  ;;  %v10364_v37 = vor.u32 %v13805_v31, %v10361_v19  ;;  %v10345_v26 = vld [vmem:[%s21995_s5 + $0xb8] sm:$0xf0] }
 0x2c0   :  { %v10620_v59 = vor.u32 %v13869_v36, %v10617_v49  ;;  %v13833_v29 = vld [vmem:[%s21995_s5 + $0x1ac] sm:$0xf]  ;;  %v10729_v46 = vld [vmem:[%s21995_s5 + $0x3b8] sm:$0xf0]  ;;  %v19326_v36 = vpop.f32.mrf.mxu2 }
 0x2c1   :  { %6332 = vmatpush.bf16.msrb.mxu0 %v11800_v48  ;;  %6346 = vmatpush.bf16.msrb.mxu1 %v11928_v21  ;;  %v10492_v48 = vor.u32 %v13837_v27, %v10489_v34  ;;  %v10601_v21 = vld [vmem:[%s21995_s5 + $0x2b8] sm:$0xf0]  ;;  %v13897_v22 = vld [vmem:[%s21995_s5 + $0x3ac] sm:$0xf] }
 0x2c2   :  { %6360 = vmatpush.bf16.msrb.mxu2 %v12056_v1  ;;  %v13801_v1 = vld [vmem:[%s21995_s5 + $0xac] sm:$0xf]  ;;  %v10732_v49 = vor.u32 %v13897_v22, %v10729_v46  ;;  %v10313_v46 = vld [vmem:[%s21995_s5 + $0x78] sm:$0xf0] }
 0x2c3   :  { %6374 = vmatpush.bf16.msrb.mxu3 %v12184_v12  ;;  %v10348_v12 = vor.u32 %v13801_v1, %v10345_v26  ;;  %v13797_v27 = vld [vmem:[%s21995_s5 + $0x8c] sm:$0xf]  ;;  %v10713_v1 = vld [vmem:[%s21995_s5 + $0x398] sm:$0xf0]  ;;  %v19343_v26 = vpop.f32.mrf.mxu3 }
 0x2c4   :  { %6333 = vmatmul.bf16.vlgmr.msrb.gmra.mxu0 %v17732_v30  ;;  %6347 = vmatmul.bf16.vlgmr.msrb.gmra.mxu1 %v17743_v17  ;;  %v13829_v34 = vld [vmem:[%s21995_s5 + $0x18c] sm:$0xf]  ;;  %22048 = vst [vmem:[#allocation38_spill] sm:$0xff] %v19343_v26 }
 0x2c5   :  { %6381 = vmatpush.bf16.msra.mxu0 %v10380_v56  ;;  %6395 = vmatpush.bf16.msra.mxu1 %v10508_v40  ;;  %v10748_v56 = vor.u32 %v13901_v35, %v10745_v23  ;;  %v13865_v40 = vld [vmem:[%s21995_s5 + $0x2ac] sm:$0xf]  ;;  %v10457_v35 = vld [vmem:[%s21995_s5 + $0x198] sm:$0xf0] }
 0x2c6   :  { %6409 = vmatpush.bf16.msra.mxu2 %v10636_v28  ;;  %v10473_v28 = vld [vmem:[%s21995_s5 + $0x1b8] sm:$0xf0]  ;;  %6375 = vmatmul.bf16.vlgmr.msrb.gmra.mxu3 %v17805_v45  ;;  %v10604_v19 = vor.u32 %v13865_v40, %v10601_v21  ;;  %v13861_v23 = vld [vmem:[%s21995_s5 + $0x28c] sm:$0xf]  ;;  %v10460_v40 = vor.u32 %v13829_v34, %v10457_v35 }
 0x2c7   :  { %6423 = vmatpush.bf16.msra.mxu3 %v10764_v33  ;;  %6361 = vmatmul.bf16.vlgmr.msrb.gmra.mxu2 %v17797_v61  ;;  %v10476_v31 = vor.u32 %v13833_v29, %v10473_v28  ;;  %v10329_v33 = vld [vmem:[%s21995_s5 + $0x98] sm:$0xf0]  ;;  %v6124_v28 = vpop.f32.mrf.mxu1  ;;  %v13793_v22 = vld [vmem:[%s21995_s5 + $0x6c] sm:$0xf] }
 0x2c8   :  { %v13889_v34 = vld [vmem:[%s21995_s5 + $0x36c] sm:$0xf]  ;;  %v10316_v35 = vor.u32 %v13793_v22, %v10313_v46 }
 0x2c9   :  { %6382 = vmatpush.bf16.msra.mxu0 %v10364_v37  ;;  %6396 = vmatpush.bf16.msra.mxu1 %v10492_v48  ;;  %v10585_v37 = vld [vmem:[%s21995_s5 + $0x298] sm:$0xf0]  ;;  %v6110_v48 = vpop.f32.mrf.mxu0  ;;  %v13885_v46 = vld [vmem:[%s21995_s5 + $0x34c] sm:$0xf] }
 0x2ca   :  { %6410 = vmatpush.bf16.msra.mxu2 %v10620_v59  ;;  %v13893_v59 = vld [vmem:[%s21995_s5 + $0x38c] sm:$0xf]  ;;  %v6111_v29 = vadd.f32 %v6110_v48, %v19187_v44  ;;  %v10588_v21 = vor.u32 %v13861_v23, %v10585_v37 }
 0x2cb   :  { %6424 = vmatpush.bf16.msra.mxu3 %v10748_v56  ;;  %v10332_v56 = vor.u32 %v13797_v27, %v10329_v33  ;;  %v10716_v27 = vor.u32 %v13893_v59, %v10713_v1  ;;  %v10569_v33 = vld [vmem:[%s21995_s5 + $0x278] sm:$0xf0]  ;;  %v13789_v48 = vld [vmem:[%s21995_s5 + $0x4c] sm:$0xf] }
 0x2cc   :  { %v6125_v44 = vadd.f32 %v6124_v28, %v6111_v29  ;;  %v10297_v59 = vld [vmem:[%s21995_s5 + $0x58] sm:$0xf0]  ;;  %v13821_v1 = vld [vmem:[%s21995_s5 + $0x14c] sm:$0xf] }
 0x2cd   :  { %6383 = vmatpush.bf16.msra.mxu0 %v10348_v12  ;;  %6397 = vmatpush.bf16.msra.mxu1 %v10476_v31  ;;  %v13825_v12 = vld [vmem:[%s21995_s5 + $0x16c] sm:$0xf]  ;;  %v10441_v31 = vld [vmem:[%s21995_s5 + $0x178] sm:$0xf0] }
 0x2ce   :  { %6411 = vmatpush.bf16.msra.mxu2 %v10604_v19  ;;  %v13857_v19 = vld [vmem:[%s21995_s5 + $0x26c] sm:$0xf]  ;;  %v10444_v23 = vor.u32 %v13825_v12, %v10441_v31  ;;  %v10425_v28 = vld [vmem:[%s21995_s5 + $0x158] sm:$0xf0]  ;;  %v10300_v31 = vor.u32 %v13789_v48, %v10297_v59 }
 0x2cf   :  { %6425 = vmatpush.bf16.msra.mxu3 %v10732_v49  ;;  %v10697_v49 = vld [vmem:[%s21995_s5 + $0x378] sm:$0xf0]  ;;  %v10572_v37 = vor.u32 %v13857_v19, %v10569_v33  ;;  %v10428_v33 = vor.u32 %v13821_v1, %v10425_v28  ;;  %v13881_v1 = vld [vmem:[%s21995_s5 + $0x32c] sm:$0xf] }
 0x2d0   :  { %v10700_v29 = vor.u32 %v13889_v34, %v10697_v49  ;;  %v10681_v12 = vld [vmem:[%s21995_s5 + $0x358] sm:$0xf0]  ;;  %v13781_v28 = vld [vmem:[%s21995_s5 + $0xc] sm:$0xf] }
 0x2d1   :  { %6384 = vmatpush.bf16.msra.mxu0 %v10332_v56  ;;  %6398 = vmatpush.bf16.msra.mxu1 %v10460_v40  ;;  %v6138_v56 = vpop.f32.mrf.mxu2  ;;  %v13853_v40 = vld [vmem:[%s21995_s5 + $0x24c] sm:$0xf]  ;;  %v10281_v49 = vld [vmem:[%s21995_s5 + $0x38] sm:$0xf0]  ;;  %v10684_v48 = vor.u32 %v13885_v46, %v10681_v12 }
 0x2d2   :  { %6412 = vmatpush.bf16.msra.mxu2 %v10588_v21  ;;  %v10553_v21 = vld [vmem:[%s21995_s5 + $0x258] sm:$0xf0]  ;;  %v6139_v22 = vadd.f32 %v6138_v56, %v6125_v44  ;;  %v13785_v44 = vld [vmem:[%s21995_s5 + $0x2c] sm:$0xf] }
 0x2d3   :  { %6426 = vmatpush.bf16.msra.mxu3 %v10716_v27  ;;  %v6152_v27 = vpop.f32.mrf.mxu3  ;;  %v10556_v34 = vor.u32 %v13853_v40, %v10553_v21  ;;  %v10537_v59 = vld [vmem:[%s21995_s5 + $0x238] sm:$0xf0]  ;;  %v10284_v56 = vor.u32 %v13785_v44, %v10281_v49  ;;  %v13813_v46 = vld [vmem:[%s21995_s5 + $0x10c] sm:$0xf] }
 0x2d4   :  { %v19394_v19 = vadd.f32 %v6152_v27, %v6139_v22  ;;  %v10265_v40 = vld [vmem:[%s21995_s5 + $0x18] sm:$0xf0]  ;;  %v13845_v27 = vld [vmem:[%s21995_s5 + $0x20c] sm:$0xf] }
 0x2d5   :  { %6385 = vmatpush.bf16.msra.mxu0 %v10316_v35  ;;  %6399 = vmatpush.bf16.msra.mxu1 %v10444_v23  ;;  %v13817_v35 = vld [vmem:[%s21995_s5 + $0x12c] sm:$0xf]  ;;  %v10409_v23 = vld [vmem:[%s21995_s5 + $0x138] sm:$0xf0] }
 0x2d6   :  { %6413 = vmatpush.bf16.msra.mxu2 %v10572_v37  ;;  %22049 = vst [vmem:[#allocation39_spill] sm:$0xff] %v19394_v19  ;;  %v13849_v37 = vld [vmem:[%s21995_s5 + $0x22c] sm:$0xf]  ;;  %v10412_v21 = vor.u32 %v13817_v35, %v10409_v23  ;;  %v10393_v12 = vld [vmem:[%s21995_s5 + $0x118] sm:$0xf0]  ;;  %v10268_v23 = vor.u32 %v13781_v28, %v10265_v40 }
 0x2d7   :  { %6427 = vmatpush.bf16.msra.mxu3 %v10700_v29  ;;  %v10665_v29 = vld [vmem:[%s21995_s5 + $0x338] sm:$0xf0]  ;;  %v10540_v22 = vor.u32 %v13849_v37, %v10537_v59  ;;  %v13937_v49 = vld [vmem:[%s21995_s5 + $0x4ec] sm:$0xf] }
 0x2d8   :  { %v10649_v44 = vld [vmem:[%s21995_s5 + $0x318] sm:$0xf0]  ;;  %v14001_v59 = vld [vmem:[%s21995_s5 + $0x6ec] sm:$0xf] }
 0x2d9   :  { %6386 = vmatpush.bf16.msra.mxu0 %v10300_v31  ;;  %6400 = vmatpush.bf16.msra.mxu1 %v10428_v33  ;;  %v10668_v31 = vor.u32 %v13881_v1, %v10665_v29  ;;  %v10521_v33 = vld [vmem:[%s21995_s5 + $0x218] sm:$0xf0]  ;;  %v10396_v29 = vor.u32 %v13813_v46, %v10393_v12  ;;  %v13965_v46 = vld [vmem:[%s21995_s5 + $0x5cc] sm:$0xf] }
 0x2da   :  { %6414 = vmatpush.bf16.msra.mxu2 %v10556_v34  ;;  %v13877_v34 = vld [vmem:[%s21995_s5 + $0x30c] sm:$0xf]  ;;  %v10889_v35 = vld [vmem:[%s21995_s5 + $0x4f8] sm:$0xf0]  ;;  %v10524_v19 = vor.u32 %v13845_v27, %v10521_v33 }
 0x2db   :  { %6428 = vmatpush.bf16.msra.mxu3 %v10684_v48  ;;  %v13969_v48 = vld [vmem:[%s21995_s5 + $0x5ec] sm:$0xf]  ;;  %v11017_v37 = vld [vmem:[%s21995_s5 + $0x5f8] sm:$0xf0]  ;;  %v10652_v40 = vor.u32 %v13877_v34, %v10649_v44  ;;  %v10892_v26 = vor.u32 %v13937_v49, %v10889_v35 }
 0x2dc   :  { %v11145_v1 = vld [vmem:[%s21995_s5 + $0x6f8] sm:$0xf0]  ;;  %v11020_v58 = vor.u32 %v13969_v48, %v11017_v37  ;;  %v14029_v34 = vld [vmem:[%s21995_s5 + $0x7cc] sm:$0xf] }
 0x2dd   :  { %6387 = vmatpush.bf16.msra.mxu0 %v10284_v56  ;;  %6401 = vmatpush.bf16.msra.mxu1 %v10412_v21  ;;  %v14033_v56 = vld [vmem:[%s21995_s5 + $0x7ec] sm:$0xf]  ;;  %v11273_v28 = vld [vmem:[%s21995_s5 + $0x7f8] sm:$0xf0]  ;;  %v11148_v13 = vor.u32 %v14001_v59, %v11145_v1 }
 0x2de   :  { %6415 = vmatpush.bf16.msra.mxu2 %v10540_v22  ;;  %v13933_v21 = vld [vmem:[%s21995_s5 + $0x4cc] sm:$0xf]  ;;  %v10873_v22 = vld [vmem:[%s21995_s5 + $0x4d8] sm:$0xf0]  ;;  %v11276_v12 = vor.u32 %v14033_v56, %v11273_v28 }
 0x2df   :  { %6429 = vmatpush.bf16.msra.mxu3 %v10668_v31  ;;  %v11001_v27 = vld [vmem:[%s21995_s5 + $0x5d8] sm:$0xf0]  ;;  %v13997_v31 = vld [vmem:[%s21995_s5 + $0x6cc] sm:$0xf]  ;;  %v10876_v49 = vor.u32 %v13933_v21, %v10873_v22 }
 0x2e0   :  { %v11129_v33 = vld [vmem:[%s21995_s5 + $0x6d8] sm:$0xf0]  ;;  %v11004_v35 = vor.u32 %v13965_v46, %v11001_v27  ;;  %v13961_v37 = vld [vmem:[%s21995_s5 + $0x5ac] sm:$0xf] }
 0x2e1   :  { %6388 = vmatpush.bf16.msra.mxu0 %v10268_v23  ;;  %6402 = vmatpush.bf16.msra.mxu1 %v10396_v29  ;;  %v11257_v44 = vld [vmem:[%s21995_s5 + $0x7d8] sm:$0xf0]  ;;  %v11132_v48 = vor.u32 %v13997_v31, %v11129_v33  ;;  %v13929_v23 = vld [vmem:[%s21995_s5 + $0x4ac] sm:$0xf] }
 0x2e2   :  { %6416 = vmatpush.bf16.msra.mxu2 %v10524_v19  ;;  %v10857_v19 = vld [vmem:[%s21995_s5 + $0x4b8] sm:$0xf0]  ;;  %v13989_v22 = vld [vmem:[%s21995_s5 + $0x68c] sm:$0xf] }
 0x2e3   :  { %6430 = vmatpush.bf16.msra.mxu3 %v10652_v40  ;;  %v11113_v59 = vld [vmem:[%s21995_s5 + $0x6b8] sm:$0xf0]  ;;  %v10860_v29 = vor.u32 %v13929_v23, %v10857_v19  ;;  %v13957_v40 = vld [vmem:[%s21995_s5 + $0x58c] sm:$0xf] }
 0x2e4   :  { %6389 = vmatmul.bf16.vlgmr.msra.gmra.mxu0 %v17102_v41  ;;  %6403 = vmatmul.bf16.vlgmr.msra.gmra.mxu1 %v17113_v52  ;;  %v14025_v41 = vld [vmem:[%s21995_s5 + $0x7ac] sm:$0xf]  ;;  %v11241_v1 = vld [vmem:[%s21995_s5 + $0x7b8] sm:$0xf0] }
 0x2e5   :  { %6437 = vmatpush.bf16.msrb.mxu0 %v10892_v26  ;;  %6451 = vmatpush.bf16.msrb.mxu1 %v11020_v58  ;;  %v11260_v26 = vor.u32 %v14029_v34, %v11257_v44  ;;  %v13993_v58 = vld [vmem:[%s21995_s5 + $0x6ac] sm:$0xf]  ;;  %v10969_v21 = vld [vmem:[%s21995_s5 + $0x598] sm:$0xf0] }
 0x2e6   :  { %6465 = vmatpush.bf16.msrb.mxu2 %v11148_v13  ;;  %v10985_v13 = vld [vmem:[%s21995_s5 + $0x5b8] sm:$0xf0]  ;;  %6431 = vmatmul.bf16.vlgmr.msra.gmra.mxu3 %v17175_v32  ;;  %v11116_v28 = vor.u32 %v13993_v58, %v11113_v59  ;;  %v13925_v52 = vld [vmem:[%s21995_s5 + $0x48c] sm:$0xf]  ;;  %v11244_v32 = vor.u32 %v14025_v41, %v11241_v1  ;;  %v10972_v33 = vor.u32 %v13957_v40, %v10969_v21 }
 0x2e7   :  { %6479 = vmatpush.bf16.msrb.mxu3 %v11276_v12  ;;  %6417 = vmatmul.bf16.vlgmr.msra.gmra.mxu2 %v17167_v53  ;;  %v10988_v56 = vor.u32 %v13961_v37, %v10985_v13  ;;  %v10841_v53 = vld [vmem:[%s21995_s5 + $0x498] sm:$0xf0]  ;;  %v14021_v12 = vld [vmem:[%s21995_s5 + $0x78c] sm:$0xf] }
 0x2e8   :  { %v11097_v46 = vld [vmem:[%s21995_s5 + $0x698] sm:$0xf0]  ;;  %v10844_v31 = vor.u32 %v13925_v52, %v10841_v53  ;;  %v13921_v44 = vld [vmem:[%s21995_s5 + $0x46c] sm:$0xf] }
 0x2e9   :  { %6438 = vmatpush.bf16.msrb.mxu0 %v10876_v49  ;;  %6452 = vmatpush.bf16.msrb.mxu1 %v11004_v35  ;;  %v11225_v27 = vld [vmem:[%s21995_s5 + $0x798] sm:$0xf0]  ;;  %v11100_v34 = vor.u32 %v13989_v22, %v11097_v46  ;;  %v13953_v35 = vld [vmem:[%s21995_s5 + $0x56c] sm:$0xf] }
 0x2ea   :  { %6466 = vmatpush.bf16.msrb.mxu2 %v11132_v48  ;;  %v10825_v49 = vld [vmem:[%s21995_s5 + $0x478] sm:$0xf0]  ;;  %v11228_v48 = vor.u32 %v14021_v12, %v11225_v27  ;;  %v13985_v19 = vld [vmem:[%s21995_s5 + $0x66c] sm:$0xf] }
 0x2eb   :  { %6480 = vmatpush.bf16.msrb.mxu3 %v11260_v26  ;;  %v10953_v23 = vld [vmem:[%s21995_s5 + $0x578] sm:$0xf0]  ;;  %v14017_v26 = vld [vmem:[%s21995_s5 + $0x76c] sm:$0xf]  ;;  %v10828_v58 = vor.u32 %v13921_v44, %v10825_v49 }
 0x2ec   :  { %v11081_v37 = vld [vmem:[%s21995_s5 + $0x678] sm:$0xf0]  ;;  %v10956_v59 = vor.u32 %v13953_v35, %v10953_v23  ;;  %v13917_v1 = vld [vmem:[%s21995_s5 + $0x44c] sm:$0xf] }
 0x2ed   :  { %6439 = vmatpush.bf16.msrb.mxu0 %v10860_v29  ;;  %6453 = vmatpush.bf16.msrb.mxu1 %v10988_v56  ;;  %v11209_v13 = vld [vmem:[%s21995_s5 + $0x778] sm:$0xf0]  ;;  %v11084_v41 = vor.u32 %v13985_v19, %v11081_v37  ;;  %v13949_v56 = vld [vmem:[%s21995_s5 + $0x54c] sm:$0xf] }
 0x2ee   :  { %6467 = vmatpush.bf16.msrb.mxu2 %v11116_v28  ;;  %v10809_v29 = vld [vmem:[%s21995_s5 + $0x458] sm:$0xf0]  ;;  %v11212_v28 = vor.u32 %v14017_v26, %v11209_v13  ;;  %v13981_v53 = vld [vmem:[%s21995_s5 + $0x64c] sm:$0xf] }
 0x2ef   :  { %6481 = vmatpush.bf16.msrb.mxu3 %v11244_v32  ;;  %v10937_v52 = vld [vmem:[%s21995_s5 + $0x558] sm:$0xf0]  ;;  %v14013_v32 = vld [vmem:[%s21995_s5 + $0x74c] sm:$0xf]  ;;  %v10812_v22 = vor.u32 %v13917_v1, %v10809_v29 }
 0x2f0   :  { %v11065_v40 = vld [vmem:[%s21995_s5 + $0x658] sm:$0xf0]  ;;  %v10940_v46 = vor.u32 %v13949_v56, %v10937_v52  ;;  %v13913_v27 = vld [vmem:[%s21995_s5 + $0x42c] sm:$0xf] }
 0x2f1   :  { %6440 = vmatpush.bf16.msrb.mxu0 %v10844_v31  ;;  %6454 = vmatpush.bf16.msrb.mxu1 %v10972_v33  ;;  %v11193_v21 = vld [vmem:[%s21995_s5 + $0x758] sm:$0xf0]  ;;  %v11068_v12 = vor.u32 %v13981_v53, %v11065_v40  ;;  %v13945_v33 = vld [vmem:[%s21995_s5 + $0x52c] sm:$0xf] }
 0x2f2   :  { %6468 = vmatpush.bf16.msrb.mxu2 %v11100_v34  ;;  %v10793_v31 = vld [vmem:[%s21995_s5 + $0x438] sm:$0xf0]  ;;  %v11196_v34 = vor.u32 %v14013_v32, %v11193_v21  ;;  %v13977_v49 = vld [vmem:[%s21995_s5 + $0x62c] sm:$0xf] }
 0x2f3   :  { %6482 = vmatpush.bf16.msrb.mxu3 %v11228_v48  ;;  %v10921_v44 = vld [vmem:[%s21995_s5 + $0x538] sm:$0xf0]  ;;  %v14009_v48 = vld [vmem:[%s21995_s5 + $0x72c] sm:$0xf]  ;;  %v10796_v19 = vor.u32 %v13913_v27, %v10793_v31 }
 0x2f4   :  { %v11049_v35 = vld [vmem:[%s21995_s5 + $0x638] sm:$0xf0]  ;;  %v13909_v37 = vld [vmem:[%s21995_s5 + $0x40c] sm:$0xf]  ;;  %v10924_v13 = vor.u32 %v13945_v33, %v10921_v44 }
 0x2f5   :  { %6441 = vmatpush.bf16.msrb.mxu0 %v10828_v58  ;;  %6455 = vmatpush.bf16.msrb.mxu1 %v10956_v59  ;;  %v11177_v23 = vld [vmem:[%s21995_s5 + $0x738] sm:$0xf0]  ;;  %v11052_v58 = vor.u32 %v13977_v49, %v11049_v35  ;;  %v13941_v59 = vld [vmem:[%s21995_s5 + $0x50c] sm:$0xf] }
 0x2f6   :  { %6469 = vmatpush.bf16.msrb.mxu2 %v11084_v41  ;;  %v10777_v26 = vld [vmem:[%s21995_s5 + $0x418] sm:$0xf0]  ;;  %v13973_v1 = vld [vmem:[%s21995_s5 + $0x60c] sm:$0xf]  ;;  %v11180_v29 = vor.u32 %v14009_v48, %v11177_v23 }
 0x2f7   :  { %6483 = vmatpush.bf16.msrb.mxu3 %v11212_v28  ;;  %v10905_v41 = vld [vmem:[%s21995_s5 + $0x518] sm:$0xf0]  ;;  %v14005_v28 = vld [vmem:[%s21995_s5 + $0x70c] sm:$0xf]  ;;  %v10780_v21 = vor.u32 %v13909_v37, %v10777_v26 }
 0x2f8   :  { %v11033_v56 = vld [vmem:[%s21995_s5 + $0x618] sm:$0xf0]  ;;  %v14065_v53 = vld [vmem:[%s21995_s5 + $0x8ec] sm:$0xf]  ;;  %v10908_v27 = vor.u32 %v13941_v59, %v10905_v41 }
 0x2f9   :  { %6442 = vmatpush.bf16.msrb.mxu0 %v10812_v22  ;;  %6456 = vmatpush.bf16.msrb.mxu1 %v10940_v46  ;;  %v11161_v52 = vld [vmem:[%s21995_s5 + $0x718] sm:$0xf0]  ;;  %v14097_v32 = vld [vmem:[%s21995_s5 + $0x9ec] sm:$0xf]  ;;  %v11036_v31 = vor.u32 %v13973_v1, %v11033_v56 }
 0x2fa   :  { %6470 = vmatpush.bf16.msrb.mxu2 %v11068_v12  ;;  %v11401_v40 = vld [vmem:[%s21995_s5 + $0x8f8] sm:$0xf0]  ;;  %v14129_v46 = vld [vmem:[%s21995_s5 + $0xaec] sm:$0xf]  ;;  %v11164_v44 = vor.u32 %v14005_v28, %v11161_v52 }
 0x2fb   :  { %6484 = vmatpush.bf16.msrb.mxu3 %v11196_v34  ;;  %v11529_v22 = vld [vmem:[%s21995_s5 + $0x9f8] sm:$0xf0]  ;;  %v14161_v33 = vld [vmem:[%s21995_s5 + $0xbec] sm:$0xf]  ;;  %v11404_v49 = vor.u32 %v14065_v53, %v11401_v40 }
 0x2fc   :  { %v11657_v12 = vld [vmem:[%s21995_s5 + $0xaf8] sm:$0xf0]  ;;  %v11532_v35 = vor.u32 %v14097_v32, %v11529_v22  ;;  %v14061_v23 = vld [vmem:[%s21995_s5 + $0x8cc] sm:$0xf] }
 0x2fd   :  { %6443 = vmatpush.bf16.msrb.mxu0 %v10796_v19  ;;  %6457 = vmatpush.bf16.msrb.mxu1 %v10924_v13  ;;  %v11785_v34 = vld [vmem:[%s21995_s5 + $0xbf8] sm:$0xf0]  ;;  %v11660_v48 = vor.u32 %v14129_v46, %v11657_v12  ;;  %v14093_v37 = vld [vmem:[%s21995_s5 + $0x9cc] sm:$0xf] }
 0x2fe   :  { %6471 = vmatpush.bf16.msrb.mxu2 %v11052_v58  ;;  %v11385_v19 = vld [vmem:[%s21995_s5 + $0x8d8] sm:$0xf0]  ;;  %v11788_v26 = vor.u32 %v14161_v33, %v11785_v34  ;;  %v14125_v58 = vld [vmem:[%s21995_s5 + $0xacc] sm:$0xf] }
 0x2ff   :  { %6485 = vmatpush.bf16.msrb.mxu3 %v11180_v29  ;;  %v11513_v13 = vld [vmem:[%s21995_s5 + $0x9d8] sm:$0xf0]  ;;  %v14157_v41 = vld [vmem:[%s21995_s5 + $0xbcc] sm:$0xf]  ;;  %v11388_v29 = vor.u32 %v14061_v23, %v11385_v19 }
 0x300   :  { %v11641_v59 = vld [vmem:[%s21995_s5 + $0xad8] sm:$0xf0]  ;;  %v11516_v56 = vor.u32 %v14093_v37, %v11513_v13  ;;  %v14057_v52 = vld [vmem:[%s21995_s5 + $0x8ac] sm:$0xf]  ;;  %v19742_v37 = vpop.f32.mrf.mxu1 }
 0x301   :  { %6444 = vmatpush.bf16.msrb.mxu0 %v10780_v21  ;;  %6458 = vmatpush.bf16.msrb.mxu1 %v10908_v27  ;;  %v11769_v1 = vld [vmem:[%s21995_s5 + $0xbd8] sm:$0xf0]  ;;  %v11644_v28 = vor.u32 %v14125_v58, %v11641_v59  ;;  %v14089_v40 = vld [vmem:[%s21995_s5 + $0x9ac] sm:$0xf] }
 0x302   :  { %6472 = vmatpush.bf16.msrb.mxu2 %v11036_v31  ;;  %v11369_v53 = vld [vmem:[%s21995_s5 + $0x8b8] sm:$0xf0]  ;;  %v11772_v32 = vor.u32 %v14157_v41, %v11769_v1  ;;  %v14121_v22 = vld [vmem:[%s21995_s5 + $0xaac] sm:$0xf]  ;;  %v19716_v31 = vpop.f32.mrf.mxu0 }
 0x303   :  { %6486 = vmatpush.bf16.msrb.mxu3 %v11164_v44  ;;  %v11497_v21 = vld [vmem:[%s21995_s5 + $0x9b8] sm:$0xf0]  ;;  %v11372_v27 = vor.u32 %v14057_v52, %v11369_v53  ;;  %v14149_v23 = vld [vmem:[%s21995_s5 + $0xb8c] sm:$0xf] }
 0x304   :  { %6445 = vmatmul.bf16.vlgmr.msrb.gmra.mxu0 %v17312_v51  ;;  %v11625_v46 = vld [vmem:[%s21995_s5 + $0xab8] sm:$0xf0]  ;;  %6459 = vmatmul.bf16.vlgmr.msrb.gmra.mxu1 %v17323_v6  ;;  %v14153_v51 = vld [vmem:[%s21995_s5 + $0xbac] sm:$0xf]  ;;  %v11500_v33 = vor.u32 %v14089_v40, %v11497_v21 }
 0x305   :  { %6493 = vmatpush.bf16.msra.mxu0 %v11404_v49  ;;  %6507 = vmatpush.bf16.msra.mxu1 %v11532_v35  ;;  %v11753_v12 = vld [vmem:[%s21995_s5 + $0xbb8] sm:$0xf0]  ;;  %v11628_v6 = vor.u32 %v14121_v22, %v11625_v46  ;;  %v14117_v35 = vld [vmem:[%s21995_s5 + $0xa8c] sm:$0xf]  ;;  %v19770_v22 = vpop.f32.mrf.mxu3 }
 0x306   :  { %6521 = vmatpush.bf16.msra.mxu2 %v11660_v48  ;;  %6487 = vmatmul.bf16.vlgmr.msrb.gmra.mxu3 %v17385_v4  ;;  %v11353_v34 = vld [vmem:[%s21995_s5 + $0x898] sm:$0xf0]  ;;  %v14085_v4 = vld [vmem:[%s21995_s5 + $0x98c] sm:$0xf]  ;;  %v11756_v44 = vor.u32 %v14153_v51, %v11753_v12  ;;  %22051 = vst [vmem:[#allocation41_spill] sm:$0xff] %v19770_v22 }
 0x307   :  { %6535 = vmatpush.bf16.msra.mxu3 %v11788_v26  ;;  %6473 = vmatmul.bf16.vlgmr.msrb.gmra.mxu2 %v17377_v43  ;;  %v14053_v43 = vld [vmem:[%s21995_s5 + $0x88c] sm:$0xf]  ;;  %v11481_v49 = vld [vmem:[%s21995_s5 + $0x998] sm:$0xf0] }
 0x308   :  { %v11609_v48 = vld [vmem:[%s21995_s5 + $0xa98] sm:$0xf0]  ;;  %v11356_v26 = vor.u32 %v14053_v43, %v11353_v34  ;;  %v11484_v13 = vor.u32 %v14085_v4, %v11481_v49  ;;  %v14049_v59 = vld [vmem:[%s21995_s5 + $0x86c] sm:$0xf] }
 0x309   :  { %6494 = vmatpush.bf16.msra.mxu0 %v11388_v29  ;;  %6508 = vmatpush.bf16.msra.mxu1 %v11516_v56  ;;  %v11737_v19 = vld [vmem:[%s21995_s5 + $0xb98] sm:$0xf0]  ;;  %v11612_v58 = vor.u32 %v14117_v35, %v11609_v48  ;;  %v14081_v1 = vld [vmem:[%s21995_s5 + $0x96c] sm:$0xf]  ;;  %v19798_v48 = vpop.f32.mrf.mxu1 }
 0x30a   :  { %6522 = vmatpush.bf16.msra.mxu2 %v11644_v28  ;;  %v11337_v41 = vld [vmem:[%s21995_s5 + $0x878] sm:$0xf0]  ;;  %v11740_v29 = vor.u32 %v14149_v23, %v11737_v19  ;;  %v14113_v28 = vld [vmem:[%s21995_s5 + $0xa6c] sm:$0xf]  ;;  %v19772_v46 = vpop.f32.mrf.mxu0 }
 0x30b   :  { %6536 = vmatpush.bf16.msra.mxu3 %v11772_v32  ;;  %v11465_v56 = vld [vmem:[%s21995_s5 + $0x978] sm:$0xf0]  ;;  %v14145_v53 = vld [vmem:[%s21995_s5 + $0xb6c] sm:$0xf]  ;;  %v19768_v32 = vpop.f32.mrf.mxu2  ;;  %v11340_v21 = vor.u32 %v14049_v59, %v11337_v41 }
 0x30c   :  { %v11593_v52 = vld [vmem:[%s21995_s5 + $0xa78] sm:$0xf0]  ;;  %22050 = vst [vmem:[#allocation40_spill] sm:$0xff] %v19768_v32  ;;  %v11468_v51 = vor.u32 %v14081_v1, %v11465_v56  ;;  %v14109_v4 = vld [vmem:[%s21995_s5 + $0xa4c] sm:$0xf] }
 0x30d   :  { %6495 = vmatpush.bf16.msra.mxu0 %v11372_v27  ;;  %6509 = vmatpush.bf16.msra.mxu1 %v11500_v33  ;;  %v11721_v40 = vld [vmem:[%s21995_s5 + $0xb78] sm:$0xf0]  ;;  %v11596_v12 = vor.u32 %v14113_v28, %v11593_v52  ;;  %v14045_v27 = vld [vmem:[%s21995_s5 + $0x84c] sm:$0xf] }
 0x30e   :  { %6523 = vmatpush.bf16.msra.mxu2 %v11628_v6  ;;  %v11321_v33 = vld [vmem:[%s21995_s5 + $0x858] sm:$0xf0]  ;;  %v14077_v6 = vld [vmem:[%s21995_s5 + $0x94c] sm:$0xf]  ;;  %v11724_v43 = vor.u32 %v14145_v53, %v11721_v40 }
 0x30f   :  { %6537 = vmatpush.bf16.msra.mxu3 %v11756_v44  ;;  %v11449_v34 = vld [vmem:[%s21995_s5 + $0x958] sm:$0xf0]  ;;  %v14141_v49 = vld [vmem:[%s21995_s5 + $0xb4c] sm:$0xf]  ;;  %v11324_v23 = vor.u32 %v14045_v27, %v11321_v33 }
 0x310   :  { %v11577_v44 = vld [vmem:[%s21995_s5 + $0xa58] sm:$0xf0]  ;;  %v11452_v19 = vor.u32 %v14077_v6, %v11449_v34  ;;  %v14073_v59 = vld [vmem:[%s21995_s5 + $0x92c] sm:$0xf] }
 0x311   :  { %6496 = vmatpush.bf16.msra.mxu0 %v11356_v26  ;;  %6510 = vmatpush.bf16.msra.mxu1 %v11484_v13  ;;  %v11705_v35 = vld [vmem:[%s21995_s5 + $0xb58] sm:$0xf0]  ;;  %v11580_v26 = vor.u32 %v14109_v4, %v11577_v44  ;;  %v14041_v13 = vld [vmem:[%s21995_s5 + $0x82c] sm:$0xf] }
 0x312   :  { %6524 = vmatpush.bf16.msra.mxu2 %v11612_v58  ;;  %v11305_v58 = vld [vmem:[%s21995_s5 + $0x838] sm:$0xf0]  ;;  %v11708_v41 = vor.u32 %v14141_v49, %v11705_v35  ;;  %v14137_v28 = vld [vmem:[%s21995_s5 + $0xb2c] sm:$0xf] }
 0x313   :  { %6538 = vmatpush.bf16.msra.mxu3 %v11740_v29  ;;  %v11433_v1 = vld [vmem:[%s21995_s5 + $0x938] sm:$0xf0]  ;;  %v14105_v29 = vld [vmem:[%s21995_s5 + $0xa2c] sm:$0xf]  ;;  %v19824_v53 = vpop.f32.mrf.mxu2  ;;  %v11308_v40 = vor.u32 %v14041_v13, %v11305_v58 }
 0x314   :  { %v11561_v56 = vld [vmem:[%s21995_s5 + $0xa38] sm:$0xf0]  ;;  %v11436_v27 = vor.u32 %v14073_v59, %v11433_v1  ;;  %v14069_v6 = vld [vmem:[%s21995_s5 + $0x90c] sm:$0xf] }
 0x315   :  { %6497 = vmatpush.bf16.msra.mxu0 %v11340_v21  ;;  %6511 = vmatpush.bf16.msra.mxu1 %v11468_v51  ;;  %v11689_v52 = vld [vmem:[%s21995_s5 + $0xb38] sm:$0xf0]  ;;  %v14037_v21 = vld [vmem:[%s21995_s5 + $0x80c] sm:$0xf]  ;;  %v11564_v33 = vor.u32 %v14105_v29, %v11561_v56 }
 0x316   :  { %6525 = vmatpush.bf16.msra.mxu2 %v11596_v12  ;;  %v11289_v51 = vld [vmem:[%s21995_s5 + $0x818] sm:$0xf0]  ;;  %v19832_v12 = vpop.f32.mrf.mxu3  ;;  %v14101_v34 = vld [vmem:[%s21995_s5 + $0xa0c] sm:$0xf]  ;;  %v11692_v4 = vor.u32 %v14137_v28, %v11689_v52 }
 0x317   :  { %6539 = vmatpush.bf16.msra.mxu3 %v11724_v43  ;;  %v11417_v43 = vld [vmem:[%s21995_s5 + $0x918] sm:$0xf0]  ;;  %v14133_v49 = vld [vmem:[%s21995_s5 + $0xb0c] sm:$0xf]  ;;  %v11292_v58 = vor.u32 %v14037_v21, %v11289_v51 }
 0x318   :  { %v11545_v44 = vld [vmem:[%s21995_s5 + $0xa18] sm:$0xf0]  ;;  %v14225_v13 = vld [vmem:[%s21995_s5 + $0xdec] sm:$0xf]  ;;  %v11420_v29 = vor.u32 %v14069_v6, %v11417_v43 }
 0x319   :  { %6498 = vmatpush.bf16.msra.mxu0 %v11324_v23  ;;  %6512 = vmatpush.bf16.msra.mxu1 %v11452_v19  ;;  %v11673_v35 = vld [vmem:[%s21995_s5 + $0xb18] sm:$0xf0]  ;;  %v19852_v23 = vpop.f32.mrf.mxu0  ;;  %v14193_v19 = vld [vmem:[%s21995_s5 + $0xcec] sm:$0xf]  ;;  %v11548_v56 = vor.u32 %v14101_v34, %v11545_v44 }
 0x31a   :  { %6526 = vmatpush.bf16.msra.mxu2 %v11580_v26  ;;  %v11913_v26 = vld [vmem:[%s21995_s5 + $0xcf8] sm:$0xf0]  ;;  %v14289_v28 = vld [vmem:[%s21995_s5 + $0xfec] sm:$0xf]  ;;  %v11676_v21 = vor.u32 %v14133_v49, %v11673_v35 }
 0x31b   :  { %6540 = vmatpush.bf16.msra.mxu3 %v11708_v41  ;;  %v12041_v59 = vld [vmem:[%s21995_s5 + $0xdf8] sm:$0xf0]  ;;  %v14257_v41 = vld [vmem:[%s21995_s5 + $0xeec] sm:$0xf]  ;;  %v11916_v51 = vor.u32 %v14193_v19, %v11913_v26  ;;  %v19904_v19 = vpop.f32.mrf.mxu2 }
 0x31c   :  { %v12169_v1 = vld [vmem:[%s21995_s5 + $0xef8] sm:$0xf0]  ;;  %v12044_v22 = vor.u32 %v14225_v13, %v12041_v59  ;;  %v14221_v6 = vld [vmem:[%s21995_s5 + $0xdcc] sm:$0xf] }
 0x31d   :  { %6499 = vmatpush.bf16.msra.mxu0 %v11308_v40  ;;  %6513 = vmatpush.bf16.msra.mxu1 %v11436_v27  ;;  %v12297_v52 = vld [vmem:[%s21995_s5 + $0xff8] sm:$0xf0]  ;;  %v19878_v40 = vpop.f32.mrf.mxu1  ;;  %v12172_v32 = vor.u32 %v14257_v41, %v12169_v1  ;;  %v14189_v27 = vld [vmem:[%s21995_s5 + $0xccc] sm:$0xf] }
 0x31e   :  { %6527 = vmatpush.bf16.msra.mxu2 %v11564_v33  ;;  %v11897_v33 = vld [vmem:[%s21995_s5 + $0xcd8] sm:$0xf0]  ;;  %v12300_v43 = vor.u32 %v14289_v28, %v12297_v52  ;;  %v14285_v49 = vld [vmem:[%s21995_s5 + $0xfcc] sm:$0xf]  ;;  %v19906_v13 = vpop.f32.mrf.mxu3 }
 0x31f   :  { %6541 = vmatpush.bf16.msra.mxu3 %v11692_v4  ;;  %v12025_v34 = vld [vmem:[%s21995_s5 + $0xdd8] sm:$0xf0]  ;;  %v14253_v4 = vld [vmem:[%s21995_s5 + $0xecc] sm:$0xf]  ;;  %v11900_v26 = vor.u32 %v14189_v27, %v11897_v33 }
 0x320   :  { %v12153_v44 = vld [vmem:[%s21995_s5 + $0xed8] sm:$0xf0]  ;;  %v12028_v59 = vor.u32 %v14221_v6, %v12025_v34  ;;  %v14185_v1 = vld [vmem:[%s21995_s5 + $0xcac] sm:$0xf] }
 0x321   :  { %6500 = vmatpush.bf16.msra.mxu0 %v11292_v58  ;;  %6514 = vmatpush.bf16.msra.mxu1 %v11420_v29  ;;  %v12281_v35 = vld [vmem:[%s21995_s5 + $0xfd8] sm:$0xf0]  ;;  %v19908_v58 = vpop.f32.mrf.mxu0  ;;  %v12156_v41 = vor.u32 %v14253_v4, %v12153_v44  ;;  %v14213_v4 = vld [vmem:[%s21995_s5 + $0xd8c] sm:$0xf] }
 0x322   :  { %6528 = vmatpush.bf16.msra.mxu2 %v11548_v56  ;;  %v11881_v29 = vld [vmem:[%s21995_s5 + $0xcb8] sm:$0xf0]  ;;  %v14217_v56 = vld [vmem:[%s21995_s5 + $0xdac] sm:$0xf]  ;;  %v12284_v28 = vor.u32 %v14285_v49, %v12281_v35 }
 0x323   :  { %6542 = vmatpush.bf16.msra.mxu3 %v11676_v21  ;;  %v12137_v52 = vld [vmem:[%s21995_s5 + $0xeb8] sm:$0xf0] }
 0x324   :  { %6501 = vmatmul.bf16.vlgmr.msra.gmra.mxu0 %v17522_v3  ;;  %6515 = vmatmul.bf16.vlgmr.msra.gmra.mxu1 %v17533_v7  ;;  %v14281_v3 = vld [vmem:[%s21995_s5 + $0xfac] sm:$0xf]  ;;  %v12265_v21 = vld [vmem:[%s21995_s5 + $0xfb8] sm:$0xf0]  ;;  %v11884_v7 = vor.u32 %v14185_v1, %v11881_v29 }
 0x325   :  { %6549 = vmatpush.bf16.msrb.mxu0 %v11916_v51  ;;  %6563 = vmatpush.bf16.msrb.mxu1 %v12044_v22  ;;  %v14249_v22 = vld [vmem:[%s21995_s5 + $0xeac] sm:$0xf]  ;;  %v14583_v51 = vld [vmem:[%s21996_s6] sm:$0xf]  ;;  %v19940_v33 = vpop.f32.mrf.mxu1  ;;  %v11865_v34 = vld [vmem:[%s21995_s5 + $0xc98] sm:$0xf0]  ;;  %v12268_v49 = vor.u32 %v14281_v3, %v12265_v21 }
 0x326   :  { %6577 = vmatpush.bf16.msrb.mxu2 %v12172_v32  ;;  %v12009_v32 = vld [vmem:[%s21995_s5 + $0xdb8] sm:$0xf0]  ;;  %v3143_v27 = vperm.slane %v14583_v51, 2  ;;  %6543 = vmatmul.bf16.vlgmr.msra.gmra.mxu3 %v17595_v11  ;;  %v12140_v6 = vor.u32 %v14249_v22, %v12137_v52  ;;  %v22052_v11 = vperm.slane %v17978_v50, 0  ;;  %v14277_v50 = vld [vmem:[%s21995_s5 + $0xf8c] sm:$0xf]  ;;  %v19972_v29 = vpop.f32.mrf.mxu3 }
 0x327   :  { %6591 = vmatpush.bf16.msrb.mxu3 %v12300_v43  ;;  %6529 = vmatmul.bf16.vlgmr.msra.gmra.mxu2 %v17587_v9  ;;  %v12012_v9 = vor.u32 %v14217_v56, %v12009_v32  ;;  %v14181_v43 = vld [vmem:[%s21995_s5 + $0xc8c] sm:$0xf]  ;;  %v11993_v35 = vld [vmem:[%s21995_s5 + $0xd98] sm:$0xf0]  ;;  %v22053_v21 = vperm.slane %v18743_v57, 1 }
 0x328   :  { %v5721_v44 = vadd.f32 %v18157_v42, %v22052_v11  ;;  %v12249_v42 = vld [vmem:[%s21995_s5 + $0xf98] sm:$0xf0]  ;;  %v11868_v1 = vor.u32 %v14181_v43, %v11865_v34  ;;  %v11996_v56 = vor.u32 %v14213_v4, %v11993_v35  ;;  %v14177_v32 = vld [vmem:[%s21995_s5 + $0xc6c] sm:$0xf]  ;;  %v6169_v57 = vadd.f32 %v19852_v23, %v3143_v27 }
 0x329   :  { %6550 = vmatpush.bf16.msrb.mxu0 %v11900_v26  ;;  %6564 = vmatpush.bf16.msrb.mxu1 %v12028_v59  ;;  %v14245_v26 = vld [vmem:[%s21995_s5 + $0xe8c] sm:$0xf]  ;;  %v12121_v59 = vld [vmem:[%s21995_s5 + $0xe98] sm:$0xf0]  ;;  %v5945_v51 = vadd.f32 %v18866_v16, %v22053_v21  ;;  %v19998_v34 = vpop.f32.mrf.mxu0 }
 0x32a   :  { %6578 = vmatpush.bf16.msrb.mxu2 %v12156_v41  ;;  %v19970_v41 = vpop.f32.mrf.mxu2  ;;  %v11849_v22 = vld [vmem:[%s21995_s5 + $0xc78] sm:$0xf0]  ;;  %v14209_v52 = vld [vmem:[%s21995_s5 + $0xd6c] sm:$0xf]  ;;  %v5735_v3 = vadd.f32 %v18171_v20, %v5721_v44 }
 0x32b   :  { %6592 = vmatpush.bf16.msrb.mxu3 %v12284_v28  ;;  %v12124_v28 = vor.u32 %v14245_v26, %v12121_v59  ;;  %v14241_v43 = vld [vmem:[%s21995_s5 + $0xe6c] sm:$0xf]  ;;  %v12105_v20 = vld [vmem:[%s21995_s5 + $0xe78] sm:$0xf0]  ;;  %v11852_v11 = vor.u32 %v14177_v32, %v11849_v22 }
 0x32c   :  { %v14273_v16 = vld [vmem:[%s21995_s5 + $0xf6c] sm:$0xf]  ;;  %v5749_v4 = vadd.f32 %v18240_v10, %v5735_v3  ;;  %v5959_v10 = vadd.f32 %v18874_v63, %v5945_v51  ;;  %v6183_v63 = vadd.f32 %v19878_v40, %v6169_v57 }
 0x32d   :  { %6551 = vmatpush.bf16.msrb.mxu0 %v11884_v7  ;;  %6565 = vmatpush.bf16.msrb.mxu1 %v12012_v9  ;;  %v6167_v7 = vadd.f32 %v19772_v46, %v3143_v27  ;;  %v12252_v9 = vor.u32 %v14277_v50, %v12249_v42  ;;  %v12233_v46 = vld [vmem:[%s21995_s5 + $0xf78] sm:$0xf0]  ;;  %v14173_v23 = vld [vmem:[%s21995_s5 + $0xc4c] sm:$0xf]  ;;  %v20018_v59 = vpop.f32.mrf.mxu1 }
 0x32e   :  { %6579 = vmatpush.bf16.msrb.mxu2 %v12140_v6  ;;  %v11977_v6 = vld [vmem:[%s21995_s5 + $0xd78] sm:$0xf0]  ;;  %v14205_v35 = vld [vmem:[%s21995_s5 + $0xd4c] sm:$0xf]  ;;  %v12236_v50 = vor.u32 %v14273_v16, %v12233_v46  ;;  %v5763_v32 = vadd.f32 %v18251_v62, %v5749_v4  ;;  %v5973_v22 = vadd.f32 %v18904_v24, %v5959_v10  ;;  %v6197_v21 = vadd.f32 %v19904_v19, %v6183_v63  ;;  %v20061_v57 = vpop.f32.mrf.mxu3 }
 0x32f   :  { %6593 = vmatpush.bf16.msrb.mxu3 %v12268_v49  ;;  %v11980_v44 = vor.u32 %v14209_v52, %v11977_v6  ;;  %v12108_v49 = vor.u32 %v14241_v43, %v12105_v20  ;;  %v11833_v27 = vld [vmem:[%s21995_s5 + $0xc58] sm:$0xf0]  ;;  %v6181_v26 = vadd.f32 %v19798_v48, %v6167_v7  ;;  %v14269_v48 = vld [vmem:[%s21995_s5 + $0xf4c] sm:$0xf] }
 0x330   :  { %v11961_v42 = vld [vmem:[%s21995_s5 + $0xd58] sm:$0xf0]  ;;  %v11836_v3 = vor.u32 %v14173_v23, %v11833_v27  ;;  %v14169_v7 = vld [vmem:[%s21995_s5 + $0xc2c] sm:$0xf]  ;;  %v5777_v20 = vadd.f32 %v18364_v60, %v5763_v32  ;;  %v6211_v27 = vadd.f32 %v19906_v13, %v6197_v21  ;;  %v14450_v32 = vld [vmem:[%s21997_s8 + $0xec] sm:$0xf0] }
 0x331   :  { %6552 = vmatpush.bf16.msrb.mxu0 %v11868_v1  ;;  %6566 = vmatpush.bf16.msrb.mxu1 %v11996_v56  ;;  %v14237_v1 = vld [vmem:[%s21995_s5 + $0xe4c] sm:$0xf]  ;;  %v12089_v56 = vld [vmem:[%s21995_s5 + $0xe58] sm:$0xf0]  ;;  %v6195_v52 = vadd.f32 %v19824_v53, %v6181_v26  ;;  %v11964_v40 = vor.u32 %v14205_v35, %v11961_v42  ;;  %v20063_v16 = vpop.f32.mrf.mxu0 }
 0x332   :  { %6580 = vmatpush.bf16.msrb.mxu2 %v12124_v28  ;;  %v12217_v28 = vld [vmem:[%s21995_s5 + $0xf58] sm:$0xf0]  ;;  %v12092_v51 = vor.u32 %v14237_v1, %v12089_v56  ;;  %v14201_v24 = vld [vmem:[%s21995_s5 + $0xd2c] sm:$0xf]  ;;  %v20049_v53 = vpop.f32.mrf.mxu2 }
 0x333   :  { %6594 = vmatpush.bf16.msrb.mxu3 %v12252_v9  ;;  %v11817_v62 = vld [vmem:[%s21995_s5 + $0xc38] sm:$0xf0]  ;;  %v12220_v19 = vor.u32 %v14269_v48, %v12217_v28  ;;  %v14233_v6 = vld [vmem:[%s21995_s5 + $0xe2c] sm:$0xf]  ;;  %v12415_v28 = vld [vmem:[%s21997_s8 + $0xe0] sm:$0xf] }
 0x334   :  { %v11945_v9 = vld [vmem:[%s21995_s5 + $0xd38] sm:$0xf0]  ;;  %v14265_v46 = vld [vmem:[%s21995_s5 + $0xf2c] sm:$0xf] }
 0x335   :  { %6553 = vmatpush.bf16.msrb.mxu0 %v11852_v11  ;;  %6567 = vmatpush.bf16.msrb.mxu1 %v11980_v44  ;;  %v12073_v43 = vld [vmem:[%s21995_s5 + $0xe38] sm:$0xf0]  ;;  %v5987_v11 = vadd.f32 %v18915_v25, %v5973_v22  ;;  %v6209_v44 = vadd.f32 %v19832_v12, %v6195_v52  ;;  %v14165_v60 = vld [vmem:[%s21995_s5 + $0xc0c] sm:$0xf]  ;;  %v11948_v35 = vor.u32 %v14201_v24, %v11945_v9  ;;  %v20091_v42 = vpop.f32.mrf.mxu1  ;;  %v12543_v22 = vld [vmem:[%s21997_s8 + $0x1e0] sm:$0xf] }
 0x336   :  { %6581 = vmatpush.bf16.msrb.mxu2 %v12108_v49  ;;  %v12201_v4 = vld [vmem:[%s21995_s5 + $0xf38] sm:$0xf0]  ;;  %v11820_v49 = vor.u32 %v14169_v7, %v11817_v62  ;;  %v12076_v10 = vor.u32 %v14233_v6, %v12073_v43  ;;  %v14197_v25 = vld [vmem:[%s21995_s5 + $0xd0c] sm:$0xf]  ;;  %v12416_v9 = vor.u32 %v14450_v32, %v12415_v28  ;;  %v20128_v43 = vpop.f32.mrf.mxu3  ;;  %v14502_v28 = vld [vmem:[%s21997_s8 + $0x28c] sm:$0xf0] }
 0x337   :  { %6595 = vmatpush.bf16.msrb.mxu3 %v12236_v50  ;;  %v11801_v23 = vld [vmem:[%s21995_s5 + $0xc18] sm:$0xf0]  ;;  %v14229_v26 = vld [vmem:[%s21995_s5 + $0xe0c] sm:$0xf]  ;;  %v6001_v50 = vadd.f32 %v19072_v15, %v5987_v11  ;;  %v6223_v13 = vadd.f32 %v19908_v58, %v6209_v44  ;;  %v12204_v1 = vor.u32 %v14265_v46, %v12201_v4  ;;  %v5791_v15 = vadd.f32 %v18378_v2, %v5777_v20  ;;  %v14482_v2 = vld [vmem:[%s21997_s8 + $0x1ec] sm:$0xf0] }
 0x338   :  { %v11929_v12 = vld [vmem:[%s21995_s5 + $0xd18] sm:$0xf0]  ;;  %v14261_v63 = vld [vmem:[%s21995_s5 + $0xf0c] sm:$0xf]  ;;  %v6225_v58 = vadd.f32 %v19998_v34, %v6211_v27  ;;  %v11804_v52 = vor.u32 %v14165_v60, %v11801_v23  ;;  %v12671_v34 = vld [vmem:[%s21997_s8 + $0x2e0] sm:$0xf]  ;;  %v12544_v20 = vor.u32 %v14482_v2, %v12543_v22 }
 0x339   :  { %6554 = vmatpush.bf16.msrb.mxu0 %v11836_v3  ;;  %6568 = vmatpush.bf16.msrb.mxu1 %v11964_v40  ;;  %v12057_v56 = vld [vmem:[%s21995_s5 + $0xe18] sm:$0xf0]  ;;  %v14514_v3 = vld [vmem:[%s21997_s8 + $0x2ec] sm:$0xf0]  ;;  %v5805_v21 = vadd.f32 %v18447_v5, %v5791_v15  ;;  %v11932_v40 = vor.u32 %v14197_v25, %v11929_v12  ;;  %v6015_v7 = vadd.f32 %v19080_v8, %v6001_v50  ;;  %v12399_v5 = vld [vmem:[%s21997_s8 + $0xc0] sm:$0xf]  ;;  %v6280_v23 = vpop.f32.mrf.mxu0 }
 0x33a   :  { %6582 = vmatpush.bf16.msrb.mxu2 %v12092_v51  ;;  %v12185_v48 = vld [vmem:[%s21995_s5 + $0xf18] sm:$0xf0]  ;;  %v12060_v51 = vor.u32 %v14229_v26, %v12057_v56  ;;  %v6237_v62 = vadd.f32 %v19940_v33, %v6223_v13  ;;  %v20125_v24 = vpop.f32.mrf.mxu2  ;;  %v6239_v6 = vadd.f32 %v20018_v59, %v6225_v58  ;;  %v12672_v46 = vor.u32 %v14514_v3, %v12671_v34  ;;  %v14446_v8 = vld [vmem:[%s21997_s8 + $0xcc] sm:$0xf0]  ;;  %v12527_v33 = vld [vmem:[%s21997_s8 + $0x1c0] sm:$0xf] }
 0x33b   :  { %6596 = vmatpush.bf16.msrb.mxu3 %v12220_v19  ;;  %v12188_v19 = vor.u32 %v14261_v63, %v12185_v48  ;;  %v6029_v4 = vadd.f32 %v19119_v39, %v6015_v7  ;;  %v14478_v11 = vld [vmem:[%s21997_s8 + $0x1cc] sm:$0xf0]  ;;  %v12655_v44 = vld [vmem:[%s21997_s8 + $0x2c0] sm:$0xf]  ;;  %v5819_v39 = vadd.f32 %v18458_v0, %v5805_v21 }
 0x33c   :  { %v6251_v59 = vadd.f32 %v19970_v41, %v6237_v62  ;;  %v6253_v60 = vadd.f32 %v20049_v53, %v6239_v6  ;;  %v12400_v41 = vor.u32 %v14446_v8, %v12399_v5  ;;  %v12528_v27 = vor.u32 %v14478_v11, %v12527_v33  ;;  %v14442_v53 = vld [vmem:[%s21997_s8 + $0xac] sm:$0xf0]  ;;  %v12511_v25 = vld [vmem:[%s21997_s8 + $0x1a0] sm:$0xf]  ;;  %v22055_v11 = vld [vmem:[#allocation33_spill] sm:$0xff] }
 0x33d   :  { %6555 = vmatpush.bf16.msrb.mxu0 %v11820_v49  ;;  %6569 = vmatpush.bf16.msrb.mxu1 %v11948_v35  ;;  %v14510_v49 = vld [vmem:[%s21997_s8 + $0x2cc] sm:$0xf0]  ;;  %v5833_v0 = vadd.f32 %v18571_v54, %v5819_v39  ;;  %v6043_v12 = vadd.f32 %v19136_v47, %v6029_v4  ;;  %v6294_v50 = vpop.f32.mrf.mxu1  ;;  %v12367_v15 = vld [vmem:[%s21997_s8 + $0x80] sm:$0xf] }
 0x33e   :  { %6583 = vmatpush.bf16.msrb.mxu2 %v12076_v10  ;;  %v12656_v35 = vor.u32 %v14510_v49, %v12655_v44  ;;  %v12383_v10 = vld [vmem:[%s21997_s8 + $0xa0] sm:$0xf]  ;;  %v6265_v26 = vadd.f32 %v19972_v29, %v6251_v59  ;;  %v14474_v13 = vld [vmem:[%s21997_s8 + $0x1ac] sm:$0xf0]  ;;  %v6267_v47 = vadd.f32 %v20061_v57, %v6253_v60  ;;  %v6322_v32 = vpop.f32.mrf.mxu3 }
 0x33f   :  { %6597 = vmatpush.bf16.msrb.mxu3 %v12204_v1  ;;  %v12639_v1 = vld [vmem:[%s21997_s8 + $0x2a0] sm:$0xf]  ;;  %v14506_v54 = vld [vmem:[%s21997_s8 + $0x2ac] sm:$0xf0]  ;;  %v12384_v29 = vor.u32 %v14442_v53, %v12383_v10  ;;  %v12512_v63 = vor.u32 %v14474_v13, %v12511_v25 }
 0x340   :  { %v6281_v56 = vadd.f32 %v6280_v23, %v6267_v47  ;;  %v12640_v48 = vor.u32 %v14506_v54, %v12639_v1  ;;  %v12623_v58 = vld [vmem:[%s21997_s8 + $0x280] sm:$0xf]  ;;  %v14434_v7 = vld [vmem:[%s21997_s8 + $0x6c] sm:$0xf0] }
 0x341   :  { %6556 = vmatpush.bf16.msrb.mxu0 %v11804_v52  ;;  %6570 = vmatpush.bf16.msrb.mxu1 %v11932_v40  ;;  %v6334_v22 = vpop.f32.mrf.mxu0  ;;  %v12624_v40 = vor.u32 %v14502_v28, %v12623_v58  ;;  %v14498_v6 = vld [vmem:[%s21997_s8 + $0x26c] sm:$0xf0]  ;;  %v12335_v33 = vld [vmem:[%s21997_s8 + $0x40] sm:$0xf] }
 0x342   :  { %6584 = vmatpush.bf16.msrb.mxu2 %v12060_v51  ;;  %v6308_v57 = vpop.f32.mrf.mxu2  ;;  %v6295_v3 = vadd.f32 %v6294_v50, %v6281_v56  ;;  %v12351_v51 = vld [vmem:[%s21997_s8 + $0x60] sm:$0xf]  ;;  %v14430_v4 = vld [vmem:[%s21997_s8 + $0x4c] sm:$0xf0] }
 0x343   :  { %6598 = vmatpush.bf16.msrb.mxu3 %v12188_v19  ;;  %v14466_v19 = vld [vmem:[%s21997_s8 + $0x16c] sm:$0xf0]  ;;  %v12463_v59 = vld [vmem:[%s21997_s8 + $0x140] sm:$0xf] }
 0x344   :  { %6557 = vmatmul.bf16.vlgmr.msrb.gmra.mxu0 %v17732_v30  ;;  %6571 = vmatmul.bf16.vlgmr.msrb.gmra.mxu1 %v17743_v17  ;;  %v6057_v30 = vadd.f32 %v19279_v18, %v6043_v12  ;;  %v6279_v17 = vadd.f32 %v20063_v16, %v6265_v26  ;;  %v5847_v18 = vadd.f32 %v18579_v38, %v5833_v0  ;;  %v14470_v16 = vld [vmem:[%s21997_s8 + $0x18c] sm:$0xf0]  ;;  %v22056_v49 = vld [vmem:[#allocation38_spill] sm:$0xff] }
 0x345   :  { %7505 = vmatpush.bf16.msra.mxu0 %v12416_v9  ;;  %7519 = vmatpush.bf16.msra.mxu1 %v12544_v20  ;;  %v6348_v62 = vpop.f32.mrf.mxu1  ;;  %v12607_v9 = vld [vmem:[%s21997_s8 + $0x260] sm:$0xf]  ;;  %v6309_v20 = vadd.f32 %v6308_v57, %v6295_v3  ;;  %v14426_v54 = vld [vmem:[%s21997_s8 + $0x2c] sm:$0xf0] }
 0x346   :  { %7533 = vmatpush.bf16.msra.mxu2 %v12672_v46  ;;  %6599 = vmatmul.bf16.vlgmr.msrb.gmra.mxu3 %v17805_v45  ;;  %v12495_v45 = vld [vmem:[%s21997_s8 + $0x180] sm:$0xf]  ;;  %v5861_v52 = vadd.f32 %v18654_v55, %v5847_v18  ;;  %v6071_v2 = vadd.f32 %v19287_v14, %v6057_v30  ;;  %v6293_v38 = vadd.f32 %v20091_v42, %v6279_v17  ;;  %v22054_v46 = vld [vmem:[#allocation32_spill] sm:$0xff] }
 0x347   :  { %6585 = vmatmul.bf16.vlgmr.msrb.gmra.mxu2 %v17797_v61  ;;  %v14438_v61 = vld [vmem:[%s21997_s8 + $0x8c] sm:$0xf0]  ;;  %v12496_v21 = vor.u32 %v14470_v16, %v12495_v45  ;;  %v12479_v55 = vld [vmem:[%s21997_s8 + $0x160] sm:$0xf]  ;;  %v12608_v8 = vor.u32 %v14498_v6, %v12607_v9  ;;  %v6323_v10 = vadd.f32 %v6322_v32, %v6309_v20  ;;  %v14512_v6 = vld [vmem:[%s21997_s8 + $0x2e4] sm:$0xf] }
 0x348   :  { %v12368_v34 = vor.u32 %v14438_v61, %v12367_v15  ;;  %v6085_v14 = vadd.f32 %v19326_v36, %v6071_v2  ;;  %v6307_v42 = vadd.f32 %v20125_v24, %v6293_v38  ;;  %v5875_v5 = vadd.f32 %v22054_v46, %v5861_v52  ;;  %v12319_v1 = vld [vmem:[%s21997_s8 + $0x20] sm:$0xf]  ;;  %v14458_v17 = vld [vmem:[%s21997_s8 + $0x12c] sm:$0xf0]  ;;  %v12673_v20 = vld [vmem:[%s21997_s8 + $0x2f0] sm:$0xf0] }
 0x349   :  { %7506 = vmatpush.bf16.msra.mxu0 %v12400_v41  ;;  %7520 = vmatpush.bf16.msra.mxu1 %v12528_v27  ;;  %v12352_v36 = vor.u32 %v14434_v7, %v12351_v51  ;;  %v12480_v24 = vor.u32 %v14466_v19, %v12479_v55  ;;  %v14462_v41 = vld [vmem:[%s21997_s8 + $0x14c] sm:$0xf0]  ;;  %v12591_v27 = vld [vmem:[%s21997_s8 + $0x240] sm:$0xf]  ;;  %v6376_v53 = vpop.f32.mrf.mxu3  ;;  %v6336_v25 = vpop.f32.mrf.mxu0  ;;  %v12320_v18 = vor.u32 %v14426_v54, %v12319_v1  ;;  %v12417_v7 = vld [vmem:[%s21997_s8 + $0xf0] sm:$0xf0] }
 0x34a   :  { %7534 = vmatpush.bf16.msra.mxu2 %v12656_v35  ;;  %v5889_v44 = vadd.f32 %v22055_v11, %v5875_v5  ;;  %v6099_v60 = vadd.f32 %v22056_v49, %v6085_v14  ;;  %v6321_v23 = vadd.f32 %v20128_v43, %v6307_v42  ;;  %v6362_v39 = vpop.f32.mrf.mxu2  ;;  %v14494_v35 = vld [vmem:[%s21997_s8 + $0x24c] sm:$0xf0]  ;;  %v12336_v43 = vor.u32 %v14430_v4, %v12335_v33  ;;  %v22057_v47 = vld [vmem:[#allocation34_spill] sm:$0xff]  ;;  %v12545_v14 = vld [vmem:[%s21997_s8 + $0x1f0] sm:$0xf0] }
 0x34b   :  { %v6337_v26 = vadd.f32 %v6336_v25, %v6323_v10  ;;  %v12464_v50 = vor.u32 %v14462_v41, %v12463_v59  ;;  %v12592_v13 = vor.u32 %v14494_v35, %v12591_v27  ;;  %v14490_v56 = vld [vmem:[%s21997_s8 + $0x22c] sm:$0xf0]  ;;  %v12303_v57 = vld [vmem:[%s21997_s8] sm:$0xf]  ;;  %v14480_v55 = vld [vmem:[%s21997_s8 + $0x1e4] sm:$0xf] }
 0x34c   :  { %v6113_v0 = vadd.f32 %v19716_v31, %v6099_v60  ;;  %v6335_v12 = vadd.f32 %v6334_v22, %v6321_v23  ;;  %v12447_v31 = vld [vmem:[%s21997_s8 + $0x120] sm:$0xf]  ;;  %v5903_v30 = vadd.f32 %v22057_v47, %v5889_v44  ;;  %v14422_v32 = vld [vmem:[%s21997_s8 + $0xc] sm:$0xf0]  ;;  %v22060_v42 = vld [vmem:[#allocation37_spill] sm:$0xff]  ;;  %v12548_v59 = vor.u32 %v14480_v55, %v12545_v14 }
 0x34d   :  { %7507 = vmatpush.bf16.msra.mxu0 %v12384_v29  ;;  %7521 = vmatpush.bf16.msra.mxu1 %v12512_v63  ;;  %v12575_v29 = vld [vmem:[%s21997_s8 + $0x220] sm:$0xf]  ;;  %v22058_v63 = vld [vmem:[#allocation36_spill] sm:$0xff]  ;;  %v6350_v45 = vpop.f32.mrf.mxu1  ;;  %v12448_v58 = vor.u32 %v14458_v17, %v12447_v31  ;;  %v12304_v9 = vor.u32 %v14422_v32, %v12303_v57  ;;  %v14444_v11 = vld [vmem:[%s21997_s8 + $0xc4] sm:$0xf]  ;;  %v12676_v44 = vor.u32 %v14512_v6, %v12673_v20 }
 0x34e   :  { %7535 = vmatpush.bf16.msra.mxu2 %v12640_v48  ;;  %v5917_v48 = vadd.f32 %v22058_v63, %v5903_v30  ;;  %v6127_v15 = vadd.f32 %v19742_v37, %v6113_v0  ;;  %v6349_v61 = vadd.f32 %v6348_v62, %v6335_v12  ;;  %v6351_v16 = vadd.f32 %v6350_v45, %v6337_v26  ;;  %v12431_v37 = vld [vmem:[%s21997_s8 + $0x100] sm:$0xf]  ;;  %v14454_v22 = vld [vmem:[%s21997_s8 + $0x10c] sm:$0xf0]  ;;  %v12401_v49 = vld [vmem:[%s21997_s8 + $0xd0] sm:$0xf0] }
 0x34f   :  { %v12576_v28 = vor.u32 %v14490_v56, %v12575_v29  ;;  %v22059_v52 = vld [vmem:[#allocation40_spill] sm:$0xff]  ;;  %v12559_v3 = vld [vmem:[%s21997_s8 + $0x200] sm:$0xf]  ;;  %v12432_v5 = vor.u32 %v14454_v22, %v12431_v37  ;;  %v14476_v60 = vld [vmem:[%s21997_s8 + $0x1c4] sm:$0xf]  ;;  %v12404_v0 = vor.u32 %v14444_v11, %v12401_v49 }
 0x350   :  { %v6141_v2 = vadd.f32 %v22059_v52, %v6127_v15  ;;  %v6363_v38 = vadd.f32 %v6362_v39, %v6349_v61  ;;  %v5931_v62 = vadd.f32 %v22060_v42, %v5917_v48  ;;  %v12529_v23 = vld [vmem:[%s21997_s8 + $0x1d0] sm:$0xf0]  ;;  %v14508_v41 = vld [vmem:[%s21997_s8 + $0x2c4] sm:$0xf]  ;;  %v22062_v35 = vld [vmem:[#allocation35_spill] sm:$0xff] }
 0x351   :  { %7508 = vmatpush.bf16.msra.mxu0 %v12368_v34  ;;  %7522 = vmatpush.bf16.msra.mxu1 %v12496_v21  ;;  %v14486_v21 = vld [vmem:[%s21997_s8 + $0x20c] sm:$0xf0]  ;;  %v6378_v19 = vpop.f32.mrf.mxu3  ;;  %v12657_v27 = vld [vmem:[%s21997_s8 + $0x2d0] sm:$0xf0]  ;;  %v12532_v12 = vor.u32 %v14476_v60, %v12529_v23  ;;  %v14504_v54 = vld [vmem:[%s21997_s8 + $0x2a4] sm:$0xf] }
 0x352   :  { %7536 = vmatpush.bf16.msra.mxu2 %v12624_v40  ;;  %v6364_v34 = vpop.f32.mrf.mxu2  ;;  %v14448_v40 = vld [vmem:[%s21997_s8 + $0xe4] sm:$0xf]  ;;  %v6377_v33 = vadd.f32 %v6376_v53, %v6363_v38  ;;  %v20326_v10 = vpack.c.bf16 %v5931_v62, %v22062_v35  ;;  %v22063_v53 = vld [vmem:[#allocation39_spill] sm:$0xff]  ;;  %v12660_v26 = vor.u32 %v14508_v41, %v12657_v27  ;;  %v12513_v1 = vld [vmem:[%s21997_s8 + $0x1b0] sm:$0xf0] }
 0x353   :  { %v6365_v51 = vadd.f32 %v6364_v34, %v6351_v16  ;;  %v12420_v4 = vor.u32 %v14448_v40, %v12417_v7  ;;  %v12641_v31 = vld [vmem:[%s21997_s8 + $0x2b0] sm:$0xf0]  ;;  %v14436_v17 = vld [vmem:[%s21997_s8 + $0x84] sm:$0xf]  ;;  %v12423_v49 = vld [vmem:[%s21997_s8 + $0xe8] sm:$0xf] }
 0x354   :  { %v12644_v29 = vor.u32 %v14504_v54, %v12641_v31  ;;  %v12369_v56 = vld [vmem:[%s21997_s8 + $0x90] sm:$0xf0]  ;;  %v14468_v63 = vld [vmem:[%s21997_s8 + $0x184] sm:$0xf]  ;;  %v14451_v60 = vld [vmem:[%s21997_s8 + $0xf4] sm:$0xf0] }
 0x355   :  { %7509 = vmatpush.bf16.msra.mxu0 %v12352_v36  ;;  %7523 = vmatpush.bf16.msra.mxu1 %v12480_v24  ;;  %v6379_v46 = vadd.f32 %v6378_v19, %v6365_v51  ;;  %v12560_v36 = vor.u32 %v14486_v21, %v12559_v3  ;;  %v22061_v24 = vld [vmem:[#allocation41_spill] sm:$0xff]  ;;  %v12497_v48 = vld [vmem:[%s21997_s8 + $0x190] sm:$0xf0]  ;;  %v14500_v15 = vld [vmem:[%s21997_s8 + $0x284] sm:$0xf]  ;;  %v12372_v45 = vor.u32 %v14436_v17, %v12369_v56 }
 0x356   :  { %7537 = vmatpush.bf16.msra.mxu2 %v12608_v8  ;;  %v6155_v8 = vadd.f32 %v22061_v24, %v6141_v2  ;;  %v12625_v61 = vld [vmem:[%s21997_s8 + $0x290] sm:$0xf0]  ;;  %v14432_v57 = vld [vmem:[%s21997_s8 + $0x64] sm:$0xf]  ;;  %v12551_v23 = vld [vmem:[%s21997_s8 + $0x1e8] sm:$0xf] }
 0x357   :  { %v20317_v39 = vpack.c.bf16 %v6379_v46, %v6377_v33  ;;  %v12628_v16 = vor.u32 %v14500_v15, %v12625_v61  ;;  %v12481_v32 = vld [vmem:[%s21997_s8 + $0x170] sm:$0xf0]  ;;  %v14496_v37 = vld [vmem:[%s21997_s8 + $0x264] sm:$0xf]  ;;  %v14483_v41 = vld [vmem:[%s21997_s8 + $0x1f4] sm:$0xf0] }
 0x358   :  { %v20329_v25 = vpack.c.bf16 %v6155_v8, %v22063_v53  ;;  %v12609_v22 = vld [vmem:[%s21997_s8 + $0x270] sm:$0xf0]  ;;  %v14428_v38 = vld [vmem:[%s21997_s8 + $0x44] sm:$0xf]  ;;  %v12679_v27 = vld [vmem:[%s21997_s8 + $0x2e8] sm:$0xf] }
 0x359   :  { %7510 = vmatpush.bf16.msra.mxu0 %v12336_v43  ;;  %7524 = vmatpush.bf16.msra.mxu1 %v12464_v50  ;;  %v14440_v43 = vld [vmem:[%s21997_s8 + $0xa4] sm:$0xf]  ;;  %v12385_v50 = vld [vmem:[%s21997_s8 + $0xb0] sm:$0xf0]  ;;  %v12612_v34 = vor.u32 %v14496_v37, %v12609_v22  ;;  %v14515_v35 = vld [vmem:[%s21997_s8 + $0x2f4] sm:$0xf0] }
 0x35a   :  { %7538 = vmatpush.bf16.msra.mxu2 %v12592_v13  ;;  %v14472_v13 = vld [vmem:[%s21997_s8 + $0x1a4] sm:$0xf]  ;;  %v12388_v47 = vor.u32 %v14440_v43, %v12385_v50  ;;  %v12337_v3 = vld [vmem:[%s21997_s8 + $0x50] sm:$0xf0]  ;;  %v12424_v43 = vor.u32 %v14451_v60, %v12423_v49  ;;  %v12680_v50 = vor.u32 %v14515_v35, %v12679_v27  ;;  %v12535_v54 = vld [vmem:[%s21997_s8 + $0x1c8] sm:$0xf] }
 0x35b   :  { %v12516_v30 = vor.u32 %v14472_v13, %v12513_v1  ;;  %v14460_v21 = vld [vmem:[%s21997_s8 + $0x144] sm:$0xf]  ;;  %v12465_v40 = vld [vmem:[%s21997_s8 + $0x150] sm:$0xf0]  ;;  %v12340_v55 = vor.u32 %v14428_v38, %v12337_v3  ;;  %v12407_v13 = vld [vmem:[%s21997_s8 + $0xc8] sm:$0xf] }
 0x35c   :  { %v14492_v51 = vld [vmem:[%s21997_s8 + $0x244] sm:$0xf]  ;;  %v12593_v7 = vld [vmem:[%s21997_s8 + $0x250] sm:$0xf0]  ;;  %v12468_v14 = vor.u32 %v14460_v21, %v12465_v40  ;;  %v14447_v1 = vld [vmem:[%s21997_s8 + $0xd4] sm:$0xf0] }
 0x35d   :  { %7511 = vmatpush.bf16.msra.mxu0 %v12320_v18  ;;  %7525 = vmatpush.bf16.msra.mxu1 %v12448_v58  ;;  %v12500_v18 = vor.u32 %v14468_v63, %v12497_v48  ;;  %v12353_v58 = vld [vmem:[%s21997_s8 + $0x70] sm:$0xf0]  ;;  %v14424_v42 = vld [vmem:[%s21997_s8 + $0x24] sm:$0xf]  ;;  %v12596_v62 = vor.u32 %v14492_v51, %v12593_v7  ;;  %v14479_v31 = vld [vmem:[%s21997_s8 + $0x1d4] sm:$0xf0]  ;;  %v12408_v56 = vor.u32 %v14447_v1, %v12407_v13 }
 0x35e   :  { %7539 = vmatpush.bf16.msra.mxu2 %v12576_v28  ;;  %v14464_v28 = vld [vmem:[%s21997_s8 + $0x164] sm:$0xf]  ;;  %v12356_v52 = vor.u32 %v14432_v57, %v12353_v58  ;;  %v12321_v19 = vld [vmem:[%s21997_s8 + $0x30] sm:$0xf0]  ;;  %v12799_v17 = vld [vmem:[%s21997_s8 + $0x3e0] sm:$0xf]  ;;  %v12536_v48 = vor.u32 %v14479_v31, %v12535_v54 }
 0x35f   :  { %v12484_v2 = vor.u32 %v14464_v28, %v12481_v32  ;;  %v12449_v6 = vld [vmem:[%s21997_s8 + $0x130] sm:$0xf0]  ;;  %v14488_v20 = vld [vmem:[%s21997_s8 + $0x224] sm:$0xf]  ;;  %v12391_v61 = vld [vmem:[%s21997_s8 + $0xa8] sm:$0xf] }
 0x360   :  { %v12577_v46 = vld [vmem:[%s21997_s8 + $0x230] sm:$0xf0]  ;;  %v14420_v24 = vld [vmem:[%s21997_s8 + $0x4] sm:$0xf]  ;;  %v14475_v57 = vld [vmem:[%s21997_s8 + $0x1b4] sm:$0xf0] }
 0x361   :  { %7512 = vmatpush.bf16.msra.mxu0 %v12304_v9  ;;  %7526 = vmatpush.bf16.msra.mxu1 %v12432_v5  ;;  %v14456_v9 = vld [vmem:[%s21997_s8 + $0x124] sm:$0xf]  ;;  %v12324_v5 = vor.u32 %v14424_v42, %v12321_v19  ;;  %v12305_v8 = vld [vmem:[%s21997_s8 + $0x10] sm:$0xf0]  ;;  %v14507_v58 = vld [vmem:[%s21997_s8 + $0x2b4] sm:$0xf0] }
 0x362   :  { %7540 = vmatpush.bf16.msra.mxu2 %v12560_v36  ;;  %v12452_v36 = vor.u32 %v14456_v9, %v12449_v6  ;;  %v14452_v33 = vld [vmem:[%s21997_s8 + $0x104] sm:$0xf]  ;;  %v12308_v53 = vor.u32 %v14420_v24, %v12305_v8  ;;  %v12783_v28 = vld [vmem:[%s21997_s8 + $0x3c0] sm:$0xf]  ;;  %v14542_v32 = vld [vmem:[%s21997_s8 + $0x3cc] sm:$0xf0] }
 0x363   :  { %v14484_v11 = vld [vmem:[%s21997_s8 + $0x204] sm:$0xf]  ;;  %v12784_v22 = vor.u32 %v14542_v32, %v12783_v28  ;;  %v12375_v38 = vld [vmem:[%s21997_s8 + $0x88] sm:$0xf]  ;;  %v14471_v21 = vld [vmem:[%s21997_s8 + $0x194] sm:$0xf0] }
 0x364   :  { %7513 = vmatmul.bf16.vlgmr.msra.gmra.mxu0 %v20326_v10  ;;  %7527 = vmatmul.bf16.vlgmr.msra.gmra.mxu1 %v20329_v25  ;;  %v12503_v3 = vld [vmem:[%s21997_s8 + $0x188] sm:$0xf]  ;;  %v14503_v51 = vld [vmem:[%s21997_s8 + $0x294] sm:$0xf0]  ;;  %v12767_v7 = vld [vmem:[%s21997_s8 + $0x3a0] sm:$0xf] }
 0x365   :  { %7561 = vmatpush.bf16.msrb.mxu0 %v12420_v4  ;;  %7575 = vmatpush.bf16.msrb.mxu1 %v12548_v59  ;;  %v12580_v4 = vor.u32 %v14488_v20, %v12577_v46  ;;  %v12433_v59 = vld [vmem:[%s21997_s8 + $0x110] sm:$0xf0]  ;;  %v12631_v40 = vld [vmem:[%s21997_s8 + $0x288] sm:$0xf]  ;;  %v14435_v6 = vld [vmem:[%s21997_s8 + $0x74] sm:$0xf0] }
 0x366   :  { %7589 = vmatpush.bf16.msrb.mxu2 %v12676_v44  ;;  %v12561_v44 = vld [vmem:[%s21997_s8 + $0x210] sm:$0xf0]  ;;  %v12632_v19 = vor.u32 %v14503_v51, %v12631_v40  ;;  %v12359_v9 = vld [vmem:[%s21997_s8 + $0x68] sm:$0xf]  ;;  %v14467_v46 = vld [vmem:[%s21997_s8 + $0x174] sm:$0xf0] }
 0x367   :  { %7541 = vmatmul.bf16.vlgmr.msra.gmra.mxu2 %v20317_v39  ;;  %v12487_v20 = vld [vmem:[%s21997_s8 + $0x168] sm:$0xf]  ;;  %v12751_v24 = vld [vmem:[%s21997_s8 + $0x380] sm:$0xf]  ;;  %v14534_v8 = vld [vmem:[%s21997_s8 + $0x38c] sm:$0xf0] }
 0x368   :  { %v14431_v49 = vld [vmem:[%s21997_s8 + $0x54] sm:$0xf0]  ;;  %v12471_v60 = vld [vmem:[%s21997_s8 + $0x148] sm:$0xf]  ;;  %v14513_v51 = vld [vmem:[%s21997_s8 + $0x2ec] sm:$0xf] }
 0x369   :  { %7562 = vmatpush.bf16.msrb.mxu0 %v12404_v0  ;;  %7576 = vmatpush.bf16.msrb.mxu1 %v12532_v12  ;;  %v12436_v0 = vor.u32 %v14452_v33, %v12433_v59  ;;  %v12564_v12 = vor.u32 %v14484_v11, %v12561_v44  ;;  %v12360_v33 = vor.u32 %v14435_v6, %v12359_v9  ;;  %v12343_v44 = vld [vmem:[%s21997_s8 + $0x48] sm:$0xf]  ;;  %v14495_v35 = vld [vmem:[%s21997_s8 + $0x254] sm:$0xf0]  ;;  %v14445_v9 = vld [vmem:[%s21997_s8 + $0xcc] sm:$0xf] }
 0x36a   :  { %7590 = vmatpush.bf16.msrb.mxu2 %v12660_v26  ;;  %v12552_v26 = vor.u32 %v14483_v41, %v12551_v23  ;;  %v12488_v59 = vor.u32 %v14467_v46, %v12487_v20  ;;  %v20568_v23 = vpop.f32.mrf.mxu0  ;;  %v14463_v41 = vld [vmem:[%s21997_s8 + $0x154] sm:$0xf0]  ;;  %v12599_v27 = vld [vmem:[%s21997_s8 + $0x248] sm:$0xf]  ;;  %v12409_v6 = vld [vmem:[%s21997_s8 + $0xd8] sm:$0xf0] }
 0x36b   :  { %v12600_v13 = vor.u32 %v14495_v35, %v12599_v27  ;;  %v12327_v1 = vld [vmem:[%s21997_s8 + $0x28] sm:$0xf]  ;;  %v14427_v54 = vld [vmem:[%s21997_s8 + $0x34] sm:$0xf0]  ;;  %v12393_v27 = vld [vmem:[%s21997_s8 + $0xb8] sm:$0xf0] }
 0x36c   :  { %v12455_v31 = vld [vmem:[%s21997_s8 + $0x128] sm:$0xf]  ;;  %v14455_v28 = vld [vmem:[%s21997_s8 + $0x114] sm:$0xf0] }
 0x36d   :  { %7563 = vmatpush.bf16.msrb.mxu0 %v12388_v47  ;;  %7577 = vmatpush.bf16.msrb.mxu1 %v12516_v30  ;;  %v12663_v47 = vld [vmem:[%s21997_s8 + $0x2c8] sm:$0xf]  ;;  %v14511_v30 = vld [vmem:[%s21997_s8 + $0x2d4] sm:$0xf0] }
 0x36e   :  { %7591 = vmatpush.bf16.msrb.mxu2 %v12644_v29  ;;  %v14546_v29 = vld [vmem:[%s21997_s8 + $0x3ec] sm:$0xf0]  ;;  %v12664_v15 = vor.u32 %v14511_v30, %v12663_v47  ;;  %v14459_v47 = vld [vmem:[%s21997_s8 + $0x134] sm:$0xf0]  ;;  %v12583_v30 = vld [vmem:[%s21997_s8 + $0x228] sm:$0xf] }
 0x36f   :  { %v12800_v63 = vor.u32 %v14546_v29, %v12799_v17  ;;  %v14491_v17 = vld [vmem:[%s21997_s8 + $0x234] sm:$0xf0]  ;;  %v12719_v29 = vld [vmem:[%s21997_s8 + $0x340] sm:$0xf]  ;;  %v12567_v32 = vld [vmem:[%s21997_s8 + $0x208] sm:$0xf] }
 0x371   :  { %7564 = vmatpush.bf16.msrb.mxu0 %v12372_v45  ;;  %7578 = vmatpush.bf16.msrb.mxu1 %v12500_v18  ;;  %v14443_v45 = vld [vmem:[%s21997_s8 + $0xb4] sm:$0xf0]  ;;  %v12519_v18 = vld [vmem:[%s21997_s8 + $0x1a8] sm:$0xf] }
 0x372   :  { %7592 = vmatpush.bf16.msrb.mxu2 %v12628_v16  ;;  %v12647_v16 = vld [vmem:[%s21997_s8 + $0x2a8] sm:$0xf]  ;;  %7547 = vmatpush.bf16.msra.mxu3 %v12800_v63  ;;  %v12392_v37 = vor.u32 %v14443_v45, %v12391_v61  ;;  %v12328_v63 = vor.u32 %v14427_v54, %v12327_v1  ;;  %v12649_v54 = vld [vmem:[%s21997_s8 + $0x2b8] sm:$0xf0] }
 0x373   :  { %v12439_v61 = vld [vmem:[%s21997_s8 + $0x108] sm:$0xf] }
 0x375   :  { %7565 = vmatpush.bf16.msrb.mxu0 %v12356_v52  ;;  %7579 = vmatpush.bf16.msrb.mxu1 %v12484_v2  ;;  %v12520_v52 = vor.u32 %v14475_v57, %v12519_v18  ;;  %v12648_v2 = vor.u32 %v14507_v58, %v12647_v16  ;;  %v20620_v18 = vpop.f32.mrf.mxu2  ;;  %v20622_v57 = vpop.f32.mrf.mxu3  ;;  %v12456_v16 = vor.u32 %v14459_v47, %v12455_v31  ;;  %v14540_v31 = vld [vmem:[%s21997_s8 + $0x3c4] sm:$0xf]  ;;  %v12785_v47 = vld [vmem:[%s21997_s8 + $0x3d0] sm:$0xf0] }
 0x376   :  { %7593 = vmatpush.bf16.msrb.mxu2 %v12612_v34  ;;  %v14439_v34 = vld [vmem:[%s21997_s8 + $0x94] sm:$0xf0]  ;;  %7548 = vmatpush.bf16.msra.mxu3 %v12784_v22  ;;  %v12584_v58 = vor.u32 %v14491_v17, %v12583_v30  ;;  %v14449_v22 = vld [vmem:[%s21997_s8 + $0xec] sm:$0xf] }
 0x379   :  { %7566 = vmatpush.bf16.msrb.mxu0 %v12340_v55  ;;  %7580 = vmatpush.bf16.msrb.mxu1 %v12468_v14  ;;  %v14538_v55 = vld [vmem:[%s21997_s8 + $0x3ac] sm:$0xf0]  ;;  %v12376_v14 = vor.u32 %v14439_v34, %v12375_v38  ;;  %v12553_v38 = vld [vmem:[%s21997_s8 + $0x1f8] sm:$0xf0]  ;;  %v12703_v34 = vld [vmem:[%s21997_s8 + $0x320] sm:$0xf] }
 0x37a   :  { %7594 = vmatpush.bf16.msrb.mxu2 %v12596_v62  ;;  %v12768_v42 = vor.u32 %v14538_v55, %v12767_v7  ;;  %v12504_v62 = vor.u32 %v14471_v21, %v12503_v3  ;;  %v14522_v3 = vld [vmem:[%s21997_s8 + $0x32c] sm:$0xf0]  ;;  %v20651_v21 = vpop.f32.mrf.mxu0  ;;  %v12681_v7 = vld [vmem:[%s21997_s8 + $0x2f8] sm:$0xf0] }
 0x37b   :  { %v12704_v55 = vor.u32 %v14522_v3, %v12703_v34  ;;  %v12684_v46 = vor.u32 %v14513_v51, %v12681_v7  ;;  %v12361_v34 = vld [vmem:[%s21997_s8 + $0x78] sm:$0xf0]  ;;  %v14465_v7 = vld [vmem:[%s21997_s8 + $0x16c] sm:$0xf] }
 0x37c   :  { %7549 = vmatpush.bf16.msra.mxu3 %v12768_v42 }
 0x37d   :  { %7567 = vmatpush.bf16.msrb.mxu0 %v12324_v5  ;;  %7581 = vmatpush.bf16.msrb.mxu1 %v12452_v36  ;;  %v12615_v5 = vld [vmem:[%s21997_s8 + $0x268] sm:$0xf]  ;;  %v14499_v36 = vld [vmem:[%s21997_s8 + $0x274] sm:$0xf0]  ;;  %v20697_v35 = vpop.f32.mrf.mxu2 }
 0x37e   :  { %7595 = vmatpush.bf16.msrb.mxu2 %v12580_v4  ;;  %v12752_v4 = vor.u32 %v14534_v8, %v12751_v24  ;;  %v12616_v11 = vor.u32 %v14499_v36, %v12615_v5  ;;  %v14477_v5 = vld [vmem:[%s21997_s8 + $0x1cc] sm:$0xf]  ;;  %v12537_v36 = vld [vmem:[%s21997_s8 + $0x1d8] sm:$0xf0] }
 0x37f   :  { %v14509_v24 = vld [vmem:[%s21997_s8 + $0x2cc] sm:$0xf]  ;;  %v12665_v8 = vld [vmem:[%s21997_s8 + $0x2d8] sm:$0xf0] }
 0x380   :  { %7550 = vmatpush.bf16.msra.mxu3 %v12752_v4  ;;  %v14518_v4 = vld [vmem:[%s21997_s8 + $0x30c] sm:$0xf0] }
 0x381   :  { %7568 = vmatpush.bf16.msrb.mxu0 %v12308_v53  ;;  %7582 = vmatpush.bf16.msrb.mxu1 %v12436_v0  ;;  %v12735_v53 = vld [vmem:[%s21997_s8 + $0x360] sm:$0xf]  ;;  %v14530_v0 = vld [vmem:[%s21997_s8 + $0x36c] sm:$0xf0] }
 0x382   :  { %7596 = vmatpush.bf16.msrb.mxu2 %v12564_v12  ;;  %v12344_v12 = vor.u32 %v14431_v49, %v12343_v44  ;;  %v12801_v44 = vld [vmem:[%s21997_s8 + $0x3f0] sm:$0xf0]  ;;  %v12412_v49 = vor.u32 %v14445_v9, %v12409_v6  ;;  %v20711_v1 = vpop.f32.mrf.mxu0  ;;  %v14532_v9 = vld [vmem:[%s21997_s8 + $0x384] sm:$0xf] }
 0x383   :  { %v12753_v6 = vld [vmem:[%s21997_s8 + $0x390] sm:$0xf0] }
 0x384   :  { %7569 = vmatmul.bf16.vlgmr.msrb.gmra.mxu0 %v20326_v10  ;;  %7583 = vmatmul.bf16.vlgmr.msrb.gmra.mxu1 %v20329_v25 }
 0x385   :  { %7617 = vmatpush.bf16.msra.mxu0 %v12424_v43  ;;  %7631 = vmatpush.bf16.msra.mxu1 %v12552_v26  ;;  %v12736_v43 = vor.u32 %v14530_v0, %v12735_v53  ;;  %v20585_v26 = vpop.f32.mrf.mxu1  ;;  %v20699_v53 = vpop.f32.mrf.mxu3  ;;  %v12668_v0 = vor.u32 %v14509_v24, %v12665_v8 }
 0x386   :  { %7645 = vmatpush.bf16.msra.mxu2 %v12680_v50  ;;  %v12472_v50 = vor.u32 %v14463_v41, %v12471_v60  ;;  %v12540_v60 = vor.u32 %v14477_v5, %v12537_v36  ;;  %v14441_v41 = vld [vmem:[%s21997_s8 + $0xac] sm:$0xf] }
 0x387   :  { %7597 = vmatmul.bf16.vlgmr.msrb.gmra.mxu2 %v20317_v39  ;;  %7551 = vmatpush.bf16.msra.mxu3 %v12736_v43  ;;  %v12521_v43 = vld [vmem:[%s21997_s8 + $0x1b8] sm:$0xf0]  ;;  %v12396_v30 = vor.u32 %v14441_v41, %v12393_v27  ;;  %v14528_v27 = vld [vmem:[%s21997_s8 + $0x364] sm:$0xf] }
 0x389   :  { %7618 = vmatpush.bf16.msra.mxu0 %v12408_v56  ;;  %7632 = vmatpush.bf16.msra.mxu1 %v12536_v48  ;;  %v14526_v56 = vld [vmem:[%s21997_s8 + $0x34c] sm:$0xf0]  ;;  %v12311_v48 = vld [vmem:[%s21997_s8 + $0x8] sm:$0xf] }
 0x38a   :  { %7646 = vmatpush.bf16.msra.mxu2 %v12664_v15  ;;  %v14423_v15 = vld [vmem:[%s21997_s8 + $0x14] sm:$0xf0]  ;;  %v12720_v45 = vor.u32 %v14526_v56, %v12719_v29  ;;  %v14437_v29 = vld [vmem:[%s21997_s8 + $0x8c] sm:$0xf]  ;;  %v20759_v3 = vpop.f32.mrf.mxu2  ;;  %v6448_v5 = vpop.f32.mrf.mxu0 }
 0x38b   :  { %v12312_v40 = vor.u32 %v14423_v15, %v12311_v48  ;;  %v12377_v48 = vld [vmem:[%s21997_s8 + $0x98] sm:$0xf0]  ;;  %v14469_v15 = vld [vmem:[%s21997_s8 + $0x18c] sm:$0xf] }
 0x38c   :  { %7552 = vmatpush.bf16.msra.mxu3 %v12720_v45  ;;  %v12788_v45 = vor.u32 %v14540_v31, %v12785_v47  ;;  %v12457_v31 = vld [vmem:[%s21997_s8 + $0x138] sm:$0xf0]  ;;  %v14489_v47 = vld [vmem:[%s21997_s8 + $0x22c] sm:$0xf] }
 0x38d   :  { %7619 = vmatpush.bf16.msra.mxu0 %v12392_v37  ;;  %7633 = vmatpush.bf16.msra.mxu1 %v12520_v52  ;;  %v14487_v37 = vld [vmem:[%s21997_s8 + $0x214] sm:$0xf0]  ;;  %v12425_v52 = vld [vmem:[%s21997_s8 + $0xf8] sm:$0xf0]  ;;  %v20665_v20 = vpop.f32.mrf.mxu1 }
 0x38e   :  { %7647 = vmatpush.bf16.msra.mxu2 %v12648_v2  ;;  %v14481_v2 = vld [vmem:[%s21997_s8 + $0x1ec] sm:$0xf]  ;;  %v12568_v42 = vor.u32 %v14487_v37, %v12567_v32  ;;  %v12633_v32 = vld [vmem:[%s21997_s8 + $0x298] sm:$0xf0]  ;;  %v14536_v37 = vld [vmem:[%s21997_s8 + $0x3a4] sm:$0xf] }
 0x390   :  { %7553 = vmatpush.bf16.msra.mxu3 %v12704_v55  ;;  %v12489_v55 = vld [vmem:[%s21997_s8 + $0x178] sm:$0xf0] }
 0x391   :  { %7620 = vmatpush.bf16.msra.mxu0 %v12376_v14  ;;  %7634 = vmatpush.bf16.msra.mxu1 %v12504_v62  ;;  %v12440_v14 = vor.u32 %v14455_v28, %v12439_v61  ;;  %v12428_v62 = vor.u32 %v14449_v22, %v12425_v52  ;;  %v12505_v61 = vld [vmem:[%s21997_s8 + $0x198] sm:$0xf0]  ;;  %v14501_v28 = vld [vmem:[%s21997_s8 + $0x28c] sm:$0xf]  ;;  %v12769_v22 = vld [vmem:[%s21997_s8 + $0x3b0] sm:$0xf0]  ;;  %v12380_v52 = vor.u32 %v14437_v29, %v12377_v48 }
 0x392   :  { %7648 = vmatpush.bf16.msra.mxu2 %v12632_v19  ;;  %v12556_v19 = vor.u32 %v14481_v2, %v12553_v38  ;;  %v12508_v2 = vor.u32 %v14469_v15, %v12505_v61  ;;  %v14433_v38 = vld [vmem:[%s21997_s8 + $0x6c] sm:$0xf]  ;;  %v12636_v51 = vor.u32 %v14501_v28, %v12633_v32  ;;  %v12492_v24 = vor.u32 %v14465_v7, %v12489_v55  ;;  %v12721_v29 = vld [vmem:[%s21997_s8 + $0x350] sm:$0xf0]  ;;  %v12313_v28 = vld [vmem:[%s21997_s8 + $0x18] sm:$0xf0] }
 0x393   :  { %v12364_v36 = vor.u32 %v14433_v38, %v12361_v34  ;;  %v14453_v32 = vld [vmem:[%s21997_s8 + $0x10c] sm:$0xf]  ;;  %v13055_v7 = vld [vmem:[%s21998_s7 + $0x1e0] sm:$0xf] }
 0x395   :  { %7621 = vmatpush.bf16.msra.mxu0 %v12360_v33  ;;  %7635 = vmatpush.bf16.msra.mxu1 %v12488_v59  ;;  %v12687_v33 = vld [vmem:[%s21997_s8 + $0x300] sm:$0xf]  ;;  %v20727_v56 = vpop.f32.mrf.mxu1 }
 0x396   :  { %7649 = vmatpush.bf16.msra.mxu2 %v12616_v11  ;;  %v12688_v59 = vor.u32 %v14518_v4, %v12687_v33  ;;  %v14544_v11 = vld [vmem:[%s21997_s8 + $0x3e4] sm:$0xf]  ;;  %v12345_v33 = vld [vmem:[%s21997_s8 + $0x58] sm:$0xf0]  ;;  %v14461_v4 = vld [vmem:[%s21997_s8 + $0x14c] sm:$0xf] }
 0x398   :  { %7554 = vmatpush.bf16.msra.mxu3 %v12688_v59  ;;  %v12756_v59 = vor.u32 %v14532_v9, %v12753_v6 }
 0x399   :  { %7622 = vmatpush.bf16.msra.mxu0 %v12344_v12  ;;  %7636 = vmatpush.bf16.msra.mxu1 %v12472_v50  ;;  %v14473_v12 = vld [vmem:[%s21997_s8 + $0x1ac] sm:$0xf] }
 0x39a   :  { %7650 = vmatpush.bf16.msra.mxu2 %v12600_v13  ;;  %v14505_v50 = vld [vmem:[%s21997_s8 + $0x2ac] sm:$0xf]  ;;  %v12804_v13 = vor.u32 %v14544_v11, %v12801_v44  ;;  %v12524_v17 = vor.u32 %v14473_v12, %v12521_v43 }
 0x39b   :  { %v14493_v44 = vld [vmem:[%s21997_s8 + $0x24c] sm:$0xf] }
 0x39c   :  { %7603 = vmatpush.bf16.msrb.mxu3 %v12804_v13 }
 0x39d   :  { %7623 = vmatpush.bf16.msra.mxu0 %v12328_v63  ;;  %7637 = vmatpush.bf16.msra.mxu1 %v12456_v16  ;;  %v12652_v63 = vor.u32 %v14505_v50, %v12649_v54  ;;  %v14584_v16 = vld [vmem:[%s21996_s6] sm:$0xf]  ;;  %v20803_v41 = vpop.f32.mrf.mxu1  ;;  %v12329_v50 = vld [vmem:[%s21997_s8 + $0x38] sm:$0xf0] }
 0x39e   :  { %7651 = vmatpush.bf16.msra.mxu2 %v12584_v58  ;;  %v3144_v58 = vperm.slane %v14584_v16, 3 }
 0x3a0   :  { %7604 = vmatpush.bf16.msrb.mxu3 %v12788_v45 }
 0x3a1   :  { %7624 = vmatpush.bf16.msra.mxu0 %v12312_v40  ;;  %7638 = vmatpush.bf16.msra.mxu1 %v12440_v14  ;;  %v20761_v40 = vpop.f32.mrf.mxu3  ;;  %v14497_v14 = vld [vmem:[%s21997_s8 + $0x26c] sm:$0xf]  ;;  %v20840_v61 = vpop.f32.mrf.mxu0 }
 0x3a2   :  { %7652 = vmatpush.bf16.msra.mxu2 %v12568_v42  ;;  %v12772_v42 = vor.u32 %v14536_v37, %v12769_v22  ;;  %v12441_v22 = vld [vmem:[%s21997_s8 + $0x118] sm:$0xf0] }
 0x3a3   :  { %v12444_v9 = vor.u32 %v14453_v32, %v12441_v22 }
 0x3a4   :  { %7625 = vmatmul.bf16.vlgmr.msra.gmra.mxu0 %v20326_v10  ;;  %7639 = vmatmul.bf16.vlgmr.msra.gmra.mxu1 %v20329_v25 }
 0x3a5   :  { %7673 = vmatpush.bf16.msrb.mxu0 %v12428_v62  ;;  %7687 = vmatpush.bf16.msrb.mxu1 %v12556_v19  ;;  %v6391_v62 = vadd.f32 %v20568_v23, %v3144_v58  ;;  %v12617_v19 = vld [vmem:[%s21997_s8 + $0x278] sm:$0xf0]  ;;  %v14429_v23 = vld [vmem:[%s21997_s8 + $0x4c] sm:$0xf] }
 0x3a6   :  { %7701 = vmatpush.bf16.msrb.mxu2 %v12684_v46  ;;  %v6393_v46 = vadd.f32 %v20651_v21, %v3144_v58  ;;  %v12620_v8 = vor.u32 %v14497_v14, %v12617_v19  ;;  %v12473_v21 = vld [vmem:[%s21997_s8 + $0x158] sm:$0xf0]  ;;  %7605 = vmatpush.bf16.msrb.mxu3 %v12772_v42  ;;  %v12348_v12 = vor.u32 %v14429_v23, %v12345_v33  ;;  %v14421_v58 = vld [vmem:[%s21997_s8 + $0xc] sm:$0xf]  ;;  %v20871_v14 = vpop.f32.mrf.mxu1  ;;  %v14354_v42 = vld [vmem:[%s21998_s7 + $0x1ec] sm:$0xf0] }
 0x3a7   :  { %7653 = vmatmul.bf16.vlgmr.msra.gmra.mxu2 %v20317_v39  ;;  %v6405_v11 = vadd.f32 %v20585_v26, %v6391_v62  ;;  %v12737_v26 = vld [vmem:[%s21997_s8 + $0x370] sm:$0xf0]  ;;  %v12476_v43 = vor.u32 %v14461_v4, %v12473_v21  ;;  %v14386_v62 = vld [vmem:[%s21998_s7 + $0x2ec] sm:$0xf0]  ;;  %v12316_v19 = vor.u32 %v14421_v58, %v12313_v28  ;;  %v13056_v23 = vor.u32 %v14354_v42, %v13055_v7  ;;  %v12911_v33 = vld [vmem:[%s21998_s7 + $0xc0] sm:$0xf] }
 0x3a8   :  { %v14318_v4 = vld [vmem:[%s21998_s7 + $0xcc] sm:$0xf0]  ;;  %v13039_v21 = vld [vmem:[%s21998_s7 + $0x1c0] sm:$0xf] }
 0x3a9   :  { %7674 = vmatpush.bf16.msrb.mxu0 %v12412_v49  ;;  %7688 = vmatpush.bf16.msrb.mxu1 %v12540_v60  ;;  %v12601_v49 = vld [vmem:[%s21997_s8 + $0x258] sm:$0xf0]  ;;  %v6407_v60 = vadd.f32 %v20665_v20, %v6393_v46  ;;  %v14425_v20 = vld [vmem:[%s21997_s8 + $0x2c] sm:$0xf]  ;;  %v20837_v48 = vpop.f32.mrf.mxu3  ;;  %v22071_v7 = vld [vmem:[#allocation4_spill] sm:$0xff] }
 0x3aa   :  { %7702 = vmatpush.bf16.msrb.mxu2 %v12668_v0  ;;  %v6419_v0 = vadd.f32 %v20620_v18, %v6405_v11  ;;  %v12604_v54 = vor.u32 %v14493_v44, %v12601_v49  ;;  %v14457_v18 = vld [vmem:[%s21997_s8 + $0x12c] sm:$0xf]  ;;  %7606 = vmatpush.bf16.msrb.mxu3 %v12756_v59  ;;  %v12332_v45 = vor.u32 %v14425_v20, %v12329_v50  ;;  %v13167_v49 = vld [vmem:[%s21998_s7 + $0x2c0] sm:$0xf]  ;;  %v6504_v20 = vpop.f32.mrf.mxu0 }
 0x3ab   :  { %v6421_v13 = vadd.f32 %v20697_v35, %v6407_v60  ;;  %v12585_v35 = vld [vmem:[%s21997_s8 + $0x238] sm:$0xf0]  ;;  %v12460_v16 = vor.u32 %v14457_v18, %v12457_v31  ;;  %v14382_v60 = vld [vmem:[%s21998_s7 + $0x2cc] sm:$0xf0]  ;;  %v13023_v18 = vld [vmem:[%s21998_s7 + $0x1a0] sm:$0xf] }
 0x3ac   :  { %v6433_v15 = vadd.f32 %v20622_v57, %v6419_v0  ;;  %v12588_v37 = vor.u32 %v14489_v47, %v12585_v35  ;;  %v12912_v0 = vor.u32 %v14318_v4, %v12911_v33  ;;  %v14346_v31 = vld [vmem:[%s21998_s7 + $0x1ac] sm:$0xf0]  ;;  %v13151_v47 = vld [vmem:[%s21998_s7 + $0x2a0] sm:$0xf] }
 0x3ad   :  { %7675 = vmatpush.bf16.msrb.mxu0 %v12396_v30  ;;  %7689 = vmatpush.bf16.msrb.mxu1 %v12524_v17  ;;  %v12740_v30 = vor.u32 %v14528_v27, %v12737_v26  ;;  %v14524_v17 = vld [vmem:[%s21997_s8 + $0x344] sm:$0xf]  ;;  %v6435_v57 = vadd.f32 %v20699_v53, %v6421_v13  ;;  %v12927_v53 = vld [vmem:[%s21998_s7 + $0xe0] sm:$0xf]  ;;  %v13024_v28 = vor.u32 %v14346_v31, %v13023_v18  ;;  %v14338_v4 = vld [vmem:[%s21998_s7 + $0x16c] sm:$0xf0] }
 0x3ae   :  { %7703 = vmatpush.bf16.msrb.mxu2 %v12652_v63  ;;  %v6476_v63 = vpop.f32.mrf.mxu2  ;;  %v12724_v38 = vor.u32 %v14524_v17, %v12721_v29  ;;  %v6447_v34 = vadd.f32 %v20711_v1, %v6433_v15  ;;  %v13183_v1 = vld [vmem:[%s21998_s7 + $0x2e0] sm:$0xf]  ;;  %v22066_v29 = vld [vmem:[#allocation3_spill] sm:$0xff] }
 0x3af   :  { %7607 = vmatpush.bf16.msrb.mxu3 %v12740_v30  ;;  %v6449_v55 = vadd.f32 %v6448_v5, %v6435_v57  ;;  %v14520_v5 = vld [vmem:[%s21997_s8 + $0x324] sm:$0xf]  ;;  %v12895_v13 = vld [vmem:[%s21998_s7 + $0xa0] sm:$0xf]  ;;  %v14378_v30 = vld [vmem:[%s21998_s7 + $0x2ac] sm:$0xf0] }
 0x3b0   :  { %v22064_v17 = vld [vmem:[#allocation2_spill] sm:$0xff]  ;;  %v13152_v32 = vor.u32 %v14378_v30, %v13151_v47  ;;  %v22076_v18 = vld [vmem:[#allocation19_spill] sm:$0xff]  ;;  %v14366_v30 = vld [vmem:[%s21998_s7 + $0x24c] sm:$0xf0] }
 0x3b1   :  { %7676 = vmatpush.bf16.msrb.mxu0 %v12380_v52  ;;  %7690 = vmatpush.bf16.msrb.mxu1 %v12508_v2  ;;  %v14485_v52 = vld [vmem:[%s21997_s8 + $0x20c] sm:$0xf]  ;;  %v12569_v2 = vld [vmem:[%s21997_s8 + $0x218] sm:$0xf0]  ;;  %v6463_v59 = vadd.f32 %v20803_v41, %v6449_v55  ;;  %v20901_v44 = vpop.f32.mrf.mxu3  ;;  %v22067_v57 = vperm.slane %v22064_v17, 1  ;;  %v22069_v22 = vperm.slane %v22064_v17, 2 }
 0x3b2   :  { %7704 = vmatpush.bf16.msrb.mxu2 %v12636_v51  ;;  %v14322_v51 = vld [vmem:[%s21998_s7 + $0xec] sm:$0xf0]  ;;  %v12572_v6 = vor.u32 %v14485_v52, %v12569_v2  ;;  %v22070_v52 = vld [vmem:[#allocation17_spill] sm:$0xff]  ;;  %v13103_v47 = vld [vmem:[%s21998_s7 + $0x240] sm:$0xf] }
 0x3b3   :  { %v12928_v46 = vor.u32 %v14322_v51, %v12927_v53  ;;  %7608 = vmatpush.bf16.msrb.mxu3 %v12724_v38  ;;  %v6477_v26 = vadd.f32 %v6476_v63, %v6463_v59  ;;  %v1419_v2 = vadd.f32 %v22070_v52, %v22069_v22  ;;  %v14342_v38 = vld [vmem:[%s21998_s7 + $0x18c] sm:$0xf0]  ;;  %v13087_v22 = vld [vmem:[%s21998_s7 + $0x220] sm:$0xf] }
 0x3b4   :  { %v14374_v53 = vld [vmem:[%s21998_s7 + $0x28c] sm:$0xf0] }
 0x3b5   :  { %7677 = vmatpush.bf16.msrb.mxu0 %v12364_v36  ;;  %7691 = vmatpush.bf16.msrb.mxu1 %v12492_v24  ;;  %v12705_v36 = vld [vmem:[%s21997_s8 + $0x330] sm:$0xf0]  ;;  %v6461_v24 = vadd.f32 %v20727_v56, %v6447_v34  ;;  %v14350_v56 = vld [vmem:[%s21998_s7 + $0x1cc] sm:$0xf0]  ;;  %v6491_v15 = vadd.f32 %v20837_v48, %v6477_v26  ;;  %v13007_v48 = vld [vmem:[%s21998_s7 + $0x180] sm:$0xf] }
 0x3b6   :  { %7705 = vmatpush.bf16.msrb.mxu2 %v12620_v8  ;;  %v13184_v8 = vor.u32 %v14386_v62, %v13183_v1  ;;  %v20899_v11 = vpop.f32.mrf.mxu2  ;;  %v12708_v41 = vor.u32 %v14520_v5, %v12705_v36  ;;  %v13040_v50 = vor.u32 %v14350_v56, %v13039_v21  ;;  %v13135_v34 = vld [vmem:[%s21998_s7 + $0x280] sm:$0xf]  ;;  %v14306_v36 = vld [vmem:[%s21998_s7 + $0x6c] sm:$0xf0] }
 0x3b7   :  { %v6475_v27 = vadd.f32 %v20759_v3, %v6461_v24  ;;  %v13168_v3 = vor.u32 %v14382_v60, %v13167_v49  ;;  %v6505_v51 = vadd.f32 %v6504_v20, %v6491_v15  ;;  %v12863_v5 = vld [vmem:[%s21998_s7 + $0x60] sm:$0xf]  ;;  %v14370_v59 = vld [vmem:[%s21998_s7 + $0x26c] sm:$0xf0]  ;;  %v22074_v60 = vld [vmem:[#allocation5_spill] sm:$0xff] }
 0x3b8   :  { %7609 = vmatpush.bf16.msrb.mxu3 %v12708_v41  ;;  %v12991_v24 = vld [vmem:[%s21998_s7 + $0x160] sm:$0xf]  ;;  %v12864_v26 = vor.u32 %v14306_v36, %v12863_v5  ;;  %v14362_v52 = vld [vmem:[%s21998_s7 + $0x22c] sm:$0xf0] }
 0x3b9   :  { %7678 = vmatpush.bf16.msrb.mxu0 %v12348_v12  ;;  %7692 = vmatpush.bf16.msrb.mxu1 %v12476_v43  ;;  %v14516_v12 = vld [vmem:[%s21997_s8 + $0x304] sm:$0xf]  ;;  %v12689_v43 = vld [vmem:[%s21997_s8 + $0x310] sm:$0xf0]  ;;  %v6489_v35 = vadd.f32 %v20761_v40, %v6475_v27  ;;  %v14310_v40 = vld [vmem:[%s21998_s7 + $0x8c] sm:$0xf0]  ;;  %v6546_v1 = vpop.f32.mrf.mxu3 }
 0x3ba   :  { %7706 = vmatpush.bf16.msrb.mxu2 %v12604_v54  ;;  %v14314_v54 = vld [vmem:[%s21998_s7 + $0xac] sm:$0xf0]  ;;  %v13119_v21 = vld [vmem:[%s21998_s7 + $0x260] sm:$0xf] }
 0x3bb   :  { %v6503_v58 = vadd.f32 %v20840_v61, %v6489_v35  ;;  %v13120_v20 = vor.u32 %v14370_v59, %v13119_v21  ;;  %v14352_v21 = vld [vmem:[%s21998_s7 + $0x1e4] sm:$0xf]  ;;  %v13057_v59 = vld [vmem:[%s21998_s7 + $0x1f0] sm:$0xf0] }
 0x3bd   :  { %7679 = vmatpush.bf16.msrb.mxu0 %v12332_v45  ;;  %7693 = vmatpush.bf16.msrb.mxu1 %v12460_v16  ;;  %v6518_v45 = vpop.f32.mrf.mxu1  ;;  %v12896_v16 = vor.u32 %v14314_v54, %v12895_v13  ;;  %v22075_v13 = vld [vmem:[#allocation13_spill] sm:$0xff] }
 0x3be   :  { %7707 = vmatpush.bf16.msrb.mxu2 %v12588_v37  ;;  %v22068_v37 = vld [vmem:[#allocation10_spill] sm:$0xff]  ;;  %v6532_v42 = vpop.f32.mrf.mxu2  ;;  %v6519_v49 = vadd.f32 %v6518_v45, %v6505_v51 }
 0x3bf   :  { %v1335_v61 = vadd.f32 %v22068_v37, %v22067_v57  ;;  %v22079_v57 = vld [vmem:[#allocation20_spill] sm:$0xff] }
 0x3c1   :  { %7680 = vmatpush.bf16.msrb.mxu0 %v12316_v19  ;;  %7694 = vmatpush.bf16.msrb.mxu1 %v12444_v9  ;;  %v6517_v19 = vadd.f32 %v20871_v14, %v6503_v58  ;;  %v6558_v9 = vpop.f32.mrf.mxu0  ;;  %v22073_v14 = vld [vmem:[#allocation18_spill] sm:$0xff] }
 0x3c2   :  { %7708 = vmatpush.bf16.msrb.mxu2 %v12572_v6  ;;  %v13008_v6 = vor.u32 %v14342_v38, %v13007_v48  ;;  %v1433_v33 = vadd.f32 %v22073_v14, %v1419_v2  ;;  %v22080_v38 = vld [vmem:[#allocation8_spill] sm:$0xff] }
 0x3c3   :  { %v6531_v56 = vadd.f32 %v20899_v11, %v6517_v19  ;;  %v12975_v11 = vld [vmem:[%s21998_s7 + $0x140] sm:$0xf]  ;;  %v14294_v19 = vld [vmem:[%s21998_s7 + $0xc] sm:$0xf0] }
 0x3c4   :  { %7681 = vmatmul.bf16.vlgmr.msrb.gmra.mxu0 %v20326_v10  ;;  %7695 = vmatmul.bf16.vlgmr.msrb.gmra.mxu1 %v20329_v25  ;;  %v12692_v10 = vor.u32 %v14516_v12, %v12689_v43  ;;  %v22065_v25 = vperm.slane %v22064_v17, 0  ;;  %v6533_v12 = vadd.f32 %v6532_v42, %v6519_v49  ;;  %v12992_v43 = vor.u32 %v14338_v4, %v12991_v24  ;;  %v13071_v24 = vld [vmem:[%s21998_s7 + $0x200] sm:$0xf]  ;;  %v12929_v4 = vld [vmem:[%s21998_s7 + $0xf0] sm:$0xf0] }
 0x3c5   :  { %8369 = vmatpush.bf16.msra.mxu0 %v12928_v46  ;;  %8383 = vmatpush.bf16.msra.mxu1 %v13056_v23  ;;  %v13136_v46 = vor.u32 %v14374_v53, %v13135_v34  ;;  %v22072_v23 = vld [vmem:[#allocation11_spill] sm:$0xff]  ;;  %v6572_v41 = vpop.f32.mrf.mxu1  ;;  %v1447_v31 = vadd.f32 %v22076_v18, %v1433_v33  ;;  %v6545_v35 = vadd.f32 %v20901_v44, %v6531_v56  ;;  %v14298_v44 = vld [vmem:[%s21998_s7 + $0x2c] sm:$0xf0]  ;;  %v22083_v56 = vld [vmem:[#allocation9_spill] sm:$0xff] }
 0x3c6   :  { %8397 = vmatpush.bf16.msra.mxu2 %v13184_v8  ;;  %v1251_v63 = vadd.f32 %v22066_v29, %v22065_v25  ;;  %7610 = vmatpush.bf16.msrb.mxu3 %v12692_v10  ;;  %v1349_v8 = vadd.f32 %v22072_v23, %v1335_v61  ;;  %v22077_v10 = vld [vmem:[#allocation6_spill] sm:$0xff]  ;;  %v6547_v45 = vadd.f32 %v6546_v1, %v6533_v12  ;;  %v14330_v61 = vld [vmem:[%s21998_s7 + $0x12c] sm:$0xf0]  ;;  %v22081_v53 = vld [vmem:[#allocation15_spill] sm:$0xff] }
 0x3c7   :  { %7709 = vmatmul.bf16.vlgmr.msrb.gmra.mxu2 %v20317_v39  ;;  %v12879_v39 = vld [vmem:[%s21998_s7 + $0x80] sm:$0xf]  ;;  %v1461_v37 = vadd.f32 %v22079_v57, %v1447_v31  ;;  %v14358_v23 = vld [vmem:[%s21998_s7 + $0x20c] sm:$0xf0]  ;;  %v13185_v12 = vld [vmem:[%s21998_s7 + $0x2f0] sm:$0xf0]  ;;  %v13060_v18 = vor.u32 %v14352_v21, %v13057_v59 }
 0x3c8   :  { %v1265_v55 = vadd.f32 %v22071_v7, %v1251_v63  ;;  %v12880_v62 = vor.u32 %v14310_v40, %v12879_v39  ;;  %v1363_v54 = vadd.f32 %v22075_v13, %v1349_v8  ;;  %v12959_v39 = vld [vmem:[%s21998_s7 + $0x120] sm:$0xf]  ;;  %v14320_v8 = vld [vmem:[%s21998_s7 + $0xe4] sm:$0xf]  ;;  %v12807_v31 = vld [vmem:[%s21997_s8 + $0x3e8] sm:$0xf] }
 0x3c9   :  { %8370 = vmatpush.bf16.msra.mxu0 %v12912_v0  ;;  %8384 = vmatpush.bf16.msra.mxu1 %v13040_v50  ;;  %v12847_v0 = vld [vmem:[%s21998_s7 + $0x40] sm:$0xf]  ;;  %v14302_v50 = vld [vmem:[%s21998_s7 + $0x4c] sm:$0xf0]  ;;  %v6600_v29 = vpop.f32.mrf.mxu3  ;;  %v6560_v58 = vpop.f32.mrf.mxu0  ;;  %v12960_v1 = vor.u32 %v14330_v61, %v12959_v39  ;;  %v22088_v39 = vld [vmem:[#allocation21_spill] sm:$0xff] }
 0x3ca   :  { %8398 = vmatpush.bf16.msra.mxu2 %v13168_v3  ;;  %v1279_v27 = vadd.f32 %v22074_v60, %v1265_v55  ;;  %v14334_v3 = vld [vmem:[%s21998_s7 + $0x14c] sm:$0xf0]  ;;  %v6586_v25 = vpop.f32.mrf.mxu2  ;;  %v12848_v63 = vor.u32 %v14302_v50, %v12847_v0  ;;  %v22078_v40 = vld [vmem:[#allocation14_spill] sm:$0xff]  ;;  %v6561_v2 = vadd.f32 %v6560_v58, %v6547_v45  ;;  %v13072_v50 = vor.u32 %v14358_v23, %v13071_v24  ;;  %v13169_v45 = vld [vmem:[%s21998_s7 + $0x2d0] sm:$0xf0] }
 0x3cb   :  { %v12976_v15 = vor.u32 %v14334_v3, %v12975_v11  ;;  %v1377_v48 = vadd.f32 %v22078_v40, %v1363_v54  ;;  %v12815_v55 = vld [vmem:[%s21998_s7] sm:$0xf]  ;;  %v22084_v60 = vld [vmem:[#allocation16_spill] sm:$0xff]  ;;  %v14384_v0 = vld [vmem:[%s21998_s7 + $0x2e4] sm:$0xf]  ;;  %v12932_v54 = vor.u32 %v14320_v8, %v12929_v4 }
 0x3cc   :  { %v1293_v17 = vadd.f32 %v22077_v10, %v1279_v27  ;;  %v22085_v11 = vld [vmem:[#allocation24_spill] sm:$0xff]  ;;  %v13188_v10 = vor.u32 %v14384_v0, %v13185_v12  ;;  %v14543_v61 = vld [vmem:[%s21997_s8 + $0x3d4] sm:$0xf0]  ;;  %v14372_v24 = vld [vmem:[%s21998_s7 + $0x284] sm:$0xf] }
 0x3cd   :  { %8371 = vmatpush.bf16.msra.mxu0 %v12896_v16  ;;  %8385 = vmatpush.bf16.msra.mxu1 %v13024_v28  ;;  %v6559_v16 = vadd.f32 %v6558_v9, %v6545_v35  ;;  %v13104_v28 = vor.u32 %v14366_v30, %v13103_v47  ;;  %v1391_v51 = vadd.f32 %v22081_v53, %v1377_v48  ;;  %v12943_v9 = vld [vmem:[%s21998_s7 + $0x100] sm:$0xf]  ;;  %v6574_v36 = vpop.f32.mrf.mxu1  ;;  %v14547_v47 = vld [vmem:[%s21997_s8 + $0x3f4] sm:$0xf0]  ;;  %v13025_v53 = vld [vmem:[%s21998_s7 + $0x1b0] sm:$0xf0] }
 0x3ce   :  { %8399 = vmatpush.bf16.msra.mxu2 %v13152_v32  ;;  %v12831_v32 = vld [vmem:[%s21998_s7 + $0x20] sm:$0xf]  ;;  %v1307_v34 = vadd.f32 %v22080_v38, %v1293_v17  ;;  %v6575_v33 = vadd.f32 %v6574_v36, %v6561_v2  ;;  %v14316_v17 = vld [vmem:[%s21998_s7 + $0xc4] sm:$0xf]  ;;  %v12808_v48 = vor.u32 %v14547_v47, %v12807_v31  ;;  %v12897_v38 = vld [vmem:[%s21998_s7 + $0xb0] sm:$0xf0] }
 0x3cf   :  { %v12832_v7 = vor.u32 %v14298_v44, %v12831_v32  ;;  %v6573_v42 = vadd.f32 %v6572_v41, %v6559_v16  ;;  %v1405_v27 = vadd.f32 %v22084_v60, %v1391_v51  ;;  %v22086_v16 = vld [vmem:[#allocation7_spill] sm:$0xff]  ;;  %v14312_v2 = vld [vmem:[%s21998_s7 + $0xa4] sm:$0xf]  ;;  %v13009_v36 = vld [vmem:[%s21998_s7 + $0x190] sm:$0xf0] }
 0x3d0   :  { %v1321_v49 = vadd.f32 %v22083_v56, %v1307_v34  ;;  %v14344_v34 = vld [vmem:[%s21998_s7 + $0x1a4] sm:$0xf]  ;;  %v13137_v23 = vld [vmem:[%s21998_s7 + $0x290] sm:$0xf0]  ;;  %v12759_v4 = vld [vmem:[%s21997_s8 + $0x388] sm:$0xf] }
 0x3d1   :  { %8372 = vmatpush.bf16.msra.mxu0 %v12880_v62  ;;  %8386 = vmatpush.bf16.msra.mxu1 %v13008_v6  ;;  %v13088_v62 = vor.u32 %v14362_v52, %v13087_v22  ;;  %v14326_v6 = vld [vmem:[%s21998_s7 + $0x10c] sm:$0xf0]  ;;  %v6587_v14 = vadd.f32 %v6586_v25, %v6573_v42  ;;  %v6602_v13 = vpop.f32.mrf.mxu3  ;;  %v12913_v25 = vld [vmem:[%s21998_s7 + $0xd0] sm:$0xf0]  ;;  %v14376_v51 = vld [vmem:[%s21998_s7 + $0x2a4] sm:$0xf]  ;;  %v12900_v42 = vor.u32 %v14312_v2, %v12897_v38 }
 0x3d2   :  { %8400 = vmatpush.bf16.msra.mxu2 %v13136_v46  ;;  %v22082_v46 = vld [vmem:[#allocation23_spill] sm:$0xff]  ;;  %v6588_v41 = vpop.f32.mrf.mxu2  ;;  %v21103_v58 = vpack.c.bf16 %v1321_v49, %v22086_v16  ;;  %v12916_v57 = vor.u32 %v14316_v17, %v12913_v25  ;;  %v14535_v21 = vld [vmem:[%s21997_s8 + $0x394] sm:$0xf0]  ;;  %v13140_v49 = vor.u32 %v14372_v24, %v13137_v23  ;;  %v14304_v60 = vld [vmem:[%s21998_s7 + $0x64] sm:$0xf] }
 0x3d3   :  { %v1475_v5 = vadd.f32 %v22082_v46, %v1461_v37  ;;  %v6601_v30 = vadd.f32 %v6600_v29, %v6587_v14  ;;  %v14380_v29 = vld [vmem:[%s21998_s7 + $0x2c4] sm:$0xf]  ;;  %v12791_v37 = vld [vmem:[%s21997_s8 + $0x3c8] sm:$0xf]  ;;  %v12881_v46 = vld [vmem:[%s21998_s7 + $0x90] sm:$0xf0] }
 0x3d4   :  { %v13172_v52 = vor.u32 %v14380_v29, %v13169_v45  ;;  %v12993_v0 = vld [vmem:[%s21998_s7 + $0x170] sm:$0xf0]  ;;  %v14368_v12 = vld [vmem:[%s21998_s7 + $0x264] sm:$0xf]  ;;  %v12727_v29 = vld [vmem:[%s21997_s8 + $0x348] sm:$0xf] }
 0x3d5   :  { %8373 = vmatpush.bf16.msra.mxu0 %v12864_v26  ;;  %8387 = vmatpush.bf16.msra.mxu1 %v12992_v43  ;;  %v12816_v26 = vor.u32 %v14294_v19, %v12815_v55  ;;  %v6589_v43 = vadd.f32 %v6588_v41, %v6575_v33  ;;  %v1489_v3 = vadd.f32 %v22085_v11, %v1475_v5  ;;  %v14340_v5 = vld [vmem:[%s21998_s7 + $0x184] sm:$0xf]  ;;  %v12743_v11 = vld [vmem:[%s21997_s8 + $0x368] sm:$0xf]  ;;  %v12849_v31 = vld [vmem:[%s21998_s7 + $0x50] sm:$0xf0] }
 0x3d6   :  { %8401 = vmatpush.bf16.msra.mxu2 %v13120_v20  ;;  %v12944_v20 = vor.u32 %v14326_v6, %v12943_v9  ;;  %v12792_v55 = vor.u32 %v14543_v61, %v12791_v37  ;;  %v13028_v19 = vor.u32 %v14344_v34, %v13025_v53  ;;  %v14308_v6 = vld [vmem:[%s21998_s7 + $0x84] sm:$0xf]  ;;  %v13012_v56 = vor.u32 %v14340_v5, %v13009_v36  ;;  %v14527_v45 = vld [vmem:[%s21997_s8 + $0x354] sm:$0xf0]  ;;  %v12961_v37 = vld [vmem:[%s21998_s7 + $0x130] sm:$0xf0] }
 0x3d7   :  { %v6603_v35 = vadd.f32 %v6602_v13, %v6589_v43  ;;  %v21111_v40 = vpack.c.bf16 %v1489_v3, %v22088_v39  ;;  %v12884_v33 = vor.u32 %v14308_v6, %v12881_v46  ;;  %v14336_v41 = vld [vmem:[%s21998_s7 + $0x164] sm:$0xf]  ;;  %v13121_v43 = vld [vmem:[%s21998_s7 + $0x270] sm:$0xf0]  ;;  %v14531_v3 = vld [vmem:[%s21997_s8 + $0x374] sm:$0xf0] }
 0x3d8   :  { %v12996_v13 = vor.u32 %v14336_v41, %v12993_v0  ;;  %v14332_v47 = vld [vmem:[%s21998_s7 + $0x144] sm:$0xf]  ;;  %v12711_v38 = vld [vmem:[%s21997_s8 + $0x328] sm:$0xf]  ;;  %v14523_v34 = vld [vmem:[%s21997_s8 + $0x334] sm:$0xf0] }
 0x3d9   :  { %8374 = vmatpush.bf16.msra.mxu0 %v12848_v63  ;;  %8388 = vmatpush.bf16.msra.mxu1 %v12976_v15  ;;  %v14348_v63 = vld [vmem:[%s21998_s7 + $0x1c4] sm:$0xf]  ;;  %v13041_v15 = vld [vmem:[%s21998_s7 + $0x1d0] sm:$0xf0]  ;;  %v21108_v44 = vpack.c.bf16 %v6603_v35, %v6601_v30  ;;  %v14323_v6 = vld [vmem:[%s21998_s7 + $0xf4] sm:$0xf0]  ;;  %v12712_v36 = vor.u32 %v14523_v34, %v12711_v38 }
 0x3da   :  { %8402 = vmatpush.bf16.msra.mxu2 %v13104_v28  ;;  %v22087_v28 = vld [vmem:[#allocation12_spill] sm:$0xff]  ;;  %v13044_v22 = vor.u32 %v14348_v63, %v13041_v15  ;;  %v14364_v35 = vld [vmem:[%s21998_s7 + $0x244] sm:$0xf]  ;;  %v12744_v63 = vor.u32 %v14531_v3, %v12743_v11  ;;  %v13063_v46 = vld [vmem:[%s21998_s7 + $0x1e8] sm:$0xf] }
 0x3db   :  { %v21106_v32 = vpack.c.bf16 %v1405_v27, %v22087_v28  ;;  %7555 = vmatmul.bf16.vlgmr.msra.gmra.mxu3 %v21108_v44  ;;  %v12865_v27 = vld [vmem:[%s21998_s7 + $0x70] sm:$0xf0]  ;;  %v14296_v39 = vld [vmem:[%s21998_s7 + $0x24] sm:$0xf]  ;;  %v14355_v5 = vld [vmem:[%s21998_s7 + $0x1f4] sm:$0xf0] }
 0x3dc   :  { %7659 = vmatpush.bf16.msra.mxu3 %v12808_v48  ;;  %v12977_v30 = vld [vmem:[%s21998_s7 + $0x150] sm:$0xf0]  ;;  %v14360_v61 = vld [vmem:[%s21998_s7 + $0x224] sm:$0xf]  ;;  %v13191_v23 = vld [vmem:[%s21998_s7 + $0x2e8] sm:$0xf] }
 0x3dd   :  { %8375 = vmatpush.bf16.msra.mxu0 %v12832_v7  ;;  %8389 = vmatpush.bf16.msra.mxu1 %v12960_v1  ;;  %v13153_v7 = vld [vmem:[%s21998_s7 + $0x2b0] sm:$0xf0]  ;;  %v12775_v1 = vld [vmem:[%s21997_s8 + $0x3a8] sm:$0xf]  ;;  %v12980_v16 = vor.u32 %v14332_v47, %v12977_v30  ;;  %v14292_v53 = vld [vmem:[%s21998_s7 + $0x4] sm:$0xf] }
 0x3de   :  { %8403 = vmatpush.bf16.msra.mxu2 %v13088_v62  ;;  %v14539_v62 = vld [vmem:[%s21997_s8 + $0x3b4] sm:$0xf0]  ;;  %v13156_v9 = vor.u32 %v14376_v51, %v13153_v7  ;;  %v12833_v48 = vld [vmem:[%s21998_s7 + $0x30] sm:$0xf0]  ;;  %v13047_v0 = vld [vmem:[%s21998_s7 + $0x1c8] sm:$0xf] }
 0x3df   :  { %v12776_v14 = vor.u32 %v14539_v62, %v12775_v1  ;;  %v12836_v2 = vor.u32 %v14296_v39, %v12833_v48  ;;  %v12945_v1 = vld [vmem:[%s21998_s7 + $0x110] sm:$0xf0]  ;;  %v14356_v62 = vld [vmem:[%s21998_s7 + $0x204] sm:$0xf]  ;;  %v12793_v47 = vld [vmem:[%s21997_s8 + $0x3d8] sm:$0xf0] }
 0x3e0   :  { %7660 = vmatpush.bf16.msra.mxu3 %v12792_v55  ;;  %v12817_v55 = vld [vmem:[%s21998_s7 + $0x10] sm:$0xf0]  ;;  %v12903_v30 = vld [vmem:[%s21998_s7 + $0xa8] sm:$0xf]  ;;  %v14537_v39 = vld [vmem:[%s21997_s8 + $0x3ac] sm:$0xf] }
 0x3e1   :  { %8376 = vmatpush.bf16.msra.mxu0 %v12816_v26  ;;  %8390 = vmatpush.bf16.msra.mxu1 %v12944_v20  ;;  %v7514_v8 = vpop.f32.mrf.mxu0  ;;  %v7528_v59 = vpop.f32.mrf.mxu1  ;;  %v12760_v20 = vor.u32 %v14535_v21, %v12759_v4  ;;  %v12820_v24 = vor.u32 %v14292_v53, %v12817_v55  ;;  %v12695_v4 = vld [vmem:[%s21997_s8 + $0x308] sm:$0xf]  ;;  %v14519_v21 = vld [vmem:[%s21997_s8 + $0x314] sm:$0xf0]  ;;  %v12777_v48 = vld [vmem:[%s21997_s8 + $0x3b8] sm:$0xf0] }
 0x3e2   :  { %8404 = vmatpush.bf16.msra.mxu2 %v13072_v50  ;;  %v7529_v26 = vadd.f32 %v7528_v59, %v7514_v8  ;;  %v12868_v50 = vor.u32 %v14304_v60, %v12865_v27  ;;  %v14387_v8 = vld [vmem:[%s21998_s7 + $0x2f4] sm:$0xf0]  ;;  %v12809_v60 = vld [vmem:[%s21997_s8 + $0x3f8] sm:$0xf0]  ;;  %v12919_v27 = vld [vmem:[%s21998_s7 + $0xc8] sm:$0xf]  ;;  %v12780_v53 = vor.u32 %v14537_v39, %v12777_v48 }
 0x3e3   :  { %v13192_v41 = vor.u32 %v14387_v8, %v13191_v23  ;;  %v14375_v38 = vld [vmem:[%s21998_s7 + $0x294] sm:$0xf0] }
 0x3e4   :  { %8377 = vmatmul.bf16.vlgmr.msra.gmra.mxu0 %v21103_v58  ;;  %8391 = vmatmul.bf16.vlgmr.msra.gmra.mxu1 %v21106_v32  ;;  %v14371_v23 = vld [vmem:[%s21998_s7 + $0x274] sm:$0xf0] }
 0x3e5   :  { %8425 = vmatpush.bf16.msrb.mxu0 %v12932_v54  ;;  %8439 = vmatpush.bf16.msrb.mxu1 %v13060_v18  ;;  %v13124_v54 = vor.u32 %v14368_v12, %v13121_v43  ;;  %v14300_v18 = vld [vmem:[%s21998_s7 + $0x44] sm:$0xf]  ;;  %v14351_v12 = vld [vmem:[%s21998_s7 + $0x1d4] sm:$0xf0]  ;;  %v12696_v43 = vor.u32 %v14519_v21, %v12695_v4  ;;  %v14529_v4 = vld [vmem:[%s21997_s8 + $0x36c] sm:$0xf] }
 0x3e6   :  { %8453 = vmatpush.bf16.msrb.mxu2 %v13188_v10  ;;  %7661 = vmatpush.bf16.msra.mxu3 %v12776_v14  ;;  %v13105_v10 = vld [vmem:[%s21998_s7 + $0x250] sm:$0xf0]  ;;  %v12852_v15 = vor.u32 %v14300_v18, %v12849_v31  ;;  %v13048_v18 = vor.u32 %v14351_v12, %v13047_v0  ;;  %v14541_v31 = vld [vmem:[%s21997_s8 + $0x3cc] sm:$0xf]  ;;  %v12745_v21 = vld [vmem:[%s21997_s8 + $0x378] sm:$0xf0] }
 0x3e7   :  { %8405 = vmatmul.bf16.vlgmr.msra.gmra.mxu2 %v21111_v40  ;;  %v13108_v28 = vor.u32 %v14364_v35, %v13105_v10  ;;  %v14315_v10 = vld [vmem:[%s21998_s7 + $0xb4] sm:$0xf0]  ;;  %v12748_v12 = vor.u32 %v14529_v4, %v12745_v21  ;;  %v14317_v21 = vld [vmem:[%s21998_s7 + $0xcc] sm:$0xf] }
 0x3e9   :  { %8426 = vmatpush.bf16.msrb.mxu0 %v12916_v57  ;;  %8440 = vmatpush.bf16.msrb.mxu1 %v13044_v22  ;;  %v14328_v57 = vld [vmem:[%s21998_s7 + $0x124] sm:$0xf]  ;;  %v13089_v22 = vld [vmem:[%s21998_s7 + $0x230] sm:$0xf0]  ;;  %v21312_v3 = vpop.f32.mrf.mxu0 }
 0x3ea   :  { %8454 = vmatpush.bf16.msrb.mxu2 %v13172_v52  ;;  %v7542_v17 = vpop.f32.mrf.mxu2  ;;  %7662 = vmatpush.bf16.msra.mxu3 %v12760_v20  ;;  %v12728_v52 = vor.u32 %v14527_v45, %v12727_v29  ;;  %v12964_v51 = vor.u32 %v14328_v57, %v12961_v37  ;;  %v13092_v7 = vor.u32 %v14360_v61, %v13089_v22  ;;  %v13175_v20 = vld [vmem:[%s21998_s7 + $0x2c8] sm:$0xf]  ;;  %v14379_v29 = vld [vmem:[%s21998_s7 + $0x2b4] sm:$0xf0] }
 0x3eb   :  { %v21213_v25 = vadd.f32 %v7542_v17, %v7529_v26  ;;  %7611 = vmatmul.bf16.vlgmr.msrb.gmra.mxu3 %v21108_v44  ;;  %v14319_v26 = vld [vmem:[%s21998_s7 + $0xd4] sm:$0xf0]  ;;  %v13031_v17 = vld [vmem:[%s21998_s7 + $0x1a8] sm:$0xf]  ;;  %v12796_v45 = vor.u32 %v14541_v31, %v12793_v47  ;;  %v12729_v31 = vld [vmem:[%s21997_s8 + $0x358] sm:$0xf0] }
 0x3ec   :  { %v12887_v57 = vld [vmem:[%s21998_s7 + $0x88] sm:$0xf]  ;;  %v14311_v61 = vld [vmem:[%s21998_s7 + $0x94] sm:$0xf0] }
 0x3ed   :  { %8427 = vmatpush.bf16.msrb.mxu0 %v12900_v42  ;;  %8441 = vmatpush.bf16.msrb.mxu1 %v13028_v19  ;;  %v14324_v42 = vld [vmem:[%s21998_s7 + $0x104] sm:$0xf]  ;;  %v13073_v19 = vld [vmem:[%s21998_s7 + $0x210] sm:$0xf0]  ;;  %v13015_v22 = vld [vmem:[%s21998_s7 + $0x188] sm:$0xf]  ;;  %v12888_v55 = vor.u32 %v14311_v61, %v12887_v57 }
 0x3ee   :  { %8455 = vmatpush.bf16.msrb.mxu2 %v13156_v9  ;;  %7663 = vmatpush.bf16.msra.mxu3 %v12744_v63  ;;  %v12935_v9 = vld [vmem:[%s21998_s7 + $0xe8] sm:$0xf]  ;;  %v12948_v14 = vor.u32 %v14324_v42, %v12945_v1  ;;  %v14347_v63 = vld [vmem:[%s21998_s7 + $0x1b4] sm:$0xf0]  ;;  %v14533_v1 = vld [vmem:[%s21997_s8 + $0x38c] sm:$0xf] }
 0x3ef   :  { %v12936_v59 = vor.u32 %v14323_v6, %v12935_v9  ;;  %v12839_v47 = vld [vmem:[%s21998_s7 + $0x28] sm:$0xf] }
 0x3f0   :  { %v12823_v57 = vld [vmem:[%s21998_s7 + $0x8] sm:$0xf] }
 0x3f1   :  { %8428 = vmatpush.bf16.msrb.mxu0 %v12884_v33  ;;  %8442 = vmatpush.bf16.msrb.mxu1 %v13012_v56  ;;  %v13076_v33 = vor.u32 %v14356_v62, %v13073_v19  ;;  %v13064_v56 = vor.u32 %v14355_v5, %v13063_v46  ;;  %v12761_v62 = vld [vmem:[%s21997_s8 + $0x398] sm:$0xf0]  ;;  %v12871_v19 = vld [vmem:[%s21998_s7 + $0x68] sm:$0xf]  ;;  %v14307_v46 = vld [vmem:[%s21998_s7 + $0x74] sm:$0xf0] }
 0x3f2   :  { %8456 = vmatpush.bf16.msrb.mxu2 %v13140_v49  ;;  %7664 = vmatpush.bf16.msra.mxu3 %v12728_v52  ;;  %v14545_v49 = vld [vmem:[%s21997_s8 + $0x3ec] sm:$0xf]  ;;  %v14343_v52 = vld [vmem:[%s21998_s7 + $0x194] sm:$0xf0]  ;;  %v21368_v34 = vpop.f32.mrf.mxu2  ;;  %v12999_v5 = vld [vmem:[%s21998_s7 + $0x168] sm:$0xf]  ;;  %v12764_v8 = vor.u32 %v14533_v1, %v12761_v62 }
 0x3f3   :  { %v12812_v11 = vor.u32 %v14545_v49, %v12809_v60  ;;  %v13016_v42 = vor.u32 %v14343_v52, %v13015_v22  ;;  %v14303_v49 = vld [vmem:[%s21998_s7 + $0x54] sm:$0xf0]  ;;  %v12983_v60 = vld [vmem:[%s21998_s7 + $0x148] sm:$0xf]  ;;  %v13065_v1 = vld [vmem:[%s21998_s7 + $0x1f8] sm:$0xf0] }
 0x3f4   :  { %v12951_v61 = vld [vmem:[%s21998_s7 + $0x108] sm:$0xf]  ;;  %v14327_v52 = vld [vmem:[%s21998_s7 + $0x114] sm:$0xf0]  ;;  %v14385_v62 = vld [vmem:[%s21998_s7 + $0x2ec] sm:$0xf] }
 0x3f5   :  { %8429 = vmatpush.bf16.msrb.mxu0 %v12868_v50  ;;  %8443 = vmatpush.bf16.msrb.mxu1 %v12996_v13  ;;  %v14383_v50 = vld [vmem:[%s21998_s7 + $0x2d4] sm:$0xf0]  ;;  %v21314_v13 = vpop.f32.mrf.mxu1 }
 0x3f6   :  { %8457 = vmatpush.bf16.msrb.mxu2 %v13124_v54  ;;  %7665 = vmatpush.bf16.msra.mxu3 %v12712_v36  ;;  %v12920_v54 = vor.u32 %v14319_v26, %v12919_v27  ;;  %v13176_v35 = vor.u32 %v14383_v50, %v13175_v20  ;;  %v14339_v36 = vld [vmem:[%s21998_s7 + $0x174] sm:$0xf0] }
 0x3f7   :  { %v14335_v27 = vld [vmem:[%s21998_s7 + $0x154] sm:$0xf0] }
 0x3f8   :  { %v14367_v26 = vld [vmem:[%s21998_s7 + $0x254] sm:$0xf0] }
 0x3f9   :  { %8430 = vmatpush.bf16.msrb.mxu0 %v12852_v15  ;;  %8444 = vmatpush.bf16.msrb.mxu1 %v12980_v16  ;;  %v13159_v15 = vld [vmem:[%s21998_s7 + $0x2a8] sm:$0xf]  ;;  %v12904_v16 = vor.u32 %v14315_v10, %v12903_v30  ;;  %v14299_v10 = vld [vmem:[%s21998_s7 + $0x34] sm:$0xf0] }
 0x3fa   :  { %8458 = vmatpush.bf16.msrb.mxu2 %v13108_v28  ;;  %7666 = vmatpush.bf16.msra.mxu3 %v12696_v43  ;;  %v13032_v28 = vor.u32 %v14347_v63, %v13031_v17  ;;  %v13160_v37 = vor.u32 %v14379_v29, %v13159_v15  ;;  %v12967_v17 = vld [vmem:[%s21998_s7 + $0x128] sm:$0xf]  ;;  %v14331_v63 = vld [vmem:[%s21998_s7 + $0x134] sm:$0xf0]  ;;  %v12840_v39 = vor.u32 %v14299_v10, %v12839_v47  ;;  %v13033_v47 = vld [vmem:[%s21998_s7 + $0x1b8] sm:$0xf0] }
 0x3fb   :  { %v13095_v15 = vld [vmem:[%s21998_s7 + $0x228] sm:$0xf]  ;;  %v14363_v29 = vld [vmem:[%s21998_s7 + $0x234] sm:$0xf0]  ;;  %v12968_v48 = vor.u32 %v14331_v63, %v12967_v17  ;;  %v13279_v63 = vld [vmem:[%s21998_s7 + $0x3a0] sm:$0xf] }
 0x3fc   :  { %v13096_v22 = vor.u32 %v14363_v29, %v13095_v15  ;;  %v14410_v15 = vld [vmem:[%s21998_s7 + $0x3ac] sm:$0xf0] }
 0x3fd   :  { %8431 = vmatpush.bf16.msrb.mxu0 %v12836_v2  ;;  %8445 = vmatpush.bf16.msrb.mxu1 %v12964_v51  ;;  %v13143_v2 = vld [vmem:[%s21998_s7 + $0x288] sm:$0xf] }
 0x3fe   :  { %8459 = vmatpush.bf16.msrb.mxu2 %v13092_v7  ;;  %7715 = vmatpush.bf16.msrb.mxu3 %v12812_v11  ;;  %v13144_v6 = vor.u32 %v14375_v38, %v13143_v2  ;;  %v13079_v2 = vld [vmem:[%s21998_s7 + $0x208] sm:$0xf]  ;;  %v14359_v38 = vld [vmem:[%s21998_s7 + $0x214] sm:$0xf0] }
 0x3ff   :  { %7667 = vmatmul.bf16.vlgmr.msra.gmra.mxu3 %v21108_v44 }
 0x401   :  { %8432 = vmatpush.bf16.msrb.mxu0 %v12820_v24  ;;  %8446 = vmatpush.bf16.msrb.mxu1 %v12948_v14  ;;  %v7570_v51 = vpop.f32.mrf.mxu0  ;;  %v7584_v7 = vpop.f32.mrf.mxu1  ;;  %v13127_v24 = vld [vmem:[%s21998_s7 + $0x268] sm:$0xf]  ;;  %v12872_v14 = vor.u32 %v14307_v46, %v12871_v19  ;;  %v13193_v19 = vld [vmem:[%s21998_s7 + $0x2f8] sm:$0xf0]  ;;  %v12952_v46 = vor.u32 %v14327_v52, %v12951_v61 }
 0x402   :  { %8460 = vmatpush.bf16.msrb.mxu2 %v13076_v33  ;;  %7716 = vmatpush.bf16.msrb.mxu3 %v12796_v45  ;;  %v7585_v9 = vadd.f32 %v7584_v7, %v7570_v51  ;;  %v13000_v33 = vor.u32 %v14339_v36, %v12999_v5  ;;  %v12937_v51 = vld [vmem:[%s21998_s7 + $0xf8] sm:$0xf0]  ;;  %v14353_v7 = vld [vmem:[%s21998_s7 + $0x1ec] sm:$0xf]  ;;  %v13080_v36 = vor.u32 %v14359_v38, %v13079_v2  ;;  %v14406_v2 = vld [vmem:[%s21998_s7 + $0x38c] sm:$0xf0] }
 0x403   :  { %v14517_v5 = vld [vmem:[%s21997_s8 + $0x30c] sm:$0xf]  ;;  %v13196_v4 = vor.u32 %v14385_v62, %v13193_v19  ;;  %v13001_v62 = vld [vmem:[%s21998_s7 + $0x178] sm:$0xf0] }
 0x404   :  { %8433 = vmatmul.bf16.vlgmr.msrb.gmra.mxu0 %v21103_v58  ;;  %8447 = vmatmul.bf16.vlgmr.msrb.gmra.mxu1 %v21106_v32  ;;  %v14369_v19 = vld [vmem:[%s21998_s7 + $0x26c] sm:$0xf] }
 0x405   :  { %8481 = vmatpush.bf16.msra.mxu0 %v12936_v59  ;;  %8495 = vmatpush.bf16.msra.mxu1 %v13064_v56  ;;  %v12855_v59 = vld [vmem:[%s21998_s7 + $0x48] sm:$0xf]  ;;  %v13128_v56 = vor.u32 %v14371_v23, %v13127_v24  ;;  %v12697_v23 = vld [vmem:[%s21997_s8 + $0x318] sm:$0xf0] }
 0x406   :  { %8509 = vmatpush.bf16.msra.mxu2 %v13192_v41  ;;  %7717 = vmatpush.bf16.msrb.mxu3 %v12780_v53  ;;  %v13111_v41 = vld [vmem:[%s21998_s7 + $0x248] sm:$0xf]  ;;  %v12856_v11 = vor.u32 %v14303_v49, %v12855_v59  ;;  %v14321_v53 = vld [vmem:[%s21998_s7 + $0xec] sm:$0xf]  ;;  %v12921_v59 = vld [vmem:[%s21998_s7 + $0xd8] sm:$0xf0] }
 0x407   :  { %8461 = vmatmul.bf16.vlgmr.msrb.gmra.mxu2 %v21111_v40  ;;  %v12940_v24 = vor.u32 %v14321_v53, %v12937_v51  ;;  %v13049_v49 = vld [vmem:[%s21998_s7 + $0x1d8] sm:$0xf0] }
 0x409   :  { %8482 = vmatpush.bf16.msra.mxu0 %v12920_v54  ;;  %8496 = vmatpush.bf16.msra.mxu1 %v13048_v18  ;;  %v7572_v20 = vpop.f32.mrf.mxu0  ;;  %v7586_v50 = vpop.f32.mrf.mxu1  ;;  %v12984_v54 = vor.u32 %v14335_v27, %v12983_v60  ;;  %v14525_v18 = vld [vmem:[%s21997_s8 + $0x34c] sm:$0xf]  ;;  %v13177_v27 = vld [vmem:[%s21998_s7 + $0x2d8] sm:$0xf0] }
 0x40a   :  { %8510 = vmatpush.bf16.msra.mxu2 %v13176_v35  ;;  %7718 = vmatpush.bf16.msrb.mxu3 %v12764_v8  ;;  %v7598_v0 = vpop.f32.mrf.mxu2  ;;  %v7587_v30 = vadd.f32 %v7586_v50, %v7572_v20  ;;  %v13112_v35 = vor.u32 %v14367_v26, %v13111_v41  ;;  %v12732_v45 = vor.u32 %v14525_v18, %v12729_v31  ;;  %v13311_v8 = vld [vmem:[%s21998_s7 + $0x3e0] sm:$0xf]  ;;  %v14381_v60 = vld [vmem:[%s21998_s7 + $0x2cc] sm:$0xf]  ;;  %v14414_v20 = vld [vmem:[%s21998_s7 + $0x3cc] sm:$0xf0] }
 0x40b   :  { %v21418_v43 = vadd.f32 %v7598_v0, %v7585_v9  ;;  %v12700_v41 = vor.u32 %v14517_v5, %v12697_v23  ;;  %v12924_v0 = vor.u32 %v14317_v21, %v12921_v59  ;;  %v12905_v18 = vld [vmem:[%s21998_s7 + $0xb8] sm:$0xf0]  ;;  %v14345_v31 = vld [vmem:[%s21998_s7 + $0x1ac] sm:$0xf] }
 0x40c   :  { %v13036_v29 = vor.u32 %v14345_v31, %v13033_v47  ;;  %v14301_v59 = vld [vmem:[%s21998_s7 + $0x4c] sm:$0xf]  ;;  %v14398_v31 = vld [vmem:[%s21998_s7 + $0x34c] sm:$0xf0] }
 0x40d   :  { %8483 = vmatpush.bf16.msra.mxu0 %v12904_v16  ;;  %8497 = vmatpush.bf16.msra.mxu1 %v13032_v28  ;;  %v14521_v16 = vld [vmem:[%s21997_s8 + $0x32c] sm:$0xf]  ;;  %v12713_v28 = vld [vmem:[%s21997_s8 + $0x338] sm:$0xf0] }
 0x40e   :  { %8511 = vmatpush.bf16.msra.mxu2 %v13160_v37  ;;  %7719 = vmatpush.bf16.msrb.mxu3 %v12748_v12  ;;  %v14295_v37 = vld [vmem:[%s21998_s7 + $0x14] sm:$0xf0]  ;;  %v13295_v12 = vld [vmem:[%s21998_s7 + $0x3c0] sm:$0xf] }
 0x40f   :  { %v13296_v10 = vor.u32 %v14414_v20, %v13295_v12 }
 0x411   :  { %8484 = vmatpush.bf16.msra.mxu0 %v12888_v55  ;;  %8498 = vmatpush.bf16.msra.mxu1 %v13016_v42  ;;  %v12716_v42 = vor.u32 %v14521_v16, %v12713_v28  ;;  %v14309_v16 = vld [vmem:[%s21998_s7 + $0x8c] sm:$0xf]  ;;  %v12889_v28 = vld [vmem:[%s21998_s7 + $0x98] sm:$0xf0] }
 0x412   :  { %8512 = vmatpush.bf16.msra.mxu2 %v13144_v6  ;;  %7720 = vmatpush.bf16.msrb.mxu3 %v12732_v45  ;;  %v7600_v55 = vpop.f32.mrf.mxu2  ;;  %v12824_v6 = vor.u32 %v14295_v37, %v12823_v57  ;;  %v14373_v57 = vld [vmem:[%s21998_s7 + $0x28c] sm:$0xf]  ;;  %v13145_v37 = vld [vmem:[%s21998_s7 + $0x298] sm:$0xf0]  ;;  %v12892_v52 = vor.u32 %v14309_v16, %v12889_v28  ;;  %v22093_v28 = vld [vmem:[#allocation28_spill] sm:$0xff] }
 0x413   :  { %v21486_v9 = vadd.f32 %v7600_v55, %v7587_v30  ;;  %v14377_v30 = vld [vmem:[%s21998_s7 + $0x2ac] sm:$0xf]  ;;  %v13148_v51 = vor.u32 %v14373_v57, %v13145_v37  ;;  %v12873_v55 = vld [vmem:[%s21998_s7 + $0x78] sm:$0xf0]  ;;  %v13215_v37 = vld [vmem:[%s21998_s7 + $0x320] sm:$0xf] }
 0x414   :  { %v13097_v16 = vld [vmem:[%s21998_s7 + $0x238] sm:$0xf0] }
 0x415   :  { %8485 = vmatpush.bf16.msra.mxu0 %v12872_v14  ;;  %8499 = vmatpush.bf16.msra.mxu1 %v13000_v33  ;;  %v14418_v14 = vld [vmem:[%s21998_s7 + $0x3ec] sm:$0xf0]  ;;  %v13068_v33 = vor.u32 %v14353_v7, %v13065_v1  ;;  %v14305_v7 = vld [vmem:[%s21998_s7 + $0x6c] sm:$0xf] }
 0x416   :  { %8513 = vmatpush.bf16.msra.mxu2 %v13128_v56  ;;  %v14349_v56 = vld [vmem:[%s21998_s7 + $0x1cc] sm:$0xf]  ;;  %7721 = vmatpush.bf16.msrb.mxu3 %v12716_v42  ;;  %v13312_v26 = vor.u32 %v14418_v14, %v13311_v8  ;;  %v12876_v8 = vor.u32 %v14305_v7, %v12873_v55  ;;  %v13247_v14 = vld [vmem:[%s21998_s7 + $0x360] sm:$0xf]  ;;  %v13081_v7 = vld [vmem:[%s21998_s7 + $0x218] sm:$0xf0] }
 0x417   :  { %v13052_v50 = vor.u32 %v14349_v56, %v13049_v49  ;;  %v14337_v42 = vld [vmem:[%s21998_s7 + $0x16c] sm:$0xf]  ;;  %v12857_v56 = vld [vmem:[%s21998_s7 + $0x58] sm:$0xf0] }
 0x418   :  { %v14333_v49 = vld [vmem:[%s21998_s7 + $0x14c] sm:$0xf]  ;;  %v22094_v55 = vld [vmem:[#allocation29_spill] sm:$0xff] }
 0x419   :  { %8486 = vmatpush.bf16.msra.mxu0 %v12856_v11  ;;  %8500 = vmatpush.bf16.msra.mxu1 %v12984_v54  ;;  %v13180_v11 = vor.u32 %v14381_v60, %v13177_v27  ;;  %v14313_v54 = vld [vmem:[%s21998_s7 + $0xac] sm:$0xf]  ;;  %v12985_v60 = vld [vmem:[%s21998_s7 + $0x158] sm:$0xf0] }
 0x41a   :  { %8514 = vmatpush.bf16.msra.mxu2 %v13112_v35  ;;  %v13161_v35 = vld [vmem:[%s21998_s7 + $0x2b8] sm:$0xf0]  ;;  %7722 = vmatpush.bf16.msrb.mxu3 %v12700_v41  ;;  %v12908_v17 = vor.u32 %v14313_v54, %v12905_v18  ;;  %v14365_v27 = vld [vmem:[%s21998_s7 + $0x24c] sm:$0xf]  ;;  %v12860_v54 = vor.u32 %v14301_v59, %v12857_v56  ;;  %v13231_v18 = vld [vmem:[%s21998_s7 + $0x340] sm:$0xf] }
 0x41b   :  { %v13164_v45 = vor.u32 %v14377_v30, %v13161_v35  ;;  %v13113_v41 = vld [vmem:[%s21998_s7 + $0x258] sm:$0xf0]  ;;  %v12988_v30 = vor.u32 %v14333_v49, %v12985_v60  ;;  %v14412_v49 = vld [vmem:[%s21998_s7 + $0x3c4] sm:$0xf]  ;;  %v13297_v60 = vld [vmem:[%s21998_s7 + $0x3d0] sm:$0xf0] }
 0x41c   :  { %v13116_v35 = vor.u32 %v14365_v27, %v13113_v41  ;;  %v22097_v27 = vld [vmem:[#allocation27_spill] sm:$0xff] }
 0x41d   :  { %8487 = vmatpush.bf16.msra.mxu0 %v12840_v39  ;;  %8501 = vmatpush.bf16.msra.mxu1 %v12968_v48  ;;  %v14341_v39 = vld [vmem:[%s21998_s7 + $0x18c] sm:$0xf]  ;;  %v13017_v48 = vld [vmem:[%s21998_s7 + $0x198] sm:$0xf0] }
 0x41e   :  { %8515 = vmatpush.bf16.msra.mxu2 %v13096_v22  ;;  %8411 = vmatpush.bf16.msra.mxu3 %v13312_v26  ;;  %v13280_v22 = vor.u32 %v14410_v15, %v13279_v63  ;;  %v13020_v53 = vor.u32 %v14341_v39, %v13017_v48  ;;  %v22092_v26 = vld [vmem:[#allocation26_spill] sm:$0xff]  ;;  %v14329_v63 = vld [vmem:[%s21998_s7 + $0x12c] sm:$0xf]  ;;  %v13232_v48 = vor.u32 %v14398_v31, %v13231_v18 }
 0x41f   :  { %7723 = vmatmul.bf16.vlgmr.msrb.gmra.mxu3 %v21108_v44  ;;  %v13263_v44 = vld [vmem:[%s21998_s7 + $0x380] sm:$0xf]  ;;  %v14400_v31 = vld [vmem:[%s21998_s7 + $0x364] sm:$0xf] }
 0x420   :  { %v13264_v23 = vor.u32 %v14406_v2, %v13263_v44  ;;  %v14293_v44 = vld [vmem:[%s21998_s7 + $0xc] sm:$0xf]  ;;  %v12825_v2 = vld [vmem:[%s21998_s7 + $0x18] sm:$0xf0] }
 0x421   :  { %8488 = vmatpush.bf16.msra.mxu0 %v12824_v6  ;;  %8502 = vmatpush.bf16.msra.mxu1 %v12952_v46  ;;  %v7626_v61 = vpop.f32.mrf.mxu0  ;;  %v7640_v38 = vpop.f32.mrf.mxu1  ;;  %v13129_v6 = vld [vmem:[%s21998_s7 + $0x278] sm:$0xf0]  ;;  %v22089_v46 = vld [vmem:[#allocation22_spill] sm:$0xff] }
 0x422   :  { %8516 = vmatpush.bf16.msra.mxu2 %v13080_v36  ;;  %8412 = vmatpush.bf16.msra.mxu3 %v13296_v10  ;;  %v7641_v1 = vadd.f32 %v7640_v38, %v7626_v61  ;;  %v22090_v5 = vperm.slane %v22089_v46, 3  ;;  %v22091_v36 = vld [vmem:[#allocation25_spill] sm:$0xff]  ;;  %v13132_v21 = vor.u32 %v14369_v19, %v13129_v6  ;;  %v14297_v10 = vld [vmem:[%s21998_s7 + $0x2c] sm:$0xf]  ;;  %v14394_v61 = vld [vmem:[%s21998_s7 + $0x32c] sm:$0xf0]  ;;  %v12828_v6 = vor.u32 %v14293_v44, %v12825_v2 }
 0x423   :  { %v14325_v38 = vld [vmem:[%s21998_s7 + $0x10c] sm:$0xf]  ;;  %v13216_v19 = vor.u32 %v14394_v61, %v13215_v37  ;;  %v22095_v46 = vld [vmem:[#allocation30_spill] sm:$0xff]  ;;  %v14419_v44 = vld [vmem:[%s21998_s7 + $0x3f4] sm:$0xf0] }
 0x424   :  { %8489 = vmatmul.bf16.vlgmr.msra.gmra.mxu0 %v21103_v58  ;;  %8503 = vmatmul.bf16.vlgmr.msra.gmra.mxu1 %v21106_v32  ;;  %v14388_v61 = vld [vmem:[%s21998_s7 + $0x304] sm:$0xf] }
 0x425   :  { %8537 = vmatpush.bf16.msrb.mxu0 %v12940_v24  ;;  %8551 = vmatpush.bf16.msrb.mxu1 %v13068_v33  ;;  %v1503_v24 = vadd.f32 %v22091_v36, %v22090_v5  ;;  %v14402_v33 = vld [vmem:[%s21998_s7 + $0x36c] sm:$0xf0] }
 0x426   :  { %8565 = vmatpush.bf16.msrb.mxu2 %v13196_v4  ;;  %8413 = vmatpush.bf16.msra.mxu3 %v13280_v22  ;;  %v13004_v4 = vor.u32 %v14337_v42, %v13001_v62 }
 0x427   :  { %8517 = vmatmul.bf16.vlgmr.msra.gmra.mxu2 %v21111_v40 }
 0x429   :  { %8538 = vmatpush.bf16.msrb.mxu0 %v12924_v0  ;;  %8552 = vmatpush.bf16.msrb.mxu1 %v13052_v50  ;;  %v1517_v0 = vadd.f32 %v22092_v26, %v1503_v24  ;;  %v7628_v50 = vpop.f32.mrf.mxu0  ;;  %v7642_v47 = vpop.f32.mrf.mxu1  ;;  %v13300_v26 = vor.u32 %v14412_v49, %v13297_v60  ;;  %v13207_v60 = vld [vmem:[%s21998_s7 + $0x308] sm:$0xf] }
 0x42a   :  { %8566 = vmatpush.bf16.msrb.mxu2 %v13180_v11  ;;  %v7654_v12 = vpop.f32.mrf.mxu2  ;;  %8414 = vmatpush.bf16.msra.mxu3 %v13264_v23  ;;  %v13248_v11 = vor.u32 %v14402_v33, %v13247_v14  ;;  %v7643_v15 = vadd.f32 %v7642_v47, %v7628_v50  ;;  %v13199_v23 = vld [vmem:[%s21998_s7 + $0x300] sm:$0xf]  ;;  %v14416_v14 = vld [vmem:[%s21998_s7 + $0x3e4] sm:$0xf]  ;;  %v13313_v33 = vld [vmem:[%s21998_s7 + $0x3f0] sm:$0xf0] }
 0x42b   :  { %v21622_v20 = vadd.f32 %v7654_v12, %v7641_v1  ;;  %v1531_v39 = vadd.f32 %v22093_v28, %v1517_v0  ;;  %v13316_v56 = vor.u32 %v14416_v14, %v13313_v33  ;;  %v14408_v0 = vld [vmem:[%s21998_s7 + $0x3a4] sm:$0xf]  ;;  %v13281_v12 = vld [vmem:[%s21998_s7 + $0x3b0] sm:$0xf0]  ;;  %v14399_v14 = vld [vmem:[%s21998_s7 + $0x354] sm:$0xf0] }
 0x42c   :  { %v13249_v47 = vld [vmem:[%s21998_s7 + $0x370] sm:$0xf0]  ;;  %v14392_v28 = vld [vmem:[%s21998_s7 + $0x324] sm:$0xf] }
 0x42d   :  { %8539 = vmatpush.bf16.msrb.mxu0 %v12908_v17  ;;  %8553 = vmatpush.bf16.msrb.mxu1 %v13036_v29  ;;  %v12841_v17 = vld [vmem:[%s21998_s7 + $0x38] sm:$0xf0]  ;;  %v1545_v42 = vadd.f32 %v22094_v55, %v1531_v39  ;;  %v13217_v39 = vld [vmem:[%s21998_s7 + $0x330] sm:$0xf0]  ;;  %v13287_v55 = vld [vmem:[%s21998_s7 + $0x3a8] sm:$0xf] }
 0x42e   :  { %8567 = vmatpush.bf16.msrb.mxu2 %v13164_v45  ;;  %v12969_v29 = vld [vmem:[%s21998_s7 + $0x138] sm:$0xf0]  ;;  %v14361_v45 = vld [vmem:[%s21998_s7 + $0x22c] sm:$0xf]  ;;  %8415 = vmatpush.bf16.msra.mxu3 %v13248_v11  ;;  %v12844_v57 = vor.u32 %v14297_v10, %v12841_v17  ;;  %v13265_v11 = vld [vmem:[%s21998_s7 + $0x390] sm:$0xf0] }
 0x42f   :  { %v12972_v22 = vor.u32 %v14329_v63, %v12969_v29  ;;  %v1559_v5 = vadd.f32 %v22095_v46, %v1545_v42  ;;  %v13233_v29 = vld [vmem:[%s21998_s7 + $0x350] sm:$0xf0]  ;;  %v14411_v42 = vld [vmem:[%s21998_s7 + $0x3b4] sm:$0xf0] }
 0x431   :  { %8540 = vmatpush.bf16.msrb.mxu0 %v12892_v52  ;;  %8554 = vmatpush.bf16.msrb.mxu1 %v13020_v53  ;;  %v13100_v52 = vor.u32 %v14361_v45, %v13097_v16  ;;  %v12953_v53 = vld [vmem:[%s21998_s7 + $0x118] sm:$0xf0] }
 0x432   :  { %8568 = vmatpush.bf16.msrb.mxu2 %v13148_v51  ;;  %v14357_v51 = vld [vmem:[%s21998_s7 + $0x20c] sm:$0xf]  ;;  %v7656_v1 = vpop.f32.mrf.mxu2  ;;  %8416 = vmatpush.bf16.msra.mxu3 %v13232_v48  ;;  %v12956_v36 = vor.u32 %v14325_v38, %v12953_v53  ;;  %v13303_v53 = vld [vmem:[%s21998_s7 + $0x3c8] sm:$0xf] }
 0x433   :  { %v21674_v62 = vadd.f32 %v7656_v1, %v7643_v15  ;;  %v13084_v24 = vor.u32 %v14357_v51, %v13081_v7  ;;  %v14396_v15 = vld [vmem:[%s21998_s7 + $0x344] sm:$0xf]  ;;  %v14415_v51 = vld [vmem:[%s21998_s7 + $0x3d4] sm:$0xf0]  ;;  %v13288_v1 = vor.u32 %v14411_v42, %v13287_v55  ;;  %v14550_v42 = vld [vmem:[%s21999_s10 + $0x10] sm:$0xff] }
 0x434   :  { %v13236_v16 = vor.u32 %v14396_v15, %v13233_v29  ;;  %v13304_v7 = vor.u32 %v14415_v51, %v13303_v53  ;;  %v13257_v15 = vld [vmem:[%s21998_s7 + $0x378] sm:$0xf0]  ;;  %v14554_v53 = vld [vmem:[%s21999_s10 + $0x30] sm:$0xff]  ;;  %v14553_v51 = vld [vmem:[%s21999_s10 + $0x28] sm:$0xff] }
 0x435   :  { %8541 = vmatpush.bf16.msrb.mxu0 %v12876_v8  ;;  %8555 = vmatpush.bf16.msrb.mxu1 %v13004_v4  ;;  %v14390_v8 = vld [vmem:[%s21998_s7 + $0x30c] sm:$0xf0] }
 0x436   :  { %8569 = vmatpush.bf16.msrb.mxu2 %v13132_v21  ;;  %8417 = vmatpush.bf16.msra.mxu3 %v13216_v19  ;;  %v13200_v4 = vor.u32 %v14390_v8, %v13199_v23  ;;  %v22096_v21 = vld [vmem:[#allocation31_spill] sm:$0xff] }
 0x437   :  { %v1573_v59 = vadd.f32 %v22096_v21, %v1559_v5  ;;  %v13271_v19 = vld [vmem:[%s21998_s7 + $0x388] sm:$0xf] }
 0x438   :  { %v13255_v5 = vld [vmem:[%s21998_s7 + $0x368] sm:$0xf] }
 0x439   :  { %8542 = vmatpush.bf16.msrb.mxu0 %v12860_v54  ;;  %8556 = vmatpush.bf16.msrb.mxu1 %v12988_v30  ;;  %v21699_v41 = vpack.c.bf16 %v1573_v59, %v22097_v27  ;;  %v13239_v8 = vld [vmem:[%s21998_s7 + $0x348] sm:$0xf]  ;;  %v14395_v59 = vld [vmem:[%s21998_s7 + $0x334] sm:$0xf0]  ;;  %v14417_v27 = vld [vmem:[%s21998_s7 + $0x3ec] sm:$0xf] }
 0x43a   :  { %8570 = vmatpush.bf16.msrb.mxu2 %v13116_v35  ;;  %8418 = vmatpush.bf16.msra.mxu3 %v13200_v4  ;;  %v13252_v35 = vor.u32 %v14400_v31, %v13249_v47  ;;  %v13240_v4 = vor.u32 %v14399_v14, %v13239_v8  ;;  %v13223_v21 = vld [vmem:[%s21998_s7 + $0x328] sm:$0xf]  ;;  %v14405_v47 = vld [vmem:[%s21998_s7 + $0x38c] sm:$0xf]  ;;  %v14560_v8 = vld [vmem:[%s21999_s10 + $0x60] sm:$0xff] }
 0x43d   :  { %8543 = vmatpush.bf16.msrb.mxu0 %v12844_v57  ;;  %8557 = vmatpush.bf16.msrb.mxu1 %v12972_v22  ;;  %v13220_v57 = vor.u32 %v14392_v28, %v13217_v39  ;;  %v13201_v22 = vld [vmem:[%s21998_s7 + $0x310] sm:$0xf0] }
 0x43e   :  { %8571 = vmatpush.bf16.msrb.mxu2 %v13100_v52  ;;  %8467 = vmatpush.bf16.msrb.mxu3 %v13316_v56  ;;  %v13319_v52 = vld [vmem:[%s21998_s7 + $0x3e8] sm:$0xf]  ;;  %v13204_v2 = vor.u32 %v14388_v61, %v13201_v22  ;;  %v13224_v56 = vor.u32 %v14395_v59, %v13223_v21  ;;  %v14389_v22 = vld [vmem:[%s21998_s7 + $0x30c] sm:$0xf] }
 0x43f   :  { %8419 = vmatmul.bf16.vlgmr.msra.gmra.mxu3 %v21699_v41  ;;  %v13320_v38 = vor.u32 %v14419_v44, %v13319_v52  ;;  %v13209_v52 = vld [vmem:[%s21998_s7 + $0x318] sm:$0xf0] }
 0x441   :  { %8544 = vmatpush.bf16.msrb.mxu0 %v12828_v6  ;;  %8558 = vmatpush.bf16.msrb.mxu1 %v12956_v36  ;;  %v7696_v50 = vpop.f32.mrf.mxu1  ;;  %v14407_v6 = vld [vmem:[%s21998_s7 + $0x394] sm:$0xf0] }
 0x442   :  { %8572 = vmatpush.bf16.msrb.mxu2 %v13084_v24  ;;  %8468 = vmatpush.bf16.msrb.mxu3 %v13300_v26  ;;  %v13272_v46 = vor.u32 %v14407_v6, %v13271_v19  ;;  %v14403_v36 = vld [vmem:[%s21998_s7 + $0x374] sm:$0xf0]  ;;  %v13321_v26 = vld [vmem:[%s21998_s7 + $0x3f8] sm:$0xf0] }
 0x443   :  { %v13256_v24 = vor.u32 %v14403_v36, %v13255_v5  ;;  %v14562_v5 = vld [vmem:[%s21999_s10 + $0x70] sm:$0xff] }
 0x444   :  { %8545 = vmatmul.bf16.vlgmr.msrb.gmra.mxu0 %v21103_v58  ;;  %8559 = vmatmul.bf16.vlgmr.msrb.gmra.mxu1 %v21106_v32  ;;  %v13284_v58 = vor.u32 %v14408_v0, %v13281_v12  ;;  %v7682_v32 = vpop.f32.mrf.mxu0  ;;  %v13324_v12 = vor.u32 %v14417_v27, %v13321_v26 }
 0x445   :  { %8573 = vmatmul.bf16.vlgmr.msrb.gmra.mxu2 %v21111_v40  ;;  %v14404_v40 = vld [vmem:[%s21998_s7 + $0x384] sm:$0xf]  ;;  %v7697_v54 = vadd.f32 %v7696_v50, %v7682_v32  ;;  %v13305_v32 = vld [vmem:[%s21998_s7 + $0x3d8] sm:$0xf0] }
 0x446   :  { %8469 = vmatpush.bf16.msrb.mxu3 %v13284_v58  ;;  %v13268_v18 = vor.u32 %v14404_v40, %v13265_v11  ;;  %v14413_v58 = vld [vmem:[%s21998_s7 + $0x3cc] sm:$0xf] }
 0x447   :  { %v13308_v40 = vor.u32 %v14413_v58, %v13305_v32  ;;  %v14557_v32 = vld [vmem:[%s21999_s10 + $0x48] sm:$0xff] }
 0x449   :  { %v7698_v63 = vpop.f32.mrf.mxu1 }
 0x44a   :  { %8470 = vmatpush.bf16.msrb.mxu3 %v13268_v18  ;;  %v7710_v30 = vpop.f32.mrf.mxu2  ;;  %v13289_v18 = vld [vmem:[%s21998_s7 + $0x3b8] sm:$0xf0] }
 0x44b   :  { %v21721_v10 = vadd.f32 %v7710_v30, %v7697_v54  ;;  %v14409_v54 = vld [vmem:[%s21998_s7 + $0x3ac] sm:$0xf] }
 0x44c   :  { %v7684_v17 = vpop.f32.mrf.mxu0  ;;  %v13292_v31 = vor.u32 %v14409_v54, %v13289_v18 }
 0x44d   :  { %v7699_v45 = vadd.f32 %v7698_v63, %v7684_v17  ;;  %v14401_v63 = vld [vmem:[%s21998_s7 + $0x36c] sm:$0xf] }
 0x44e   :  { %8471 = vmatpush.bf16.msrb.mxu3 %v13252_v35  ;;  %v13260_v29 = vor.u32 %v14401_v63, %v13257_v15  ;;  %v14570_v63 = vld [vmem:[%s21999_s10 + $0xb0] sm:$0xff] }
 0x452   :  { %8472 = vmatpush.bf16.msrb.mxu3 %v13236_v16  ;;  %v7712_v48 = vpop.f32.mrf.mxu2  ;;  %v13241_v16 = vld [vmem:[%s21998_s7 + $0x358] sm:$0xf0] }
 0x453   :  { %v21735_v37 = vadd.f32 %v7712_v48, %v7699_v45  ;;  %v14397_v45 = vld [vmem:[%s21998_s7 + $0x34c] sm:$0xf] }
 0x454   :  { %v13244_v28 = vor.u32 %v14397_v45, %v13241_v16  ;;  %v14393_v48 = vld [vmem:[%s21998_s7 + $0x32c] sm:$0xf]  ;;  %v14568_v16 = vld [vmem:[%s21999_s10 + $0xa0] sm:$0xff] }
 0x455   :  { %v14569_v45 = vld [vmem:[%s21999_s10 + $0xa8] sm:$0xff] }
 0x456   :  { %8473 = vmatpush.bf16.msrb.mxu3 %v13220_v57  ;;  %v13225_v57 = vld [vmem:[%s21998_s7 + $0x338] sm:$0xf0] }
 0x457   :  { %v13228_v61 = vor.u32 %v14393_v48, %v13225_v57 }
 0x45a   :  { %8474 = vmatpush.bf16.msrb.mxu3 %v13204_v2  ;;  %v13212_v2 = vor.u32 %v14389_v22, %v13209_v52 }
 0x45d   :  { %8475 = vmatmul.bf16.vlgmr.msrb.gmra.mxu3 %v21699_v41 }
 0x45e   :  { %8523 = vmatpush.bf16.msra.mxu3 %v13320_v38  ;;  %v7556_v23 = vpop.f32.mrf.mxu3 }
 0x45f   :  { %v21781_v33 = vadd.f32 %v7556_v23, %v21213_v25  ;;  %v14391_v25 = vld [vmem:[%s21998_s7 + $0x314] sm:$0xf0] }
 0x460   :  { %v13208_v0 = vor.u32 %v14391_v25, %v13207_v60  ;;  %v14559_v60 = vld [vmem:[%s21999_s10 + $0x58] sm:$0xff] }
 0x461   :  { %v8378_v36 = vpop.f32.mrf.mxu0  ;;  %v8392_v23 = vpop.f32.mrf.mxu1 }
 0x462   :  { %8524 = vmatpush.bf16.msra.mxu3 %v13304_v7  ;;  %v14552_v7 = vld [vmem:[%s21999_s10 + $0x20] sm:$0xff] }
 0x466   :  { %8525 = vmatpush.bf16.msra.mxu3 %v13288_v1  ;;  %v21789_v49 = vpop.f32.mrf.mxu3  ;;  %v14549_v1 = vld [vmem:[%s21999_s10 + $0x8] sm:$0xff] }
 0x469   :  { %v8394_v27 = vpop.f32.mrf.mxu1 }
 0x46a   :  { %8526 = vmatpush.bf16.msra.mxu3 %v13272_v46  ;;  %v14548_v46 = vld [vmem:[%s21999_s10] sm:$0xff]  ;;  %v8406_v59 = vpop.f32.mrf.mxu2 }
 0x46e   :  { %8527 = vmatpush.bf16.msra.mxu3 %v13256_v24  ;;  %v7612_v50 = vpop.f32.mrf.mxu3  ;;  %v7531_v24 = vadd.f32 %v21314_v13, %v21312_v3 }
 0x46f   :  { %v21810_v11 = vadd.f32 %v7612_v50, %v21418_v43  ;;  %v13273_v43 = vld [vmem:[%s21998_s7 + $0x398] sm:$0xf0] }
 0x470   :  { %v13276_v35 = vor.u32 %v14405_v47, %v13273_v43  ;;  %v7545_v14 = vadd.f32 %v21368_v34, %v7531_v24  ;;  %v21912_v34 = vld [vmem:[%s22001_s9] sm:$0xf]  ;;  %v14571_v43 = vld [vmem:[%s21999_s10 + $0xb8] sm:$0xff]  ;;  %v14578_v24 = vld [vmem:[%s21999_s10 + $0xf0] sm:$0xff] }
 0x471   :  { %8911 = vmatpush.bf16.msra.mxu2 %v14571_v43 }
 0x472   :  { %8528 = vmatpush.bf16.msra.mxu3 %v13240_v4  ;;  %v8379_v4 = vadd.f32 %v8378_v36, %v21781_v33  ;;  %v7559_v21 = vadd.f32 %v21789_v49, %v7545_v14  ;;  %v14558_v33 = vld [vmem:[%s21999_s10 + $0x50] sm:$0xff]  ;;  %v8408_v58 = vpop.f32.mrf.mxu2  ;;  %v14577_v14 = vld [vmem:[%s21999_s10 + $0xe8] sm:$0xff] }
 0x474   :  { %v8393_v13 = vadd.f32 %v8392_v23, %v8379_v4  ;;  %v14576_v4 = vld [vmem:[%s21999_s10 + $0xe0] sm:$0xff] }
 0x475   :  { %8912 = vmatpush.bf16.msra.mxu2 %v14570_v63 }
 0x476   :  { %8529 = vmatpush.bf16.msra.mxu3 %v13224_v56  ;;  %v7614_v30 = vpop.f32.mrf.mxu3  ;;  %v8380_v56 = vpop.f32.mrf.mxu0  ;;  %v8407_v49 = vadd.f32 %v8406_v59, %v8393_v13 }
 0x477   :  { %v21826_v17 = vadd.f32 %v7614_v30, %v21486_v9  ;;  %v8381_v3 = vadd.f32 %v8380_v56, %v7559_v21 }
 0x479   :  { %v8395_v26 = vadd.f32 %v8394_v27, %v8381_v3  ;;  %8913 = vmatpush.bf16.msra.mxu2 %v14569_v45  ;;  %v14575_v3 = vld [vmem:[%s21999_s10 + $0xd8] sm:$0xff] }
 0x47a   :  { %8530 = vmatpush.bf16.msra.mxu3 %v13208_v0 }
 0x47b   :  { %v8409_v50 = vadd.f32 %v8408_v58, %v8395_v26  ;;  %v8597_v58 = vperm.slane %v21912_v34, 2 }
 0x47d   :  { %8531 = vmatmul.bf16.vlgmr.msra.gmra.mxu3 %v21699_v41  ;;  %8914 = vmatpush.bf16.msra.mxu2 %v14568_v16 }
 0x47e   :  { %8579 = vmatpush.bf16.msrb.mxu3 %v13324_v12  ;;  %v8595_v12 = vperm.slane %v21912_v34, 0 }
 0x482   :  { %8580 = vmatpush.bf16.msrb.mxu3 %v13308_v40  ;;  %v7668_v9 = vpop.f32.mrf.mxu3 }
 0x483   :  { %v21841_v39 = vadd.f32 %v7668_v9, %v21622_v20  ;;  %v14555_v20 = vld [vmem:[%s21999_s10 + $0x38] sm:$0xff]  ;;  %v8448_v9 = vpop.f32.mrf.mxu1 }
 0x484   :  { %8883 = vmatpush.bf16.msra.mxu0 %v14555_v20 }
 0x486   :  { %8581 = vmatpush.bf16.msrb.mxu3 %v13292_v31  ;;  %v14556_v31 = vld [vmem:[%s21999_s10 + $0x40] sm:$0xff] }
 0x488   :  { %8884 = vmatpush.bf16.msra.mxu0 %v14554_v53 }
 0x48a   :  { %8582 = vmatpush.bf16.msrb.mxu3 %v13276_v35  ;;  %v7670_v44 = vpop.f32.mrf.mxu3 }
 0x48b   :  { %v21859_v38 = vadd.f32 %v7670_v44, %v21674_v62  ;;  %v14551_v62 = vld [vmem:[%s21999_s10 + $0x18] sm:$0xff]  ;;  %v14566_v44 = vld [vmem:[%s21999_s10 + $0x90] sm:$0xff]  ;;  %v8450_v53 = vpop.f32.mrf.mxu1 }
 0x48c   :  { %8885 = vmatpush.bf16.msra.mxu0 %v14553_v51 }
 0x48e   :  { %8583 = vmatpush.bf16.msrb.mxu3 %v13260_v29  ;;  %v8434_v29 = vpop.f32.mrf.mxu0 }
 0x48f   :  { %v8435_v48 = vadd.f32 %v8434_v29, %v21810_v11 }
 0x490   :  { %8886 = vmatpush.bf16.msra.mxu0 %v14552_v7 }
 0x491   :  { %v8449_v52 = vadd.f32 %v8448_v9, %v8435_v48 }
 0x492   :  { %8584 = vmatpush.bf16.msrb.mxu3 %v13244_v28  ;;  %v8462_v28 = vpop.f32.mrf.mxu2 }
 0x494   :  { %8887 = vmatpush.bf16.msra.mxu0 %v14551_v62  ;;  %v8596_v62 = vperm.slane %v21912_v34, 1 }
 0x496   :  { %8585 = vmatpush.bf16.msrb.mxu3 %v13228_v61  ;;  %v8436_v57 = vpop.f32.mrf.mxu0  ;;  %v14567_v61 = vld [vmem:[%s21999_s10 + $0x98] sm:$0xff] }
 0x497   :  { %8915 = vmatpush.bf16.msra.mxu2 %v14567_v61  ;;  %v8437_v20 = vadd.f32 %v8436_v57, %v21826_v17 }
 0x498   :  { %8888 = vmatpush.bf16.msra.mxu0 %v14550_v42 }
 0x499   :  { %v8451_v7 = vadd.f32 %v8450_v53, %v8437_v20  ;;  %v8598_v20 = vperm.slane %v21912_v34, 3 }
 0x49a   :  { %8586 = vmatpush.bf16.msrb.mxu3 %v13212_v2  ;;  %v8463_v2 = vadd.f32 %v8462_v28, %v8449_v52  ;;  %v8464_v51 = vpop.f32.mrf.mxu2 }
 0x49b   :  { %8916 = vmatpush.bf16.msra.mxu2 %v14566_v44  ;;  %v8465_v42 = vadd.f32 %v8464_v51, %v8451_v7 }
 0x49c   :  { %8889 = vmatpush.bf16.msra.mxu0 %v14549_v1 }
 0x49d   :  { %8587 = vmatmul.bf16.vlgmr.msrb.gmra.mxu3 %v21699_v41 }
 0x4a0   :  { %8890 = vmatpush.bf16.msra.mxu0 %v14548_v46  ;;  %v14564_v46 = vld [vmem:[%s21999_s10 + $0x80] sm:$0xff] }
 0x4a1   :  { %v8504_v21 = vpop.f32.mrf.mxu1 }
 0x4a2   :  { %v7724_v41 = vpop.f32.mrf.mxu3 }
 0x4a3   :  { %v21875_v55 = vadd.f32 %v7724_v41, %v21721_v10  ;;  %v14563_v10 = vld [vmem:[%s21999_s10 + $0x78] sm:$0xff]  ;;  %v14565_v41 = vld [vmem:[%s21999_s10 + $0x88] sm:$0xff] }
 0x4a4   :  { %8897 = vmatpush.bf16.msra.mxu1 %v14563_v10  ;;  %8917 = vmatpush.bf16.msra.mxu2 %v14565_v41 }
 0x4a8   :  { %8898 = vmatpush.bf16.msra.mxu1 %v14562_v5  ;;  %v14579_v5 = vld [vmem:[%s21999_s10 + $0xf8] sm:$0xff]  ;;  %8918 = vmatpush.bf16.msra.mxu2 %v14564_v46 }
 0x4a9   :  { %8925 = vmatpush.bf16.msra.mxu3 %v14579_v5  ;;  %v8506_v26 = vpop.f32.mrf.mxu1 }
 0x4aa   :  { %v7726_v19 = vpop.f32.mrf.mxu3  ;;  %v8518_v59 = vpop.f32.mrf.mxu2 }
 0x4ab   :  { %v21884_v6 = vadd.f32 %v7726_v19, %v21735_v37  ;;  %v14561_v37 = vld [vmem:[%s21999_s10 + $0x68] sm:$0xff] }
 0x4ac   :  { %8899 = vmatpush.bf16.msra.mxu1 %v14561_v37 }
 0x4ad   :  { %8926 = vmatpush.bf16.msra.mxu3 %v14578_v24 }
 0x4b0   :  { %8900 = vmatpush.bf16.msra.mxu1 %v14560_v8  ;;  %v8490_v8 = vpop.f32.mrf.mxu0 }
 0x4b1   :  { %8927 = vmatpush.bf16.msra.mxu3 %v14577_v14  ;;  %v8491_v56 = vadd.f32 %v8490_v8, %v21841_v39 }
 0x4b4   :  { %8901 = vmatpush.bf16.msra.mxu1 %v14559_v60 }
 0x4b5   :  { %8928 = vmatpush.bf16.msra.mxu3 %v14576_v4 }
 0x4b8   :  { %8902 = vmatpush.bf16.msra.mxu1 %v14558_v33  ;;  %v8492_v60 = vpop.f32.mrf.mxu0  ;;  %v14574_v33 = vld [vmem:[%s21999_s10 + $0xd0] sm:$0xff] }
 0x4b9   :  { %8929 = vmatpush.bf16.msra.mxu3 %v14575_v3  ;;  %v8493_v27 = vadd.f32 %v8492_v60, %v21859_v38 }
 0x4bc   :  { %8903 = vmatpush.bf16.msra.mxu1 %v14557_v32  ;;  %v14573_v32 = vld [vmem:[%s21999_s10 + $0xc8] sm:$0xff] }
 0x4bd   :  { %8930 = vmatpush.bf16.msra.mxu3 %v14574_v33 }
 0x4c0   :  { %8904 = vmatpush.bf16.msra.mxu1 %v14556_v31 }
 0x4c1   :  { %8931 = vmatpush.bf16.msra.mxu3 %v14573_v32  ;;  %v8560_v63 = vpop.f32.mrf.mxu1 }
 0x4c2   :  { %v8420_v25 = vpop.f32.mrf.mxu3 }
 0x4c3   :  { %v8421_v0 = vadd.f32 %v8420_v25, %v8407_v49  ;;  %v8505_v25 = vadd.f32 %v8504_v21, %v8491_v56 }
 0x4c5   :  { %v8603_v54 = vadd.f32 %v8595_v12, %v8421_v0  ;;  %v8519_v49 = vadd.f32 %v8518_v59, %v8505_v25  ;;  %v8520_v0 = vpop.f32.mrf.mxu2 }
 0x4c7   :  { %v8611_v30 = vmax.f32 %v8603_v54, 0.0 }
 0x4c9   :  { %v8562_v57 = vpop.f32.mrf.mxu1 }
 0x4ca   :  { %v8422_v40 = vpop.f32.mrf.mxu3 }
 0x4cb   :  { %v8423_v18 = vadd.f32 %v8422_v40, %v8409_v50 }
 0x4cd   :  { %v8607_v47 = vadd.f32 %v8595_v12, %v8423_v18  ;;  %v8507_v12 = vadd.f32 %v8506_v26, %v8493_v27  ;;  %v14572_v18 = vld [vmem:[%s21999_s10 + $0xc0] sm:$0xff] }
 0x4ce   :  { %8932 = vmatpush.bf16.msra.mxu3 %v14572_v18 }
 0x4cf   :  { %v8615_v35 = vmax.f32 %v8607_v47, 0.0  ;;  %v8521_v50 = vadd.f32 %v8520_v0, %v8507_v12 }
 0x4d1   :  { %v8619_v15 = vpack.c.bf16 %v8615_v35, %v8611_v30  ;;  %v8546_v35 = vpop.f32.mrf.mxu0 }
 0x4d2   :  { %v8547_v29 = vadd.f32 %v8546_v35, %v21875_v55 }
 0x4d3   :  { %8891 = vmatmul.bf16.vlgmr.msra.gmra.mxu0 %v8619_v15  ;;  %v8574_v15 = vpop.f32.mrf.mxu2 }
 0x4d4   :  { %v8561_v9 = vadd.f32 %v8560_v63, %v8547_v29 }
 0x4d6   :  { %v8575_v48 = vadd.f32 %v8574_v15, %v8561_v9 }
 0x4d9   :  { %v8548_v45 = vpop.f32.mrf.mxu0 }
 0x4da   :  { %v8549_v28 = vadd.f32 %v8548_v45, %v21884_v6  ;;  %v14580_v6 = vld [vmem:[%s22000_s11] ss:$0 sm:$0xff] }
 0x4db   :  { %v8576_v61 = vpop.f32.mrf.mxu2 }
 0x4e0   :  { %v8476_v22 = vpop.f32.mrf.mxu3 }
 0x4e1   :  { %v8477_v11 = vadd.f32 %v8476_v22, %v8463_v2  ;;  %v8563_v22 = vadd.f32 %v8562_v57, %v8549_v28 }
 0x4e3   :  { %v8604_v17 = vadd.f32 %v8596_v62, %v8477_v11  ;;  %v8577_v44 = vadd.f32 %v8576_v61, %v8563_v22 }
 0x4e5   :  { %v8612_v36 = vmax.f32 %v8604_v17, 0.0 }
 0x4e8   :  { %v8478_v1 = vpop.f32.mrf.mxu3 }
 0x4e9   :  { %v8479_v19 = vadd.f32 %v8478_v1, %v8465_v42 }
 0x4eb   :  { %v8608_v10 = vadd.f32 %v8596_v62, %v8479_v19 }
 0x4ed   :  { %v8616_v37 = vmax.f32 %v8608_v10, 0.0 }
 0x4ef   :  { %v8620_v23 = vpack.c.bf16 %v8616_v37, %v8612_v36 }
 0x4f1   :  { %8905 = vmatmul.bf16.vlgmr.msra.gmra.mxu1 %v8620_v23 }
 0x500   :  { %v8532_v13 = vpop.f32.mrf.mxu3 }
 0x501   :  { %v8533_v39 = vadd.f32 %v8532_v13, %v8519_v49 }
 0x503   :  { %v8605_v38 = vadd.f32 %v8597_v58, %v8533_v39 }
 0x505   :  { %v8613_v47 = vmax.f32 %v8605_v38, 0.0 }
 0x508   :  { %v8534_v40 = vpop.f32.mrf.mxu3 }
 0x509   :  { %v8535_v54 = vadd.f32 %v8534_v40, %v8521_v50 }
 0x50b   :  { %v8609_v31 = vadd.f32 %v8597_v58, %v8535_v54 }
 0x50d   :  { %v8617_v43 = vmax.f32 %v8609_v31, 0.0 }
 0x50f   :  { %v8621_v30 = vpack.c.bf16 %v8617_v43, %v8613_v47 }
 0x511   :  { %8919 = vmatmul.bf16.vlgmr.msra.gmra.mxu2 %v8621_v30 }
 0x520   :  { %v8588_v16 = vpop.f32.mrf.mxu3 }
 0x521   :  { %v8589_v52 = vadd.f32 %v8588_v16, %v8575_v48 }
 0x523   :  { %v8606_v53 = vadd.f32 %v8598_v20, %v8589_v52 }
 0x525   :  { %v8614_v11 = vmax.f32 %v8606_v53, 0.0 }
 0x528   :  { %v8590_v2 = vpop.f32.mrf.mxu3 }
 0x529   :  { %v8591_v51 = vadd.f32 %v8590_v2, %v8577_v44 }
 0x52b   :  { %v8610_v7 = vadd.f32 %v8598_v20, %v8591_v51 }
 0x52d   :  { %v8618_v62 = vmax.f32 %v8610_v7, 0.0 }
 0x52f   :  { %v8622_v55 = vpack.c.bf16 %v8618_v62, %v8614_v11 }
 0x531   :  { %8933 = vmatmul.bf16.vlgmr.msra.gmra.mxu3 %v8622_v55 }
 0x550   :  { %v8892_v41 = vpop.f32.mrf.mxu0 }
 0x551   :  { %v8893_v17 = vadd.f32 %v14580_v6, %v8892_v41 }
 0x558   :  { %v8894_v34 = vpop.f32.mrf.mxu0 }
 0x559   :  { %v8895_v37 = vadd.f32 %v14580_v6, %v8894_v34 }
 0x56e   :  { %v8906_v42 = vpop.f32.mrf.mxu1 }
 0x56f   :  { %v8907_v19 = vadd.f32 %v8906_v42, %v8893_v17 }
 0x576   :  { %v8908_v36 = vpop.f32.mrf.mxu1 }
 0x577   :  { %v8909_v23 = vadd.f32 %v8908_v36, %v8895_v37 }
 0x594   :  { %v8920_v1 = vpop.f32.mrf.mxu2 }
 0x595   :  { %v8921_v46 = vadd.f32 %v8920_v1, %v8907_v19 }
 0x59c   :  { %v8922_v24 = vpop.f32.mrf.mxu2 }
 0x59d   :  { %v8923_v8 = vadd.f32 %v8922_v24, %v8909_v23 }
 0x5b4   :  { %v8934_v10 = vpop.f32.mrf.mxu3 }
 0x5b5   :  { %v8935_v5 = vadd.f32 %v8934_v10, %v8921_v46 }
 0x5b7   :  { %8939 = vst [vmem:[%s22002_s12] sm:$0xff] %v8935_v5 }
 0x5bc   :  { %v8936_v14 = vpop.f32.mrf.mxu3 }
 0x5bd   :  { %v8937_v4 = vadd.f32 %v8936_v14, %v8923_v8 }
 0x5bf   :  { %8940 = vst [vmem:[%s22002_s12 + $0x8] sm:$0xff] %v8937_v4 }

</bundles_post_ra>
